<compile_context>
chip_gen: v6e
topology: v6e:2x2x1
jax: 0.10.0
libtpu: 0.0.40
codegen_flags: <defaults>
</compile_context>

<pallas_src>
import jax
import jax.numpy as jnp
from jax.experimental import pallas as pl
from jax.experimental.pallas import tpu as pltpu


# (C_out, kernel, stride) per conv layer.  The LayerNorm shapes in the PyTorch
# module ([8,47,47] ... [256,1,1]) imply a fixed 96x96 spatial input.
LAYER_SPECS = [
    (8, 4, 2),     # 96 -> 47
    (16, 3, 2),    # 47 -> 23
    (32, 3, 2),    # 23 -> 11
    (64, 3, 2),    # 11 -> 5
    (128, 3, 1),   # 5  -> 3
    (256, 3, 1),   # 3  -> 1
]
INPUT_HW = 96
LN_EPS = 1e-5


def _spatial_sizes():
    sizes = [INPUT_HW]
    for _, k, s in LAYER_SPECS:
        sizes.append((sizes[-1] - k) // s + 1)
    return sizes


# ---------------------------------------------------------------------------
# Fused kernel: one grid step == one batch sample, all 6 layers.
# ---------------------------------------------------------------------------
def _fused_cnn_kernel(*refs):
    """refs = (x, [S, WR, bias_row] * 6, out).

    Activation layout: a[w, c*H + h] = act[c, h, w]  (W on sublanes, C*H on
    lanes, so lanes are always >= 256-dense).  Per layer:
        acc = sum_kw  S[kw] @ a @ WR[kw]  + bias_row
        a   = relu(layernorm(acc))        # LN over all C*H*W elements
    Only 2-D matmuls, broadcasts and full-array reductions are used.
    """
    x_ref = refs[0]
    o_ref = refs[-1]
    n_layers = len(LAYER_SPECS)

    a = x_ref[0]                                     # (W_in, C_in*H_in) bf16
    for l in range(n_layers):
        s_ref, wr_ref, b_ref = refs[1 + 3 * l: 4 + 3 * l]
        k = s_ref.shape[0]
        w_out = s_ref.shape[1]
        n_cols = wr_ref.shape[2]                     # C_out * H_out

        acc = jnp.zeros((w_out, n_cols), jnp.float32)
        for kw in range(k):
            # Column(-tap) selection: exact 0/1 pick of input columns on the MXU.
            p = jnp.dot(s_ref[kw], a, preferred_element_type=jnp.float32)
            # Channel + kernel-row contraction against the pre-placed weights.
            acc = acc + jnp.dot(p.astype(jnp.bfloat16), wr_ref[kw],
                                preferred_element_type=jnp.float32)
        acc = acc + b_ref[...]                       # (1, C_out*H_out) broadcast

        # Per-sample LayerNorm over all C*H*W elements (two-pass stats), ReLU.
        inv_n = 1.0 / float(acc.shape[0] * acc.shape[1])
        mean = jnp.sum(acc) * inv_n
        cent = acc - mean
        var = jnp.sum(cent * cent) * inv_n
        y = jnp.maximum(cent * jax.lax.rsqrt(var + LN_EPS), 0.0)

        if l == n_layers - 1:
            o_ref[0] = y.astype(o_ref.dtype)         # (1, 256) f32
        else:
            a = y.astype(jnp.bfloat16)


# ---------------------------------------------------------------------------
# Parameters: synthetic Conv2d weights + host-side packing into kernel operands
# ---------------------------------------------------------------------------
def init_conv_params(key, in_channels):
    """Deterministic synthetic Conv2d weights/biases in PyTorch layout."""
    params = []
    c_in = in_channels
    for c_out, k, _ in LAYER_SPECS:
        key, kw_, kb_ = jax.random.split(key, 3)
        fan_in = c_in * k * k
        scale = 1.0 / jnp.sqrt(float(fan_in))
        w = jax.random.uniform(kw_, (c_out, c_in, k, k), jnp.float32, -scale, scale)
        b = jax.random.uniform(kb_, (c_out,), jnp.float32, -scale, scale)
        params.append((w, b))
        c_in = c_out
    return params


def pack_params(conv_params):
    """Precompute per-layer constant matrices for the fused kernel.

      S  : (k, W_out, W_in)             0/1 tap selector  S[kw, ow, w] = (w == s*ow + kw)
      WR : (k, C_in*H_in, C_out*H_out)  WR[kw, c*H_in+h, o*H_out+oh] =
                                            w[o, c, h - s*oh, kw]  (0 if out of range)
      br : (1, C_out*H_out)             bias broadcast over output rows (f32)
    Total ~5 MB bf16 -> lives in VMEM for the whole kernel.
    """
    sizes = _spatial_sizes()
    packed = []
    for (w, b), (c_out, k, s), h_in, h_out in zip(conv_params, LAYER_SPECS,
                                                  sizes[:-1], sizes[1:]):
        c_in = w.shape[1]
        w_in, w_out = h_in, h_out                    # square feature maps

        ow = jnp.arange(w_out)[:, None]
        wi = jnp.arange(w_in)[None, :]

        h = jnp.arange(h_in)[:, None, None]
        oh = jnp.arange(h_out)[None, :, None]
        kh = jnp.arange(k)[None, None, :]
        place = (h == s * oh + kh).astype(jnp.float32)   # (H_in, H_out, k)

        s_taps, wr_taps = [], []
        for kw in range(k):
            s_taps.append((wi == s * ow + kw).astype(jnp.float32))
            wr = jnp.einsum('hqt,oct->choq', place, w[:, :, :, kw])
            wr_taps.append(wr.reshape(c_in * h_in, c_out * h_out))

        s_l = jnp.stack(s_taps).astype(jnp.bfloat16)
        wr_l = jnp.stack(wr_taps).astype(jnp.bfloat16)
        br_l = jnp.repeat(b, h_out)[None, :].astype(jnp.float32)
        packed.append((s_l, wr_l, br_l))
    return packed


# ---------------------------------------------------------------------------
# Forward
# ---------------------------------------------------------------------------
def _const_spec(shape):
    zero = (0,) * len(shape)
    return pl.BlockSpec(shape, lambda i, _z=zero: _z)


@jax.jit
def base_cnn_forward(x, packed_params):
    """x: (B, C_in, 96, 96) f32 -> (B, 256) f32  (== BaseCNN.forward)."""
    B, c_in, H, W = x.shape
    # NCHW -> (B, W, C*H):  xt[b, w, c*H + h] = x[b, c, h, w]   (cheap layout glue,
    # no im2col inflation; this is the only pre-kernel HBM pass).
    xt = jnp.transpose(x, (0, 3, 1, 2)).reshape(B, W, c_in * H).astype(jnp.bfloat16)

    consts = [t for layer in packed_params for t in layer]
    in_specs = [pl.BlockSpec((1, W, c_in * H), lambda i: (i, 0, 0))]
    in_specs += [_const_spec(t.shape) for t in consts]

    c_last = LAYER_SPECS[-1][0]
    out = pl.pallas_call(
        _fused_cnn_kernel,
        out_shape=jax.ShapeDtypeStruct((B, 1, c_last), jnp.float32),
        grid=(B,),
        in_specs=in_specs,
        out_specs=pl.BlockSpec((1, 1, c_last), lambda i: (i, 0, 0)),
        compiler_params=pltpu.CompilerParams(
            dimension_semantics=("parallel",),
            vmem_limit_bytes=32 * 1024 * 1024),
    )(xt, *consts)
    return out.reshape(B, c_last)                    # Flatten -> (B, 256)


# ---------------------------------------------------------------------------
if __name__ == "__main__":
    key = jax.random.PRNGKey(0)
    k_x, k_p = jax.random.split(key)

    batch, in_channels = 2, 4
    # Spatial size 96x96 is fixed by the LayerNorm shapes in the module.
    x = jax.random.normal(k_x, (batch, in_channels, INPUT_HW, INPUT_HW), jnp.float32)

    conv_params = init_conv_params(k_p, in_channels)
    packed = pack_params(conv_params)

    out = base_cnn_forward(x, packed)
    out = jax.block_until_ready(out)

    assert out.shape == (batch, 256), out.shape
    assert out.dtype == jnp.float32
    print("KERNEL_OK")
</pallas_src>

<mosaic_0001>
module attributes {stable_mosaic.version = 11 : i64} {
  func.func @_fused_cnn_kernel(%arg0: i32, %arg1: memref<1x96x384xbf16, #tpu.memory_space<vmem>>, %arg2: memref<4x47x96xbf16, #tpu.memory_space<vmem>>, %arg3: memref<4x384x376xbf16, #tpu.memory_space<vmem>>, %arg4: memref<1x376xf32, #tpu.memory_space<vmem>>, %arg5: memref<3x23x47xbf16, #tpu.memory_space<vmem>>, %arg6: memref<3x376x368xbf16, #tpu.memory_space<vmem>>, %arg7: memref<1x368xf32, #tpu.memory_space<vmem>>, %arg8: memref<3x11x23xbf16, #tpu.memory_space<vmem>>, %arg9: memref<3x368x352xbf16, #tpu.memory_space<vmem>>, %arg10: memref<1x352xf32, #tpu.memory_space<vmem>>, %arg11: memref<3x5x11xbf16, #tpu.memory_space<vmem>>, %arg12: memref<3x352x320xbf16, #tpu.memory_space<vmem>>, %arg13: memref<1x320xf32, #tpu.memory_space<vmem>>, %arg14: memref<3x3x5xbf16, #tpu.memory_space<vmem>>, %arg15: memref<3x320x384xbf16, #tpu.memory_space<vmem>>, %arg16: memref<1x384xf32, #tpu.memory_space<vmem>>, %arg17: memref<3x1x3xbf16, #tpu.memory_space<vmem>>, %arg18: memref<3x384x256xbf16, #tpu.memory_space<vmem>>, %arg19: memref<1x256xf32, #tpu.memory_space<vmem>>, %arg20: memref<1x1x256xf32, #tpu.memory_space<vmem>>) attributes {dimension_semantics = [#tpu.dimension_semantics<parallel>], iteration_bounds = array<i64: 2>, scalar_prefetch = 0 : i64, scratch_operands = 0 : i64, tpu.core_type = #tpu.core_type<tc>, window_params = [{transform_indices = @transform_0, window_bounds = array<i64: 1, 96, 384>}, {pipeline_mode = #tpu.pipeline_mode<synchronous>, transform_indices = @transform_1, window_bounds = array<i64: 4, 47, 96>}, {pipeline_mode = #tpu.pipeline_mode<synchronous>, transform_indices = @transform_2, window_bounds = array<i64: 4, 384, 376>}, {pipeline_mode = #tpu.pipeline_mode<synchronous>, transform_indices = @transform_3, window_bounds = array<i64: 1, 376>}, {pipeline_mode = #tpu.pipeline_mode<synchronous>, transform_indices = @transform_4, window_bounds = array<i64: 3, 23, 47>}, {pipeline_mode = #tpu.pipeline_mode<synchronous>, transform_indices = @transform_5, window_bounds = array<i64: 3, 376, 368>}, {pipeline_mode = #tpu.pipeline_mode<synchronous>, transform_indices = @transform_6, window_bounds = array<i64: 1, 368>}, {pipeline_mode = #tpu.pipeline_mode<synchronous>, transform_indices = @transform_7, window_bounds = array<i64: 3, 11, 23>}, {pipeline_mode = #tpu.pipeline_mode<synchronous>, transform_indices = @transform_8, window_bounds = array<i64: 3, 368, 352>}, {pipeline_mode = #tpu.pipeline_mode<synchronous>, transform_indices = @transform_9, window_bounds = array<i64: 1, 352>}, {pipeline_mode = #tpu.pipeline_mode<synchronous>, transform_indices = @transform_10, window_bounds = array<i64: 3, 5, 11>}, {pipeline_mode = #tpu.pipeline_mode<synchronous>, transform_indices = @transform_11, window_bounds = array<i64: 3, 352, 320>}, {pipeline_mode = #tpu.pipeline_mode<synchronous>, transform_indices = @transform_12, window_bounds = array<i64: 1, 320>}, {pipeline_mode = #tpu.pipeline_mode<synchronous>, transform_indices = @transform_13, window_bounds = array<i64: 3, 3, 5>}, {pipeline_mode = #tpu.pipeline_mode<synchronous>, transform_indices = @transform_14, window_bounds = array<i64: 3, 320, 384>}, {pipeline_mode = #tpu.pipeline_mode<synchronous>, transform_indices = @transform_15, window_bounds = array<i64: 1, 384>}, {pipeline_mode = #tpu.pipeline_mode<synchronous>, transform_indices = @transform_16, window_bounds = array<i64: 3, 1, 3>}, {pipeline_mode = #tpu.pipeline_mode<synchronous>, transform_indices = @transform_17, window_bounds = array<i64: 3, 384, 256>}, {pipeline_mode = #tpu.pipeline_mode<synchronous>, transform_indices = @transform_18, window_bounds = array<i64: 1, 256>}, {transform_indices = @transform_19, window_bounds = array<i64: 1, 1, 256>}]} {
    %c0 = arith.constant 0 : index
    %c0_0 = arith.constant 0 : index
    %c0_1 = arith.constant 0 : index
    %0 = vector.load %arg1[%c0, %c0_0, %c0_1] : memref<1x96x384xbf16, #tpu.memory_space<vmem>>, vector<1x96x384xbf16>
    %1 = vector.shape_cast %0 : vector<1x96x384xbf16> to vector<96x384xbf16>
    %cst = arith.constant 0.000000e+00 : f32
    %2 = vector.broadcast %cst : f32 to vector<47x376xf32>
    %c0_2 = arith.constant 0 : index
    %c0_3 = arith.constant 0 : index
    %c0_4 = arith.constant 0 : index
    %3 = vector.load %arg2[%c0_2, %c0_3, %c0_4] : memref<4x47x96xbf16, #tpu.memory_space<vmem>>, vector<1x47x96xbf16>
    %4 = vector.shape_cast %3 : vector<1x47x96xbf16> to vector<47x96xbf16>
    %cst_5 = arith.constant dense<0.000000e+00> : vector<47x384xf32>
    %5 = tpu.matmul %4, %1, %cst_5 {dimension_numbers = #tpu.dot_dimension_numbers<[1], [0], [0], [1], [0, 0, 1, 1], [], []>} : vector<47x96xbf16>, vector<96x384xbf16>, vector<47x384xf32> -> vector<47x384xf32>
    %6 = arith.truncf %5 : vector<47x384xf32> to vector<47x384xbf16>
    %c0_6 = arith.constant 0 : index
    %c0_7 = arith.constant 0 : index
    %c0_8 = arith.constant 0 : index
    %7 = vector.load %arg3[%c0_6, %c0_7, %c0_8] : memref<4x384x376xbf16, #tpu.memory_space<vmem>>, vector<1x384x376xbf16>
    %8 = vector.shape_cast %7 : vector<1x384x376xbf16> to vector<384x376xbf16>
    %cst_9 = arith.constant dense<0.000000e+00> : vector<47x376xf32>
    %9 = tpu.matmul %6, %8, %cst_9 {dimension_numbers = #tpu.dot_dimension_numbers<[1], [0], [0], [1], [0, 0, 1, 1], [], []>} : vector<47x384xbf16>, vector<384x376xbf16>, vector<47x376xf32> -> vector<47x376xf32>
    %10 = arith.addf %2, %9 : vector<47x376xf32>
    %c1 = arith.constant 1 : index
    %c0_10 = arith.constant 0 : index
    %c0_11 = arith.constant 0 : index
    %11 = vector.load %arg2[%c1, %c0_10, %c0_11] : memref<4x47x96xbf16, #tpu.memory_space<vmem>>, vector<1x47x96xbf16>
    %12 = vector.shape_cast %11 : vector<1x47x96xbf16> to vector<47x96xbf16>
    %cst_12 = arith.constant dense<0.000000e+00> : vector<47x384xf32>
    %13 = tpu.matmul %12, %1, %cst_12 {dimension_numbers = #tpu.dot_dimension_numbers<[1], [0], [0], [1], [0, 0, 1, 1], [], []>} : vector<47x96xbf16>, vector<96x384xbf16>, vector<47x384xf32> -> vector<47x384xf32>
    %14 = arith.truncf %13 : vector<47x384xf32> to vector<47x384xbf16>
    %c1_13 = arith.constant 1 : index
    %c0_14 = arith.constant 0 : index
    %c0_15 = arith.constant 0 : index
    %15 = vector.load %arg3[%c1_13, %c0_14, %c0_15] : memref<4x384x376xbf16, #tpu.memory_space<vmem>>, vector<1x384x376xbf16>
    %16 = vector.shape_cast %15 : vector<1x384x376xbf16> to vector<384x376xbf16>
    %cst_16 = arith.constant dense<0.000000e+00> : vector<47x376xf32>
    %17 = tpu.matmul %14, %16, %cst_16 {dimension_numbers = #tpu.dot_dimension_numbers<[1], [0], [0], [1], [0, 0, 1, 1], [], []>} : vector<47x384xbf16>, vector<384x376xbf16>, vector<47x376xf32> -> vector<47x376xf32>
    %18 = arith.addf %10, %17 : vector<47x376xf32>
    %c2 = arith.constant 2 : index
    %c0_17 = arith.constant 0 : index
    %c0_18 = arith.constant 0 : index
    %19 = vector.load %arg2[%c2, %c0_17, %c0_18] : memref<4x47x96xbf16, #tpu.memory_space<vmem>>, vector<1x47x96xbf16>
    %20 = vector.shape_cast %19 : vector<1x47x96xbf16> to vector<47x96xbf16>
    %cst_19 = arith.constant dense<0.000000e+00> : vector<47x384xf32>
    %21 = tpu.matmul %20, %1, %cst_19 {dimension_numbers = #tpu.dot_dimension_numbers<[1], [0], [0], [1], [0, 0, 1, 1], [], []>} : vector<47x96xbf16>, vector<96x384xbf16>, vector<47x384xf32> -> vector<47x384xf32>
    %22 = arith.truncf %21 : vector<47x384xf32> to vector<47x384xbf16>
    %c2_20 = arith.constant 2 : index
    %c0_21 = arith.constant 0 : index
    %c0_22 = arith.constant 0 : index
    %23 = vector.load %arg3[%c2_20, %c0_21, %c0_22] : memref<4x384x376xbf16, #tpu.memory_space<vmem>>, vector<1x384x376xbf16>
    %24 = vector.shape_cast %23 : vector<1x384x376xbf16> to vector<384x376xbf16>
    %cst_23 = arith.constant dense<0.000000e+00> : vector<47x376xf32>
    %25 = tpu.matmul %22, %24, %cst_23 {dimension_numbers = #tpu.dot_dimension_numbers<[1], [0], [0], [1], [0, 0, 1, 1], [], []>} : vector<47x384xbf16>, vector<384x376xbf16>, vector<47x376xf32> -> vector<47x376xf32>
    %26 = arith.addf %18, %25 : vector<47x376xf32>
    %c3 = arith.constant 3 : index
    %c0_24 = arith.constant 0 : index
    %c0_25 = arith.constant 0 : index
    %27 = vector.load %arg2[%c3, %c0_24, %c0_25] : memref<4x47x96xbf16, #tpu.memory_space<vmem>>, vector<1x47x96xbf16>
    %28 = vector.shape_cast %27 : vector<1x47x96xbf16> to vector<47x96xbf16>
    %cst_26 = arith.constant dense<0.000000e+00> : vector<47x384xf32>
    %29 = tpu.matmul %28, %1, %cst_26 {dimension_numbers = #tpu.dot_dimension_numbers<[1], [0], [0], [1], [0, 0, 1, 1], [], []>} : vector<47x96xbf16>, vector<96x384xbf16>, vector<47x384xf32> -> vector<47x384xf32>
    %30 = arith.truncf %29 : vector<47x384xf32> to vector<47x384xbf16>
    %c3_27 = arith.constant 3 : index
    %c0_28 = arith.constant 0 : index
    %c0_29 = arith.constant 0 : index
    %31 = vector.load %arg3[%c3_27, %c0_28, %c0_29] : memref<4x384x376xbf16, #tpu.memory_space<vmem>>, vector<1x384x376xbf16>
    %32 = vector.shape_cast %31 : vector<1x384x376xbf16> to vector<384x376xbf16>
    %cst_30 = arith.constant dense<0.000000e+00> : vector<47x376xf32>
    %33 = tpu.matmul %30, %32, %cst_30 {dimension_numbers = #tpu.dot_dimension_numbers<[1], [0], [0], [1], [0, 0, 1, 1], [], []>} : vector<47x384xbf16>, vector<384x376xbf16>, vector<47x376xf32> -> vector<47x376xf32>
    %34 = arith.addf %26, %33 : vector<47x376xf32>
    %c0_31 = arith.constant 0 : index
    %c0_32 = arith.constant 0 : index
    %35 = vector.load %arg4[%c0_31, %c0_32] : memref<1x376xf32, #tpu.memory_space<vmem>>, vector<1x376xf32>
    %36 = vector.broadcast %35 : vector<1x376xf32> to vector<47x376xf32>
    %37 = arith.addf %34, %36 : vector<47x376xf32>
    %38 = vector.shape_cast %37 : vector<47x376xf32> to vector<1x47x376xf32>
    %cst_33 = arith.constant dense<0.000000e+00> : vector<1xf32>
    %39 = vector.multi_reduction <add>, %38, %cst_33 [1, 2] : vector<1x47x376xf32> to vector<1xf32>
    %40 = vector.shape_cast %39 : vector<1xf32> to vector<1x1x1xf32>
    %41 = vector.extract %40[0, 0, 0] : f32 from vector<1x1x1xf32>
    %cst_34 = arith.constant 5.65866903E-5 : f32
    %42 = arith.mulf %41, %cst_34 : f32
    %43 = vector.broadcast %42 : f32 to vector<47x376xf32>
    %44 = arith.subf %37, %43 : vector<47x376xf32>
    %45 = arith.mulf %44, %44 : vector<47x376xf32>
    %46 = vector.shape_cast %45 : vector<47x376xf32> to vector<1x47x376xf32>
    %cst_35 = arith.constant dense<0.000000e+00> : vector<1xf32>
    %47 = vector.multi_reduction <add>, %46, %cst_35 [1, 2] : vector<1x47x376xf32> to vector<1xf32>
    %48 = vector.shape_cast %47 : vector<1xf32> to vector<1x1x1xf32>
    %49 = vector.extract %48[0, 0, 0] : f32 from vector<1x1x1xf32>
    %cst_36 = arith.constant 5.65866903E-5 : f32
    %50 = arith.mulf %49, %cst_36 : f32
    %cst_37 = arith.constant 9.99999974E-6 : f32
    %51 = arith.addf %50, %cst_37 : f32
    %52 = math.rsqrt %51 : f32
    %53 = vector.broadcast %52 : f32 to vector<47x376xf32>
    %54 = arith.mulf %44, %53 : vector<47x376xf32>
    %cst_38 = arith.constant 0.000000e+00 : f32
    %55 = vector.broadcast %cst_38 : f32 to vector<47x376xf32>
    %56 = arith.maximumf %54, %55 : vector<47x376xf32>
    %57 = arith.truncf %56 : vector<47x376xf32> to vector<47x376xbf16>
    %cst_39 = arith.constant 0.000000e+00 : f32
    %58 = vector.broadcast %cst_39 : f32 to vector<23x368xf32>
    %c0_40 = arith.constant 0 : index
    %c0_41 = arith.constant 0 : index
    %c0_42 = arith.constant 0 : index
    %59 = vector.load %arg5[%c0_40, %c0_41, %c0_42] : memref<3x23x47xbf16, #tpu.memory_space<vmem>>, vector<1x23x47xbf16>
    %60 = vector.shape_cast %59 : vector<1x23x47xbf16> to vector<23x47xbf16>
    %cst_43 = arith.constant dense<0.000000e+00> : vector<23x376xf32>
    %61 = tpu.matmul %60, %57, %cst_43 {dimension_numbers = #tpu.dot_dimension_numbers<[1], [0], [0], [1], [0, 0, 1, 1], [], []>} : vector<23x47xbf16>, vector<47x376xbf16>, vector<23x376xf32> -> vector<23x376xf32>
    %62 = arith.truncf %61 : vector<23x376xf32> to vector<23x376xbf16>
    %c0_44 = arith.constant 0 : index
    %c0_45 = arith.constant 0 : index
    %c0_46 = arith.constant 0 : index
    %63 = vector.load %arg6[%c0_44, %c0_45, %c0_46] : memref<3x376x368xbf16, #tpu.memory_space<vmem>>, vector<1x376x368xbf16>
    %64 = vector.shape_cast %63 : vector<1x376x368xbf16> to vector<376x368xbf16>
    %cst_47 = arith.constant dense<0.000000e+00> : vector<23x368xf32>
    %65 = tpu.matmul %62, %64, %cst_47 {dimension_numbers = #tpu.dot_dimension_numbers<[1], [0], [0], [1], [0, 0, 1, 1], [], []>} : vector<23x376xbf16>, vector<376x368xbf16>, vector<23x368xf32> -> vector<23x368xf32>
    %66 = arith.addf %58, %65 : vector<23x368xf32>
    %c1_48 = arith.constant 1 : index
    %c0_49 = arith.constant 0 : index
    %c0_50 = arith.constant 0 : index
    %67 = vector.load %arg5[%c1_48, %c0_49, %c0_50] : memref<3x23x47xbf16, #tpu.memory_space<vmem>>, vector<1x23x47xbf16>
    %68 = vector.shape_cast %67 : vector<1x23x47xbf16> to vector<23x47xbf16>
    %cst_51 = arith.constant dense<0.000000e+00> : vector<23x376xf32>
    %69 = tpu.matmul %68, %57, %cst_51 {dimension_numbers = #tpu.dot_dimension_numbers<[1], [0], [0], [1], [0, 0, 1, 1], [], []>} : vector<23x47xbf16>, vector<47x376xbf16>, vector<23x376xf32> -> vector<23x376xf32>
    %70 = arith.truncf %69 : vector<23x376xf32> to vector<23x376xbf16>
    %c1_52 = arith.constant 1 : index
    %c0_53 = arith.constant 0 : index
    %c0_54 = arith.constant 0 : index
    %71 = vector.load %arg6[%c1_52, %c0_53, %c0_54] : memref<3x376x368xbf16, #tpu.memory_space<vmem>>, vector<1x376x368xbf16>
    %72 = vector.shape_cast %71 : vector<1x376x368xbf16> to vector<376x368xbf16>
    %cst_55 = arith.constant dense<0.000000e+00> : vector<23x368xf32>
    %73 = tpu.matmul %70, %72, %cst_55 {dimension_numbers = #tpu.dot_dimension_numbers<[1], [0], [0], [1], [0, 0, 1, 1], [], []>} : vector<23x376xbf16>, vector<376x368xbf16>, vector<23x368xf32> -> vector<23x368xf32>
    %74 = arith.addf %66, %73 : vector<23x368xf32>
    %c2_56 = arith.constant 2 : index
    %c0_57 = arith.constant 0 : index
    %c0_58 = arith.constant 0 : index
    %75 = vector.load %arg5[%c2_56, %c0_57, %c0_58] : memref<3x23x47xbf16, #tpu.memory_space<vmem>>, vector<1x23x47xbf16>
    %76 = vector.shape_cast %75 : vector<1x23x47xbf16> to vector<23x47xbf16>
    %cst_59 = arith.constant dense<0.000000e+00> : vector<23x376xf32>
    %77 = tpu.matmul %76, %57, %cst_59 {dimension_numbers = #tpu.dot_dimension_numbers<[1], [0], [0], [1], [0, 0, 1, 1], [], []>} : vector<23x47xbf16>, vector<47x376xbf16>, vector<23x376xf32> -> vector<23x376xf32>
    %78 = arith.truncf %77 : vector<23x376xf32> to vector<23x376xbf16>
    %c2_60 = arith.constant 2 : index
    %c0_61 = arith.constant 0 : index
    %c0_62 = arith.constant 0 : index
    %79 = vector.load %arg6[%c2_60, %c0_61, %c0_62] : memref<3x376x368xbf16, #tpu.memory_space<vmem>>, vector<1x376x368xbf16>
    %80 = vector.shape_cast %79 : vector<1x376x368xbf16> to vector<376x368xbf16>
    %cst_63 = arith.constant dense<0.000000e+00> : vector<23x368xf32>
    %81 = tpu.matmul %78, %80, %cst_63 {dimension_numbers = #tpu.dot_dimension_numbers<[1], [0], [0], [1], [0, 0, 1, 1], [], []>} : vector<23x376xbf16>, vector<376x368xbf16>, vector<23x368xf32> -> vector<23x368xf32>
    %82 = arith.addf %74, %81 : vector<23x368xf32>
    %c0_64 = arith.constant 0 : index
    %c0_65 = arith.constant 0 : index
    %83 = vector.load %arg7[%c0_64, %c0_65] : memref<1x368xf32, #tpu.memory_space<vmem>>, vector<1x368xf32>
    %84 = vector.broadcast %83 : vector<1x368xf32> to vector<23x368xf32>
    %85 = arith.addf %82, %84 : vector<23x368xf32>
    %86 = vector.shape_cast %85 : vector<23x368xf32> to vector<1x23x368xf32>
    %cst_66 = arith.constant dense<0.000000e+00> : vector<1xf32>
    %87 = vector.multi_reduction <add>, %86, %cst_66 [1, 2] : vector<1x23x368xf32> to vector<1xf32>
    %88 = vector.shape_cast %87 : vector<1xf32> to vector<1x1x1xf32>
    %89 = vector.extract %88[0, 0, 0] : f32 from vector<1x1x1xf32>
    %cst_67 = arith.constant 1.18147451E-4 : f32
    %90 = arith.mulf %89, %cst_67 : f32
    %91 = vector.broadcast %90 : f32 to vector<23x368xf32>
    %92 = arith.subf %85, %91 : vector<23x368xf32>
    %93 = arith.mulf %92, %92 : vector<23x368xf32>
    %94 = vector.shape_cast %93 : vector<23x368xf32> to vector<1x23x368xf32>
    %cst_68 = arith.constant dense<0.000000e+00> : vector<1xf32>
    %95 = vector.multi_reduction <add>, %94, %cst_68 [1, 2] : vector<1x23x368xf32> to vector<1xf32>
    %96 = vector.shape_cast %95 : vector<1xf32> to vector<1x1x1xf32>
    %97 = vector.extract %96[0, 0, 0] : f32 from vector<1x1x1xf32>
    %cst_69 = arith.constant 1.18147451E-4 : f32
    %98 = arith.mulf %97, %cst_69 : f32
    %cst_70 = arith.constant 9.99999974E-6 : f32
    %99 = arith.addf %98, %cst_70 : f32
    %100 = math.rsqrt %99 : f32
    %101 = vector.broadcast %100 : f32 to vector<23x368xf32>
    %102 = arith.mulf %92, %101 : vector<23x368xf32>
    %cst_71 = arith.constant 0.000000e+00 : f32
    %103 = vector.broadcast %cst_71 : f32 to vector<23x368xf32>
    %104 = arith.maximumf %102, %103 : vector<23x368xf32>
    %105 = arith.truncf %104 : vector<23x368xf32> to vector<23x368xbf16>
    %cst_72 = arith.constant 0.000000e+00 : f32
    %106 = vector.broadcast %cst_72 : f32 to vector<11x352xf32>
    %c0_73 = arith.constant 0 : index
    %c0_74 = arith.constant 0 : index
    %c0_75 = arith.constant 0 : index
    %107 = vector.load %arg8[%c0_73, %c0_74, %c0_75] : memref<3x11x23xbf16, #tpu.memory_space<vmem>>, vector<1x11x23xbf16>
    %108 = vector.shape_cast %107 : vector<1x11x23xbf16> to vector<11x23xbf16>
    %cst_76 = arith.constant dense<0.000000e+00> : vector<11x368xf32>
    %109 = tpu.matmul %108, %105, %cst_76 {dimension_numbers = #tpu.dot_dimension_numbers<[1], [0], [0], [1], [0, 0, 1, 1], [], []>} : vector<11x23xbf16>, vector<23x368xbf16>, vector<11x368xf32> -> vector<11x368xf32>
    %110 = arith.truncf %109 : vector<11x368xf32> to vector<11x368xbf16>
    %c0_77 = arith.constant 0 : index
    %c0_78 = arith.constant 0 : index
    %c0_79 = arith.constant 0 : index
    %111 = vector.load %arg9[%c0_77, %c0_78, %c0_79] : memref<3x368x352xbf16, #tpu.memory_space<vmem>>, vector<1x368x352xbf16>
    %112 = vector.shape_cast %111 : vector<1x368x352xbf16> to vector<368x352xbf16>
    %cst_80 = arith.constant dense<0.000000e+00> : vector<11x352xf32>
    %113 = tpu.matmul %110, %112, %cst_80 {dimension_numbers = #tpu.dot_dimension_numbers<[1], [0], [0], [1], [0, 0, 1, 1], [], []>} : vector<11x368xbf16>, vector<368x352xbf16>, vector<11x352xf32> -> vector<11x352xf32>
    %114 = arith.addf %106, %113 : vector<11x352xf32>
    %c1_81 = arith.constant 1 : index
    %c0_82 = arith.constant 0 : index
    %c0_83 = arith.constant 0 : index
    %115 = vector.load %arg8[%c1_81, %c0_82, %c0_83] : memref<3x11x23xbf16, #tpu.memory_space<vmem>>, vector<1x11x23xbf16>
    %116 = vector.shape_cast %115 : vector<1x11x23xbf16> to vector<11x23xbf16>
    %cst_84 = arith.constant dense<0.000000e+00> : vector<11x368xf32>
    %117 = tpu.matmul %116, %105, %cst_84 {dimension_numbers = #tpu.dot_dimension_numbers<[1], [0], [0], [1], [0, 0, 1, 1], [], []>} : vector<11x23xbf16>, vector<23x368xbf16>, vector<11x368xf32> -> vector<11x368xf32>
    %118 = arith.truncf %117 : vector<11x368xf32> to vector<11x368xbf16>
    %c1_85 = arith.constant 1 : index
    %c0_86 = arith.constant 0 : index
    %c0_87 = arith.constant 0 : index
    %119 = vector.load %arg9[%c1_85, %c0_86, %c0_87] : memref<3x368x352xbf16, #tpu.memory_space<vmem>>, vector<1x368x352xbf16>
    %120 = vector.shape_cast %119 : vector<1x368x352xbf16> to vector<368x352xbf16>
    %cst_88 = arith.constant dense<0.000000e+00> : vector<11x352xf32>
    %121 = tpu.matmul %118, %120, %cst_88 {dimension_numbers = #tpu.dot_dimension_numbers<[1], [0], [0], [1], [0, 0, 1, 1], [], []>} : vector<11x368xbf16>, vector<368x352xbf16>, vector<11x352xf32> -> vector<11x352xf32>
    %122 = arith.addf %114, %121 : vector<11x352xf32>
    %c2_89 = arith.constant 2 : index
    %c0_90 = arith.constant 0 : index
    %c0_91 = arith.constant 0 : index
    %123 = vector.load %arg8[%c2_89, %c0_90, %c0_91] : memref<3x11x23xbf16, #tpu.memory_space<vmem>>, vector<1x11x23xbf16>
    %124 = vector.shape_cast %123 : vector<1x11x23xbf16> to vector<11x23xbf16>
    %cst_92 = arith.constant dense<0.000000e+00> : vector<11x368xf32>
    %125 = tpu.matmul %124, %105, %cst_92 {dimension_numbers = #tpu.dot_dimension_numbers<[1], [0], [0], [1], [0, 0, 1, 1], [], []>} : vector<11x23xbf16>, vector<23x368xbf16>, vector<11x368xf32> -> vector<11x368xf32>
    %126 = arith.truncf %125 : vector<11x368xf32> to vector<11x368xbf16>
    %c2_93 = arith.constant 2 : index
    %c0_94 = arith.constant 0 : index
    %c0_95 = arith.constant 0 : index
    %127 = vector.load %arg9[%c2_93, %c0_94, %c0_95] : memref<3x368x352xbf16, #tpu.memory_space<vmem>>, vector<1x368x352xbf16>
    %128 = vector.shape_cast %127 : vector<1x368x352xbf16> to vector<368x352xbf16>
    %cst_96 = arith.constant dense<0.000000e+00> : vector<11x352xf32>
    %129 = tpu.matmul %126, %128, %cst_96 {dimension_numbers = #tpu.dot_dimension_numbers<[1], [0], [0], [1], [0, 0, 1, 1], [], []>} : vector<11x368xbf16>, vector<368x352xbf16>, vector<11x352xf32> -> vector<11x352xf32>
    %130 = arith.addf %122, %129 : vector<11x352xf32>
    %c0_97 = arith.constant 0 : index
    %c0_98 = arith.constant 0 : index
    %131 = vector.load %arg10[%c0_97, %c0_98] : memref<1x352xf32, #tpu.memory_space<vmem>>, vector<1x352xf32>
    %132 = vector.broadcast %131 : vector<1x352xf32> to vector<11x352xf32>
    %133 = arith.addf %130, %132 : vector<11x352xf32>
    %134 = vector.shape_cast %133 : vector<11x352xf32> to vector<1x11x352xf32>
    %cst_99 = arith.constant dense<0.000000e+00> : vector<1xf32>
    %135 = vector.multi_reduction <add>, %134, %cst_99 [1, 2] : vector<1x11x352xf32> to vector<1xf32>
    %136 = vector.shape_cast %135 : vector<1xf32> to vector<1x1x1xf32>
    %137 = vector.extract %136[0, 0, 0] : f32 from vector<1x1x1xf32>
    %cst_100 = arith.constant 2.58264452E-4 : f32
    %138 = arith.mulf %137, %cst_100 : f32
    %139 = vector.broadcast %138 : f32 to vector<11x352xf32>
    %140 = arith.subf %133, %139 : vector<11x352xf32>
    %141 = arith.mulf %140, %140 : vector<11x352xf32>
    %142 = vector.shape_cast %141 : vector<11x352xf32> to vector<1x11x352xf32>
    %cst_101 = arith.constant dense<0.000000e+00> : vector<1xf32>
    %143 = vector.multi_reduction <add>, %142, %cst_101 [1, 2] : vector<1x11x352xf32> to vector<1xf32>
    %144 = vector.shape_cast %143 : vector<1xf32> to vector<1x1x1xf32>
    %145 = vector.extract %144[0, 0, 0] : f32 from vector<1x1x1xf32>
    %cst_102 = arith.constant 2.58264452E-4 : f32
    %146 = arith.mulf %145, %cst_102 : f32
    %cst_103 = arith.constant 9.99999974E-6 : f32
    %147 = arith.addf %146, %cst_103 : f32
    %148 = math.rsqrt %147 : f32
    %149 = vector.broadcast %148 : f32 to vector<11x352xf32>
    %150 = arith.mulf %140, %149 : vector<11x352xf32>
    %cst_104 = arith.constant 0.000000e+00 : f32
    %151 = vector.broadcast %cst_104 : f32 to vector<11x352xf32>
    %152 = arith.maximumf %150, %151 : vector<11x352xf32>
    %153 = arith.truncf %152 : vector<11x352xf32> to vector<11x352xbf16>
    %cst_105 = arith.constant 0.000000e+00 : f32
    %154 = vector.broadcast %cst_105 : f32 to vector<5x320xf32>
    %c0_106 = arith.constant 0 : index
    %c0_107 = arith.constant 0 : index
    %c0_108 = arith.constant 0 : index
    %155 = vector.load %arg11[%c0_106, %c0_107, %c0_108] : memref<3x5x11xbf16, #tpu.memory_space<vmem>>, vector<1x5x11xbf16>
    %156 = vector.shape_cast %155 : vector<1x5x11xbf16> to vector<5x11xbf16>
    %cst_109 = arith.constant dense<0.000000e+00> : vector<5x352xf32>
    %157 = tpu.matmul %156, %153, %cst_109 {dimension_numbers = #tpu.dot_dimension_numbers<[1], [0], [0], [1], [0, 0, 1, 1], [], []>} : vector<5x11xbf16>, vector<11x352xbf16>, vector<5x352xf32> -> vector<5x352xf32>
    %158 = arith.truncf %157 : vector<5x352xf32> to vector<5x352xbf16>
    %c0_110 = arith.constant 0 : index
    %c0_111 = arith.constant 0 : index
    %c0_112 = arith.constant 0 : index
    %159 = vector.load %arg12[%c0_110, %c0_111, %c0_112] : memref<3x352x320xbf16, #tpu.memory_space<vmem>>, vector<1x352x320xbf16>
    %160 = vector.shape_cast %159 : vector<1x352x320xbf16> to vector<352x320xbf16>
    %cst_113 = arith.constant dense<0.000000e+00> : vector<5x320xf32>
    %161 = tpu.matmul %158, %160, %cst_113 {dimension_numbers = #tpu.dot_dimension_numbers<[1], [0], [0], [1], [0, 0, 1, 1], [], []>} : vector<5x352xbf16>, vector<352x320xbf16>, vector<5x320xf32> -> vector<5x320xf32>
    %162 = arith.addf %154, %161 : vector<5x320xf32>
    %c1_114 = arith.constant 1 : index
    %c0_115 = arith.constant 0 : index
    %c0_116 = arith.constant 0 : index
    %163 = vector.load %arg11[%c1_114, %c0_115, %c0_116] : memref<3x5x11xbf16, #tpu.memory_space<vmem>>, vector<1x5x11xbf16>
    %164 = vector.shape_cast %163 : vector<1x5x11xbf16> to vector<5x11xbf16>
    %cst_117 = arith.constant dense<0.000000e+00> : vector<5x352xf32>
    %165 = tpu.matmul %164, %153, %cst_117 {dimension_numbers = #tpu.dot_dimension_numbers<[1], [0], [0], [1], [0, 0, 1, 1], [], []>} : vector<5x11xbf16>, vector<11x352xbf16>, vector<5x352xf32> -> vector<5x352xf32>
    %166 = arith.truncf %165 : vector<5x352xf32> to vector<5x352xbf16>
    %c1_118 = arith.constant 1 : index
    %c0_119 = arith.constant 0 : index
    %c0_120 = arith.constant 0 : index
    %167 = vector.load %arg12[%c1_118, %c0_119, %c0_120] : memref<3x352x320xbf16, #tpu.memory_space<vmem>>, vector<1x352x320xbf16>
    %168 = vector.shape_cast %167 : vector<1x352x320xbf16> to vector<352x320xbf16>
    %cst_121 = arith.constant dense<0.000000e+00> : vector<5x320xf32>
    %169 = tpu.matmul %166, %168, %cst_121 {dimension_numbers = #tpu.dot_dimension_numbers<[1], [0], [0], [1], [0, 0, 1, 1], [], []>} : vector<5x352xbf16>, vector<352x320xbf16>, vector<5x320xf32> -> vector<5x320xf32>
    %170 = arith.addf %162, %169 : vector<5x320xf32>
    %c2_122 = arith.constant 2 : index
    %c0_123 = arith.constant 0 : index
    %c0_124 = arith.constant 0 : index
    %171 = vector.load %arg11[%c2_122, %c0_123, %c0_124] : memref<3x5x11xbf16, #tpu.memory_space<vmem>>, vector<1x5x11xbf16>
    %172 = vector.shape_cast %171 : vector<1x5x11xbf16> to vector<5x11xbf16>
    %cst_125 = arith.constant dense<0.000000e+00> : vector<5x352xf32>
    %173 = tpu.matmul %172, %153, %cst_125 {dimension_numbers = #tpu.dot_dimension_numbers<[1], [0], [0], [1], [0, 0, 1, 1], [], []>} : vector<5x11xbf16>, vector<11x352xbf16>, vector<5x352xf32> -> vector<5x352xf32>
    %174 = arith.truncf %173 : vector<5x352xf32> to vector<5x352xbf16>
    %c2_126 = arith.constant 2 : index
    %c0_127 = arith.constant 0 : index
    %c0_128 = arith.constant 0 : index
    %175 = vector.load %arg12[%c2_126, %c0_127, %c0_128] : memref<3x352x320xbf16, #tpu.memory_space<vmem>>, vector<1x352x320xbf16>
    %176 = vector.shape_cast %175 : vector<1x352x320xbf16> to vector<352x320xbf16>
    %cst_129 = arith.constant dense<0.000000e+00> : vector<5x320xf32>
    %177 = tpu.matmul %174, %176, %cst_129 {dimension_numbers = #tpu.dot_dimension_numbers<[1], [0], [0], [1], [0, 0, 1, 1], [], []>} : vector<5x352xbf16>, vector<352x320xbf16>, vector<5x320xf32> -> vector<5x320xf32>
    %178 = arith.addf %170, %177 : vector<5x320xf32>
    %c0_130 = arith.constant 0 : index
    %c0_131 = arith.constant 0 : index
    %179 = vector.load %arg13[%c0_130, %c0_131] : memref<1x320xf32, #tpu.memory_space<vmem>>, vector<1x320xf32>
    %180 = vector.broadcast %179 : vector<1x320xf32> to vector<5x320xf32>
    %181 = arith.addf %178, %180 : vector<5x320xf32>
    %182 = vector.shape_cast %181 : vector<5x320xf32> to vector<1x5x320xf32>
    %cst_132 = arith.constant dense<0.000000e+00> : vector<1xf32>
    %183 = vector.multi_reduction <add>, %182, %cst_132 [1, 2] : vector<1x5x320xf32> to vector<1xf32>
    %184 = vector.shape_cast %183 : vector<1xf32> to vector<1x1x1xf32>
    %185 = vector.extract %184[0, 0, 0] : f32 from vector<1x1x1xf32>
    %cst_133 = arith.constant 6.250000e-04 : f32
    %186 = arith.mulf %185, %cst_133 : f32
    %187 = vector.broadcast %186 : f32 to vector<5x320xf32>
    %188 = arith.subf %181, %187 : vector<5x320xf32>
    %189 = arith.mulf %188, %188 : vector<5x320xf32>
    %190 = vector.shape_cast %189 : vector<5x320xf32> to vector<1x5x320xf32>
    %cst_134 = arith.constant dense<0.000000e+00> : vector<1xf32>
    %191 = vector.multi_reduction <add>, %190, %cst_134 [1, 2] : vector<1x5x320xf32> to vector<1xf32>
    %192 = vector.shape_cast %191 : vector<1xf32> to vector<1x1x1xf32>
    %193 = vector.extract %192[0, 0, 0] : f32 from vector<1x1x1xf32>
    %cst_135 = arith.constant 6.250000e-04 : f32
    %194 = arith.mulf %193, %cst_135 : f32
    %cst_136 = arith.constant 9.99999974E-6 : f32
    %195 = arith.addf %194, %cst_136 : f32
    %196 = math.rsqrt %195 : f32
    %197 = vector.broadcast %196 : f32 to vector<5x320xf32>
    %198 = arith.mulf %188, %197 : vector<5x320xf32>
    %cst_137 = arith.constant 0.000000e+00 : f32
    %199 = vector.broadcast %cst_137 : f32 to vector<5x320xf32>
    %200 = arith.maximumf %198, %199 : vector<5x320xf32>
    %201 = arith.truncf %200 : vector<5x320xf32> to vector<5x320xbf16>
    %cst_138 = arith.constant 0.000000e+00 : f32
    %202 = vector.broadcast %cst_138 : f32 to vector<3x384xf32>
    %c0_139 = arith.constant 0 : index
    %c0_140 = arith.constant 0 : index
    %c0_141 = arith.constant 0 : index
    %203 = vector.load %arg14[%c0_139, %c0_140, %c0_141] : memref<3x3x5xbf16, #tpu.memory_space<vmem>>, vector<1x3x5xbf16>
    %204 = vector.shape_cast %203 : vector<1x3x5xbf16> to vector<3x5xbf16>
    %cst_142 = arith.constant dense<0.000000e+00> : vector<3x320xf32>
    %205 = tpu.matmul %204, %201, %cst_142 {dimension_numbers = #tpu.dot_dimension_numbers<[1], [0], [0], [1], [0, 0, 1, 1], [], []>} : vector<3x5xbf16>, vector<5x320xbf16>, vector<3x320xf32> -> vector<3x320xf32>
    %206 = arith.truncf %205 : vector<3x320xf32> to vector<3x320xbf16>
    %c0_143 = arith.constant 0 : index
    %c0_144 = arith.constant 0 : index
    %c0_145 = arith.constant 0 : index
    %207 = vector.load %arg15[%c0_143, %c0_144, %c0_145] : memref<3x320x384xbf16, #tpu.memory_space<vmem>>, vector<1x320x384xbf16>
    %208 = vector.shape_cast %207 : vector<1x320x384xbf16> to vector<320x384xbf16>
    %cst_146 = arith.constant dense<0.000000e+00> : vector<3x384xf32>
    %209 = tpu.matmul %206, %208, %cst_146 {dimension_numbers = #tpu.dot_dimension_numbers<[1], [0], [0], [1], [0, 0, 1, 1], [], []>} : vector<3x320xbf16>, vector<320x384xbf16>, vector<3x384xf32> -> vector<3x384xf32>
    %210 = arith.addf %202, %209 : vector<3x384xf32>
    %c1_147 = arith.constant 1 : index
    %c0_148 = arith.constant 0 : index
    %c0_149 = arith.constant 0 : index
    %211 = vector.load %arg14[%c1_147, %c0_148, %c0_149] : memref<3x3x5xbf16, #tpu.memory_space<vmem>>, vector<1x3x5xbf16>
    %212 = vector.shape_cast %211 : vector<1x3x5xbf16> to vector<3x5xbf16>
    %cst_150 = arith.constant dense<0.000000e+00> : vector<3x320xf32>
    %213 = tpu.matmul %212, %201, %cst_150 {dimension_numbers = #tpu.dot_dimension_numbers<[1], [0], [0], [1], [0, 0, 1, 1], [], []>} : vector<3x5xbf16>, vector<5x320xbf16>, vector<3x320xf32> -> vector<3x320xf32>
    %214 = arith.truncf %213 : vector<3x320xf32> to vector<3x320xbf16>
    %c1_151 = arith.constant 1 : index
    %c0_152 = arith.constant 0 : index
    %c0_153 = arith.constant 0 : index
    %215 = vector.load %arg15[%c1_151, %c0_152, %c0_153] : memref<3x320x384xbf16, #tpu.memory_space<vmem>>, vector<1x320x384xbf16>
    %216 = vector.shape_cast %215 : vector<1x320x384xbf16> to vector<320x384xbf16>
    %cst_154 = arith.constant dense<0.000000e+00> : vector<3x384xf32>
    %217 = tpu.matmul %214, %216, %cst_154 {dimension_numbers = #tpu.dot_dimension_numbers<[1], [0], [0], [1], [0, 0, 1, 1], [], []>} : vector<3x320xbf16>, vector<320x384xbf16>, vector<3x384xf32> -> vector<3x384xf32>
    %218 = arith.addf %210, %217 : vector<3x384xf32>
    %c2_155 = arith.constant 2 : index
    %c0_156 = arith.constant 0 : index
    %c0_157 = arith.constant 0 : index
    %219 = vector.load %arg14[%c2_155, %c0_156, %c0_157] : memref<3x3x5xbf16, #tpu.memory_space<vmem>>, vector<1x3x5xbf16>
    %220 = vector.shape_cast %219 : vector<1x3x5xbf16> to vector<3x5xbf16>
    %cst_158 = arith.constant dense<0.000000e+00> : vector<3x320xf32>
    %221 = tpu.matmul %220, %201, %cst_158 {dimension_numbers = #tpu.dot_dimension_numbers<[1], [0], [0], [1], [0, 0, 1, 1], [], []>} : vector<3x5xbf16>, vector<5x320xbf16>, vector<3x320xf32> -> vector<3x320xf32>
    %222 = arith.truncf %221 : vector<3x320xf32> to vector<3x320xbf16>
    %c2_159 = arith.constant 2 : index
    %c0_160 = arith.constant 0 : index
    %c0_161 = arith.constant 0 : index
    %223 = vector.load %arg15[%c2_159, %c0_160, %c0_161] : memref<3x320x384xbf16, #tpu.memory_space<vmem>>, vector<1x320x384xbf16>
    %224 = vector.shape_cast %223 : vector<1x320x384xbf16> to vector<320x384xbf16>
    %cst_162 = arith.constant dense<0.000000e+00> : vector<3x384xf32>
    %225 = tpu.matmul %222, %224, %cst_162 {dimension_numbers = #tpu.dot_dimension_numbers<[1], [0], [0], [1], [0, 0, 1, 1], [], []>} : vector<3x320xbf16>, vector<320x384xbf16>, vector<3x384xf32> -> vector<3x384xf32>
    %226 = arith.addf %218, %225 : vector<3x384xf32>
    %c0_163 = arith.constant 0 : index
    %c0_164 = arith.constant 0 : index
    %227 = vector.load %arg16[%c0_163, %c0_164] : memref<1x384xf32, #tpu.memory_space<vmem>>, vector<1x384xf32>
    %228 = vector.broadcast %227 : vector<1x384xf32> to vector<3x384xf32>
    %229 = arith.addf %226, %228 : vector<3x384xf32>
    %230 = vector.shape_cast %229 : vector<3x384xf32> to vector<1x3x384xf32>
    %cst_165 = arith.constant dense<0.000000e+00> : vector<1xf32>
    %231 = vector.multi_reduction <add>, %230, %cst_165 [1, 2] : vector<1x3x384xf32> to vector<1xf32>
    %232 = vector.shape_cast %231 : vector<1xf32> to vector<1x1x1xf32>
    %233 = vector.extract %232[0, 0, 0] : f32 from vector<1x1x1xf32>
    %cst_166 = arith.constant 8.68055562E-4 : f32
    %234 = arith.mulf %233, %cst_166 : f32
    %235 = vector.broadcast %234 : f32 to vector<3x384xf32>
    %236 = arith.subf %229, %235 : vector<3x384xf32>
    %237 = arith.mulf %236, %236 : vector<3x384xf32>
    %238 = vector.shape_cast %237 : vector<3x384xf32> to vector<1x3x384xf32>
    %cst_167 = arith.constant dense<0.000000e+00> : vector<1xf32>
    %239 = vector.multi_reduction <add>, %238, %cst_167 [1, 2] : vector<1x3x384xf32> to vector<1xf32>
    %240 = vector.shape_cast %239 : vector<1xf32> to vector<1x1x1xf32>
    %241 = vector.extract %240[0, 0, 0] : f32 from vector<1x1x1xf32>
    %cst_168 = arith.constant 8.68055562E-4 : f32
    %242 = arith.mulf %241, %cst_168 : f32
    %cst_169 = arith.constant 9.99999974E-6 : f32
    %243 = arith.addf %242, %cst_169 : f32
    %244 = math.rsqrt %243 : f32
    %245 = vector.broadcast %244 : f32 to vector<3x384xf32>
    %246 = arith.mulf %236, %245 : vector<3x384xf32>
    %cst_170 = arith.constant 0.000000e+00 : f32
    %247 = vector.broadcast %cst_170 : f32 to vector<3x384xf32>
    %248 = arith.maximumf %246, %247 : vector<3x384xf32>
    %249 = arith.truncf %248 : vector<3x384xf32> to vector<3x384xbf16>
    %cst_171 = arith.constant 0.000000e+00 : f32
    %250 = vector.broadcast %cst_171 : f32 to vector<1x256xf32>
    %c0_172 = arith.constant 0 : index
    %c0_173 = arith.constant 0 : index
    %c0_174 = arith.constant 0 : index
    %251 = vector.load %arg17[%c0_172, %c0_173, %c0_174] : memref<3x1x3xbf16, #tpu.memory_space<vmem>>, vector<1x1x3xbf16>
    %252 = vector.shape_cast %251 : vector<1x1x3xbf16> to vector<1x3xbf16>
    %cst_175 = arith.constant dense<0.000000e+00> : vector<1x384xf32>
    %253 = tpu.matmul %252, %249, %cst_175 {dimension_numbers = #tpu.dot_dimension_numbers<[1], [0], [0], [1], [0, 0, 1, 1], [], []>} : vector<1x3xbf16>, vector<3x384xbf16>, vector<1x384xf32> -> vector<1x384xf32>
    %254 = arith.truncf %253 : vector<1x384xf32> to vector<1x384xbf16>
    %c0_176 = arith.constant 0 : index
    %c0_177 = arith.constant 0 : index
    %c0_178 = arith.constant 0 : index
    %255 = vector.load %arg18[%c0_176, %c0_177, %c0_178] : memref<3x384x256xbf16, #tpu.memory_space<vmem>>, vector<1x384x256xbf16>
    %256 = vector.shape_cast %255 : vector<1x384x256xbf16> to vector<384x256xbf16>
    %cst_179 = arith.constant dense<0.000000e+00> : vector<1x256xf32>
    %257 = tpu.matmul %254, %256, %cst_179 {dimension_numbers = #tpu.dot_dimension_numbers<[1], [0], [0], [1], [0, 0, 1, 1], [], []>} : vector<1x384xbf16>, vector<384x256xbf16>, vector<1x256xf32> -> vector<1x256xf32>
    %258 = arith.addf %250, %257 : vector<1x256xf32>
    %c1_180 = arith.constant 1 : index
    %c0_181 = arith.constant 0 : index
    %c0_182 = arith.constant 0 : index
    %259 = vector.load %arg17[%c1_180, %c0_181, %c0_182] : memref<3x1x3xbf16, #tpu.memory_space<vmem>>, vector<1x1x3xbf16>
    %260 = vector.shape_cast %259 : vector<1x1x3xbf16> to vector<1x3xbf16>
    %cst_183 = arith.constant dense<0.000000e+00> : vector<1x384xf32>
    %261 = tpu.matmul %260, %249, %cst_183 {dimension_numbers = #tpu.dot_dimension_numbers<[1], [0], [0], [1], [0, 0, 1, 1], [], []>} : vector<1x3xbf16>, vector<3x384xbf16>, vector<1x384xf32> -> vector<1x384xf32>
    %262 = arith.truncf %261 : vector<1x384xf32> to vector<1x384xbf16>
    %c1_184 = arith.constant 1 : index
    %c0_185 = arith.constant 0 : index
    %c0_186 = arith.constant 0 : index
    %263 = vector.load %arg18[%c1_184, %c0_185, %c0_186] : memref<3x384x256xbf16, #tpu.memory_space<vmem>>, vector<1x384x256xbf16>
    %264 = vector.shape_cast %263 : vector<1x384x256xbf16> to vector<384x256xbf16>
    %cst_187 = arith.constant dense<0.000000e+00> : vector<1x256xf32>
    %265 = tpu.matmul %262, %264, %cst_187 {dimension_numbers = #tpu.dot_dimension_numbers<[1], [0], [0], [1], [0, 0, 1, 1], [], []>} : vector<1x384xbf16>, vector<384x256xbf16>, vector<1x256xf32> -> vector<1x256xf32>
    %266 = arith.addf %258, %265 : vector<1x256xf32>
    %c2_188 = arith.constant 2 : index
    %c0_189 = arith.constant 0 : index
    %c0_190 = arith.constant 0 : index
    %267 = vector.load %arg17[%c2_188, %c0_189, %c0_190] : memref<3x1x3xbf16, #tpu.memory_space<vmem>>, vector<1x1x3xbf16>
    %268 = vector.shape_cast %267 : vector<1x1x3xbf16> to vector<1x3xbf16>
    %cst_191 = arith.constant dense<0.000000e+00> : vector<1x384xf32>
    %269 = tpu.matmul %268, %249, %cst_191 {dimension_numbers = #tpu.dot_dimension_numbers<[1], [0], [0], [1], [0, 0, 1, 1], [], []>} : vector<1x3xbf16>, vector<3x384xbf16>, vector<1x384xf32> -> vector<1x384xf32>
    %270 = arith.truncf %269 : vector<1x384xf32> to vector<1x384xbf16>
    %c2_192 = arith.constant 2 : index
    %c0_193 = arith.constant 0 : index
    %c0_194 = arith.constant 0 : index
    %271 = vector.load %arg18[%c2_192, %c0_193, %c0_194] : memref<3x384x256xbf16, #tpu.memory_space<vmem>>, vector<1x384x256xbf16>
    %272 = vector.shape_cast %271 : vector<1x384x256xbf16> to vector<384x256xbf16>
    %cst_195 = arith.constant dense<0.000000e+00> : vector<1x256xf32>
    %273 = tpu.matmul %270, %272, %cst_195 {dimension_numbers = #tpu.dot_dimension_numbers<[1], [0], [0], [1], [0, 0, 1, 1], [], []>} : vector<1x384xbf16>, vector<384x256xbf16>, vector<1x256xf32> -> vector<1x256xf32>
    %274 = arith.addf %266, %273 : vector<1x256xf32>
    %c0_196 = arith.constant 0 : index
    %c0_197 = arith.constant 0 : index
    %275 = vector.load %arg19[%c0_196, %c0_197] : memref<1x256xf32, #tpu.memory_space<vmem>>, vector<1x256xf32>
    %276 = arith.addf %274, %275 : vector<1x256xf32>
    %277 = vector.shape_cast %276 : vector<1x256xf32> to vector<1x1x256xf32>
    %cst_198 = arith.constant dense<0.000000e+00> : vector<1xf32>
    %278 = vector.multi_reduction <add>, %277, %cst_198 [1, 2] : vector<1x1x256xf32> to vector<1xf32>
    %279 = vector.shape_cast %278 : vector<1xf32> to vector<1x1x1xf32>
    %280 = vector.extract %279[0, 0, 0] : f32 from vector<1x1x1xf32>
    %cst_199 = arith.constant 3.906250e-03 : f32
    %281 = arith.mulf %280, %cst_199 : f32
    %282 = vector.broadcast %281 : f32 to vector<1x256xf32>
    %283 = arith.subf %276, %282 : vector<1x256xf32>
    %284 = arith.mulf %283, %283 : vector<1x256xf32>
    %285 = vector.shape_cast %284 : vector<1x256xf32> to vector<1x1x256xf32>
    %cst_200 = arith.constant dense<0.000000e+00> : vector<1xf32>
    %286 = vector.multi_reduction <add>, %285, %cst_200 [1, 2] : vector<1x1x256xf32> to vector<1xf32>
    %287 = vector.shape_cast %286 : vector<1xf32> to vector<1x1x1xf32>
    %288 = vector.extract %287[0, 0, 0] : f32 from vector<1x1x1xf32>
    %cst_201 = arith.constant 3.906250e-03 : f32
    %289 = arith.mulf %288, %cst_201 : f32
    %cst_202 = arith.constant 9.99999974E-6 : f32
    %290 = arith.addf %289, %cst_202 : f32
    %291 = math.rsqrt %290 : f32
    %292 = vector.broadcast %291 : f32 to vector<1x256xf32>
    %293 = arith.mulf %283, %292 : vector<1x256xf32>
    %cst_203 = arith.constant 0.000000e+00 : f32
    %294 = vector.broadcast %cst_203 : f32 to vector<1x256xf32>
    %295 = arith.maximumf %293, %294 : vector<1x256xf32>
    %c0_204 = arith.constant 0 : index
    %c0_205 = arith.constant 0 : index
    %c0_206 = arith.constant 0 : index
    %296 = vector.load %arg20[%c0_204, %c0_205, %c0_206] : memref<1x1x256xf32, #tpu.memory_space<vmem>>, vector<1x1x256xf32>
    %297 = vector.shape_cast %296 : vector<1x1x256xf32> to vector<1x256xf32>
    %298 = vector.shape_cast %295 : vector<1x256xf32> to vector<1x1x256xf32>
    tpu.vector_store %arg20[%c0_204, %c0_205, %c0_206], %298 {strides = array<i32>} : memref<1x1x256xf32, #tpu.memory_space<vmem>>, vector<1x1x256xf32>,
    return
  }
  func.func @transform_0(%arg0: i32) -> (i32, i32, i32) {
    %c0_i32 = arith.constant 0 : i32
    %c0_i32_0 = arith.constant 0 : i32
    %c0_i32_1 = arith.constant 0 : i32
    return %arg0, %c0_i32, %c0_i32_0 : i32, i32, i32
  }
  func.func @transform_1(%arg0: i32) -> (i32, i32, i32) {
    %c0_i32 = arith.constant 0 : i32
    %c0_i32_0 = arith.constant 0 : i32
    %c0_i32_1 = arith.constant 0 : i32
    %c0_i32_2 = arith.constant 0 : i32
    return %c0_i32, %c0_i32_0, %c0_i32_1 : i32, i32, i32
  }
  func.func @transform_2(%arg0: i32) -> (i32, i32, i32) {
    %c0_i32 = arith.constant 0 : i32
    %c0_i32_0 = arith.constant 0 : i32
    %c0_i32_1 = arith.constant 0 : i32
    %c0_i32_2 = arith.constant 0 : i32
    return %c0_i32, %c0_i32_0, %c0_i32_1 : i32, i32, i32
  }
  func.func @transform_3(%arg0: i32) -> (i32, i32) {
    %c0_i32 = arith.constant 0 : i32
    %c0_i32_0 = arith.constant 0 : i32
    %c0_i32_1 = arith.constant 0 : i32
    return %c0_i32, %c0_i32_0 : i32, i32
  }
  func.func @transform_4(%arg0: i32) -> (i32, i32, i32) {
    %c0_i32 = arith.constant 0 : i32
    %c0_i32_0 = arith.constant 0 : i32
    %c0_i32_1 = arith.constant 0 : i32
    %c0_i32_2 = arith.constant 0 : i32
    return %c0_i32, %c0_i32_0, %c0_i32_1 : i32, i32, i32
  }
  func.func @transform_5(%arg0: i32) -> (i32, i32, i32) {
    %c0_i32 = arith.constant 0 : i32
    %c0_i32_0 = arith.constant 0 : i32
    %c0_i32_1 = arith.constant 0 : i32
    %c0_i32_2 = arith.constant 0 : i32
    return %c0_i32, %c0_i32_0, %c0_i32_1 : i32, i32, i32
  }
  func.func @transform_6(%arg0: i32) -> (i32, i32) {
    %c0_i32 = arith.constant 0 : i32
    %c0_i32_0 = arith.constant 0 : i32
    %c0_i32_1 = arith.constant 0 : i32
    return %c0_i32, %c0_i32_0 : i32, i32
  }
  func.func @transform_7(%arg0: i32) -> (i32, i32, i32) {
    %c0_i32 = arith.constant 0 : i32
    %c0_i32_0 = arith.constant 0 : i32
    %c0_i32_1 = arith.constant 0 : i32
    %c0_i32_2 = arith.constant 0 : i32
    return %c0_i32, %c0_i32_0, %c0_i32_1 : i32, i32, i32
  }
  func.func @transform_8(%arg0: i32) -> (i32, i32, i32) {
    %c0_i32 = arith.constant 0 : i32
    %c0_i32_0 = arith.constant 0 : i32
    %c0_i32_1 = arith.constant 0 : i32
    %c0_i32_2 = arith.constant 0 : i32
    return %c0_i32, %c0_i32_0, %c0_i32_1 : i32, i32, i32
  }
  func.func @transform_9(%arg0: i32) -> (i32, i32) {
    %c0_i32 = arith.constant 0 : i32
    %c0_i32_0 = arith.constant 0 : i32
    %c0_i32_1 = arith.constant 0 : i32
    return %c0_i32, %c0_i32_0 : i32, i32
  }
  func.func @transform_10(%arg0: i32) -> (i32, i32, i32) {
    %c0_i32 = arith.constant 0 : i32
    %c0_i32_0 = arith.constant 0 : i32
    %c0_i32_1 = arith.constant 0 : i32
    %c0_i32_2 = arith.constant 0 : i32
    return %c0_i32, %c0_i32_0, %c0_i32_1 : i32, i32, i32
  }
  func.func @transform_11(%arg0: i32) -> (i32, i32, i32) {
    %c0_i32 = arith.constant 0 : i32
    %c0_i32_0 = arith.constant 0 : i32
    %c0_i32_1 = arith.constant 0 : i32
    %c0_i32_2 = arith.constant 0 : i32
    return %c0_i32, %c0_i32_0, %c0_i32_1 : i32, i32, i32
  }
  func.func @transform_12(%arg0: i32) -> (i32, i32) {
    %c0_i32 = arith.constant 0 : i32
    %c0_i32_0 = arith.constant 0 : i32
    %c0_i32_1 = arith.constant 0 : i32
    return %c0_i32, %c0_i32_0 : i32, i32
  }
  func.func @transform_13(%arg0: i32) -> (i32, i32, i32) {
    %c0_i32 = arith.constant 0 : i32
    %c0_i32_0 = arith.constant 0 : i32
    %c0_i32_1 = arith.constant 0 : i32
    %c0_i32_2 = arith.constant 0 : i32
    return %c0_i32, %c0_i32_0, %c0_i32_1 : i32, i32, i32
  }
  func.func @transform_14(%arg0: i32) -> (i32, i32, i32) {
    %c0_i32 = arith.constant 0 : i32
    %c0_i32_0 = arith.constant 0 : i32
    %c0_i32_1 = arith.constant 0 : i32
    %c0_i32_2 = arith.constant 0 : i32
    return %c0_i32, %c0_i32_0, %c0_i32_1 : i32, i32, i32
  }
  func.func @transform_15(%arg0: i32) -> (i32, i32) {
    %c0_i32 = arith.constant 0 : i32
    %c0_i32_0 = arith.constant 0 : i32
    %c0_i32_1 = arith.constant 0 : i32
    return %c0_i32, %c0_i32_0 : i32, i32
  }
  func.func @transform_16(%arg0: i32) -> (i32, i32, i32) {
    %c0_i32 = arith.constant 0 : i32
    %c0_i32_0 = arith.constant 0 : i32
    %c0_i32_1 = arith.constant 0 : i32
    %c0_i32_2 = arith.constant 0 : i32
    return %c0_i32, %c0_i32_0, %c0_i32_1 : i32, i32, i32
  }
  func.func @transform_17(%arg0: i32) -> (i32, i32, i32) {
    %c0_i32 = arith.constant 0 : i32
    %c0_i32_0 = arith.constant 0 : i32
    %c0_i32_1 = arith.constant 0 : i32
    %c0_i32_2 = arith.constant 0 : i32
    return %c0_i32, %c0_i32_0, %c0_i32_1 : i32, i32, i32
  }
  func.func @transform_18(%arg0: i32) -> (i32, i32) {
    %c0_i32 = arith.constant 0 : i32
    %c0_i32_0 = arith.constant 0 : i32
    %c0_i32_1 = arith.constant 0 : i32
    return %c0_i32, %c0_i32_0 : i32, i32
  }
  func.func @transform_19(%arg0: i32) -> (i32, i32, i32) {
    %c0_i32 = arith.constant 0 : i32
    %c0_i32_0 = arith.constant 0 : i32
    %c0_i32_1 = arith.constant 0 : i32
    return %arg0, %c0_i32, %c0_i32_0 : i32, i32, i32
  }
}

</mosaic_0001>

<bundles_post_ra>
// kernel: base_cnn_forward.1
= control target key start
LH: loop header
LB: loop body
LE: loop exit
PB: predicated region body
PF: predicated region fallthrough
CT: control target
= control target key end

     0   :  { %s25924_s0 = inlined_call_operand.vmem [shape: bf16[2,96,384], index: 0, kind: input, shape index: {}]   ;;  %s25925_s1 = inlined_call_operand.vmem [shape: bf16[4,47,96], index: 1, kind: input, shape index: {}]   ;;  %s25926_s2 = inlined_call_operand.vmem [shape: bf16[4,384,376], index: 2, kind: input, shape index: {}]   ;;  %s25927_s3 = inlined_call_operand.vmem [shape: f32[1,376], index: 3, kind: input, shape index: {}]   ;;  %s25928_s4 = inlined_call_operand.vmem [shape: bf16[3,23,47], index: 4, kind: input, shape index: {}]   ;;  %s25929_s5 = inlined_call_operand.vmem [shape: bf16[3,376,368], index: 5, kind: input, shape index: {}]   ;;  %s25930_s6 = inlined_call_operand.vmem [shape: f32[1,368], index: 6, kind: input, shape index: {}]   ;;  %s25931_s7 = inlined_call_operand.vmem [shape: bf16[3,11,23], index: 7, kind: input, shape index: {}]   ;;  %s25932_s8 = inlined_call_operand.vmem [shape: bf16[3,368,352], index: 8, kind: input, shape index: {}]   ;;  %s25933_s9 = inlined_call_operand.vmem [shape: f32[1,352], index: 9, kind: input, shape index: {}]   ;;  %s25934_s10 = inlined_call_operand.vmem [shape: bf16[3,5,11], index: 10, kind: input, shape index: {}]   ;;  %s25935_s11 = inlined_call_operand.vmem [shape: bf16[3,352,320], index: 11, kind: input, shape index: {}]   ;;  %s25936_s12 = inlined_call_operand.vmem [shape: f32[1,320], index: 12, kind: input, shape index: {}]   ;;  %s25937_s13 = inlined_call_operand.vmem [shape: bf16[3,3,5], index: 13, kind: input, shape index: {}]   ;;  %s25938_s14 = inlined_call_operand.vmem [shape: bf16[3,320,384], index: 14, kind: input, shape index: {}]   ;;  %s25939_s15 = inlined_call_operand.vmem [shape: f32[1,384], index: 15, kind: input, shape index: {}]   ;;  %s25940_s16 = inlined_call_operand.vmem [shape: bf16[3,1,3], index: 16, kind: input, shape index: {}]   ;;  %s25941_s17 = inlined_call_operand.vmem [shape: bf16[3,384,256], index: 17, kind: input, shape index: {}]   ;;  %s25942_s18 = inlined_call_operand.vmem [shape: f32[1,256], index: 18, kind: input, shape index: {}]   ;;  %s25943_s19 = inlined_call_operand.vmem [shape: f32[2,1,256], index: 19, kind: output, shape index: {}]  }
   0x1   :  { %25952 = sst [smem:[#allocation15_spill]] %s25924_s0  ;;  %s20656_s0 = smov 0  }
   0x2   :  { %25953 = sst [smem:[#allocation16_spill]] %s25925_s1 }
   0x3   :  { %25954 = sst [smem:[#allocation17_spill]] %s25926_s2 }
   0x4   :  { %25955 = sst [smem:[#allocation18_spill]] %s25927_s3 }
   0x5 LB: > { %s15088_s30 = sadd.s32 4294967295, %s20549_s0   ;;  %p15092_p0 = scmp.ge.s32.totalorder %s20549_s0, 1  ;;  %s20549_s0 = sphi %s20656_s0, %s29_s0  }
   0x6   : > { %p537_p1 = scmp.lt.s32.totalorder %s20549_s0, 3 }
   0x8   : > { %p538_p2 = pnand %p15092_p0, %p537_p1 }
   0xa   : > { %541 = sbr.rel (%p538_p2) target bundleno = 8002 (0x1f42), region = 96 }
   0xf   : > { %p592_p3 = scmp.lt.s32.totalorder %s15088_s30, 1  ;;  %v25946_v0 = vmov 0.0   ;;  %vm20552_vm0 = vmmov 0   ;;  %v25948_v1 = vmov 0   ;;  %s25956_s22 = sld [smem:[#allocation15_spill]]  ;;  %vm743_vm1 = vcmask 785408  }
  0x10   : > { %18218 = vmatprep.subr.bf16.mxu1 %v25946_v0  ;;  %18230 = vmatprep.mubr.msk.bf16.mxu1 %vm20552_vm0, %v25946_v0  ;;  %s25957_s25 = sld [smem:[#allocation16_spill]]  ;;  %vm4317_vm2 = vcmask 982016   ;;  %vm4336_vm3 = vcmask 1046528   ;;  %vm4341_vm4 = vcmask 980992   ;;  %vm4494_vm5 = vcmask 1047552  }
  0x11   : > { %s25990_s30 = smov (!%p592_p3, %s15088_s30), 1  ;;  %785 = vmatprep.mubr.bf16.mxu0 %v25948_v1  ;;  %s25958_s21 = sld [smem:[#allocation17_spill]]  ;;  %vm4487_vm6 = vcmask 384000   ;;  %vm5305_vm7 = vcmask 1043456   ;;  %vm6945_vm8 = vcmask 916480   ;;  %vm6956_vm9 = vcmask 915456  }
  0x12   : > { %s18735_s20 = smul.u32 144, %s25990_s30  ;;  %s25972_s23 = sld [smem:[#allocation18_spill]]  ;;  %vm7051_vm10 = vcmask 1042432   ;;  %vm7047_vm11 = vcmask 187392   ;;  %vm9277_vm12 = vcmask 780288   ;;  %vm9347_vm13 = vcmask 1044480  }
  0x13   : > { %vm9348_vm14 = vcmask 1045504   ;;  %vm9343_vm15 = vcmask 89088  }
  0x15   : > { %s20674_s2 = scalar_lea.vmem %s25956_s22, %s18735_s20 }
  0x16   : > { %v18785_v2 = vld [vmem:[%s20674_s2 + $0x7c] ss:$12 sps:$4 sm:$0xff]   ;;  %v18787_v3 = vld [vmem:[%s20674_s2 + $0x80] ss:$12 sps:$4 sm:$0xff]   ;;  %v18788_v4 = vld [vmem:[%s20674_s2 + $0x78] ss:$12 sps:$4 sm:$0xff]  }
  0x17   : > { %757 = vmatprep.subr.bf16.mxu0 %v18785_v2  ;;  %18219 = vmatpush3.bf16.msra.mxu1 %v18787_v3  ;;  %v18789_v5 = vld [vmem:[%s20674_s2 + $0x64] ss:$12 sps:$4 sm:$0xff]   ;;  %v18791_v6 = vld [vmem:[%s20674_s2 + $0x68] ss:$12 sps:$4 sm:$0xff]   ;;  %v18792_v7 = vld [vmem:[%s20674_s2 + $0x60] ss:$12 sps:$4 sm:$0xff]  }
  0x18   : > { %758 = vmatpush1.bf16.msra.mxu0 %v18788_v4  ;;  %18220 = vmatprep.subr.bf16.mxu1 %v25946_v0  ;;  %v18793_v8 = vld [vmem:[%s20674_s2 + $0x4c] ss:$12 sps:$4 sm:$0xff]   ;;  %v18795_v9 = vld [vmem:[%s20674_s2 + $0x50] ss:$12 sps:$4 sm:$0xff]   ;;  %v18796_v10 = vld [vmem:[%s20674_s2 + $0x48] ss:$12 sps:$4 sm:$0xff]  }
  0x19   : > { %759 = vmatprep.subr.bf16.mxu0 %v18789_v5  ;;  %v18797_v11 = vld [vmem:[%s20674_s2 + $0x34] ss:$12 sps:$4 sm:$0xff]   ;;  %v18799_v12 = vld [vmem:[%s20674_s2 + $0x38] ss:$12 sps:$4 sm:$0xff]   ;;  %v18800_v13 = vld [vmem:[%s20674_s2 + $0x30] ss:$12 sps:$4 sm:$0xff]  }
  0x1a   : > { %v18801_v14 = vld [vmem:[%s20674_s2 + $0x1c] ss:$12 sps:$4 sm:$0xff]   ;;  %v18803_v15 = vld [vmem:[%s20674_s2 + $0x20] ss:$12 sps:$4 sm:$0xff]   ;;  %v18804_v16 = vld [vmem:[%s20674_s2 + $0x18] ss:$12 sps:$4 sm:$0xff]  }
  0x1b   : > { %18221 = vmatpush3.bf16.msra.mxu1 %v18791_v6  ;;  %v18805_v17 = vld [vmem:[%s20674_s2 + $0x4] ss:$12 sps:$4 sm:$0xff]   ;;  %v18807_v18 = vld [vmem:[%s20674_s2 + $0x8] ss:$12 sps:$4 sm:$0xff]   ;;  %v18808_v19 = vld [vmem:[%s20674_s2] ss:$12 sps:$4 sm:$0xff]  }
  0x1c   : > { %760 = vmatpush1.bf16.msra.mxu0 %v18792_v7  ;;  %18222 = vmatprep.subr.bf16.mxu1 %v25946_v0  ;;  %v18809_v20 = vld [vmem:[%s25957_s25] sm:$0xff]   ;;  %v18810_v21 = vld [vmem:[%s25957_s25 + $0x8] sm:$0xff]   ;;  %v18811_v22 = vld [vmem:[%s25957_s25 + $0x10] sm:$0xff]  }
  0x1d   : > { %761 = vmatprep.subr.bf16.mxu0 %v18793_v8  ;;  %v18841_v23 = vld [vmem:[%s25958_s21 + $0x46c] ss:$12 sps:$4 sm:$0xff]   ;;  %v18815_v26 = vld [vmem:[%s25958_s21 + $0x2e8] ss:$12 sps:$4 sm:$0xff]   ;;  %v18818_v29 = vld [vmem:[%s25958_s21 + $0x2d0] ss:$12 sps:$4 sm:$0xff]  }
  0x1e   : > { %v18817_v24 = vld [vmem:[%s25958_s21 + $0x2ec] ss:$12 sps:$4 sm:$0xff]   ;;  %v18820_v27 = vld [vmem:[%s25958_s21 + $0x2d4] ss:$12 sps:$4 sm:$0xff]   ;;  %v18823_v30 = vld [vmem:[%s25958_s21 + $0x2bc] ss:$12 sps:$4 sm:$0xff]  }
  0x1f   : > { %18223 = vmatpush3.bf16.msra.mxu1 %v18795_v9  ;;  %v18812_v25 = vld [vmem:[%s25957_s25 + $0x18] sm:$0xff]   ;;  %v18839_v28 = vld [vmem:[%s25958_s21 + $0x468] ss:$12 sps:$4 sm:$0xff]   ;;  %v18813_v31 = vld [vmem:[%s25957_s25 + $0x20] sm:$0xff]  }
  0x20   : > { %762 = vmatpush1.bf16.msra.mxu0 %v18796_v10  ;;  %18224 = vmatprep.subr.bf16.mxu1 %v25946_v0  ;;  %v18821_v32 = vld [vmem:[%s25958_s21 + $0x2b8] ss:$12 sps:$4 sm:$0xff]   ;;  %v18824_v34 = vld [vmem:[%s25958_s21 + $0x2a0] ss:$12 sps:$4 sm:$0xff]   ;;  %v18827_v37 = vld [vmem:[%s25958_s21 + $0x288] ss:$12 sps:$4 sm:$0xff]  }
  0x21   : > { %763 = vmatprep.subr.bf16.mxu0 %v18797_v11  ;;  %v18826_v33 = vld [vmem:[%s25958_s21 + $0x2a4] ss:$12 sps:$4 sm:$0xff]   ;;  %v18829_v35 = vld [vmem:[%s25958_s21 + $0x28c] ss:$12 sps:$4 sm:$0xff]   ;;  %v18832_v38 = vld [vmem:[%s25958_s21 + $0x274] ss:$12 sps:$4 sm:$0xff]  }
  0x22   : > { %v18814_v36 = vld [vmem:[%s25957_s25 + $0x28] sm:$0xff]   ;;  %v18830_v39 = vld [vmem:[%s25958_s21 + $0x270] ss:$12 sps:$4 sm:$0xff]   ;;  %v18833_v41 = vld [vmem:[%s25958_s21 + $0x258] ss:$12 sps:$4 sm:$0xff]  }
  0x23   : > { %18225 = vmatpush3.bf16.msra.mxu1 %v18799_v12  ;;  %v18835_v40 = vld [vmem:[%s25958_s21 + $0x25c] ss:$12 sps:$4 sm:$0xff]   ;;  %v18838_v42 = vld [vmem:[%s25958_s21 + $0x244] ss:$12 sps:$4 sm:$0xff]   ;;  %v18836_v43 = vld [vmem:[%s25958_s21 + $0x240] ss:$12 sps:$4 sm:$0xff]  }
  0x24   : > { %764 = vmatpush1.bf16.msra.mxu0 %v18800_v13  ;;  %18226 = vmatprep.subr.bf16.mxu1 %v25946_v0  ;;  %v18844_v44 = vld [vmem:[%s25958_s21 + $0x3ac] ss:$12 sps:$4 sm:$0xff]   ;;  %v18847_v45 = vld [vmem:[%s25958_s21 + $0x454] ss:$12 sps:$4 sm:$0xff]   ;;  %v18845_v47 = vld [vmem:[%s25958_s21 + $0x450] ss:$12 sps:$4 sm:$0xff]  }
  0x25   : > { %765 = vmatprep.subr.bf16.mxu0 %v18801_v14  ;;  %v18842_v46 = vld [vmem:[%s25958_s21 + $0x3a8] ss:$12 sps:$4 sm:$0xff]   ;;  %v18848_v50 = vld [vmem:[%s25958_s21 + $0x390] ss:$12 sps:$4 sm:$0xff]   ;;  %v18851_v51 = vld [vmem:[%s25958_s21 + $0x438] ss:$12 sps:$4 sm:$0xff]  }
  0x26   : > { %v18850_v48 = vld [vmem:[%s25958_s21 + $0x394] ss:$12 sps:$4 sm:$0xff]   ;;  %v18853_v49 = vld [vmem:[%s25958_s21 + $0x43c] ss:$12 sps:$4 sm:$0xff]   ;;  %v18859_v53 = vld [vmem:[%s25958_s21 + $0x424] ss:$12 sps:$4 sm:$0xff]  }
  0x27   : > { %18227 = vmatpush3.bf16.msra.mxu1 %v18803_v15  ;;  %v18856_v52 = vld [vmem:[%s25958_s21 + $0x37c] ss:$12 sps:$4 sm:$0xff]   ;;  %v18854_v54 = vld [vmem:[%s25958_s21 + $0x378] ss:$12 sps:$4 sm:$0xff]   ;;  %v18857_v55 = vld [vmem:[%s25958_s21 + $0x420] ss:$12 sps:$4 sm:$0xff]  }
  0x28   : > { %766 = vmatpush1.bf16.msra.mxu0 %v18804_v16  ;;  %18228 = vmatprep.subr.bf16.mxu1 %v25946_v0  ;;  %v18862_v56 = vld [vmem:[%s25958_s21 + $0x364] ss:$12 sps:$4 sm:$0xff]   ;;  %v18865_v57 = vld [vmem:[%s25958_s21 + $0x40c] ss:$12 sps:$4 sm:$0xff]   ;;  %v18863_v59 = vld [vmem:[%s25958_s21 + $0x408] ss:$12 sps:$4 sm:$0xff]  }
  0x29   : > { %767 = vmatprep.subr.bf16.mxu0 %v18805_v17  ;;  %v18860_v58 = vld [vmem:[%s25958_s21 + $0x360] ss:$12 sps:$4 sm:$0xff]   ;;  %v18866_v62 = vld [vmem:[%s25958_s21 + $0x348] ss:$12 sps:$4 sm:$0xff]   ;;  %v18869_v63 = vld [vmem:[%s25958_s21 + $0x3f0] ss:$12 sps:$4 sm:$0xff]  }
  0x2a   : > { %v18868_v60 = vld [vmem:[%s25958_s21 + $0x34c] ss:$12 sps:$4 sm:$0xff]   ;;  %v18871_v61 = vld [vmem:[%s25958_s21 + $0x3f4] ss:$12 sps:$4 sm:$0xff]  }
  0x2b   : > { %18229 = vmatpush3.bf16.msra.mxu1 %v18807_v18 }
  0x2c   : > { %768 = vmatpush1.bf16.msra.mxu0 %v18808_v19  ;;  %18242 = vmatprep.subr.bf16.mxu1 %v25946_v0 }
  0x2d   : > { %1013 = vmatprep.subr.bf16.mxu0 %v18785_v2  ;;  %v18874_v2 = vld [vmem:[%s25958_s21 + $0x334] ss:$12 sps:$4 sm:$0xff]  }
  0x2e   : > { %18231 = vmatmul.mubr.msk.bf16.vlgmr.msra.gmra.mxu1 %vm743_vm1, %v18809_v20 }
  0x2f   : > { %15116 = vmatmul.mubr.msk.bf16.vlgmr.msra.gmra.mxu0 %vm743_vm1, %v18809_v20  ;;  %18243 = vmatpush3.bf16.msra.mxu1 %v18787_v3  ;;  %v18877_v3 = vld [vmem:[%s25958_s21 + $0x3dc] ss:$12 sps:$4 sm:$0xff]  }
  0x30   : > { %1014 = vmatpush1.bf16.msra.mxu0 %v18788_v4  ;;  %18244 = vmatprep.subr.bf16.mxu1 %v25946_v0  ;;  %v18872_v4 = vld [vmem:[%s25958_s21 + $0x330] ss:$12 sps:$4 sm:$0xff]  }
  0x31   : > { %1015 = vmatprep.subr.bf16.mxu0 %v18789_v5  ;;  %18234 = vmatprep.mubr.msk.bf16.mxu1 %vm20552_vm0, %v25946_v0  ;;  %v18875_v5 = vld [vmem:[%s25958_s21 + $0x3d8] ss:$12 sps:$4 sm:$0xff]  }
  0x32   : > { %795 = vmatprep.mubr.bf16.mxu0 %v25948_v1 }
  0x33   : > { %18245 = vmatpush3.bf16.msra.mxu1 %v18791_v6  ;;  %v18880_v6 = vld [vmem:[%s25958_s21 + $0x31c] ss:$12 sps:$4 sm:$0xff]  }
  0x34   : > { %1016 = vmatpush1.bf16.msra.mxu0 %v18792_v7  ;;  %18246 = vmatprep.subr.bf16.mxu1 %v25946_v0  ;;  %v18883_v7 = vld [vmem:[%s25958_s21 + $0x3c4] ss:$12 sps:$4 sm:$0xff]  }
  0x35   : > { %1017 = vmatprep.subr.bf16.mxu0 %v18793_v8  ;;  %v18878_v8 = vld [vmem:[%s25958_s21 + $0x318] ss:$12 sps:$4 sm:$0xff]  }
  0x36   : > { %18235 = vmatmul.mubr.msk.bf16.gmra.mxu1 %vm743_vm1, %v18810_v21 }
  0x37   : > { %15117 = vmatmul.mubr.msk.bf16.gmra.mxu0 %vm743_vm1, %v18810_v21  ;;  %18247 = vmatpush3.bf16.msra.mxu1 %v18795_v9  ;;  %v18881_v9 = vld [vmem:[%s25958_s21 + $0x3c0] ss:$12 sps:$4 sm:$0xff]  }
  0x38   : > { %1018 = vmatpush1.bf16.msra.mxu0 %v18796_v10  ;;  %18248 = vmatprep.subr.bf16.mxu1 %v25946_v0  ;;  %v18886_v10 = vld [vmem:[%s25958_s21 + $0x304] ss:$12 sps:$4 sm:$0xff]  }
  0x39   : > { %1019 = vmatprep.subr.bf16.mxu0 %v18797_v11  ;;  %18238 = vmatprep.mubr.msk.bf16.mxu1 %vm20552_vm0, %v25946_v0  ;;  %v18887_v11 = vld [vmem:[%s25958_s21 + $0x3b0] ss:$12 sps:$4 sm:$0xff]  }
  0x3a   : > { %805 = vmatprep.mubr.bf16.mxu0 %v25948_v1 }
  0x3b   : > { %18249 = vmatpush3.bf16.msra.mxu1 %v18799_v12  ;;  %v18884_v12 = vld [vmem:[%s25958_s21 + $0x300] ss:$12 sps:$4 sm:$0xff]  }
  0x3c   : > { %1020 = vmatpush1.bf16.msra.mxu0 %v18800_v13  ;;  %18250 = vmatprep.subr.bf16.mxu1 %v25946_v0 }
  0x3d   : > { %1021 = vmatprep.subr.bf16.mxu0 %v18801_v14 }
  0x3e   : > { %18239 = vmatmul.mubr.msk.bf16.gmra.mxu1 %vm743_vm1, %v18811_v22 }
  0x3f   : > { %15118 = vmatmul.mubr.msk.bf16.gmra.mxu0 %vm743_vm1, %v18811_v22  ;;  %18251 = vmatpush3.bf16.msra.mxu1 %v18803_v15 }
  0x40   : > { %1022 = vmatpush1.bf16.msra.mxu0 %v18804_v16  ;;  %18252 = vmatprep.subr.bf16.mxu1 %v25946_v0 }
  0x41   : > { %1023 = vmatprep.subr.bf16.mxu0 %v18805_v17  ;;  %18254 = vmatprep.mubr.msk.bf16.mxu1 %vm20552_vm0, %v25946_v0 }
  0x42   : > { %1041 = vmatprep.mubr.bf16.mxu0 %v25948_v1 }
  0x43   : > { %18253 = vmatpush3.bf16.msra.mxu1 %v18807_v18 }
  0x44   : > { %1024 = vmatpush1.bf16.msra.mxu0 %v18808_v19  ;;  %1682 = vmatprep.subr.bf16.mxu1 %v18841_v23 }
  0x45   : > { %1619 = vmatprep.subr.bf16.mxu0 %v18817_v24 }
  0x46   : > { %18255 = vmatmul.mubr.msk.bf16.vlgmr.msra.gmra.mxu1 %vm743_vm1, %v18812_v25 }
  0x47   : > { %15131 = vmatmul.mubr.msk.bf16.vlgmr.msra.gmra.mxu0 %vm743_vm1, %v18812_v25  ;;  %18258 = vmatprep.mubr.msk.bf16.mxu1 %vm20552_vm0, %v25946_v0 }
  0x48   : > { %1051 = vmatprep.mubr.bf16.mxu0 %v25948_v1  ;;  %1620 = vmatpush1.bf16.msra.mxu0 %v18815_v26 }
  0x49   : > { %1621 = vmatprep.subr.bf16.mxu0 %v18820_v27  ;;  %1683 = vmatpush1.bf16.msra.mxu1 %v18839_v28 }
  0x4a   : > { %1684 = vmatprep.subr.bf16.mxu1 %v18847_v45 }
  0x4c   : > { %1622 = vmatpush1.bf16.msra.mxu0 %v18818_v29 }
  0x4d   : > { %1623 = vmatprep.subr.bf16.mxu0 %v18823_v30  ;;  %1685 = vmatpush1.bf16.msra.mxu1 %v18845_v47 }
  0x4e   : > { %18259 = vmatmul.mubr.msk.bf16.gmra.mxu1 %vm743_vm1, %v18813_v31  ;;  %1686 = vmatprep.subr.bf16.mxu1 %v18853_v49 }
  0x4f   : > { %15132 = vmatmul.mubr.msk.bf16.gmra.mxu0 %vm743_vm1, %v18813_v31  ;;  %18262 = vmatprep.mubr.msk.bf16.mxu1 %vm20552_vm0, %v25946_v0 }
  0x50   : > { %1061 = vmatprep.mubr.bf16.mxu0 %v25948_v1  ;;  %1624 = vmatpush1.bf16.msra.mxu0 %v18821_v32 }
  0x51   : > { %1625 = vmatprep.subr.bf16.mxu0 %v18826_v33  ;;  %1687 = vmatpush1.bf16.msra.mxu1 %v18851_v51 }
  0x52   : > { %1688 = vmatprep.subr.bf16.mxu1 %v18859_v53  ;;  %v18890_v53 = vld [vmem:[%s25958_s21 + $0x2d8] ss:$12 sps:$4 sm:$0xff]  }
  0x54   : > { %1626 = vmatpush1.bf16.msra.mxu0 %v18824_v34 }
  0x55   : > { %1627 = vmatprep.subr.bf16.mxu0 %v18829_v35  ;;  %1689 = vmatpush1.bf16.msra.mxu1 %v18857_v55 }
  0x56   : > { %18263 = vmatmul.mubr.msk.bf16.gmra.mxu1 %vm743_vm1, %v18814_v36  ;;  %1690 = vmatprep.subr.bf16.mxu1 %v18865_v57  ;;  %v18892_v57 = vld [vmem:[%s25958_s21 + $0x380] ss:$12 sps:$4 sm:$0xff]  }
  0x57   : > { %15133 = vmatmul.mubr.msk.bf16.gmra.mxu0 %vm743_vm1, %v18814_v36  ;;  %1714 = vmatprep.mubr.bf16.mxu1 %v25948_v1 }
  0x58   : > { %1628 = vmatpush1.bf16.msra.mxu0 %v18827_v37 }
  0x59   : > { %1629 = vmatprep.subr.bf16.mxu0 %v18832_v38  ;;  %1691 = vmatpush1.bf16.msra.mxu1 %v18863_v59 }
  0x5a   : > { %1692 = vmatprep.subr.bf16.mxu1 %v18871_v61 }
  0x5c   : > { %1630 = vmatpush1.bf16.msra.mxu0 %v18830_v39 }
  0x5d   : > { %1631 = vmatprep.subr.bf16.mxu0 %v18835_v40  ;;  %1693 = vmatpush1.bf16.msra.mxu1 %v18869_v63  ;;  %v18894_v63 = vld [vmem:[%s25958_s21 + $0x458] ss:$12 sps:$4 sm:$0xff]  }
  0x5e   : > { %1694 = vmatprep.subr.bf16.mxu1 %v18877_v3  ;;  %v18895_v3 = vld [vmem:[%s25958_s21 + $0x368] ss:$12 sps:$4 sm:$0xff]  }
  0x60   : > { %1632 = vmatpush1.bf16.msra.mxu0 %v18833_v41 }
  0x61   : > { %1633 = vmatprep.subr.bf16.mxu0 %v18838_v42  ;;  %1695 = vmatpush1.bf16.msra.mxu1 %v18875_v5 }
  0x62   : > { %1696 = vmatprep.subr.bf16.mxu1 %v18883_v7 }
  0x64   : > { %1634 = vmatpush1.bf16.msra.mxu0 %v18836_v43 }
  0x65   : > { %1635 = vmatprep.subr.bf16.mxu0 %v18844_v44  ;;  %1697 = vmatpush1.bf16.msra.mxu1 %v18881_v9  ;;  %v18897_v9 = vld [vmem:[%s25958_s21 + $0x440] ss:$12 sps:$4 sm:$0xff]  }
  0x66   : > { %17606 = vmatprep.subr.bf16.mxu1 %v18887_v11 }
  0x68   : > { %1636 = vmatpush2.bf16.msra.mxu0 %v18842_v46  ;;  %v18888_v46 = vld [vmem:[%s25958_s21 + $0x2f0] ss:$12 sps:$4 sm:$0xff]  }
  0x69   : > { %1637 = vmatprep.subr.bf16.mxu0 %v18850_v48  ;;  %v18889_v48 = vld [vmem:[%s25958_s21 + $0x398] ss:$12 sps:$4 sm:$0xff]  }
  0x6c   : > { %1638 = vmatpush2.bf16.msra.mxu0 %v18848_v50 }
  0x6d   : > { %1639 = vmatprep.subr.bf16.mxu0 %v18856_v52 }
  0x70   : > { %1640 = vmatpush2.bf16.msra.mxu0 %v18854_v54  ;;  %v18891_v54 = vld [vmem:[%s25958_s21 + $0x470] ss:$12 sps:$4 sm:$0xff]  }
  0x71   : > { %1641 = vmatprep.subr.bf16.mxu0 %v18862_v56 }
  0x74   : > { %1642 = vmatpush2.bf16.msra.mxu0 %v18860_v58 }
  0x75   : > { %1643 = vmatprep.subr.bf16.mxu0 %v18868_v60 }
  0x78   : > { %1644 = vmatpush2.bf16.msra.mxu0 %v18866_v62  ;;  %v18893_v62 = vld [vmem:[%s25958_s21 + $0x2c0] ss:$12 sps:$4 sm:$0xff]  }
  0x79   : > { %1645 = vmatprep.subr.bf16.mxu0 %v18874_v2 }
  0x7c   : > { %1646 = vmatpush2.bf16.msra.mxu0 %v18872_v4 }
  0x7d   : > { %1647 = vmatprep.subr.bf16.mxu0 %v18880_v6 }
  0x80   : > { %1648 = vmatpush2.bf16.msra.mxu0 %v18878_v8  ;;  %v18896_v8 = vld [vmem:[%s25958_s21 + $0x2a8] ss:$12 sps:$4 sm:$0xff]  }
  0x81   : > { %1649 = vmatprep.subr.bf16.mxu0 %v18886_v10 }
  0x84   : > { %1650 = vmatpush2.bf16.msra.mxu0 %v18884_v12 }
  0x85   : > { %18266 = vmatprep.subr.bf16.mxu0 %v25946_v0 }
  0xee   : > { %v850_v13 = vpop.f32.mrf.mxu1 }
  0xef   : > { %v787_v14 = vpop.f32.mrf.mxu0 }
  0xf0   : > { %v18232_v15 = vpop.f32.mrf.mxu1 }
  0xf1   : > { %v20899_v16 = vpop.f32.mrf.mxu0 }
  0xf2   : > { %v853_v17 = vpop.f32.mrf.mxu1 }
  0xf3   : > { %v20901_v18 = vpack.c.bf16 %v853_v17, %v850_v13  ;;  %v791_v19 = vpop.f32.mrf.mxu0 }
  0xf4   : > { %v20903_v20 = vpack.c.bf16 %v791_v19, %v787_v14  ;;  %v18233_v21 = vpop.f32.mrf.mxu1  ;;  %v18898_v14 = vld [vmem:[%s25958_s21 + $0x350] ss:$12 sps:$4 sm:$0xff]  }
  0xf5   : > { %v20905_v22 = vpop.f32.mrf.mxu0  ;;  %v18899_v19 = vld [vmem:[%s25958_s21 + $0x290] ss:$12 sps:$4 sm:$0xff]   ;;  %v18900_v21 = vld [vmem:[%s25958_s21 + $0x428] ss:$12 sps:$4 sm:$0xff]  }
  0xf6   : > { %v858_v23 = vpop.f32.mrf.mxu1 }
  0xf7   : > { %v797_v24 = vpop.f32.mrf.mxu0 }
  0xf8   : > { %v18236_v25 = vpop.f32.mrf.mxu1 }
  0xf9   : > { %v20907_v26 = vpop.f32.mrf.mxu0 }
  0xfa   : > { %v861_v27 = vpop.f32.mrf.mxu1 }
  0xfb   : > { %v20909_v28 = vpack.c.bf16 %v861_v27, %v858_v23  ;;  %v801_v29 = vpop.f32.mrf.mxu0 }
  0xfc   : > { %v20911_v30 = vpack.c.bf16 %v801_v29, %v797_v24  ;;  %v18237_v31 = vpop.f32.mrf.mxu1  ;;  %v18901_v24 = vld [vmem:[%s25958_s21 + $0x338] ss:$12 sps:$4 sm:$0xff]  }
  0xfd   : > { %v20913_v32 = vpop.f32.mrf.mxu0 }
  0xfe   : > { %v866_v33 = vpop.f32.mrf.mxu1 }
  0xff   : > { %v807_v34 = vpop.f32.mrf.mxu0 }
 0x100   : > { %v18240_v35 = vpop.f32.mrf.mxu1 }
 0x101   : > { %v20915_v36 = vpop.f32.mrf.mxu0 }
 0x102   : > { %v869_v37 = vpop.f32.mrf.mxu1 }
 0x103   : > { %v20917_v38 = vpack.c.bf16 %v869_v37, %v866_v33  ;;  %v811_v39 = vpop.f32.mrf.mxu0  ;;  %v18902_v33 = vld [vmem:[%s25958_s21 + $0x278] ss:$12 sps:$4 sm:$0xff]  }
 0x104   : > { %v20919_v40 = vpack.c.bf16 %v811_v39, %v807_v34  ;;  %v18241_v41 = vpop.f32.mrf.mxu1  ;;  %v18903_v34 = vld [vmem:[%s25958_s21 + $0x410] ss:$12 sps:$4 sm:$0xff]  }
 0x105   : > { %v20921_v42 = vpop.f32.mrf.mxu0  ;;  %v18904_v41 = vld [vmem:[%s25958_s21 + $0x320] ss:$12 sps:$4 sm:$0xff]  }
 0x106   : > { %v1106_v43 = vpop.f32.mrf.mxu1 }
 0x107   : > { %v1043_v44 = vpop.f32.mrf.mxu0 }
 0x108   : > { %v18256_v45 = vpop.f32.mrf.mxu1 }
 0x109   : > { %v1045_v47 = vpop.f32.mrf.mxu0  ;;  %v18907_v45 = vld [vmem:[%s25958_s21 + $0x308] ss:$12 sps:$4 sm:$0xff]  }
 0x10a   : > { %v1109_v49 = vpop.f32.mrf.mxu1 }
 0x10b   : > { %v20929_v50 = vpack.c.bf16 %v1109_v49, %v1106_v43  ;;  %v1047_v51 = vpop.f32.mrf.mxu0  ;;  %v18905_v43 = vld [vmem:[%s25958_s21 + $0x260] ss:$12 sps:$4 sm:$0xff]   ;;  %v18910_v49 = vld [vmem:[%s25958_s21 + $0xa8] ss:$12 sps:$4 sm:$0xff]  }
 0x10c   : > { %v18257_v52 = vpop.f32.mrf.mxu1  ;;  %v20937_v55 = vpack.c.bf16 %v1047_v51, %v1043_v44  ;;  %v18906_v44 = vld [vmem:[%s25958_s21 + $0x3f8] ss:$12 sps:$4 sm:$0xff]   ;;  %v18913_v51 = vld [vmem:[%s25958_s21 + $0x3c8] ss:$12 sps:$4 sm:$0xff]  }
 0x10d   : > { %v1049_v56 = vpop.f32.mrf.mxu0  ;;  %1715 = vmatmul.mubr.bf16.vlgmr.msra.gmra.mxu1 %v20929_v50  ;;  %v18916_v52 = vld [vmem:[%s25958_s21 + $0x94] ss:$12 sps:$4 sm:$0xff]  }
 0x10e   : > { %v20943_v58 = vpack.c.bf16 %v1049_v56, %v1045_v47  ;;  %17607 = vmatpush3.bf16.msra.mxu1 %v18888_v46  ;;  %v1114_v59 = vpop.f32.mrf.mxu1  ;;  %1724 = vmatprep.mubr.bf16.mxu1 %v25948_v1  ;;  %v18908_v46 = vld [vmem:[%s25958_s21 + $0x248] ss:$12 sps:$4 sm:$0xff]   ;;  %v18909_v47 = vld [vmem:[%s25958_s21 + $0x3e0] ss:$12 sps:$4 sm:$0xff]  }
 0x10f   : > { %v1053_v60 = vpop.f32.mrf.mxu0  ;;  %17608 = vmatprep.subr.bf16.mxu1 %v18889_v48  ;;  %v18912_v48 = vld [vmem:[%s25958_s21 + $0xac] ss:$12 sps:$4 sm:$0xff]   ;;  %v18917_v56 = vld [vmem:[%s25958_s21 + $0x228] ss:$12 sps:$4 sm:$0xff]  }
 0x110   : > { %v18260_v61 = vpop.f32.mrf.mxu1  ;;  %1651 = vmatprep.mubr.bf16.mxu0 %v20943_v58 }
 0x111   : > { %v1055_v2 = vpop.f32.mrf.mxu0  ;;  %1652 = vmatmul.mubr.bf16.vlgmr.msra.gmra.mxu0 %v20937_v55  ;;  %v18931_v61 = vld [vmem:[%s25958_s21 + $0x1fc] ss:$12 sps:$4 sm:$0xff]  }
 0x112   : > { %17609 = vmatpush3.bf16.msra.mxu1 %v18890_v53  ;;  %18267 = vmatpush3.bf16.msra.mxu0 %v18891_v54  ;;  %v1117_v4 = vpop.f32.mrf.mxu1  ;;  %v18919_v53 = vld [vmem:[%s25958_s21 + $0x22c] ss:$12 sps:$4 sm:$0xff]   ;;  %v18914_v54 = vld [vmem:[%s25958_s21 + $0x90] ss:$12 sps:$4 sm:$0xff]  }
 0x113   : > { %v20957_v5 = vpack.c.bf16 %v1117_v4, %v1114_v59  ;;  %v1057_v6 = vpop.f32.mrf.mxu0  ;;  %17610 = vmatprep.subr.bf16.mxu1 %v18892_v57  ;;  %18268 = vmatprep.subr.bf16.mxu0 %v25946_v0  ;;  %v18922_v57 = vld [vmem:[%s25958_s21 + $0x7c] ss:$12 sps:$4 sm:$0xff]   ;;  %v18920_v59 = vld [vmem:[%s25958_s21 + $0x78] ss:$12 sps:$4 sm:$0xff]   ;;  %v18935_v4 = vld [vmem:[%s25958_s21 + $0x1e0] ss:$12 sps:$4 sm:$0xff]  }
 0x114   : > { %v18261_v7 = vpop.f32.mrf.mxu1  ;;  %v20966_v10 = vpack.c.bf16 %v1057_v6, %v1053_v60  ;;  %v18928_v60 = vld [vmem:[%s25958_s21 + $0x64] ss:$12 sps:$4 sm:$0xff]   ;;  %v18940_v6 = vld [vmem:[%s25958_s21 + $0x34] ss:$12 sps:$4 sm:$0xff]  }
 0x115   : > { %v1059_v11 = vpop.f32.mrf.mxu0  ;;  %1725 = vmatmul.mubr.bf16.gmra.mxu1 %v20957_v5  ;;  %v18943_v7 = vld [vmem:[%s25958_s21 + $0x1cc] ss:$12 sps:$4 sm:$0xff]  }
 0x116   : > { %v20969_v12 = vpack.c.bf16 %v1059_v11, %v1055_v2  ;;  %17611 = vmatpush3.bf16.msra.mxu1 %v18893_v62  ;;  %18269 = vmatpush3.bf16.msra.mxu0 %v18894_v63  ;;  %v1122_v13 = vpop.f32.mrf.mxu1  ;;  %v18926_v62 = vld [vmem:[%s25958_s21 + $0x60] ss:$12 sps:$4 sm:$0xff]   ;;  %v18937_v2 = vld [vmem:[%s25958_s21 + $0x1e4] ss:$12 sps:$4 sm:$0xff]  }
 0x117   : > { %v1063_v15 = vpop.f32.mrf.mxu0  ;;  %17612 = vmatprep.subr.bf16.mxu1 %v18895_v3  ;;  %18270 = vmatprep.subr.bf16.mxu0 %v25946_v0  ;;  %v18934_v63 = vld [vmem:[%s25958_s21 + $0x4c] ss:$12 sps:$4 sm:$0xff]   ;;  %v18932_v3 = vld [vmem:[%s25958_s21 + $0x48] ss:$12 sps:$4 sm:$0xff]   ;;  %v18947_v11 = vld [vmem:[%s25958_s21 + $0x1b0] ss:$12 sps:$4 sm:$0xff]  }
 0x118   : > { %v18264_v17 = vpop.f32.mrf.mxu1  ;;  %1661 = vmatprep.mubr.bf16.mxu0 %v20969_v12  ;;  %1734 = vmatprep.mubr.bf16.mxu1 %v25948_v1 }
 0x119   : > { %v1065_v23 = vpop.f32.mrf.mxu0  ;;  %1662 = vmatmul.mubr.bf16.gmra.mxu0 %v20966_v10  ;;  %v18958_v17 = vld [vmem:[%s25958_s21 + $0x16c] ss:$12 sps:$4 sm:$0xff]  }
 0x11a   : > { %17613 = vmatpush3.bf16.msra.mxu1 %v18896_v8  ;;  %18271 = vmatpush3.bf16.msra.mxu0 %v18897_v9  ;;  %v1125_v25 = vpop.f32.mrf.mxu1  ;;  %v21097_v8 = vpack.c.bf16 %v20905_v22, %v20899_v16  ;;  %v18941_v9 = vld [vmem:[%s25958_s21 + $0x1c8] ss:$12 sps:$4 sm:$0xff]   ;;  %v18944_v22 = vld [vmem:[%s25958_s21 + $0x18] ss:$12 sps:$4 sm:$0xff]  }
 0x11b   : > { %v20987_v27 = vpack.c.bf16 %v1125_v25, %v1122_v13  ;;  %v1067_v29 = vpop.f32.mrf.mxu0  ;;  %17614 = vmatprep.subr.bf16.mxu1 %v18898_v14  ;;  %18272 = vmatprep.subr.bf16.mxu0 %v25946_v0  ;;  %v18949_v16 = vld [vmem:[%s25958_s21 + $0x1b4] ss:$12 sps:$4 sm:$0xff]   ;;  %v18955_v13 = vld [vmem:[%s25958_s21 + $0x19c] ss:$12 sps:$4 sm:$0xff]  }
 0x11c   : > { %v18265_v31 = vpop.f32.mrf.mxu1  ;;  %v20996_v35 = vpack.c.bf16 %v1067_v29, %v1063_v15  ;;  %v18950_v14 = vld [vmem:[%s25958_s21] ss:$12 sps:$4 sm:$0xff]   ;;  %v18953_v15 = vld [vmem:[%s25958_s21 + $0x198] ss:$12 sps:$4 sm:$0xff]   ;;  %v18965_v25 = vld [vmem:[%s25958_s21 + $0x170] ss:$12 sps:$4 sm:$0xff]  }
 0x11d   : > { %v1069_v37 = vpop.f32.mrf.mxu0  ;;  %1735 = vmatmul.mubr.bf16.gmra.mxu1 %v20987_v27  ;;  %v18966_v29 = vld [vmem:[%s25958_s21 + $0xb0] ss:$12 sps:$4 sm:$0xff]  }
 0x11e   : > { %v1136_v39 = vpack.c.bf16 %v1069_v37, %v1065_v23  ;;  %17615 = vmatpush3.bf16.msra.mxu1 %v18899_v19  ;;  %18273 = vmatpush3.bf16.msra.mxu0 %v18900_v21  ;;  %v18961_v19 = vld [vmem:[%s25958_s21 + $0x184] ss:$12 sps:$4 sm:$0xff]   ;;  %v18956_v21 = vld [vmem:[%s25958_s21 + $0x168] ss:$12 sps:$4 sm:$0xff]   ;;  %v18959_v23 = vld [vmem:[%s25958_s21 + $0x180] ss:$12 sps:$4 sm:$0xff]  }
 0x11f   : > { %17616 = vmatprep.subr.bf16.mxu1 %v18901_v24  ;;  %18274 = vmatprep.subr.bf16.mxu0 %v25946_v0  ;;  %v18964_v24 = vld [vmem:[%s25958_s21 + $0x154] ss:$12 sps:$4 sm:$0xff]   ;;  %v18969_v31 = vld [vmem:[%s25958_s21 + $0x13c] ss:$12 sps:$4 sm:$0xff]   ;;  %v18974_v37 = vld [vmem:[%s25958_s21 + $0x124] ss:$12 sps:$4 sm:$0xff]  }
 0x120   : > { %1671 = vmatprep.mubr.bf16.mxu0 %v1136_v39  ;;  %1777 = vmatprep.mubr.bf16.mxu1 %v20943_v58  ;;  %v18925_v58 = vld [vmem:[%s25958_s21 + $0x214] ss:$12 sps:$4 sm:$0xff]  }
 0x121   : > { %1672 = vmatmul.mubr.bf16.gmra.mxu0 %v20996_v35 }
 0x122   : > { %17617 = vmatpush3.bf16.msra.mxu1 %v18902_v33  ;;  %18275 = vmatpush3.bf16.msra.mxu0 %v18903_v34  ;;  %v18970_v33 = vld [vmem:[%s25958_s21 + $0x158] ss:$12 sps:$4 sm:$0xff]  }
 0x123   : > { %17618 = vmatprep.subr.bf16.mxu1 %v18904_v41  ;;  %18276 = vmatprep.subr.bf16.mxu0 %v25946_v0  ;;  %v18967_v34 = vld [vmem:[%s25958_s21 + $0x138] ss:$12 sps:$4 sm:$0xff]   ;;  %v18972_v41 = vld [vmem:[%s25958_s21 + $0x120] ss:$12 sps:$4 sm:$0xff]  }
 0x124   : > { %18282 = vmatprep.mubr.msk.bf16.mxu0 %vm20552_vm0, %v25946_v0 }
 0x126   : > { %17619 = vmatpush3.bf16.msra.mxu1 %v18905_v43  ;;  %18277 = vmatpush3.bf16.msra.mxu0 %v18906_v44  ;;  %v18976_v43 = vld [vmem:[%s25958_s21 + $0x80] ss:$12 sps:$4 sm:$0xff]  }
 0x127   : > { %17620 = vmatprep.subr.bf16.mxu1 %v18907_v45  ;;  %18278 = vmatprep.subr.bf16.mxu0 %v25946_v0  ;;  %v18979_v44 = vld [vmem:[%s25958_s21 + $0x10c] ss:$12 sps:$4 sm:$0xff]   ;;  %v18980_v45 = vld [vmem:[%s25958_s21 + $0x128] ss:$12 sps:$4 sm:$0xff]  }
 0x12a   : > { %17621 = vmatpush3.bf16.msra.mxu1 %v18908_v46  ;;  %18279 = vmatpush3.bf16.msra.mxu0 %v18909_v47  ;;  %v18977_v46 = vld [vmem:[%s25958_s21 + $0x108] ss:$12 sps:$4 sm:$0xff]  }
 0x12b   : > { %18280 = vmatprep.subr.bf16.mxu0 %v25946_v0  ;;  %2243 = vmatprep.subr.bf16.mxu1 %v18912_v48  ;;  %v18981_v47 = vld [vmem:[%s25958_s21 + $0x68] ss:$12 sps:$4 sm:$0xff]  }
 0x12c   : > { %v18984_v48 = vld [vmem:[%s25958_s21 + $0xf4] ss:$12 sps:$4 sm:$0xff]  }
 0x12d   : > { %1778 = vmatmul.mubr.bf16.vlgmr.msra.gmra.mxu1 %v20937_v55  ;;  %v18923_v55 = vld [vmem:[%s25958_s21 + $0x210] ss:$12 sps:$4 sm:$0xff]  }
 0x12e   : > { %18281 = vmatpush3.bf16.msra.mxu0 %v18913_v51  ;;  %2244 = vmatpush1.bf16.msra.mxu1 %v18910_v49  ;;  %v18985_v49 = vld [vmem:[%s25958_s21 + $0x110] ss:$12 sps:$4 sm:$0xff]  }
 0x12f   : > { %2245 = vmatprep.subr.bf16.mxu1 %v18916_v52  ;;  %2306 = vmatprep.subr.bf16.mxu0 %v18919_v53  ;;  %v18982_v51 = vld [vmem:[%s25958_s21 + $0xf0] ss:$12 sps:$4 sm:$0xff]  }
 0x130   : > { %1785 = vmatprep.mubr.bf16.mxu1 %v20969_v12  ;;  %v18952_v12 = vld [vmem:[%s25958_s21 + $0x4] ss:$12 sps:$4 sm:$0xff]   ;;  %v18989_v53 = vld [vmem:[%s25958_s21 + $0xdc] ss:$12 sps:$4 sm:$0xff]  }
 0x131   : > { %18283 = vmatmul.mubr.bf16.vlgmr.msra.gmra.mxu0 %v20929_v50  ;;  %v18929_v50 = vld [vmem:[%s25958_s21 + $0x1f8] ss:$12 sps:$4 sm:$0xff]   ;;  %v18986_v52 = vld [vmem:[%s25958_s21 + $0x50] ss:$12 sps:$4 sm:$0xff]  }
 0x132   : > { %2246 = vmatpush1.bf16.msra.mxu1 %v18914_v54  ;;  %2307 = vmatpush1.bf16.msra.mxu0 %v18917_v56  ;;  %v18990_v54 = vld [vmem:[%s25958_s21 + $0xf8] ss:$12 sps:$4 sm:$0xff]  }
 0x133   : > { %2247 = vmatprep.subr.bf16.mxu1 %v18922_v57  ;;  %2308 = vmatprep.subr.bf16.mxu0 %v18925_v58  ;;  %v18987_v56 = vld [vmem:[%s25958_s21 + $0xd8] ss:$12 sps:$4 sm:$0xff]  }
 0x134   : > { %18286 = vmatprep.mubr.msk.bf16.mxu0 %vm20552_vm0, %v25946_v0  ;;  %v18991_v57 = vld [vmem:[%s25958_s21 + $0x38] ss:$12 sps:$4 sm:$0xff]  }
 0x135   : > { %1786 = vmatmul.mubr.bf16.gmra.mxu1 %v20966_v10  ;;  %v18946_v10 = vld [vmem:[%s25958_s21 + $0x1c] ss:$12 sps:$4 sm:$0xff]   ;;  %v18994_v58 = vld [vmem:[%s25958_s21 + $0xc4] ss:$12 sps:$4 sm:$0xff]  }
 0x136   : > { %2248 = vmatpush1.bf16.msra.mxu1 %v18920_v59  ;;  %2309 = vmatpush1.bf16.msra.mxu0 %v18923_v55  ;;  %v18995_v59 = vld [vmem:[%s25958_s21 + $0xe0] ss:$12 sps:$4 sm:$0xff]  }
 0x137   : > { %2249 = vmatprep.subr.bf16.mxu1 %v18928_v60  ;;  %2310 = vmatprep.subr.bf16.mxu0 %v18931_v61  ;;  %v18992_v55 = vld [vmem:[%s25958_s21 + $0xc0] ss:$12 sps:$4 sm:$0xff]   ;;  %v18997_v61 = vld [vmem:[%s25958_s21 + $0xc8] ss:$12 sps:$4 sm:$0xff]  }
 0x138   : > { %1793 = vmatprep.mubr.bf16.mxu1 %v1136_v39  ;;  %v18975_v39 = vld [vmem:[%s25958_s21 + $0x140] ss:$12 sps:$4 sm:$0xff]  }
 0x139   : > { %18287 = vmatmul.mubr.bf16.gmra.mxu0 %v20957_v5  ;;  %v18938_v5 = vld [vmem:[%s25958_s21 + $0x30] ss:$12 sps:$4 sm:$0xff]   ;;  %v18996_v60 = vld [vmem:[%s25958_s21 + $0x20] ss:$12 sps:$4 sm:$0xff]  }
 0x13a   : > { %2250 = vmatpush1.bf16.msra.mxu1 %v18926_v62  ;;  %2311 = vmatpush1.bf16.msra.mxu0 %v18929_v50  ;;  %v18999_v62 = vld [vmem:[%s25958_s21 + $0x230] ss:$12 sps:$4 sm:$0xff]   ;;  %v18998_v50 = vld [vmem:[%s25958_s21 + $0x8] ss:$12 sps:$4 sm:$0xff]  }
 0x13b   : > { %2251 = vmatprep.subr.bf16.mxu1 %v18934_v63  ;;  %2312 = vmatprep.subr.bf16.mxu0 %v18937_v2  ;;  %v877_v63 = vpack.c.bf16 %v20913_v32, %v20907_v26  ;;  %v19000_v2 = vld [vmem:[%s25958_s21 + $0x218] ss:$12 sps:$4 sm:$0xff]   ;;  %v19001_v26 = vld [vmem:[%s25958_s21 + $0x200] ss:$12 sps:$4 sm:$0xff]  }
 0x13c   : > { %18290 = vmatprep.mubr.msk.bf16.mxu0 %vm20552_vm0, %v25946_v0  ;;  %v20508_v32 = vld [vmem:[%s20674_s2 + $0x78] ss:$12 sps:$4 sm:$0xff]  }
 0x13d   : > { %1794 = vmatmul.mubr.bf16.gmra.mxu1 %v20996_v35  ;;  %v18971_v35 = vld [vmem:[%s25958_s21 + $0x98] ss:$12 sps:$4 sm:$0xff]  }
 0x13e   : > { %2252 = vmatpush1.bf16.msra.mxu1 %v18932_v3  ;;  %2275 = vmatprep.mubr.bf16.mxu1 %v21097_v8  ;;  %v20507_v3 = vld [vmem:[%s20674_s2 + $0x7c] ss:$12 sps:$4 sm:$0xff]  }
 0x13f   : > { %2313 = vmatpush1.bf16.msra.mxu0 %v18935_v4  ;;  %2253 = vmatprep.subr.bf16.mxu1 %v18940_v6  ;;  %v880_v4 = vpack.c.bf16 %v20921_v42, %v20915_v36  ;;  %v20509_v6 = vld [vmem:[%s20674_s2 + $0x64] ss:$12 sps:$4 sm:$0xff]   ;;  %v20511_v36 = vld [vmem:[%s20674_s2 + $0x4c] ss:$12 sps:$4 sm:$0xff]  }
 0x140   : > { %2314 = vmatprep.subr.bf16.mxu0 %v18943_v7  ;;  %v19002_v7 = vld [vmem:[%s25958_s21 + $0x1e8] ss:$12 sps:$4 sm:$0xff]   ;;  %v19003_v42 = vld [vmem:[%s25958_s21 + $0x1d0] ss:$12 sps:$4 sm:$0xff]  }
 0x141   : > { %18291 = vmatmul.mubr.bf16.gmra.mxu0 %v20987_v27  ;;  %v18962_v27 = vld [vmem:[%s25958_s21 + $0x150] ss:$12 sps:$4 sm:$0xff]  }
 0x142   : > { %2254 = vmatpush1.bf16.msra.mxu1 %v18938_v5  ;;  %2338 = vmatprep.mubr.bf16.mxu0 %v25948_v1  ;;  %v20513_v5 = vld [vmem:[%s20674_s2 + $0x34] ss:$12 sps:$4 sm:$0xff]  }
 0x143   : > { %2315 = vmatpush1.bf16.msra.mxu0 %v18941_v9  ;;  %2255 = vmatprep.subr.bf16.mxu1 %v18946_v10  ;;  %v19004_v9 = vld [vmem:[%s25958_s21 + $0x1b8] ss:$12 sps:$4 sm:$0xff]   ;;  %v20515_v10 = vld [vmem:[%s20674_s2 + $0x1c] ss:$12 sps:$4 sm:$0xff]  }
 0x144   : > { %2316 = vmatprep.subr.bf16.mxu0 %v18949_v16  ;;  %v19005_v16 = vld [vmem:[%s25958_s21 + $0x1a0] ss:$12 sps:$4 sm:$0xff]  }
 0x146   : > { %2256 = vmatpush1.bf16.msra.mxu1 %v18944_v22  ;;  %v20516_v22 = vld [vmem:[%s20674_s2 + $0x18] ss:$12 sps:$4 sm:$0xff]  }
 0x147   : > { %2317 = vmatpush1.bf16.msra.mxu0 %v18947_v11  ;;  %2257 = vmatprep.subr.bf16.mxu1 %v18952_v12  ;;  %v20517_v11 = vld [vmem:[%s20674_s2 + $0x4] ss:$12 sps:$4 sm:$0xff]  }
 0x148   : > { %2318 = vmatprep.subr.bf16.mxu0 %v18955_v13  ;;  %v19006_v12 = vld [vmem:[%s25957_s25 + $0x30] sm:$0xff]  }
 0x149   : > { %v19007_v13 = vld [vmem:[%s25958_s21 + $0x188] ss:$12 sps:$4 sm:$0xff]  }
 0x14a   : > { %2258 = vmatpush1.bf16.msra.mxu1 %v18950_v14  ;;  %v19008_v14 = vld [vmem:[%s25957_s25 + $0x38] sm:$0xff]  }
 0x14b   : > { %2319 = vmatpush1.bf16.msra.mxu0 %v18953_v15  ;;  %2259 = vmatprep.subr.bf16.mxu1 %v18958_v17  ;;  %v20519_v15 = vld [vmem:[%s20674_s2 + $0x80] ss:$12 sps:$4 sm:$0xff]  }
 0x14c   : > { %2320 = vmatprep.subr.bf16.mxu0 %v18961_v19  ;;  %v19012_v17 = vld [vmem:[%s25958_s21 + $0x52c] ss:$12 sps:$4 sm:$0xff]   ;;  %v20520_v19 = vld [vmem:[%s20674_s2 + $0x68] ss:$12 sps:$4 sm:$0xff]  }
 0x14e   : > { %2260 = vmatpush2.bf16.msra.mxu1 %v18956_v21  ;;  %v19009_v21 = vld [vmem:[%s25957_s25 + $0x40] sm:$0xff]  }
 0x14f   : > { %2321 = vmatpush1.bf16.msra.mxu0 %v18959_v23  ;;  %2261 = vmatprep.subr.bf16.mxu1 %v18964_v24  ;;  %v19015_v23 = vld [vmem:[%s25958_s21 + $0x514] ss:$12 sps:$4 sm:$0xff]   ;;  %v20521_v24 = vld [vmem:[%s20674_s2 + $0x50] ss:$12 sps:$4 sm:$0xff]  }
 0x150   : > { %17651 = vmatprep.subr.bf16.mxu0 %v18965_v25  ;;  %v19013_v25 = vld [vmem:[%s25958_s21 + $0x510] ss:$12 sps:$4 sm:$0xff]  }
 0x152   : > { %2339 = vmatmul.mubr.bf16.vlgmr.msra.gmra.mxu0 %v20901_v18  ;;  %2262 = vmatpush2.bf16.msra.mxu1 %v18962_v27  ;;  %v20522_v27 = vld [vmem:[%s20674_s2 + $0x38] ss:$12 sps:$4 sm:$0xff]  }
 0x153   : > { %17652 = vmatpush3.bf16.msra.mxu0 %v18966_v29  ;;  %2263 = vmatprep.subr.bf16.mxu1 %v18969_v31  ;;  %v19016_v29 = vld [vmem:[%s25958_s21 + $0x4f8] ss:$12 sps:$4 sm:$0xff]  }
 0x154   : > { %17653 = vmatprep.subr.bf16.mxu0 %v18970_v33  ;;  %2348 = vmatprep.mubr.bf16.mxu0 %v25948_v1  ;;  %v19021_v31 = vld [vmem:[%s25958_s21 + $0x4e4] ss:$12 sps:$4 sm:$0xff]   ;;  %v20523_v33 = vld [vmem:[%s20674_s2 + $0x20] ss:$12 sps:$4 sm:$0xff]  }
 0x156   : > { %2264 = vmatpush2.bf16.msra.mxu1 %v18967_v34  ;;  %v19019_v34 = vld [vmem:[%s25958_s21 + $0x4e0] ss:$12 sps:$4 sm:$0xff]  }
 0x157   : > { %17654 = vmatpush3.bf16.msra.mxu0 %v18971_v35  ;;  %2265 = vmatprep.subr.bf16.mxu1 %v18974_v37  ;;  %v20524_v35 = vld [vmem:[%s20674_s2 + $0x8] ss:$12 sps:$4 sm:$0xff]  }
 0x158   : > { %17655 = vmatprep.subr.bf16.mxu0 %v18975_v39  ;;  %v19022_v37 = vld [vmem:[%s25958_s21 + $0x4c8] ss:$12 sps:$4 sm:$0xff]  }
 0x159   : > { %v19027_v39 = vld [vmem:[%s25958_s21 + $0x4b4] ss:$12 sps:$4 sm:$0xff]  }
 0x15a   : > { %2349 = vmatmul.mubr.bf16.gmra.mxu0 %v20909_v28  ;;  %2266 = vmatpush2.bf16.msra.mxu1 %v18972_v41  ;;  %v19025_v41 = vld [vmem:[%s25958_s21 + $0x4b0] ss:$12 sps:$4 sm:$0xff]  }
 0x15b   : > { %17656 = vmatpush3.bf16.msra.mxu0 %v18976_v43  ;;  %2267 = vmatprep.subr.bf16.mxu1 %v18979_v44  ;;  %v19028_v43 = vld [vmem:[%s25958_s21 + $0x498] ss:$12 sps:$4 sm:$0xff]   ;;  %v19030_v44 = vld [vmem:[%s25958_s21 + $0x49c] ss:$12 sps:$4 sm:$0xff]  }
 0x15c   : > { %17657 = vmatprep.subr.bf16.mxu0 %v18980_v45  ;;  %2358 = vmatprep.mubr.bf16.mxu0 %v25948_v1  ;;  %v19033_v45 = vld [vmem:[%s25958_s21 + $0x484] ss:$12 sps:$4 sm:$0xff]  }
 0x15e   : > { %2268 = vmatpush2.bf16.msra.mxu1 %v18977_v46  ;;  %v19031_v46 = vld [vmem:[%s25958_s21 + $0x480] ss:$12 sps:$4 sm:$0xff]  }
 0x15f   : > { %17658 = vmatpush3.bf16.msra.mxu0 %v18981_v47  ;;  %2269 = vmatprep.subr.bf16.mxu1 %v18984_v48  ;;  %v19036_v47 = vld [vmem:[%s25958_s21 + $0x5ec] ss:$12 sps:$4 sm:$0xff]   ;;  %v19034_v48 = vld [vmem:[%s25958_s21 + $0x5e8] ss:$12 sps:$4 sm:$0xff]  }
 0x160   : > { %17659 = vmatprep.subr.bf16.mxu0 %v18985_v49  ;;  %v19039_v49 = vld [vmem:[%s25958_s21 + $0x5d4] ss:$12 sps:$4 sm:$0xff]  }
 0x162   : > { %2359 = vmatmul.mubr.bf16.gmra.mxu0 %v20917_v38  ;;  %2270 = vmatpush2.bf16.msra.mxu1 %v18982_v51  ;;  %v19037_v51 = vld [vmem:[%s25958_s21 + $0x5d0] ss:$12 sps:$4 sm:$0xff]  }
 0x163   : > { %17660 = vmatpush3.bf16.msra.mxu0 %v18986_v52  ;;  %2401 = vmatprep.mubr.bf16.mxu0 %v21097_v8  ;;  %v20512_v8 = vld [vmem:[%s20674_s2 + $0x48] ss:$12 sps:$4 sm:$0xff]  }
 0x164   : > { %2271 = vmatprep.subr.bf16.mxu1 %v18989_v53  ;;  %17661 = vmatprep.subr.bf16.mxu0 %v18990_v54  ;;  %v19042_v52 = vld [vmem:[%s25958_s21 + $0x5bc] ss:$12 sps:$4 sm:$0xff]   ;;  %v19040_v53 = vld [vmem:[%s25958_s21 + $0x5b8] ss:$12 sps:$4 sm:$0xff]  }
 0x165   : > { %v19045_v54 = vld [vmem:[%s25958_s21 + $0x5a4] ss:$12 sps:$4 sm:$0xff]  }
 0x166   : > { %2272 = vmatpush2.bf16.msra.mxu1 %v18987_v56  ;;  %v19043_v56 = vld [vmem:[%s25958_s21 + $0x5a0] ss:$12 sps:$4 sm:$0xff]  }
 0x167   : > { %17662 = vmatpush3.bf16.msra.mxu0 %v18991_v57  ;;  %2273 = vmatprep.subr.bf16.mxu1 %v18994_v58  ;;  %v19048_v57 = vld [vmem:[%s25958_s21 + $0x58c] ss:$12 sps:$4 sm:$0xff]   ;;  %v19046_v58 = vld [vmem:[%s25958_s21 + $0x588] ss:$12 sps:$4 sm:$0xff]  }
 0x168   : > { %17663 = vmatprep.subr.bf16.mxu0 %v18995_v59  ;;  %v19051_v59 = vld [vmem:[%s25958_s21 + $0x574] ss:$12 sps:$4 sm:$0xff]  }
 0x16a   : > { %2274 = vmatpush2.bf16.msra.mxu1 %v18992_v55  ;;  %v19049_v55 = vld [vmem:[%s25958_s21 + $0x570] ss:$12 sps:$4 sm:$0xff]  }
 0x16b   : > { %17664 = vmatpush3.bf16.msra.mxu0 %v18996_v60  ;;  %18294 = vmatprep.subr.bf16.mxu1 %v25946_v0  ;;  %v19054_v60 = vld [vmem:[%s25958_s21 + $0x55c] ss:$12 sps:$4 sm:$0xff]  }
 0x16c   : > { %17665 = vmatprep.subr.bf16.mxu0 %v18997_v61  ;;  %v19052_v61 = vld [vmem:[%s25958_s21 + $0x558] ss:$12 sps:$4 sm:$0xff]  }
 0x16d   : > { %2276 = vmatmul.mubr.bf16.vlgmr.msra.gmra.mxu1 %v20903_v20 }
 0x16e   : > { %2285 = vmatprep.mubr.bf16.mxu1 %v877_v63  ;;  %18295 = vmatpush3.bf16.msra.mxu1 %v18999_v62  ;;  %v19057_v62 = vld [vmem:[%s25958_s21 + $0x6ac] ss:$12 sps:$4 sm:$0xff]  }
 0x16f   : > { %17666 = vmatpush3.bf16.msra.mxu0 %v18998_v50  ;;  %18296 = vmatprep.subr.bf16.mxu1 %v25946_v0  ;;  %v19055_v50 = vld [vmem:[%s25958_s21 + $0x6a8] ss:$12 sps:$4 sm:$0xff]  }
 0x170   : > { %2518 = vmatprep.subr.bf16.mxu0 %v20507_v3  ;;  %v19058_v3 = vld [vmem:[%s25958_s21 + $0x540] ss:$12 sps:$4 sm:$0xff]  }
 0x172   : > { %2402 = vmatmul.mubr.bf16.vlgmr.msra.gmra.mxu0 %v20903_v20  ;;  %18297 = vmatpush3.bf16.msra.mxu1 %v19000_v2  ;;  %v20510_v20 = vld [vmem:[%s20674_s2 + $0x60] ss:$12 sps:$4 sm:$0xff]   ;;  %v19060_v2 = vld [vmem:[%s25958_s21 + $0x544] ss:$12 sps:$4 sm:$0xff]  }
 0x173   : > { %2409 = vmatprep.mubr.bf16.mxu0 %v877_v63  ;;  %2519 = vmatpush1.bf16.msra.mxu0 %v20508_v32 }
 0x174   : > { %18298 = vmatprep.subr.bf16.mxu1 %v25946_v0  ;;  %2520 = vmatprep.subr.bf16.mxu0 %v20509_v6 }
 0x175   : > { %2286 = vmatmul.mubr.bf16.gmra.mxu1 %v20911_v30 }
 0x176   : > { %2295 = vmatprep.mubr.bf16.mxu1 %v880_v4  ;;  %18299 = vmatpush3.bf16.msra.mxu1 %v19001_v26  ;;  %v19063_v26 = vld [vmem:[%s25958_s21 + $0x694] ss:$12 sps:$4 sm:$0xff]  }
 0x177   : > { %2521 = vmatpush1.bf16.msra.mxu0 %v20510_v20  ;;  %18300 = vmatprep.subr.bf16.mxu1 %v25946_v0 }
 0x178   : > { %2522 = vmatprep.subr.bf16.mxu0 %v20511_v36  ;;  %v19066_v36 = vld [vmem:[%s25958_s21 + $0x67c] ss:$12 sps:$4 sm:$0xff]  }
 0x17a   : > { %2410 = vmatmul.mubr.bf16.gmra.mxu0 %v20911_v30  ;;  %18301 = vmatpush3.bf16.msra.mxu1 %v19002_v7  ;;  %v20514_v30 = vld [vmem:[%s20674_s2 + $0x30] ss:$12 sps:$4 sm:$0xff]  }
 0x17b   : > { %2417 = vmatprep.mubr.bf16.mxu0 %v880_v4  ;;  %2523 = vmatpush1.bf16.msra.mxu0 %v20512_v8  ;;  %v19061_v4 = vld [vmem:[%s25958_s21 + $0x690] ss:$12 sps:$4 sm:$0xff]  }
 0x17c   : > { %18302 = vmatprep.subr.bf16.mxu1 %v25946_v0  ;;  %2524 = vmatprep.subr.bf16.mxu0 %v20513_v5  ;;  %v19064_v5 = vld [vmem:[%s25958_s21 + $0x678] ss:$12 sps:$4 sm:$0xff]  }
 0x17d   : > { %2296 = vmatmul.mubr.bf16.gmra.mxu1 %v20919_v40 }
 0x17e   : > { %18303 = vmatpush3.bf16.msra.mxu1 %v19003_v42  ;;  %18310 = vmatprep.mubr.msk.bf16.mxu1 %vm20552_vm0, %v25946_v0 }
 0x17f   : > { %2525 = vmatpush1.bf16.msra.mxu0 %v20514_v30  ;;  %18304 = vmatprep.subr.bf16.mxu1 %v25946_v0 }
 0x180   : > { %2526 = vmatprep.subr.bf16.mxu0 %v20515_v10 }
 0x182   : > { %2418 = vmatmul.mubr.bf16.gmra.mxu0 %v20919_v40  ;;  %18305 = vmatpush3.bf16.msra.mxu1 %v19004_v9  ;;  %v20518_v40 = vld [vmem:[%s20674_s2] ss:$12 sps:$4 sm:$0xff]  }
 0x183   : > { %2527 = vmatpush1.bf16.msra.mxu0 %v20516_v22  ;;  %18306 = vmatprep.subr.bf16.mxu1 %v25946_v0 }
 0x184   : > { %2528 = vmatprep.subr.bf16.mxu0 %v20517_v11  ;;  %2546 = vmatprep.mubr.bf16.mxu0 %v25948_v1 }
 0x186   : > { %18307 = vmatpush3.bf16.msra.mxu1 %v19005_v16 }
 0x187   : > { %2529 = vmatpush1.bf16.msra.mxu0 %v20518_v40  ;;  %18308 = vmatprep.subr.bf16.mxu1 %v25946_v0 }
 0x188   : > { %3124 = vmatprep.subr.bf16.mxu0 %v19012_v17 }
 0x18a   : > { %15386 = vmatmul.mubr.msk.bf16.vlgmr.msra.gmra.mxu0 %vm743_vm1, %v19006_v12  ;;  %18309 = vmatpush3.bf16.msra.mxu1 %v19007_v13  ;;  %v19070_v13 = vld [vmem:[%s25958_s21 + $0x664] ss:$12 sps:$4 sm:$0xff]  }
 0x18b   : > { %18322 = vmatprep.subr.bf16.mxu1 %v25946_v0  ;;  %2556 = vmatprep.mubr.bf16.mxu0 %v25948_v1 }
 0x18d   : > { %18311 = vmatmul.mubr.bf16.vlgmr.msra.gmra.mxu1 %v20901_v18  ;;  %v19010_v18 = vld [vmem:[%s25958_s21 + $0x528] ss:$12 sps:$4 sm:$0xff]  }
 0x18e   : > { %18323 = vmatpush3.bf16.msra.mxu1 %v20519_v15  ;;  %18314 = vmatprep.mubr.msk.bf16.mxu1 %vm20552_vm0, %v25946_v0 }
 0x18f   : > { %18324 = vmatprep.subr.bf16.mxu1 %v25946_v0  ;;  %3125 = vmatpush1.bf16.msra.mxu0 %v19010_v18  ;;  %v19072_v18 = vld [vmem:[%s25958_s21 + $0x648] ss:$12 sps:$4 sm:$0xff]  }
 0x190   : > { %3126 = vmatprep.subr.bf16.mxu0 %v19015_v23 }
 0x192   : > { %18325 = vmatpush3.bf16.msra.mxu1 %v20520_v19  ;;  %15387 = vmatmul.mubr.msk.bf16.gmra.mxu0 %vm743_vm1, %v19008_v14 }
 0x193   : > { %18326 = vmatprep.subr.bf16.mxu1 %v25946_v0  ;;  %2566 = vmatprep.mubr.bf16.mxu0 %v25948_v1 }
 0x194   : > { %3127 = vmatpush1.bf16.msra.mxu0 %v19013_v25 }
 0x195   : > { %18315 = vmatmul.mubr.bf16.gmra.mxu1 %v20909_v28  ;;  %v19018_v28 = vld [vmem:[%s25958_s21 + $0x4fc] ss:$12 sps:$4 sm:$0xff]  }
 0x196   : > { %18327 = vmatpush3.bf16.msra.mxu1 %v20521_v24  ;;  %18318 = vmatprep.mubr.msk.bf16.mxu1 %vm20552_vm0, %v25946_v0 }
 0x197   : > { %18328 = vmatprep.subr.bf16.mxu1 %v25946_v0  ;;  %3128 = vmatprep.subr.bf16.mxu0 %v19018_v28 }
 0x198   : > { %3129 = vmatpush1.bf16.msra.mxu0 %v19016_v29  ;;  %v19076_v29 = vld [vmem:[%s25958_s21 + $0x630] ss:$12 sps:$4 sm:$0xff]  }
 0x199   : > { %3130 = vmatprep.subr.bf16.mxu0 %v19021_v31  ;;  %v19078_v31 = vld [vmem:[%s25958_s21 + $0x634] ss:$12 sps:$4 sm:$0xff]  }
 0x19a   : > { %18329 = vmatpush3.bf16.msra.mxu1 %v20522_v27  ;;  %15388 = vmatmul.mubr.msk.bf16.gmra.mxu0 %vm743_vm1, %v19009_v21 }
 0x19b   : > { %18330 = vmatprep.subr.bf16.mxu1 %v25946_v0 }
 0x19c   : > { %3131 = vmatpush1.bf16.msra.mxu0 %v19019_v34 }
 0x19d   : > { %18319 = vmatmul.mubr.bf16.gmra.mxu1 %v20917_v38  ;;  %v19024_v38 = vld [vmem:[%s25958_s21 + $0x4cc] ss:$12 sps:$4 sm:$0xff]  }
 0x19e   : > { %18331 = vmatpush3.bf16.msra.mxu1 %v20523_v33  ;;  %18334 = vmatprep.mubr.msk.bf16.mxu1 %vm20552_vm0, %v25946_v0 }
 0x19f   : > { %18332 = vmatprep.subr.bf16.mxu1 %v25946_v0  ;;  %3132 = vmatprep.subr.bf16.mxu0 %v19024_v38 }
 0x1a0   : > { %3133 = vmatpush1.bf16.msra.mxu0 %v19022_v37  ;;  %v19080_v37 = vld [vmem:[%s25958_s21 + $0x618] ss:$12 sps:$4 sm:$0xff]  }
 0x1a1   : > { %3134 = vmatprep.subr.bf16.mxu0 %v19027_v39  ;;  %v19082_v39 = vld [vmem:[%s25958_s21 + $0x61c] ss:$12 sps:$4 sm:$0xff]  }
 0x1a2   : > { %18333 = vmatpush3.bf16.msra.mxu1 %v20524_v35 }
 0x1a3   : > { %3187 = vmatprep.subr.bf16.mxu1 %v19057_v62 }
 0x1a4   : > { %3135 = vmatpush1.bf16.msra.mxu0 %v19025_v41 }
 0x1a5   : > { %18335 = vmatmul.mubr.msk.bf16.vlgmr.msra.gmra.mxu1 %vm743_vm1, %v19006_v12  ;;  %3136 = vmatprep.subr.bf16.mxu0 %v19030_v44  ;;  %v19068_v12 = vld [vmem:[%s25958_s21 + $0x660] ss:$12 sps:$4 sm:$0xff]  }
 0x1a6   : > { %18338 = vmatprep.mubr.msk.bf16.mxu1 %vm20552_vm0, %v25946_v0  ;;  %3188 = vmatpush1.bf16.msra.mxu1 %v19055_v50 }
 0x1a7   : > { %3189 = vmatprep.subr.bf16.mxu1 %v19063_v26 }
 0x1a8   : > { %3137 = vmatpush1.bf16.msra.mxu0 %v19028_v43 }
 0x1a9   : > { %3138 = vmatprep.subr.bf16.mxu0 %v19033_v45 }
 0x1aa   : > { %3190 = vmatpush1.bf16.msra.mxu1 %v19061_v4 }
 0x1ab   : > { %3191 = vmatprep.subr.bf16.mxu1 %v19066_v36 }
 0x1ac   : > { %3139 = vmatpush1.bf16.msra.mxu0 %v19031_v46  ;;  %v19084_v46 = vld [vmem:[%s25958_s21 + $0x600] ss:$12 sps:$4 sm:$0xff]  }
 0x1ad   : > { %18339 = vmatmul.mubr.msk.bf16.gmra.mxu1 %vm743_vm1, %v19008_v14  ;;  %3140 = vmatprep.subr.bf16.mxu0 %v19036_v47  ;;  %v19086_v47 = vld [vmem:[%s25958_s21 + $0x604] ss:$12 sps:$4 sm:$0xff]  }
 0x1ae   : > { %18342 = vmatprep.mubr.msk.bf16.mxu1 %vm20552_vm0, %v25946_v0  ;;  %3192 = vmatpush1.bf16.msra.mxu1 %v19064_v5 }
 0x1af   : > { %3193 = vmatprep.subr.bf16.mxu1 %v19070_v13 }
 0x1b0   : > { %3141 = vmatpush2.bf16.msra.mxu0 %v19034_v48 }
 0x1b1   : > { %3142 = vmatprep.subr.bf16.mxu0 %v19039_v49  ;;  %v19088_v49 = vld [vmem:[%s25958_s21 + $0x5f0] ss:$12 sps:$4 sm:$0xff]  }
 0x1b2   : > { %3194 = vmatpush1.bf16.msra.mxu1 %v19068_v12 }
 0x1b4   : > { %3143 = vmatpush2.bf16.msra.mxu0 %v19037_v51 }
 0x1b5   : > { %18343 = vmatmul.mubr.msk.bf16.gmra.mxu1 %vm743_vm1, %v19009_v21  ;;  %3144 = vmatprep.subr.bf16.mxu0 %v19042_v52  ;;  %v19074_v21 = vld [vmem:[%s25958_s21 + $0x64c] ss:$12 sps:$4 sm:$0xff]  }
 0x1b6   : > { %3219 = vmatprep.mubr.bf16.mxu1 %v25948_v1  ;;  %3195 = vmatprep.subr.bf16.mxu1 %v19074_v21 }
 0x1b7   : > { %3196 = vmatpush1.bf16.msra.mxu1 %v19072_v18 }
 0x1b8   : > { %3145 = vmatpush2.bf16.msra.mxu0 %v19040_v53  ;;  %3197 = vmatprep.subr.bf16.mxu1 %v19078_v31 }
 0x1b9   : > { %3146 = vmatprep.subr.bf16.mxu0 %v19045_v54 }
 0x1bb   : > { %3198 = vmatpush1.bf16.msra.mxu1 %v19076_v29 }
 0x1bc   : > { %3147 = vmatpush2.bf16.msra.mxu0 %v19043_v56  ;;  %3199 = vmatprep.subr.bf16.mxu1 %v19082_v39 }
 0x1bd   : > { %3148 = vmatprep.subr.bf16.mxu0 %v19048_v57 }
 0x1bf   : > { %3200 = vmatpush1.bf16.msra.mxu1 %v19080_v37 }
 0x1c0   : > { %3149 = vmatpush2.bf16.msra.mxu0 %v19046_v58  ;;  %3201 = vmatprep.subr.bf16.mxu1 %v19086_v47 }
 0x1c1   : > { %3150 = vmatprep.subr.bf16.mxu0 %v19051_v59 }
 0x1c3   : > { %3202 = vmatpush1.bf16.msra.mxu1 %v19084_v46 }
 0x1c4   : > { %3151 = vmatpush2.bf16.msra.mxu0 %v19049_v55  ;;  %17705 = vmatprep.subr.bf16.mxu1 %v19088_v49 }
 0x1c5   : > { %3152 = vmatprep.subr.bf16.mxu0 %v19054_v60 }
 0x1c8   : > { %3153 = vmatpush2.bf16.msra.mxu0 %v19052_v61 }
 0x1c9   : > { %3154 = vmatprep.subr.bf16.mxu0 %v19060_v2 }
 0x1cc   : > { %3155 = vmatpush2.bf16.msra.mxu0 %v19058_v3 }
 0x1cd   : > { %v1716_v63 = vpop.f32.mrf.mxu1  ;;  %18346 = vmatprep.subr.bf16.mxu0 %v25946_v0 }
 0x1cf   : > { %v1718_v32 = vpop.f32.mrf.mxu1 }
 0x1d1   : > { %v1653_v6 = vpop.f32.mrf.mxu0  ;;  %v1720_v7 = vpop.f32.mrf.mxu1 }
 0x1d2   : > { %v21451_v20 = vadd.f32 %v1716_v63, %v1653_v6 }
 0x1d3   : > { %v1655_v42 = vpop.f32.mrf.mxu0  ;;  %v21457_v8 = vpop.f32.mrf.mxu1 }
 0x1d4   : > { %v21462_v9 = vadd.f32 %v1718_v32, %v1655_v42 }
 0x1d5   : > { %v1657_v30 = vpop.f32.mrf.mxu0  ;;  %v1726_v10 = vpop.f32.mrf.mxu1 }
 0x1d6   : > { %v21464_v16 = vadd.f32 %v1720_v7, %v1657_v30 }
 0x1d7   : > { %v21466_v22 = vpop.f32.mrf.mxu0  ;;  %v1728_v11 = vpop.f32.mrf.mxu1 }
 0x1d9   : > { %v1663_v40 = vpop.f32.mrf.mxu0  ;;  %v1730_v14 = vpop.f32.mrf.mxu1 }
 0x1da   : > { %v21474_v15 = vadd.f32 %v1726_v10, %v1663_v40 }
 0x1db   : > { %v1665_v17 = vpop.f32.mrf.mxu0  ;;  %v21476_v19 = vpop.f32.mrf.mxu1 }
 0x1dc   : > { %v21484_v23 = vadd.f32 %v1728_v11, %v1665_v17 }
 0x1dd   : > { %v1667_v24 = vpop.f32.mrf.mxu0  ;;  %v1736_v25 = vpop.f32.mrf.mxu1 }
 0x1de   : > { %v21486_v28 = vadd.f32 %v1730_v14, %v1667_v24 }
 0x1df   : > { %v21488_v27 = vpop.f32.mrf.mxu0  ;;  %v1738_v33 = vpop.f32.mrf.mxu1 }
 0x1e1   : > { %v1673_v34 = vpop.f32.mrf.mxu0  ;;  %v1740_v43 = vpop.f32.mrf.mxu1 }
 0x1e2   : > { %v21496_v38 = vadd.f32 %v1736_v25, %v1673_v34 }
 0x1e3   : > { %v1675_v35 = vpop.f32.mrf.mxu0  ;;  %v21514_v48 = vpop.f32.mrf.mxu1 }
 0x1e4   : > { %v21504_v41 = vadd.f32 %v1738_v33, %v1675_v35 }
 0x1e5   : > { %v1677_v44 = vpop.f32.mrf.mxu0 }
 0x1e6   : > { %v21506_v45 = vadd.f32 %v1740_v43, %v1677_v44 }
 0x1e7   : > { %v21519_v52 = vpop.f32.mrf.mxu0 }
 0x1ed   : > { %v17622_v51 = vpop.f32.mrf.mxu1 }
 0x1ef   : > { %v17623_v53 = vpop.f32.mrf.mxu1 }
 0x1f0   : > { %v17624_v54 = vadd.f32 %v17623_v53, %v17622_v51 }
 0x1f1   : > { %v17625_v56 = vpop.f32.mrf.mxu1  ;;  %v1836_v57 = vpop.f32.mrf.mxu0 }
 0x1f2   : > { %v1837_v58 = vadd.f32 %v17624_v54, %v1836_v57 }
 0x1f3   : > { %v17626_v59 = vpop.f32.mrf.mxu1  ;;  %v18284_v55 = vpop.f32.mrf.mxu0 }
 0x1f4   : > { %v17627_v60 = vadd.f32 %v17626_v59, %v17625_v56 }
 0x1f5   : > { %v17628_v61 = vpop.f32.mrf.mxu1  ;;  %v1839_v62 = vpop.f32.mrf.mxu0 }
 0x1f6   : > { %v21521_v50 = vadd.f32 %v17627_v60, %v1839_v62 }
 0x1f7   : > { %v17629_v63 = vpop.f32.mrf.mxu1  ;;  %v18285_v2 = vpop.f32.mrf.mxu0 }
 0x1f8   : > { %v17630_v3 = vadd.f32 %v17629_v63, %v17628_v61 }
 0x1f9   : > { %v17631_v26 = vpop.f32.mrf.mxu1  ;;  %v1844_v32 = vpop.f32.mrf.mxu0 }
 0x1fa   : > { %v21523_v4 = vadd.f32 %v17630_v3, %v1844_v32 }
 0x1fb   : > { %v17632_v6 = vpop.f32.mrf.mxu1  ;;  %v18288_v7 = vpop.f32.mrf.mxu0 }
 0x1fc   : > { %v17633_v36 = vadd.f32 %v17632_v6, %v17631_v26 }
 0x1fd   : > { %v17634_v42 = vpop.f32.mrf.mxu1  ;;  %v1847_v5 = vpop.f32.mrf.mxu0 }
 0x1fe   : > { %v21525_v30 = vadd.f32 %v17633_v36, %v1847_v5 }
 0x1ff   : > { %v17635_v10 = vpop.f32.mrf.mxu1  ;;  %v18289_v11 = vpop.f32.mrf.mxu0 }
 0x200   : > { %v17636_v12 = vadd.f32 %v17635_v10, %v17634_v42 }
 0x201   : > { %v17637_v13 = vpop.f32.mrf.mxu1  ;;  %v1852_v40 = vpop.f32.mrf.mxu0 }
 0x202   : > { %v21527_v14 = vadd.f32 %v17636_v12, %v1852_v40 }
 0x203   : > { %v17638_v17 = vpop.f32.mrf.mxu1  ;;  %v18292_v18 = vpop.f32.mrf.mxu0 }
 0x204   : > { %v17639_v21 = vadd.f32 %v17638_v17, %v17637_v13 }
 0x205   : > { %v1855_v24 = vpop.f32.mrf.mxu0 }
 0x206   : > { %v21529_v25 = vadd.f32 %v17639_v21, %v1855_v24 }
 0x207   : > { %v18293_v29 = vpop.f32.mrf.mxu0 }
 0x212   : > { %v2340_v31 = vpop.f32.mrf.mxu0 }
 0x214   : > { %v2342_v33 = vpop.f32.mrf.mxu0 }
 0x216   : > { %v2344_v34 = vpop.f32.mrf.mxu0 }
 0x218   : > { %v21531_v35 = vpop.f32.mrf.mxu0 }
 0x21a   : > { %v2350_v37 = vpop.f32.mrf.mxu0 }
 0x21c   : > { %v2352_v39 = vpop.f32.mrf.mxu0 }
 0x21e   : > { %v2354_v43 = vpop.f32.mrf.mxu0 }
 0x220   : > { %v21533_v44 = vpop.f32.mrf.mxu0 }
 0x222   : > { %v2360_v46 = vpop.f32.mrf.mxu0 }
 0x224   : > { %v2362_v47 = vpop.f32.mrf.mxu0 }
 0x226   : > { %v2364_v49 = vpop.f32.mrf.mxu0 }
 0x228   : > { %v21536_v56 = vpop.f32.mrf.mxu0 }
 0x229   : > { %25959 = vst [vmem:[#allocation2_spill] sm:$0xff] %v21536_v56  ;;  %v1723_v56 = vadd.f32 %v21457_v8, %v21466_v22 }
 0x22d   : > { %v2277_v51 = vpop.f32.mrf.mxu1 }
 0x22e   : > { %v2278_v53 = vadd.f32 %v2277_v51, %v21451_v20 }
 0x22f   : > { %v2279_v54 = vpop.f32.mrf.mxu1 }
 0x230   : > { %v21538_v57 = vadd.f32 %v2340_v31, %v2278_v53  ;;  %v2280_v59 = vadd.f32 %v2279_v54, %v21462_v9 }
 0x231   : > { %v2281_v55 = vpop.f32.mrf.mxu1 }
 0x232   : > { %v21541_v60 = vadd.f32 %v2342_v33, %v2280_v59  ;;  %v2282_v61 = vadd.f32 %v2281_v55, %v21464_v16  ;;  %v17667_v62 = vpop.f32.mrf.mxu0 }
 0x233   : > { %v21544_v63 = vpop.f32.mrf.mxu1 }
 0x234   : > { %v21546_v2 = vadd.f32 %v2344_v34, %v2282_v61  ;;  %v17668_v3 = vpop.f32.mrf.mxu0 }
 0x235   : > { %v17669_v26 = vadd.f32 %v17668_v3, %v17667_v62  ;;  %v2287_v20 = vpop.f32.mrf.mxu1 }
 0x236   : > { %v2288_v32 = vadd.f32 %v2287_v20, %v21474_v15  ;;  %v17670_v6 = vpop.f32.mrf.mxu0 }
 0x237   : > { %v2289_v7 = vpop.f32.mrf.mxu1  ;;  %v2404_v36 = vadd.f32 %v17669_v26, %v1837_v58 }
 0x238   : > { %v21549_v42 = vadd.f32 %v2350_v37, %v2288_v32  ;;  %v2290_v9 = vadd.f32 %v2289_v7, %v21484_v23  ;;  %v17671_v5 = vpop.f32.mrf.mxu0 }
 0x239   : > { %v17672_v10 = vadd.f32 %v17671_v5, %v17670_v6  ;;  %v2291_v16 = vpop.f32.mrf.mxu1 }
 0x23a   : > { %v21552_v11 = vadd.f32 %v2352_v39, %v2290_v9  ;;  %v2292_v12 = vadd.f32 %v2291_v16, %v21486_v28  ;;  %v17673_v13 = vpop.f32.mrf.mxu0 }
 0x23b   : > { %v21555_v40 = vpop.f32.mrf.mxu1  ;;  %v2407_v17 = vadd.f32 %v17672_v10, %v21521_v50 }
 0x23c   : > { %v21558_v15 = vadd.f32 %v2354_v43, %v2292_v12  ;;  %v17674_v18 = vpop.f32.mrf.mxu0 }
 0x23d   : > { %v17675_v58 = vadd.f32 %v17674_v18, %v17673_v13  ;;  %v2297_v21 = vpop.f32.mrf.mxu1  ;;  %v19075_v18 = vld [vmem:[%s25958_s21 + $0x680] ss:$12 sps:$4 sm:$0xff]  }
 0x23e   : > { %v2298_v24 = vadd.f32 %v2297_v21, %v21496_v38  ;;  %v17676_v23 = vpop.f32.mrf.mxu0 }
 0x23f   : > { %v2299_v29 = vpop.f32.mrf.mxu1  ;;  %v2412_v31 = vadd.f32 %v17675_v58, %v21523_v4 }
 0x240   : > { %v21562_v33 = vadd.f32 %v2360_v46, %v2298_v24  ;;  %v2300_v28 = vadd.f32 %v2299_v29, %v21504_v41  ;;  %v17677_v34 = vpop.f32.mrf.mxu0 }
 0x241   : > { %v17678_v37 = vadd.f32 %v17677_v34, %v17676_v23  ;;  %v2301_v39 = vpop.f32.mrf.mxu1  ;;  %v19079_v34 = vld [vmem:[%s25958_s21 + $0x668] ss:$12 sps:$4 sm:$0xff]  }
 0x242   : > { %v21565_v51 = vadd.f32 %v2362_v47, %v2300_v28  ;;  %v2302_v50 = vadd.f32 %v2301_v39, %v21506_v45  ;;  %v17679_v43 = vpop.f32.mrf.mxu0 }
 0x243   : > { %v2415_v53 = vadd.f32 %v17678_v37, %v21525_v30  ;;  %v21572_v62 = vpop.f32.mrf.mxu1 }
 0x244   : > { %v21569_v54 = vadd.f32 %v2364_v49, %v2302_v50  ;;  %v17680_v38 = vpop.f32.mrf.mxu0  ;;  %v19067_v49 = vld [vmem:[%s25958_s21 + $0x6b0] ss:$12 sps:$4 sm:$0xff]  }
 0x245   : > { %v17681_v59 = vadd.f32 %v17680_v38, %v17679_v43  ;;  %v19083_v38 = vld [vmem:[%s25958_s21 + $0x650] ss:$12 sps:$4 sm:$0xff]  }
 0x246   : > { %v17682_v55 = vpop.f32.mrf.mxu0 }
 0x247   : > { %v2420_v4 = vadd.f32 %v17681_v59, %v21527_v14 }
 0x248   : > { %v17683_v46 = vpop.f32.mrf.mxu0 }
 0x249   : > { %v17684_v61 = vadd.f32 %v17683_v46, %v17682_v55 }
 0x24a   : > { %v2548_v41 = vpop.f32.mrf.mxu0 }
 0x24b   : > { %v2423_v47 = vadd.f32 %v17684_v61, %v21529_v25 }
 0x24c   : > { %v2550_v3 = vpop.f32.mrf.mxu0 }
 0x24d   : > { %v2460_v26 = vpop.f32.mrf.mxu1 }
 0x24e   : > { %v21575_v45 = vadd.f32 %v2460_v26, %v2404_v36  ;;  %v2552_v20 = vpop.f32.mrf.mxu0  ;;  %v19071_v36 = vld [vmem:[%s25958_s21 + $0x698] ss:$12 sps:$4 sm:$0xff]  }
 0x24f   : > { %v18312_v30 = vpop.f32.mrf.mxu1  ;;  %v21580_v32 = vpack.c.bf16 %v2552_v20, %v2548_v41  ;;  %v19089_v20 = vld [vmem:[%s25958_s21 + $0x620] ss:$12 sps:$4 sm:$0xff]  }
 0x250   : > { %v2554_v14 = vpop.f32.mrf.mxu0  ;;  %v19090_v30 = vld [vmem:[%s25958_s21 + $0x530] ss:$12 sps:$4 sm:$0xff]  }
 0x251   : > { %v21582_v6 = vpack.c.bf16 %v2554_v14, %v2550_v3  ;;  %v2463_v7 = vpop.f32.mrf.mxu1  ;;  %v19087_v3 = vld [vmem:[%s25958_s21 + $0x638] ss:$12 sps:$4 sm:$0xff]  }
 0x252   : > { %v21584_v9 = vadd.f32 %v2463_v7, %v2407_v17  ;;  %v2558_v5 = vpop.f32.mrf.mxu0 }
 0x253   : > { %3156 = vmatprep.mubr.bf16.mxu0 %v21582_v6  ;;  %v18313_v25 = vpop.f32.mrf.mxu1 }
 0x254   : > { %3157 = vmatmul.mubr.bf16.vlgmr.msra.gmra.mxu0 %v21580_v32  ;;  %v2560_v10 = vpop.f32.mrf.mxu0  ;;  %v19092_v25 = vld [vmem:[%s25958_s21 + $0x608] ss:$12 sps:$4 sm:$0xff]  }
 0x255   : > { %18347 = vmatpush3.bf16.msra.mxu0 %v19067_v49  ;;  %v2468_v16 = vpop.f32.mrf.mxu1  ;;  %v19091_v49 = vld [vmem:[%s25958_s21 + $0x5d8] ss:$12 sps:$4 sm:$0xff]  }
 0x256   : > { %v21591_v12 = vadd.f32 %v2468_v16, %v2412_v31  ;;  %18348 = vmatprep.subr.bf16.mxu0 %v25946_v0  ;;  %v2562_v13 = vpop.f32.mrf.mxu0 }
 0x257   : > { %v18316_v17 = vpop.f32.mrf.mxu1  ;;  %v21597_v58 = vpack.c.bf16 %v2562_v13, %v2558_v5 }
 0x258   : > { %v2564_v21 = vpop.f32.mrf.mxu0  ;;  %v19095_v17 = vld [vmem:[%s25958_s21 + $0x500] ss:$12 sps:$4 sm:$0xff]  }
 0x259   : > { %18349 = vmatpush3.bf16.msra.mxu0 %v19071_v36  ;;  %v2471_v24 = vpop.f32.mrf.mxu1  ;;  %v21599_v23 = vpack.c.bf16 %v2564_v21, %v2560_v10  ;;  %v19093_v36 = vld [vmem:[%s25958_s21 + $0x518] ss:$12 sps:$4 sm:$0xff]   ;;  %v19094_v10 = vld [vmem:[%s25958_s21 + $0x5c0] ss:$12 sps:$4 sm:$0xff]  }
 0x25a   : > { %v21601_v29 = vadd.f32 %v2471_v24, %v2415_v53  ;;  %18350 = vmatprep.subr.bf16.mxu0 %v25946_v0  ;;  %v2568_v31 = vpop.f32.mrf.mxu0 }
 0x25b   : > { %v18317_v28 = vpop.f32.mrf.mxu1  ;;  %3166 = vmatprep.mubr.bf16.mxu0 %v21599_v23 }
 0x25c   : > { %v2570_v37 = vpop.f32.mrf.mxu0  ;;  %3167 = vmatmul.mubr.bf16.gmra.mxu0 %v21597_v58  ;;  %v19097_v28 = vld [vmem:[%s25958_s21 + $0x4e8] ss:$12 sps:$4 sm:$0xff]  }
 0x25d   : > { %18351 = vmatpush3.bf16.msra.mxu0 %v19075_v18  ;;  %v2476_v39 = vpop.f32.mrf.mxu1  ;;  %v19096_v18 = vld [vmem:[%s25958_s21 + $0x5a8] ss:$12 sps:$4 sm:$0xff]  }
 0x25e   : > { %v21609_v50 = vadd.f32 %v2476_v39, %v2420_v4  ;;  %18352 = vmatprep.subr.bf16.mxu0 %v25946_v0  ;;  %v2572_v43 = vpop.f32.mrf.mxu0 }
 0x25f   : > { %v18320_v53 = vpop.f32.mrf.mxu1  ;;  %v21615_v59 = vpack.c.bf16 %v2572_v43, %v2568_v31  ;;  %v19099_v43 = vld [vmem:[%s25958_s21 + $0x4d0] ss:$12 sps:$4 sm:$0xff]  }
 0x260   : > { %v2574_v55 = vpop.f32.mrf.mxu0  ;;  %v19100_v53 = vld [vmem:[%s25958_s21 + $0x578] ss:$12 sps:$4 sm:$0xff]  }
 0x261   : > { %18353 = vmatpush3.bf16.msra.mxu0 %v19079_v34  ;;  %v2479_v46 = vpop.f32.mrf.mxu1  ;;  %v21617_v61 = vpack.c.bf16 %v2574_v55, %v2570_v37  ;;  %v19098_v34 = vld [vmem:[%s25958_s21 + $0x590] ss:$12 sps:$4 sm:$0xff]  }
 0x262   : > { %v21619_v41 = vadd.f32 %v2479_v46, %v2423_v47  ;;  %18354 = vmatprep.subr.bf16.mxu0 %v25946_v0 }
 0x263   : > { %v18321_v4 = vpop.f32.mrf.mxu1  ;;  %3176 = vmatprep.mubr.bf16.mxu0 %v21617_v61 }
 0x264   : > { %3177 = vmatmul.mubr.bf16.gmra.mxu0 %v21615_v59  ;;  %v19101_v4 = vld [vmem:[%s25958_s21 + $0x4b8] ss:$12 sps:$4 sm:$0xff]  }
 0x265   : > { %18355 = vmatpush3.bf16.msra.mxu0 %v19083_v38  ;;  %v2611_v26 = vpop.f32.mrf.mxu1  ;;  %18362 = vmatprep.mubr.msk.bf16.mxu0 %vm20552_vm0, %v25946_v0 }
 0x266   : > { %18356 = vmatprep.subr.bf16.mxu0 %v25946_v0 }
 0x267   : > { %v18336_v47 = vpop.f32.mrf.mxu1 }
 0x268   : > { %v19104_v47 = vld [vmem:[%s25958_s21 + $0x548] ss:$12 sps:$4 sm:$0xff]  }
 0x269   : > { %18357 = vmatpush3.bf16.msra.mxu0 %v19087_v3  ;;  %v2614_v14 = vpop.f32.mrf.mxu1  ;;  %v19102_v3 = vld [vmem:[%s25958_s21 + $0x560] ss:$12 sps:$4 sm:$0xff]  }
 0x26a   : > { %v2636_v7 = vpack.c.bf16 %v2614_v14, %v2611_v26  ;;  %18358 = vmatprep.subr.bf16.mxu0 %v25946_v0  ;;  %v19103_v26 = vld [vmem:[%s25958_s21 + $0x4a0] ss:$12 sps:$4 sm:$0xff]  }
 0x26b   : > { %v18337_v5 = vpop.f32.mrf.mxu1  ;;  %v20528_v14 = vld [vmem:[%s20674_s2 + $0x60] ss:$12 sps:$4 sm:$0xff]  }
 0x26c   : > { %3220 = vmatmul.mubr.bf16.vlgmr.msra.gmra.mxu1 %v2636_v7  ;;  %v20531_v5 = vld [vmem:[%s20674_s2 + $0x34] ss:$12 sps:$4 sm:$0xff]  }
 0x26d   : > { %18359 = vmatpush3.bf16.msra.mxu0 %v19089_v20  ;;  %17706 = vmatpush3.bf16.msra.mxu1 %v19090_v30  ;;  %v2619_v16 = vpop.f32.mrf.mxu1  ;;  %v19105_v20 = vld [vmem:[%s25958_s21 + $0x488] ss:$12 sps:$4 sm:$0xff]   ;;  %v20526_v30 = vld [vmem:[%s20674_s2 + $0x78] ss:$12 sps:$4 sm:$0xff]  }
 0x26e   : > { %18360 = vmatprep.subr.bf16.mxu0 %v25946_v0  ;;  %17707 = vmatprep.subr.bf16.mxu1 %v19091_v49  ;;  %v20527_v49 = vld [vmem:[%s20674_s2 + $0x64] ss:$12 sps:$4 sm:$0xff]  }
 0x26f   : > { %v18340_v13 = vpop.f32.mrf.mxu1  ;;  %3229 = vmatprep.mubr.bf16.mxu1 %v25948_v1 }
 0x270   : > { %v20538_v13 = vld [vmem:[%s20674_s2 + $0x68] ss:$12 sps:$4 sm:$0xff]  }
 0x271   : > { %18361 = vmatpush3.bf16.msra.mxu0 %v19092_v25  ;;  %17708 = vmatpush3.bf16.msra.mxu1 %v19093_v36  ;;  %v2622_v21 = vpop.f32.mrf.mxu1  ;;  %v20533_v25 = vld [vmem:[%s20674_s2 + $0x1c] ss:$12 sps:$4 sm:$0xff]   ;;  %v20534_v36 = vld [vmem:[%s20674_s2 + $0x18] ss:$12 sps:$4 sm:$0xff]  }
 0x272   : > { %v2639_v24 = vpack.c.bf16 %v2622_v21, %v2619_v16  ;;  %17709 = vmatprep.subr.bf16.mxu1 %v19094_v10  ;;  %v20536_v10 = vld [vmem:[%s20674_s2] ss:$12 sps:$4 sm:$0xff]   ;;  %v19109_v21 = vld [vmem:[%s25958_s21 + $0x768] ss:$12 sps:$4 sm:$0xff]  }
 0x273   : > { %v18341_v31 = vpop.f32.mrf.mxu1  ;;  %v20537_v16 = vld [vmem:[%s20674_s2 + $0x80] ss:$12 sps:$4 sm:$0xff]  }
 0x274   : > { %18363 = vmatmul.mubr.bf16.vlgmr.msra.gmra.mxu0 %v2636_v7  ;;  %3230 = vmatmul.mubr.bf16.gmra.mxu1 %v2639_v24  ;;  %v20529_v7 = vld [vmem:[%s20674_s2 + $0x4c] ss:$12 sps:$4 sm:$0xff]   ;;  %v19114_v31 = vld [vmem:[%s25958_s21 + $0x754] ss:$12 sps:$4 sm:$0xff]  }
 0x275   : > { %17710 = vmatpush3.bf16.msra.mxu1 %v19095_v17  ;;  %v2627_v37 = vpop.f32.mrf.mxu1  ;;  %18366 = vmatprep.mubr.msk.bf16.mxu0 %vm20552_vm0, %v25946_v0  ;;  %v19111_v17 = vld [vmem:[%s25958_s21 + $0x76c] ss:$12 sps:$4 sm:$0xff]  }
 0x276   : > { %17711 = vmatprep.subr.bf16.mxu1 %v19096_v18  ;;  %3239 = vmatprep.mubr.bf16.mxu1 %v25948_v1  ;;  %v20539_v18 = vld [vmem:[%s20674_s2 + $0x50] ss:$12 sps:$4 sm:$0xff]  }
 0x277   : > { %v18344_v39 = vpop.f32.mrf.mxu1  ;;  %4023 = vmatprep.subr.bf16.mxu0 %v19111_v17  ;;  %v19156_v17 = vld [vmem:[%s25958_s21 + $0x79c] ss:$12 sps:$4 sm:$0xff]  }
 0x278   : > { %4024 = vmatpush1.bf16.msra.mxu0 %v19109_v21  ;;  %v20541_v39 = vld [vmem:[%s20674_s2 + $0x20] ss:$12 sps:$4 sm:$0xff]  }
 0x279   : > { %17712 = vmatpush3.bf16.msra.mxu1 %v19097_v28  ;;  %v2630_v38 = vpop.f32.mrf.mxu1  ;;  %v20540_v28 = vld [vmem:[%s20674_s2 + $0x38] ss:$12 sps:$4 sm:$0xff]   ;;  %4025 = vmatprep.subr.bf16.mxu0 %v19114_v31  ;;  %v19159_v21 = vld [vmem:[%s25958_s21 + $0x8d4] ss:$12 sps:$4 sm:$0xff]  }
 0x27a   : > { %v2642_v55 = vpack.c.bf16 %v2630_v38, %v2627_v37  ;;  %17713 = vmatprep.subr.bf16.mxu1 %v19098_v34  ;;  %v19112_v34 = vld [vmem:[%s25958_s21 + $0x750] ss:$12 sps:$4 sm:$0xff]   ;;  %v20542_v38 = vld [vmem:[%s20674_s2 + $0x8] ss:$12 sps:$4 sm:$0xff]  }
 0x27b   : > { %v18345_v46 = vpop.f32.mrf.mxu1  ;;  %v19117_v37 = vld [vmem:[%s25958_s21 + $0x73c] ss:$12 sps:$4 sm:$0xff]   ;;  %v19162_v31 = vld [vmem:[%s25958_s21 + $0x784] ss:$12 sps:$4 sm:$0xff]  }
 0x27c   : > { %18367 = vmatmul.mubr.bf16.gmra.mxu0 %v2639_v24  ;;  %3240 = vmatmul.mubr.bf16.gmra.mxu1 %v2642_v55  ;;  %v19108_v24 = vld [vmem:[%s25957_s25 + $0x58] sm:$0xff]  }
 0x27d   : > { %17714 = vmatpush3.bf16.msra.mxu1 %v19099_v43  ;;  %18370 = vmatprep.mubr.msk.bf16.mxu0 %vm20552_vm0, %v25946_v0  ;;  %v19115_v43 = vld [vmem:[%s25958_s21 + $0x738] ss:$12 sps:$4 sm:$0xff]  }
 0x27e   : > { %17715 = vmatprep.subr.bf16.mxu1 %v19100_v53  ;;  %3282 = vmatprep.mubr.bf16.mxu1 %v21582_v6  ;;  %v20525_v6 = vld [vmem:[%s20674_s2 + $0x7c] ss:$12 sps:$4 sm:$0xff]   ;;  %v19120_v53 = vld [vmem:[%s25958_s21 + $0x724] ss:$12 sps:$4 sm:$0xff]   ;;  %v19123_v46 = vld [vmem:[%s25958_s21 + $0x70c] ss:$12 sps:$4 sm:$0xff]  }
 0x27f   : > { %4026 = vmatpush1.bf16.msra.mxu0 %v19112_v34  ;;  %v19165_v34 = vld [vmem:[%s25958_s21 + $0x8bc] ss:$12 sps:$4 sm:$0xff]  }
 0x280   : > { %4027 = vmatprep.subr.bf16.mxu0 %v19117_v37  ;;  %v19163_v37 = vld [vmem:[%s25958_s21 + $0x8b8] ss:$12 sps:$4 sm:$0xff]  }
 0x281   : > { %17716 = vmatpush3.bf16.msra.mxu1 %v19101_v4  ;;  %v19121_v4 = vld [vmem:[%s25958_s21 + $0x708] ss:$12 sps:$4 sm:$0xff]  }
 0x282   : > { %17717 = vmatprep.subr.bf16.mxu1 %v19102_v3  ;;  %v19126_v3 = vld [vmem:[%s25958_s21 + $0x6f4] ss:$12 sps:$4 sm:$0xff]  }
 0x283   : > { %4028 = vmatpush1.bf16.msra.mxu0 %v19115_v43  ;;  %v19166_v43 = vld [vmem:[%s25958_s21 + $0x8a0] ss:$12 sps:$4 sm:$0xff]  }
 0x284   : > { %18371 = vmatmul.mubr.bf16.gmra.mxu0 %v2642_v55  ;;  %v19118_v55 = vld [vmem:[%s25958_s21 + $0x720] ss:$12 sps:$4 sm:$0xff]   ;;  %4029 = vmatprep.subr.bf16.mxu0 %v19120_v53 }
 0x285   : > { %17718 = vmatpush3.bf16.msra.mxu1 %v19103_v26  ;;  %v19124_v26 = vld [vmem:[%s25958_s21 + $0x6f0] ss:$12 sps:$4 sm:$0xff]   ;;  %v19172_v53 = vld [vmem:[%s25958_s21 + $0x88c] ss:$12 sps:$4 sm:$0xff]  }
 0x286   : > { %17719 = vmatprep.subr.bf16.mxu1 %v19104_v47  ;;  %v19129_v47 = vld [vmem:[%s25958_s21 + $0x6dc] ss:$12 sps:$4 sm:$0xff]  }
 0x287   : > { %4030 = vmatpush1.bf16.msra.mxu0 %v19118_v55  ;;  %v19176_v55 = vld [vmem:[%s25958_s21 + $0x874] ss:$12 sps:$4 sm:$0xff]  }
 0x288   : > { %4031 = vmatprep.subr.bf16.mxu0 %v19123_v46  ;;  %v19174_v46 = vld [vmem:[%s25958_s21 + $0x870] ss:$12 sps:$4 sm:$0xff]  }
 0x289   : > { %17720 = vmatpush3.bf16.msra.mxu1 %v19105_v20  ;;  %v19127_v20 = vld [vmem:[%s25958_s21 + $0x6d8] ss:$12 sps:$4 sm:$0xff]  }
 0x28a   : > { %3417 = vmatprep.subr.bf16.mxu1 %v20525_v6  ;;  %v19132_v6 = vld [vmem:[%s25958_s21 + $0x6c4] ss:$12 sps:$4 sm:$0xff]  }
 0x28b   : > { %4032 = vmatpush1.bf16.msra.mxu0 %v19121_v4  ;;  %v19180_v4 = vld [vmem:[%s25958_s21 + $0x85c] ss:$12 sps:$4 sm:$0xff]  }
 0x28c   : > { %3283 = vmatmul.mubr.bf16.vlgmr.msra.gmra.mxu1 %v21580_v32  ;;  %v20530_v32 = vld [vmem:[%s20674_s2 + $0x48] ss:$12 sps:$4 sm:$0xff]   ;;  %4033 = vmatprep.subr.bf16.mxu0 %v19126_v3  ;;  %v19178_v3 = vld [vmem:[%s25958_s21 + $0x858] ss:$12 sps:$4 sm:$0xff]  }
 0x28d   : > { %3290 = vmatprep.mubr.bf16.mxu1 %v21599_v23  ;;  %3418 = vmatpush1.bf16.msra.mxu1 %v20526_v30  ;;  %v20532_v23 = vld [vmem:[%s20674_s2 + $0x30] ss:$12 sps:$4 sm:$0xff]   ;;  %v19130_v30 = vld [vmem:[%s25958_s21 + $0x6c0] ss:$12 sps:$4 sm:$0xff]  }
 0x28e   : > { %3419 = vmatprep.subr.bf16.mxu1 %v20527_v49  ;;  %v19133_v49 = vld [vmem:[%s25958_s21 + $0x828] ss:$12 sps:$4 sm:$0xff]  }
 0x28f   : > { %4034 = vmatpush1.bf16.msra.mxu0 %v19124_v26  ;;  %v19184_v26 = vld [vmem:[%s25958_s21 + $0x844] ss:$12 sps:$4 sm:$0xff]  }
 0x290   : > { %4035 = vmatprep.subr.bf16.mxu0 %v19129_v47  ;;  %v19182_v47 = vld [vmem:[%s25958_s21 + $0x840] ss:$12 sps:$4 sm:$0xff]  }
 0x291   : > { %3420 = vmatpush1.bf16.msra.mxu1 %v20528_v14  ;;  %v19135_v14 = vld [vmem:[%s25958_s21 + $0x82c] ss:$12 sps:$4 sm:$0xff]  }
 0x292   : > { %3421 = vmatprep.subr.bf16.mxu1 %v20529_v7  ;;  %v19138_v7 = vld [vmem:[%s25958_s21 + $0x814] ss:$12 sps:$4 sm:$0xff]  }
 0x293   : > { %4036 = vmatpush1.bf16.msra.mxu0 %v19127_v20  ;;  %v19186_v20 = vld [vmem:[%s25958_s21 + $0x830] ss:$12 sps:$4 sm:$0xff]  }
 0x294   : > { %3291 = vmatmul.mubr.bf16.gmra.mxu1 %v21597_v58  ;;  %v20535_v58 = vld [vmem:[%s20674_s2 + $0x4] ss:$12 sps:$4 sm:$0xff]   ;;  %4037 = vmatprep.subr.bf16.mxu0 %v19132_v6 }
 0x295   : > { %3298 = vmatprep.mubr.bf16.mxu1 %v21617_v61  ;;  %3422 = vmatpush1.bf16.msra.mxu1 %v20530_v32  ;;  %v19106_v61 = vld [vmem:[%s25957_s25 + $0x48] sm:$0xff]   ;;  %v19136_v32 = vld [vmem:[%s25958_s21 + $0x810] ss:$12 sps:$4 sm:$0xff]  }
 0x296   : > { %3423 = vmatprep.subr.bf16.mxu1 %v20531_v5  ;;  %v19141_v5 = vld [vmem:[%s25958_s21 + $0x7fc] ss:$12 sps:$4 sm:$0xff]  }
 0x297   : > { %4038 = vmatpush1.bf16.msra.mxu0 %v19130_v30 }
 0x298   : > { %4039 = vmatprep.subr.bf16.mxu0 %v19135_v14 }
 0x299   : > { %3424 = vmatpush1.bf16.msra.mxu1 %v20532_v23  ;;  %v19139_v23 = vld [vmem:[%s25958_s21 + $0x7f8] ss:$12 sps:$4 sm:$0xff]  }
 0x29a   : > { %3425 = vmatprep.subr.bf16.mxu1 %v20533_v25  ;;  %v19144_v25 = vld [vmem:[%s25958_s21 + $0x7e4] ss:$12 sps:$4 sm:$0xff]  }
 0x29b   : > { %4040 = vmatpush2.bf16.msra.mxu0 %v19133_v49 }
 0x29c   : > { %3299 = vmatmul.mubr.bf16.gmra.mxu1 %v21615_v59  ;;  %v19107_v59 = vld [vmem:[%s25957_s25 + $0x50] sm:$0xff]   ;;  %4041 = vmatprep.subr.bf16.mxu0 %v19138_v7 }
 0x29d   : > { %3426 = vmatpush1.bf16.msra.mxu1 %v20534_v36  ;;  %3445 = vmatprep.mubr.bf16.mxu1 %v25948_v1  ;;  %v19142_v36 = vld [vmem:[%s25958_s21 + $0x7e0] ss:$12 sps:$4 sm:$0xff]  }
 0x29e   : > { %3427 = vmatprep.subr.bf16.mxu1 %v20535_v58  ;;  %v19147_v58 = vld [vmem:[%s25958_s21 + $0x7cc] ss:$12 sps:$4 sm:$0xff]  }
 0x29f   : > { %4042 = vmatpush2.bf16.msra.mxu0 %v19136_v32 }
 0x2a0   : > { %4043 = vmatprep.subr.bf16.mxu0 %v19141_v5 }
 0x2a1   : > { %3428 = vmatpush1.bf16.msra.mxu1 %v20536_v10  ;;  %v19150_v10 = vld [vmem:[%s25958_s21 + $0x7b4] ss:$12 sps:$4 sm:$0xff]  }
 0x2a2   : > { %18374 = vmatprep.subr.bf16.mxu1 %v25946_v0 }
 0x2a3   : > { %4044 = vmatpush2.bf16.msra.mxu0 %v19139_v23 }
 0x2a4   : > { %15569 = vmatmul.mubr.msk.bf16.vlgmr.msra.gmra.mxu1 %vm743_vm1, %v19106_v61  ;;  %4045 = vmatprep.subr.bf16.mxu0 %v19144_v25 }
 0x2a5   : > { %18375 = vmatpush3.bf16.msra.mxu1 %v20537_v16  ;;  %3455 = vmatprep.mubr.bf16.mxu1 %v25948_v1  ;;  %v19148_v16 = vld [vmem:[%s25958_s21 + $0x7b0] ss:$12 sps:$4 sm:$0xff]  }
 0x2a6   : > { %18376 = vmatprep.subr.bf16.mxu1 %v25946_v0 }
 0x2a7   : > { %4046 = vmatpush2.bf16.msra.mxu0 %v19142_v36 }
 0x2a8   : > { %4047 = vmatprep.subr.bf16.mxu0 %v19147_v58 }
 0x2a9   : > { %18377 = vmatpush3.bf16.msra.mxu1 %v20538_v13  ;;  %v19151_v13 = vld [vmem:[%s25958_s21 + $0x8e8] ss:$12 sps:$4 sm:$0xff]  }
 0x2aa   : > { %18378 = vmatprep.subr.bf16.mxu1 %v25946_v0 }
 0x2ac   : > { %15570 = vmatmul.mubr.msk.bf16.gmra.mxu1 %vm743_vm1, %v19107_v59 }
 0x2ad   : > { %18379 = vmatpush3.bf16.msra.mxu1 %v20539_v18  ;;  %3465 = vmatprep.mubr.bf16.mxu1 %v25948_v1  ;;  %v19154_v18 = vld [vmem:[%s25958_s21 + $0x798] ss:$12 sps:$4 sm:$0xff]  }
 0x2ae   : > { %18380 = vmatprep.subr.bf16.mxu1 %v25946_v0 }
 0x2b1   : > { %18381 = vmatpush3.bf16.msra.mxu1 %v20540_v28  ;;  %v19160_v28 = vld [vmem:[%s25958_s21 + $0x780] ss:$12 sps:$4 sm:$0xff]  }
 0x2b2   : > { %18382 = vmatprep.subr.bf16.mxu1 %v25946_v0 }
 0x2b4   : > { %15571 = vmatmul.mubr.msk.bf16.gmra.mxu1 %vm743_vm1, %v19108_v24 }
 0x2b5   : > { %18383 = vmatpush3.bf16.msra.mxu1 %v20541_v39  ;;  %18386 = vmatprep.mubr.msk.bf16.mxu1 %vm20552_vm0, %v25946_v0  ;;  %v19168_v39 = vld [vmem:[%s25958_s21 + $0x8a4] ss:$12 sps:$4 sm:$0xff]  }
 0x2b6   : > { %18384 = vmatprep.subr.bf16.mxu1 %v25946_v0 }
 0x2b9   : > { %18385 = vmatpush3.bf16.msra.mxu1 %v20542_v38  ;;  %v19170_v38 = vld [vmem:[%s25958_s21 + $0x888] ss:$12 sps:$4 sm:$0xff]  }
 0x2bc   : > { %18387 = vmatmul.mubr.msk.bf16.vlgmr.msra.gmra.mxu1 %vm743_vm1, %v19106_v61  ;;  %v19145_v61 = vld [vmem:[%s25958_s21 + $0x7c8] ss:$12 sps:$4 sm:$0xff]  }
 0x2bd   : > { %18390 = vmatprep.mubr.msk.bf16.mxu1 %vm20552_vm0, %v25946_v0  ;;  %4048 = vmatpush2.bf16.msra.mxu0 %v19145_v61 }
 0x2be   : > { %4049 = vmatprep.subr.bf16.mxu0 %v19150_v10 }
 0x2c1   : > { %4050 = vmatpush2.bf16.msra.mxu0 %v19148_v16 }
 0x2c2   : > { %4051 = vmatprep.subr.bf16.mxu0 %v19156_v17 }
 0x2c4   : > { %18391 = vmatmul.mubr.msk.bf16.gmra.mxu1 %vm743_vm1, %v19107_v59  ;;  %v19153_v59 = vld [vmem:[%s25958_s21 + $0x8ec] ss:$12 sps:$4 sm:$0xff]  }
 0x2c5   : > { %18394 = vmatprep.mubr.msk.bf16.mxu1 %vm20552_vm0, %v25946_v0  ;;  %4086 = vmatprep.subr.bf16.mxu1 %v19153_v59 }
 0x2c6   : > { %4087 = vmatpush1.bf16.msra.mxu1 %v19151_v13  ;;  %4052 = vmatpush2.bf16.msra.mxu0 %v19154_v18 }
 0x2c7   : > { %4088 = vmatprep.subr.bf16.mxu1 %v19159_v21  ;;  %4053 = vmatprep.subr.bf16.mxu0 %v19162_v31 }
 0x2ca   : > { %4054 = vmatpush2.bf16.msra.mxu0 %v19160_v28 }
 0x2cb   : > { %18398 = vmatprep.subr.bf16.mxu0 %v25946_v0 }
 0x2cc   : > { %18395 = vmatmul.mubr.msk.bf16.gmra.mxu1 %vm743_vm1, %v19108_v24  ;;  %v19157_v24 = vld [vmem:[%s25958_s21 + $0x8d0] ss:$12 sps:$4 sm:$0xff]  }
 0x2cd   : > { %4118 = vmatprep.mubr.bf16.mxu1 %v25948_v1  ;;  %4089 = vmatpush1.bf16.msra.mxu1 %v19157_v24 }
 0x2ce   : > { %4090 = vmatprep.subr.bf16.mxu1 %v19165_v34 }
 0x2d1   : > { %4091 = vmatpush1.bf16.msra.mxu1 %v19163_v37 }
 0x2d2   : > { %4092 = vmatprep.subr.bf16.mxu1 %v19168_v39 }
 0x2d5   : > { %4093 = vmatpush1.bf16.msra.mxu1 %v19166_v43 }
 0x2d6   : > { %4094 = vmatprep.subr.bf16.mxu1 %v19172_v53 }
 0x2d9   : > { %4095 = vmatpush1.bf16.msra.mxu1 %v19170_v38 }
 0x2da   : > { %4096 = vmatprep.subr.bf16.mxu1 %v19176_v55 }
 0x2dd   : > { %4097 = vmatpush1.bf16.msra.mxu1 %v19174_v46 }
 0x2de   : > { %4098 = vmatprep.subr.bf16.mxu1 %v19180_v4 }
 0x2e1   : > { %4099 = vmatpush1.bf16.msra.mxu1 %v19178_v3 }
 0x2e2   : > { %4100 = vmatprep.subr.bf16.mxu1 %v19184_v26 }
 0x2e5   : > { %4101 = vmatpush1.bf16.msra.mxu1 %v19182_v47 }
 0x2e6   : > { %17759 = vmatprep.subr.bf16.mxu1 %v19186_v20 }
 0x314   : > { %v3158_v6 = vpop.f32.mrf.mxu0 }
 0x316   : > { %v3160_v30 = vpop.f32.mrf.mxu0 }
 0x318   : > { %v3162_v49 = vpop.f32.mrf.mxu0 }
 0x31a   : > { %v21892_v14 = vpop.f32.mrf.mxu0 }
 0x31c   : > { %v3168_v7 = vpop.f32.mrf.mxu0 }
 0x31e   : > { %v3170_v32 = vpop.f32.mrf.mxu0 }
 0x320   : > { %v3172_v5 = vpop.f32.mrf.mxu0 }
 0x322   : > { %v21894_v23 = vpop.f32.mrf.mxu0 }
 0x324   : > { %v3178_v25 = vpop.f32.mrf.mxu0 }
 0x326   : > { %v3180_v36 = vpop.f32.mrf.mxu0 }
 0x328   : > { %v3182_v61 = vpop.f32.mrf.mxu0 }
 0x32a   : > { %v21899_v17 = vpop.f32.mrf.mxu0 }
 0x32c   : > { %v3221_v58 = vpop.f32.mrf.mxu1 }
 0x32d   : > { %v3222_v10 = vadd.f32 %v3221_v58, %v3158_v6 }
 0x32e   : > { %v3223_v16 = vpop.f32.mrf.mxu1 }
 0x32f   : > { %v21897_v59 = vadd.f32 %v3222_v10, %v21538_v57  ;;  %v3224_v13 = vadd.f32 %v3223_v16, %v3160_v30 }
 0x330   : > { %v3225_v18 = vpop.f32.mrf.mxu1 }
 0x331   : > { %v21902_v21 = vadd.f32 %v3224_v13, %v21541_v60  ;;  %v3226_v24 = vadd.f32 %v3225_v18, %v3162_v49 }
 0x332   : > { %v21904_v31 = vpop.f32.mrf.mxu1 }
 0x333   : > { %v21907_v28 = vadd.f32 %v3226_v24, %v21546_v2 }
 0x334   : > { %v3341_v34 = vpop.f32.mrf.mxu0  ;;  %v3231_v37 = vpop.f32.mrf.mxu1 }
 0x335   : > { %v3232_v39 = vadd.f32 %v3231_v37, %v3168_v7 }
 0x336   : > { %v18364_v43 = vpop.f32.mrf.mxu0  ;;  %v3233_v53 = vpop.f32.mrf.mxu1 }
 0x337   : > { %v21910_v57 = vadd.f32 %v3232_v39, %v21549_v42  ;;  %v3234_v38 = vadd.f32 %v3233_v53, %v3170_v32 }
 0x338   : > { %v3344_v55 = vpop.f32.mrf.mxu0  ;;  %v3235_v46 = vpop.f32.mrf.mxu1 }
 0x339   : > { %v21913_v60 = vadd.f32 %v3234_v38, %v21552_v11  ;;  %v3236_v4 = vadd.f32 %v3235_v46, %v3172_v5 }
 0x33a   : > { %v18365_v3 = vpop.f32.mrf.mxu0  ;;  %v21915_v26 = vpop.f32.mrf.mxu1 }
 0x33b   : > { %v21918_v2 = vadd.f32 %v3236_v4, %v21558_v15 }
 0x33c   : > { %v3349_v47 = vpop.f32.mrf.mxu0  ;;  %v3241_v20 = vpop.f32.mrf.mxu1 }
 0x33d   : > { %v3242_v6 = vadd.f32 %v3241_v20, %v3178_v25 }
 0x33e   : > { %v18368_v30 = vpop.f32.mrf.mxu0  ;;  %v3243_v49 = vpop.f32.mrf.mxu1 }
 0x33f   : > { %v21921_v42 = vadd.f32 %v3242_v6, %v21562_v33  ;;  %v3244_v7 = vadd.f32 %v3243_v49, %v3180_v36 }
 0x340   : > { %v3352_v32 = vpop.f32.mrf.mxu0  ;;  %v3245_v58 = vpop.f32.mrf.mxu1 }
 0x341   : > { %25960 = vst [vmem:[#allocation3_spill] sm:$0xff] %v21921_v42  ;;  %v21924_v11 = vadd.f32 %v3244_v7, %v21565_v51  ;;  %v3246_v5 = vadd.f32 %v3245_v58, %v3182_v61 }
 0x342   : > { %v18369_v10 = vpop.f32.mrf.mxu0  ;;  %v21929_v25 = vpop.f32.mrf.mxu1 }
 0x343   : > { %25961 = vst [vmem:[#allocation4_spill] sm:$0xff] %v21924_v11  ;;  %v21927_v16 = vadd.f32 %v3246_v5, %v21569_v54  ;;  %25963 = vst [vmem:[#allocation6_spill] sm:$0xff] %v21929_v25 }
 0x344   : > { %v3357_v15 = vpop.f32.mrf.mxu0 }
 0x345   : > { %25962 = vst [vmem:[#allocation5_spill] sm:$0xff] %v21927_v16 }
 0x346   : > { %v18372_v13 = vpop.f32.mrf.mxu0 }
 0x348   : > { %v3360_v18 = vpop.f32.mrf.mxu0 }
 0x34a   : > { %v18373_v24 = vpop.f32.mrf.mxu0 }
 0x34c   : > { %v17721_v37 = vpop.f32.mrf.mxu1 }
 0x34e   : > { %v17722_v33 = vpop.f32.mrf.mxu1 }
 0x34f   : > { %v17723_v39 = vadd.f32 %v17722_v33, %v17721_v37 }
 0x350   : > { %v17724_v36 = vpop.f32.mrf.mxu1 }
 0x351   : > { %v3342_v43 = vadd.f32 %v17723_v39, %v3341_v34 }
 0x352   : > { %v17725_v53 = vpop.f32.mrf.mxu1 }
 0x353   : > { %v21932_v51 = vadd.f32 %v3342_v43, %v21575_v45  ;;  %v17726_v61 = vadd.f32 %v17725_v53, %v17724_v36 }
 0x354   : > { %v17727_v38 = vpop.f32.mrf.mxu1 }
 0x355   : > { %v3345_v46 = vadd.f32 %v17726_v61, %v3344_v55 }
 0x356   : > { %v17728_v54 = vpop.f32.mrf.mxu1 }
 0x357   : > { %v21935_v4 = vadd.f32 %v3345_v46, %v21584_v9  ;;  %v17729_v3 = vadd.f32 %v17728_v54, %v17727_v38  ;;  %v19177_v46 = vld [vmem:[%s25958_s21 + $0x8c0] ss:$12 sps:$4 sm:$0xff]  }
 0x358   : > { %v17730_v20 = vpop.f32.mrf.mxu1 }
 0x359   : > { %v3350_v6 = vadd.f32 %v17729_v3, %v3349_v47 }
 0x35a   : > { %v17731_v30 = vpop.f32.mrf.mxu1 }
 0x35b   : > { %v21938_v49 = vadd.f32 %v3350_v6, %v21591_v12  ;;  %v17732_v7 = vadd.f32 %v17731_v30, %v17730_v20  ;;  %v19181_v6 = vld [vmem:[%s25958_s21 + $0x8a8] ss:$12 sps:$4 sm:$0xff]  }
 0x35c   : > { %v17733_v34 = vpop.f32.mrf.mxu1 }
 0x35d   : > { %v3353_v58 = vadd.f32 %v17732_v7, %v3352_v32 }
 0x35e   : > { %v17734_v5 = vpop.f32.mrf.mxu1 }
 0x35f   : > { %v21941_v45 = vadd.f32 %v3353_v58, %v21601_v29  ;;  %v17735_v10 = vadd.f32 %v17734_v5, %v17733_v34  ;;  %v19169_v29 = vld [vmem:[%s25958_s21 + $0x8f0] ss:$12 sps:$4 sm:$0xff]  }
 0x360   : > { %v17736_v55 = vpop.f32.mrf.mxu1  ;;  %v19185_v58 = vld [vmem:[%s25958_s21 + $0x890] ss:$12 sps:$4 sm:$0xff]  }
 0x361   : > { %v3358_v13 = vadd.f32 %v17735_v10, %v3357_v15 }
 0x362   : > { %v17737_v24 = vpop.f32.mrf.mxu1 }
 0x363   : > { %v21944_v9 = vadd.f32 %v3358_v13, %v21609_v50  ;;  %v17738_v37 = vadd.f32 %v17737_v24, %v17736_v55  ;;  %v19187_v13 = vld [vmem:[%s25958_s21 + $0x878] ss:$12 sps:$4 sm:$0xff]  }
 0x364   : > { %v3447_v47 = vpop.f32.mrf.mxu1 }
 0x365   : > { %25964 = vst [vmem:[#allocation7_spill] sm:$0xff] %v21944_v9  ;;  %v3361_v33 = vadd.f32 %v17738_v37, %v3360_v18  ;;  %v19188_v37 = vld [vmem:[%s25958_s21 + $0x770] ss:$12 sps:$4 sm:$0xff]  }
 0x366   : > { %v3449_v39 = vpop.f32.mrf.mxu1 }
 0x367   : > { %v21947_v12 = vadd.f32 %v3361_v33, %v21619_v41  ;;  %v19173_v41 = vld [vmem:[%s25958_s21 + $0x8d8] ss:$12 sps:$4 sm:$0xff]  }
 0x368   : > { %v3451_v36 = vpop.f32.mrf.mxu1  ;;  %v19189_v33 = vld [vmem:[%s25958_s21 + $0x818] ss:$12 sps:$4 sm:$0xff]  }
 0x369   : > { %25965 = vst [vmem:[#allocation8_spill] sm:$0xff] %v21947_v12  ;;  %v21954_v15 = vpack.c.bf16 %v3451_v36, %v3447_v47  ;;  %v19190_v36 = vld [vmem:[%s25958_s21 + $0x860] ss:$12 sps:$4 sm:$0xff]  }
 0x36a   : > { %v3453_v32 = vpop.f32.mrf.mxu1 }
 0x36b   : > { %v21949_v43 = vpack.c.bf16 %v3453_v32, %v3449_v39 }
 0x36c   : > { %v3457_v53 = vpop.f32.mrf.mxu1 }
 0x36d   : > { %4055 = vmatprep.mubr.bf16.mxu0 %v21949_v43 }
 0x36e   : > { %v3459_v50 = vpop.f32.mrf.mxu1  ;;  %4056 = vmatmul.mubr.bf16.vlgmr.msra.gmra.mxu0 %v21954_v15 }
 0x36f   : > { %18399 = vmatpush3.bf16.msra.mxu0 %v19169_v29  ;;  %v19191_v29 = vld [vmem:[%s25958_s21 + $0x758] ss:$12 sps:$4 sm:$0xff]  }
 0x370   : > { %v3461_v18 = vpop.f32.mrf.mxu1  ;;  %18400 = vmatprep.subr.bf16.mxu0 %v25946_v0 }
 0x371   : > { %v21967_v54 = vpack.c.bf16 %v3461_v18, %v3457_v53  ;;  %v19192_v53 = vld [vmem:[%s25958_s21 + $0x800] ss:$12 sps:$4 sm:$0xff]  }
 0x372   : > { %v3463_v61 = vpop.f32.mrf.mxu1 }
 0x373   : > { %v21962_v38 = vpack.c.bf16 %v3463_v61, %v3459_v50  ;;  %18401 = vmatpush3.bf16.msra.mxu0 %v19173_v41  ;;  %v19193_v41 = vld [vmem:[%s25958_s21 + $0x848] ss:$12 sps:$4 sm:$0xff]   ;;  %v19194_v61 = vld [vmem:[%s25958_s21 + $0x740] ss:$12 sps:$4 sm:$0xff]  }
 0x374   : > { %v3467_v3 = vpop.f32.mrf.mxu1  ;;  %18402 = vmatprep.subr.bf16.mxu0 %v25946_v0 }
 0x375   : > { %4065 = vmatprep.mubr.bf16.mxu0 %v21962_v38 }
 0x376   : > { %v3469_v20 = vpop.f32.mrf.mxu1  ;;  %4066 = vmatmul.mubr.bf16.gmra.mxu0 %v21967_v54 }
 0x377   : > { %18403 = vmatpush3.bf16.msra.mxu0 %v19177_v46 }
 0x378   : > { %v3471_v30 = vpop.f32.mrf.mxu1  ;;  %18404 = vmatprep.subr.bf16.mxu0 %v25946_v0 }
 0x379   : > { %v21981_v5 = vpack.c.bf16 %v3471_v30, %v3467_v3  ;;  %v19195_v3 = vld [vmem:[%s25958_s21 + $0x7e8] ss:$12 sps:$4 sm:$0xff]  }
 0x37a   : > { %v3473_v7 = vpop.f32.mrf.mxu1  ;;  %v19196_v30 = vld [vmem:[%s25958_s21 + $0x728] ss:$12 sps:$4 sm:$0xff]  }
 0x37b   : > { %v21976_v34 = vpack.c.bf16 %v3473_v7, %v3469_v20  ;;  %18405 = vmatpush3.bf16.msra.mxu0 %v19181_v6  ;;  %v19197_v7 = vld [vmem:[%s25958_s21 + $0x7d0] ss:$12 sps:$4 sm:$0xff]  }
 0x37c   : > { %v3510_v10 = vpop.f32.mrf.mxu1  ;;  %18406 = vmatprep.subr.bf16.mxu0 %v25946_v0 }
 0x37d   : > { %4075 = vmatprep.mubr.bf16.mxu0 %v21976_v34 }
 0x37e   : > { %v18388_v55 = vpop.f32.mrf.mxu1  ;;  %4076 = vmatmul.mubr.bf16.gmra.mxu0 %v21981_v5 }
 0x37f   : > { %18407 = vmatpush3.bf16.msra.mxu0 %v19185_v58  ;;  %18414 = vmatprep.mubr.msk.bf16.mxu0 %vm20552_vm0, %v25946_v0  ;;  %v19198_v55 = vld [vmem:[%s25958_s21 + $0x710] ss:$12 sps:$4 sm:$0xff]  }
 0x380   : > { %v3513_v24 = vpop.f32.mrf.mxu1  ;;  %18408 = vmatprep.subr.bf16.mxu0 %v25946_v0 }
 0x381   : > { %v3535_v47 = vpack.c.bf16 %v3513_v24, %v3510_v10  ;;  %v19199_v24 = vld [vmem:[%s25958_s21 + $0x7b8] ss:$12 sps:$4 sm:$0xff]  }
 0x382   : > { %v18389_v39 = vpop.f32.mrf.mxu1 }
 0x383   : > { %18409 = vmatpush3.bf16.msra.mxu0 %v19187_v13  ;;  %4119 = vmatmul.mubr.bf16.vlgmr.msra.gmra.mxu1 %v3535_v47  ;;  %v19202_v39 = vld [vmem:[%s25958_s21 + $0x6e0] ss:$12 sps:$4 sm:$0xff]  }
 0x384   : > { %17760 = vmatpush3.bf16.msra.mxu1 %v19188_v37  ;;  %v3518_v32 = vpop.f32.mrf.mxu1  ;;  %18410 = vmatprep.subr.bf16.mxu0 %v25946_v0 }
 0x385   : > { %17761 = vmatprep.subr.bf16.mxu1 %v19189_v33  ;;  %4128 = vmatprep.mubr.bf16.mxu1 %v25948_v1  ;;  %v19201_v33 = vld [vmem:[%s25958_s21 + $0x7a0] ss:$12 sps:$4 sm:$0xff]  }
 0x386   : > { %v18392_v50 = vpop.f32.mrf.mxu1 }
 0x387   : > { %18411 = vmatpush3.bf16.msra.mxu0 %v19190_v36  ;;  %v19204_v36 = vld [vmem:[%s25958_s21 + $0x6c8] ss:$12 sps:$4 sm:$0xff]  }
 0x388   : > { %17762 = vmatpush3.bf16.msra.mxu1 %v19191_v29  ;;  %v3521_v18 = vpop.f32.mrf.mxu1  ;;  %18412 = vmatprep.subr.bf16.mxu0 %v25946_v0 }
 0x389   : > { %v3538_v46 = vpack.c.bf16 %v3521_v18, %v3518_v32  ;;  %17763 = vmatprep.subr.bf16.mxu1 %v19192_v53 }
 0x38a   : > { %v18393_v20 = vpop.f32.mrf.mxu1 }
 0x38b   : > { %18413 = vmatpush3.bf16.msra.mxu0 %v19193_v41  ;;  %4129 = vmatmul.mubr.bf16.gmra.mxu1 %v3538_v46 }
 0x38c   : > { %17764 = vmatpush3.bf16.msra.mxu1 %v19194_v61  ;;  %v3526_v6 = vpop.f32.mrf.mxu1  ;;  %4138 = vmatprep.mubr.bf16.mxu1 %v25948_v1 }
 0x38d   : > { %17765 = vmatprep.subr.bf16.mxu1 %v19195_v3 }
 0x38e   : > { %18415 = vmatmul.mubr.bf16.vlgmr.msra.gmra.mxu0 %v3535_v47  ;;  %v18396_v58 = vpop.f32.mrf.mxu1  ;;  %v19200_v47 = vld [vmem:[%s25958_s21 + $0x6f8] ss:$12 sps:$4 sm:$0xff]  }
 0x38f   : > { %18418 = vmatprep.mubr.msk.bf16.mxu0 %vm20552_vm0, %v25946_v0 }
 0x390   : > { %17766 = vmatpush3.bf16.msra.mxu1 %v19196_v30  ;;  %v3529_v10 = vpop.f32.mrf.mxu1 }
 0x391   : > { %v3541_v13 = vpack.c.bf16 %v3529_v10, %v3526_v6  ;;  %17767 = vmatprep.subr.bf16.mxu1 %v19197_v7 }
 0x392   : > { %v18397_v37 = vpop.f32.mrf.mxu1 }
 0x393   : > { %4139 = vmatmul.mubr.bf16.gmra.mxu1 %v3541_v13 }
 0x394   : > { %17768 = vmatpush3.bf16.msra.mxu1 %v19198_v55  ;;  %4181 = vmatprep.mubr.bf16.mxu1 %v21949_v43  ;;  %v19203_v43 = vld [vmem:[%s25958_s21 + $0x788] ss:$12 sps:$4 sm:$0xff]  }
 0x395   : > { %17769 = vmatprep.subr.bf16.mxu1 %v19199_v24 }
 0x396   : > { %18419 = vmatmul.mubr.bf16.gmra.mxu0 %v3538_v46 }
 0x397   : > { %18422 = vmatprep.mubr.msk.bf16.mxu0 %vm20552_vm0, %v25946_v0  ;;  %v25950_v0 = vlaneseq }
 0x398   : > { %17770 = vmatpush3.bf16.msra.mxu1 %v19200_v47 }
 0x399   : > { %17771 = vmatprep.subr.bf16.mxu1 %v19201_v33 }
 0x39c   : > { %17772 = vmatpush3.bf16.msra.mxu1 %v19202_v39 }
 0x39d   : > { %17773 = vmatprep.subr.bf16.mxu1 %v19203_v43 }
 0x39e   : > { %18423 = vmatmul.mubr.bf16.gmra.mxu0 %v3541_v13 }
 0x39f   : > { %4538 = vmatprep.mubr.bf16.mxu0 %v25948_v1 }
 0x3a0   : > { %17774 = vmatpush3.bf16.msra.mxu1 %v19204_v36 }
 0x3a3   : > { %4182 = vmatmul.mubr.bf16.vlgmr.msra.gmra.mxu1 %v21954_v15 }
 0x3a4   : > { %4189 = vmatprep.mubr.bf16.mxu1 %v21962_v38 }
 0x3ab   : > { %4190 = vmatmul.mubr.bf16.gmra.mxu1 %v21967_v54 }
 0x3ac   : > { %4197 = vmatprep.mubr.bf16.mxu1 %v21976_v34 }
 0x3b3   : > { %4198 = vmatmul.mubr.bf16.gmra.mxu1 %v21981_v5 }
 0x3b4   : > { %4755 = vmatprep.mubr.bf16.mxu1 %v25948_v1 }
 0x42e   : > { %v4057_v32 = vpop.f32.mrf.mxu0 }
 0x430   : > { %v4059_v29 = vpop.f32.mrf.mxu0 }
 0x432   : > { %v4061_v53 = vpop.f32.mrf.mxu0 }
 0x434   : > { %v4063_v50 = vpop.f32.mrf.mxu0 }
 0x436   : > { %v22059_v41 = vpop.f32.mrf.mxu0 }
 0x438   : > { %v22061_v18 = vpop.f32.mrf.mxu0 }
 0x43a   : > { %v22063_v61 = vpop.f32.mrf.mxu0 }
 0x43c   : > { %v22065_v15 = vpop.f32.mrf.mxu0 }
 0x43e   : > { %v22067_v38 = vpop.f32.mrf.mxu0 }
 0x440   : > { %v22069_v34 = vpop.f32.mrf.mxu0 }
 0x442   : > { %v22071_v3 = vpop.f32.mrf.mxu0 }
 0x443   : > { %v4120_v54 = vpop.f32.mrf.mxu1  ;;  %25966 = vst [vmem:[#allocation9_spill] sm:$0xff] %v22071_v3 }
 0x444   : > { %v22073_v30 = vpop.f32.mrf.mxu0 }
 0x445   : > { %v4122_v5 = vpop.f32.mrf.mxu1  ;;  %25967 = vst [vmem:[#allocation10_spill] sm:$0xff] %v22073_v30 }
 0x446   : > { %v4123_v9 = vadd.f32 %v4122_v5, %v4059_v29 }
 0x447   : > { %v4124_v46 = vpop.f32.mrf.mxu1 }
 0x449   : > { %v4126_v20 = vpop.f32.mrf.mxu1 }
 0x44b   : > { %v4130_v6 = vpop.f32.mrf.mxu1 }
 0x44d   : > { %v22075_v7 = vpop.f32.mrf.mxu1 }
 0x44e   : > { %v4240_v58 = vpop.f32.mrf.mxu0 }
 0x44f   : > { %v22077_v10 = vpop.f32.mrf.mxu1 }
 0x450   : > { %v18416_v55 = vpop.f32.mrf.mxu0 }
 0x451   : > { %v22079_v13 = vpop.f32.mrf.mxu1  ;;  %v22092_v55 = vshrl.u32 %v25950_v0, 7  ;;  %v2284_v0 = vadd.f32 %v21544_v63, %v1723_v56 }
 0x452   : > { %v4243_v24 = vpop.f32.mrf.mxu0 }
 0x453   : > { %v22081_v47 = vpop.f32.mrf.mxu1  ;;  %25969 = vst [vmem:[#allocation12_spill] sm:$0xff] %v22092_v55  ;;  %v22104_v42 = vsub.s32 0, %v22092_v55  ;;  %v22110_v5 = vsub.s32 2, %v22092_v55  ;;  %v2347_v63 = vadd.f32 %v21531_v35, %v2284_v0 }
 0x454   : > { %v18417_v37 = vpop.f32.mrf.mxu0 }
 0x455   : > { %v22083_v43 = vpop.f32.mrf.mxu1  ;;  %v22095_v37 = vsub.s32 1, %v22092_v55 }
 0x456   : > { %v4248_v33 = vpop.f32.mrf.mxu0 }
 0x457   : > { %v22087_v12 = vpop.f32.mrf.mxu1 }
 0x458   : > { %v18420_v39 = vpop.f32.mrf.mxu0  ;;  %25968 = vst [vmem:[#allocation11_spill] sm:$0xff] %v22087_v12 }
 0x459   : > { %v22097_v30 = vpop.f32.mrf.mxu1 }
 0x45a   : > { %v22085_v36 = vpop.f32.mrf.mxu0  ;;  %25970 = vst [vmem:[#allocation13_spill] sm:$0xff] %v22097_v30 }
 0x45c   : > { %v18421_v1 = vpop.f32.mrf.mxu0 }
 0x45d   : > { %v4121_v1 = vadd.f32 %v4120_v54, %v4057_v32  ;;  %v3228_v32 = vadd.f32 %v21904_v31, %v21892_v14 }
 0x45e   : > { %v22089_v16 = vpop.f32.mrf.mxu0 }
 0x45f   : > { %v4263_v54 = vadd.f32 %v4121_v1, %v21897_v59  ;;  %v3368_v59 = vadd.f32 %v3228_v32, %v2347_v63 }
 0x460   : > { %v18424_v11 = vpop.f32.mrf.mxu0 }
 0x461   : > { %v4281_v11 = vld [vmem:[%s25972_s23] sm:$0x7] }
 0x462   : > { %v22099_v39 = vpop.f32.mrf.mxu0  ;;  %v22115_v30 = vrot.slane %v4281_v11, %v22095_v37  ;;  %v22121_v3 = vrot.slane %v4281_v11, %v22104_v42  ;;  %v22124_v56 = vrot.slane %v4281_v11, %v22110_v5 }
 0x463   : > { %25971 = vst [vmem:[#allocation14_spill] sm:$0xff] %v22099_v39  ;;  %v17775_v12 = vpop.f32.mrf.mxu1  ;;  %v4264_v39 = vadd.f32 %v4123_v9, %v21902_v21  ;;  %v4127_v9 = vadd.f32 %v4126_v20, %v4063_v50  ;;  %v4131_v20 = vadd.f32 %v4130_v6, %v22059_v41 }
 0x464   : > { %v18425_v29 = vpop.f32.mrf.mxu0  ;;  %v22132_v1 = vadd.f32 %v22121_v3, %v4263_v54 }
 0x465   : > { %v17776_v8 = vpop.f32.mrf.mxu1  ;;  %v4125_v29 = vadd.f32 %v4124_v46, %v4061_v53  ;;  %v22128_v21 = vadd.f32 %v22115_v30, %v4264_v39  ;;  %v4267_v50 = vadd.f32 %v4127_v9, %v3368_v59  ;;  %v4269_v54 = vadd.f32 %v4131_v20, %v21910_v57 }
 0x466   : > { %v17777_v22 = vadd.f32 %v17776_v8, %v17775_v12 }
 0x467   : > { %v17778_v55 = vpop.f32.mrf.mxu1  ;;  %v4266_v53 = vadd.f32 %v4125_v29, %v21907_v28  ;;  %v4316_v35 = vadd.f32 %v22128_v21, %v22132_v1  ;;  %v1733_v28 = vadd.f32 %v21476_v19, %v21488_v27 }
 0x468   : > { %v4241_v25 = vadd.f32 %v17777_v22, %v4240_v58 }
 0x469   : > { %v17779_v12 = vpop.f32.mrf.mxu1  ;;  %v22147_v11 = vadd.f32 %v22121_v3, %v4266_v53  ;;  %v2294_v32 = vadd.f32 %v21555_v40, %v1733_v28 }
 0x46a   : > { %v4265_v14 = vadd.f32 %v4241_v25, %v21932_v51  ;;  %v17780_v31 = vadd.f32 %v17779_v12, %v17778_v55 }
 0x46b   : > { %v17781_v46 = vpop.f32.mrf.mxu1 }
 0x46c   : > { %v22136_v58 = vadd.f32 %v22124_v56, %v4265_v14  ;;  %v4244_v0 = vadd.f32 %v17780_v31, %v4243_v24  ;;  %v4133_v24 = vadd.f32 %v22075_v7, %v22061_v18  ;;  %v3238_v18 = vadd.f32 %v21915_v26, %v21894_v23 }
 0x46d   : > { %v17782_v25 = vpop.f32.mrf.mxu1  ;;  %v2357_v14 = vadd.f32 %v21533_v44, %v2294_v32  ;;  %v4137_v23 = vadd.f32 %v22079_v13, %v22065_v15  ;;  %v25979_v32 = vld [vmem:[#allocation13_spill] sm:$0xff] }
 0x46e   : > { %v4318_v51 = vsel %vm4317_vm2, %v22136_v58, 0.0  ;;  %v4268_v55 = vadd.f32 %v4244_v0, %v21935_v4  ;;  %v17783_v39 = vadd.f32 %v17782_v25, %v17781_v46  ;;  %v22156_v4 = vadd.f32 %v22115_v30, %v4267_v50 }
 0x46f   : > { %v4319_v8 = vadd.f32 %v4318_v51, %v4316_v35  ;;  %v17784_v22 = vpop.f32.mrf.mxu1  ;;  %v4270_v7 = vadd.f32 %v4133_v24, %v21913_v60  ;;  %v3374_v31 = vadd.f32 %v3238_v18, %v2357_v14  ;;  %v1743_v46 = vadd.f32 %v21514_v48, %v21519_v52 }
 0x470   : > { %v22152_v41 = vadd.f32 %v22124_v56, %v4268_v55  ;;  %v4249_v6 = vadd.f32 %v17783_v39, %v4248_v33  ;;  %v4135_v33 = vadd.f32 %v22077_v10, %v22063_v61  ;;  %v4141_v0 = vadd.f32 %v22081_v47, %v22067_v38  ;;  %v25974_v47 = vld [vmem:[#allocation9_spill] sm:$0xff]  ;;  %v25975_v55 = vld [vmem:[#allocation11_spill] sm:$0xff] }
 0x471   : > { %v4320_v19 = vadd.f32 %v4319_v8, %v22147_v11  ;;  %v17785_v27 = vpop.f32.mrf.mxu1  ;;  %v22180_v59 = vadd.f32 %v22115_v30, %v4270_v7  ;;  %v4273_v13 = vadd.f32 %v4137_v23, %v3374_v31  ;;  %v2304_v20 = vadd.f32 %v21572_v62, %v1743_v46  ;;  %v25982_v7 = vld [vmem:[#allocation5_spill] sm:$0xff] }
 0x472   : > { %v4271_v29 = vadd.f32 %v4249_v6, %v21938_v49  ;;  %v17786_v63 = vadd.f32 %v17785_v27, %v17784_v22  ;;  %v4322_v57 = vsel %vm4317_vm2, %v22152_v41, 0.0  ;;  %v22172_v49 = vadd.f32 %v22121_v3, %v4269_v54  ;;  %v25977_v6 = vld [vmem:[#allocation2_spill] sm:$0xff]  ;;  %v25981_v27 = vld [vmem:[#allocation4_spill] sm:$0xff] }
 0x473   : > { %v4321_v40 = vadd.f32 %v4320_v19, %v22156_v4  ;;  %v17787_v9 = vpop.f32.mrf.mxu1  ;;  %v4143_v48 = vadd.f32 %v22083_v43, %v22069_v34  ;;  %v4145_v39 = vadd.f32 %v25975_v55, %v25974_v47  ;;  %v22207_v24 = vadd.f32 %v22115_v30, %v4273_v13  ;;  %v25978_v43 = vld [vmem:[#allocation10_spill] sm:$0xff] }
 0x474   : > { %v4252_v12 = vadd.f32 %v17786_v63, %v22085_v36  ;;  %v22177_v61 = vadd.f32 %v22124_v56, %v4271_v29  ;;  %v4272_v36 = vadd.f32 %v4135_v33, %v21918_v2  ;;  %v2367_v34 = vadd.f32 %v25977_v6, %v2304_v20 }
 0x475   : > { %v4323_v60 = vadd.f32 %v4322_v57, %v4321_v40  ;;  %v17788_v26 = vpop.f32.mrf.mxu1  ;;  %v4147_v54 = vadd.f32 %v25979_v32, %v25978_v43  ;;  %v4276_v29 = vadd.f32 %v4143_v48, %v25981_v27  ;;  %v4278_v33 = vadd.f32 %v4145_v39, %v25982_v7 }
 0x476   : > { %v17789_v10 = vadd.f32 %v17788_v26, %v17787_v9  ;;  %v4274_v15 = vadd.f32 %v4252_v12, %v21941_v45  ;;  %v4326_v2 = vsel %vm4317_vm2, %v22177_v61, 0.0  ;;  %v22195_v51 = vadd.f32 %v22121_v3, %v4272_v36  ;;  %v25973_v45 = vld [vmem:[#allocation6_spill] sm:$0xff]  ;;  %v25984_v36 = vld [vmem:[#allocation8_spill] sm:$0xff] }
 0x477   : > { %v4324_v44 = vadd.f32 %v4323_v60, %v22172_v49  ;;  %v17790_v53 = vpop.f32.mrf.mxu1  ;;  %v3248_v38 = vadd.f32 %v25973_v45, %v21899_v17  ;;  %v25980_v17 = vld [vmem:[#allocation7_spill] sm:$0xff]  ;;  %v25983_v9 = vld [vmem:[#allocation14_spill] sm:$0xff]  ;;  %v22228_v26 = vadd.f32 %v22115_v30, %v4276_v29  ;;  %v22232_v31 = vadd.f32 %v22121_v3, %v4278_v33 }
 0x478   : > { %v4257_v25 = vadd.f32 %v17789_v10, %v22089_v16  ;;  %v22204_v62 = vadd.f32 %v22124_v56, %v4274_v15  ;;  %v25976_v16 = vld [vmem:[#allocation3_spill] sm:$0xff] }
 0x479   : > { %v4325_v35 = vadd.f32 %v4324_v44, %v22180_v59  ;;  %v17791_v50 = vpop.f32.mrf.mxu1  ;;  %v4275_v8 = vadd.f32 %v4141_v0, %v25976_v16  ;;  %v3380_v18 = vadd.f32 %v3248_v38, %v2367_v34 }
 0x47a   : > { %v17792_v28 = vadd.f32 %v17791_v50, %v17790_v53  ;;  %v4277_v19 = vadd.f32 %v4257_v25, %v25980_v17  ;;  %v4330_v40 = vsel %vm4317_vm2, %v22204_v62, 0.0 }
 0x47b   : > { %v4327_v52 = vadd.f32 %v4326_v2, %v4325_v35  ;;  %v22222_v12 = vadd.f32 %v22121_v3, %v4275_v8  ;;  %v4279_v23 = vadd.f32 %v4147_v54, %v3380_v18  ;;  %v4337_v35 = vsel %vm4336_vm3, %v22232_v31, 0.0 }
 0x47c   : > { %v4260_v57 = vadd.f32 %v17792_v28, %v25983_v9  ;;  %v22225_v60 = vadd.f32 %v22124_v56, %v4277_v19 }
 0x47d   : > { %v4328_v22 = vadd.f32 %v4327_v52, %v22195_v51  ;;  %v22237_v46 = vadd.f32 %v22115_v30, %v4279_v23 }
 0x47e   : > { %v4280_v44 = vadd.f32 %v4260_v57, %v25984_v36  ;;  %v4334_v15 = vsel %vm4317_vm2, %v22225_v60, 0.0 }
 0x47f   : > { %v4329_v63 = vadd.f32 %v4328_v22, %v22207_v24  ;;  %v4339_v50 = vsel %vm4336_vm3, %v22237_v46, 0.0 }
 0x480   : > { %v22242_v0 = vadd.f32 %v22124_v56, %v4280_v44 }
 0x481   : > { %v4331_v14 = vadd.f32 %v4330_v40, %v4329_v63 }
 0x482   : > { %v4342_v30 = vsel %vm4341_vm4, %v22242_v0, 0.0 }
 0x483   : > { %v4332_v10 = vadd.f32 %v4331_v14, %v22222_v12 }
 0x485   : > { %v4333_v53 = vadd.f32 %v4332_v10, %v22228_v26 }
 0x487   : > { %v4335_v13 = vadd.f32 %v4334_v15, %v4333_v53 }
 0x489   : > { %v4338_v3 = vadd.f32 %v4337_v35, %v4335_v13 }
 0x48b   : > { %v4340_v20 = vadd.f32 %v4339_v50, %v4338_v3 }
 0x48d   : > { %v4343_v2 = vadd.f32 %v4342_v30, %v4340_v20 }
 0x48f   : > { %4344 = vadd.xlane.f32.xlu0 %v4343_v2 }
 0x518   : > { %v4345_v25 = vpop.xlane.xlu0 %4344 }
 0x519   : > { %v4346_v48 = vrot.slane %v4345_v25, 4 }
 0x51b   : > { %v4347_v52 = vadd.f32 %v4346_v48, %v4345_v25 }
 0x51d   : > { %v4348_v45 = vrot.slane %v4347_v52, 2 }
 0x51f   : > { %v4349_v56 = vadd.f32 %v4348_v45, %v4347_v52 }
 0x521   : > { %v4350_v38 = vrot.slane %v4349_v56, 1 }
 0x523   : > { %v4351_v47 = vadd.f32 %v4350_v38, %v4349_v56 }
 0x525   : > { %18736 = vpush %v4351_v47 }
 0x556   : > { %s18737_s24 = spop %18736 }
 0x557   : > { %s4353_s3 = smul.f32 5.658669e-05, %s18737_s24 }
 0x559   : > { %v4354_v55 = vstv %s4353_s3 }
 0x55a   : > { %v22251_v39 = vsub.f32 %v22132_v1, %v4354_v55  ;;  %v22254_v28 = vsub.f32 %v22128_v21, %v4354_v55  ;;  %v22257_v16 = vsub.f32 %v22136_v58, %v4354_v55  ;;  %v22266_v34 = vsub.f32 %v22147_v11, %v4354_v55 }
 0x55b   : > { %v22269_v1 = vsub.f32 %v22152_v41, %v4354_v55  ;;  %v22272_v21 = vsub.f32 %v22156_v4, %v4354_v55  ;;  %v22280_v19 = vsub.f32 %v22172_v49, %v4354_v55  ;;  %v22285_v4 = vsub.f32 %v22177_v61, %v4354_v55 }
 0x55c   : > { %v4373_v8 = vmul.f32 %v22251_v39, %v22251_v39  ;;  %v4374_v22 = vmul.f32 %v22254_v28, %v22254_v28  ;;  %v4375_v6 = vmul.f32 %v22257_v16, %v22257_v16  ;;  %v4376_v32 = vmul.f32 %v22266_v34, %v22266_v34 }
 0x55d   : > { %v4378_v17 = vmul.f32 %v22269_v1, %v22269_v1  ;;  %v4377_v11 = vmul.f32 %v22272_v21, %v22272_v21  ;;  %v22288_v27 = vsub.f32 %v22180_v59, %v4354_v55  ;;  %v4379_v18 = vmul.f32 %v22280_v19, %v22280_v19 }
 0x55e   : > { %v4391_v58 = vadd.f32 %v4374_v22, %v4373_v8  ;;  %v4392_v43 = vsel %vm4317_vm2, %v4375_v6, 0.0  ;;  %v4381_v49 = vmul.f32 %v22285_v4, %v22285_v4  ;;  %v22296_v33 = vsub.f32 %v22195_v51, %v4354_v55 }
 0x55f   : > { %v4396_v63 = vsel %vm4317_vm2, %v4378_v17, 0.0  ;;  %v4380_v61 = vmul.f32 %v22288_v27, %v22288_v27  ;;  %v22301_v59 = vsub.f32 %v22204_v62, %v4354_v55  ;;  %v4365_v9 = vsub.f32 %v22207_v24, %v4354_v55 }
 0x560   : > { %v4393_v54 = vadd.f32 %v4392_v43, %v4391_v58  ;;  %v4400_v14 = vsel %vm4317_vm2, %v4381_v49, 0.0  ;;  %v4382_v23 = vmul.f32 %v22296_v33, %v22296_v33  ;;  %v4367_v36 = vsub.f32 %v22222_v12, %v4354_v55 }
 0x561   : > { %v4384_v51 = vmul.f32 %v22301_v59, %v22301_v59  ;;  %v4383_v44 = vmul.f32 %v4365_v9, %v4365_v9  ;;  %v4369_v15 = vsub.f32 %v22225_v60, %v4354_v55  ;;  %v4368_v62 = vsub.f32 %v22228_v26, %v4354_v55 }
 0x562   : > { %v4394_v41 = vadd.f32 %v4393_v54, %v4376_v32  ;;  %v4370_v24 = vsub.f32 %v22232_v31, %v4354_v55  ;;  %v4385_v3 = vmul.f32 %v4367_v36, %v4367_v36  ;;  %v4371_v20 = vsub.f32 %v22237_v46, %v4354_v55 }
 0x563   : > { %v4404_v35 = vsel %vm4317_vm2, %v4384_v51, 0.0  ;;  %v4387_v30 = vmul.f32 %v4369_v15, %v4369_v15  ;;  %v4386_v2 = vmul.f32 %v4368_v62, %v4368_v62  ;;  %v4372_v12 = vsub.f32 %v22242_v0, %v4354_v55 }
 0x564   : > { %v4395_v29 = vadd.f32 %v4394_v41, %v4377_v11  ;;  %v4388_v48 = vmul.f32 %v4370_v24, %v4370_v24  ;;  %v4389_v45 = vmul.f32 %v4371_v20, %v4371_v20 }
 0x565   : > { %v4408_v60 = vsel %vm4317_vm2, %v4387_v30, 0.0  ;;  %v4390_v56 = vmul.f32 %v4372_v12, %v4372_v12 }
 0x566   : > { %v4397_v7 = vadd.f32 %v4396_v63, %v4395_v29  ;;  %v4410_v31 = vsel %vm4336_vm3, %v4388_v48, 0.0  ;;  %v4412_v47 = vsel %vm4336_vm3, %v4389_v45, 0.0 }
 0x567   : > { %v4414_v46 = vsel %vm4341_vm4, %v4390_v56, 0.0  ;;  %vm12185_vm4 = vcmask 523264  }
 0x568   : > { %v4398_v40 = vadd.f32 %v4397_v7, %v4379_v18  ;;  %v20554_v18 = vmov 65535  }
 0x569   : > { %v4495_v7 = vsel %vm4336_vm3, 4294967295, %v20554_v18 }
 0x56a   : > { %v4399_v57 = vadd.f32 %v4398_v40, %v4380_v61 }
 0x56c   : > { %v4401_v10 = vadd.f32 %v4400_v14, %v4399_v57 }
 0x56e   : > { %v4402_v53 = vadd.f32 %v4401_v10, %v4382_v23 }
 0x570   : > { %v4403_v13 = vadd.f32 %v4402_v53, %v4383_v44  ;;  %v4496_v44 = vsel %vm4494_vm5, %v4495_v7, 0  ;;  %v19218_v7 = vld [vmem:[%s25929_s5 + $0x294] ss:$12 sps:$4 sm:$0xff]   ;;  %vm13570_vm5 = vcmask 1040384  }
 0x572   : > { %v4405_v50 = vadd.f32 %v4404_v35, %v4403_v13 }
 0x574   : > { %v4406_v25 = vadd.f32 %v4405_v50, %v4385_v3 }
 0x576   : > { %v4407_v52 = vadd.f32 %v4406_v25, %v4386_v2 }
 0x578   : > { %v4409_v26 = vadd.f32 %v4408_v60, %v4407_v52 }
 0x57a   : > { %v4411_v38 = vadd.f32 %v4410_v31, %v4409_v26 }
 0x57c   : > { %v4413_v8 = vadd.f32 %v4412_v47, %v4411_v38 }
 0x57e   : > { %v4415_v22 = vadd.f32 %v4414_v46, %v4413_v8 }
 0x580   : > { %4416 = vadd.xlane.f32.xlu0 %v4415_v22 }
 0x609   : > { %v4417_v6 = vpop.xlane.xlu0 %4416 }
 0x60a   : > { %v4418_v58 = vrot.slane %v4417_v6, 4 }
 0x60c   : > { %v4419_v0 = vadd.f32 %v4418_v58, %v4417_v6  ;;  %v19209_v58 = vld [vmem:[%s25929_s5 + $0x2dc] ss:$12 sps:$4 sm:$0xff]  }
 0x60e   : > { %v4420_v55 = vrot.slane %v4419_v0, 2 }
 0x610   : > { %v4421_v43 = vadd.f32 %v4420_v55, %v4419_v0  ;;  %v19214_v55 = vld [vmem:[%s25929_s5 + $0x2c8] ss:$12 sps:$4 sm:$0xff]  }
 0x612   : > { %v4422_v32 = vrot.slane %v4421_v43, 1 }
 0x614   : > { %v4423_v54 = vadd.f32 %v4422_v32, %v4421_v43  ;;  %v25985_v43 = vmov 0   ;;  %v19212_v32 = vld [vmem:[%s25929_s5 + $0x2c4] ss:$12 sps:$4 sm:$0xff]  }
 0x616   : > { %18738 = vpush %v4423_v54 }
 0x647   : > { %s18739_s26 = spop %18738 }
 0x648   : > { %s4425_s27 = smul.f32 5.658669e-05, %s18739_s26 }
 0x64a   : > { %s4426_s28 = sadd.f32 1e-05, %s4425_s27 }
 0x64c   : > { %v4427_v17 = vstv %s4426_s28 }
 0x64d   : > { %20495 = vrsqrt.f32 %v4427_v17  ;;  %v19207_v17 = vld [vmem:[%s25928_s4 + $0x8] ss:$0 sps:$4 sm:$0xff]  }
 0x65a   : > { %v20496_v11 = vpop.eup %20495 }
 0x65b   : > { %18740 = vpush %v20496_v11  ;;  %v19208_v11 = vld [vmem:[%s25928_s4 + $0x14] ss:$0 sps:$4 sm:$0xff]  }
 0x68c   : > { %s18741_s2 = spop %18740 }
 0x68d   : > { %v4430_v41 = vstv %s18741_s2 }
 0x68e   : > { %v4444_v29 = vmul.f32 %v4430_v41, %v4368_v62  ;;  %v4447_v63 = vmul.f32 %v4430_v41, %v4371_v20  ;;  %v4443_v49 = vmul.f32 %v4430_v41, %v4367_v36  ;;  %v4446_v61 = vmul.f32 %v4430_v41, %v4370_v24 }
 0x68f   : > { %v4438_v40 = vmul.f32 %v4430_v41, %v22288_v27  ;;  %v4441_v57 = vmul.f32 %v4430_v41, %v4365_v9  ;;  %v4445_v14 = vmul.f32 %v4430_v41, %v4369_v15  ;;  %v4448_v23 = vmul.f32 %v4430_v41, %v4372_v12 }
 0x690   : > { %v4462_v10 = vmax.f32 %v4444_v29, 0.0  ;;  %v4465_v51 = vmax.f32 %v4447_v63, 0.0  ;;  %v4461_v53 = vmax.f32 %v4443_v49, 0.0  ;;  %v4464_v13 = vmax.f32 %v4446_v61, 0.0  ;;  %v19215_v29 = vld [vmem:[%s25929_s5 + $0x2ac] ss:$12 sps:$4 sm:$0xff]  }
 0x691   : > { %v4456_v35 = vmax.f32 %v4438_v40, 0.0  ;;  %v4459_v3 = vmax.f32 %v4441_v57, 0.0  ;;  %v4437_v50 = vmul.f32 %v4430_v41, %v22280_v19  ;;  %v4440_v20 = vmul.f32 %v4430_v41, %v22296_v33  ;;  %v19220_v63 = vld [vmem:[%s25929_s5 + $0x298] ss:$12 sps:$4 sm:$0xff]   ;;  %v19223_v49 = vld [vmem:[%s25929_s5 + $0x280] ss:$12 sps:$4 sm:$0xff]  }
 0x692   : > { %v4474_v62 = vpack.c.bf16 %v4465_v51, %v4462_v10  ;;  %v4473_v30 = vpack.c.bf16 %v4464_v13, %v4461_v53  ;;  %v4432_v36 = vmul.f32 %v4430_v41, %v22254_v28  ;;  %v4435_v27 = vmul.f32 %v4430_v41, %v22272_v21  ;;  %v19221_v61 = vld [vmem:[%s25929_s5 + $0x27c] ss:$12 sps:$4 sm:$0xff]   ;;  %v19224_v57 = vld [vmem:[%s25929_s5 + $0x264] ss:$12 sps:$4 sm:$0xff]   ;;  %v19230_v51 = vld [vmem:[%s25929_s5 + $0x234] ss:$12 sps:$4 sm:$0xff]  }
 0x693   : > { %v4463_v9 = vmax.f32 %v4445_v14, 0.0  ;;  %v4466_v15 = vmax.f32 %v4448_v23, 0.0  ;;  %v4455_v25 = vmax.f32 %v4437_v50, 0.0  ;;  %v4458_v12 = vmax.f32 %v4440_v20, 0.0  ;;  %v19226_v40 = vld [vmem:[%s25929_s5 + $0x268] ss:$12 sps:$4 sm:$0xff]  }
 0x694   : > { %v22327_v24 = vand.u32 %v4496_v44, %v4474_v62  ;;  %v22329_v2 = vand.u32 %v4496_v44, %v4473_v30  ;;  %v4431_v48 = vmul.f32 %v4430_v41, %v22251_v39  ;;  %v22334_v19 = vpack.c.bf16 %v4459_v3, %v4456_v35  ;;  %v19229_v14 = vld [vmem:[%s25929_s5 + $0x250] ss:$12 sps:$4 sm:$0xff]   ;;  %v19227_v23 = vld [vmem:[%s25929_s5 + $0x24c] ss:$12 sps:$4 sm:$0xff]   ;;  %v19238_v13 = vld [vmem:[%s25929_s5 + $0x388] ss:$12 sps:$4 sm:$0xff]  }
 0x695   : > { %v4450_v33 = vmax.f32 %v4432_v36, 0.0  ;;  %v4453_v28 = vmax.f32 %v4435_v27, 0.0  ;;  %v4434_v21 = vmul.f32 %v4430_v41, %v22266_v34  ;;  %v4475_v52 = vpack.c.bf16 %v4466_v15, %v4463_v9  ;;  %v19211_v34 = vld [vmem:[%s25929_s5 + $0x2e0] ss:$12 sps:$4 sm:$0xff]   ;;  %v19232_v10 = vld [vmem:[%s25929_s5 + $0x238] ss:$12 sps:$4 sm:$0xff]  }
 0x696   : > { %4516 = vmatprep.subr.bf16.mxu0 %v22327_v24  ;;  %4733 = vmatprep.subr.bf16.mxu1 %v22327_v24  ;;  %v22341_v39 = vpack.c.bf16 %v4458_v12, %v4455_v25  ;;  %v4449_v45 = vmax.f32 %v4431_v48, 0.0  ;;  %v4439_v56 = vmul.f32 %v4430_v41, %v22285_v4  ;;  %v4442_v31 = vmul.f32 %v4430_v41, %v22301_v59  ;;  %v19205_v4 = vld [vmem:[%s25928_s4] sm:$0xff]   ;;  %v19206_v59 = vld [vmem:[%s25928_s4 + $0xc] sm:$0xff]   ;;  %v19233_v53 = vld [vmem:[%s25929_s5 + $0x39c] ss:$12 sps:$4 sm:$0xff]  }
 0x697   : > { %4517 = vmatpush1.bf16.msra.mxu0 %v22329_v2  ;;  %4734 = vmatpush1.bf16.msra.mxu1 %v22329_v2  ;;  %v4452_v60 = vmax.f32 %v4434_v21, 0.0  ;;  %v22343_v26 = vpack.c.bf16 %v4453_v28, %v4450_v33  ;;  %v22354_v38 = vand.u32 %v4496_v44, %v4475_v52  ;;  %v4433_v22 = vmul.f32 %v4430_v41, %v22257_v16  ;;  %v19235_v44 = vld [vmem:[%s25929_s5 + $0x3a0] ss:$12 sps:$4 sm:$0xff]   ;;  %v19236_v35 = vld [vmem:[%s25929_s5 + $0x384] ss:$12 sps:$4 sm:$0xff]  }
 0x698   : > { %4518 = vmatprep.subr.bf16.mxu0 %v22334_v19  ;;  %4735 = vmatprep.subr.bf16.mxu1 %v22334_v19  ;;  %v4457_v8 = vmax.f32 %v4439_v56, 0.0  ;;  %v4460_v46 = vmax.f32 %v4442_v31, 0.0  ;;  %v4436_v6 = vmul.f32 %v4430_v41, %v22269_v1  ;;  %v19217_v41 = vld [vmem:[%s25929_s5 + $0x2b0] ss:$12 sps:$4 sm:$0xff]   ;;  %v19239_v3 = vld [vmem:[%s25929_s5 + $0x36c] ss:$12 sps:$4 sm:$0xff]  }
 0x699   : > { %v22356_v47 = vpack.c.bf16 %v4452_v60, %v4449_v45  ;;  %v4451_v16 = vmax.f32 %v4433_v22, 0.0  ;;  %v19241_v62 = vld [vmem:[%s25929_s5 + $0x370] ss:$12 sps:$4 sm:$0xff]   ;;  %v19244_v50 = vld [vmem:[%s25929_s5 + $0x358] ss:$12 sps:$4 sm:$0xff]  }
 0x69a   : > { %v22374_v0 = vpack.c.bf16 %v4460_v46, %v4457_v8  ;;  %v4454_v1 = vmax.f32 %v4436_v6, 0.0  ;;  %v19242_v20 = vld [vmem:[%s25929_s5 + $0x354] ss:$12 sps:$4 sm:$0xff]   ;;  %v19245_v36 = vld [vmem:[%s25929_s5 + $0x33c] ss:$12 sps:$4 sm:$0xff]  }
 0x69b   : > { %4519 = vmatpush1.bf16.msra.mxu0 %v22341_v39  ;;  %4736 = vmatpush1.bf16.msra.mxu1 %v22341_v39  ;;  %v19247_v30 = vld [vmem:[%s25929_s5 + $0x340] ss:$12 sps:$4 sm:$0xff]   ;;  %v19250_v27 = vld [vmem:[%s25929_s5 + $0x328] ss:$12 sps:$4 sm:$0xff]   ;;  %v19248_v9 = vld [vmem:[%s25929_s5 + $0x324] ss:$12 sps:$4 sm:$0xff]  }
 0x69c   : > { %4520 = vmatprep.subr.bf16.mxu0 %v22343_v26  ;;  %4737 = vmatprep.subr.bf16.mxu1 %v22343_v26  ;;  %v22386_v54 = vpack.c.bf16 %v4454_v1, %v4451_v16  ;;  %v19251_v15 = vld [vmem:[%s25929_s5 + $0x30c] ss:$12 sps:$4 sm:$0xff]   ;;  %v19253_v25 = vld [vmem:[%s25929_s5 + $0x310] ss:$12 sps:$4 sm:$0xff]   ;;  %v19256_v28 = vld [vmem:[%s25929_s5 + $0x2f4] ss:$12 sps:$4 sm:$0xff]  }
 0x69d   : > { %v15850_v12 = vld [vmem:[%s25929_s5 + $0x45c] sm:$0xff]  ;;  %v19258_v21 = vld [vmem:[%s25929_s5 + $0x2f8] ss:$12 sps:$4 sm:$0xff]   ;;  %v19261_v45 = vld [vmem:[%s25929_s5 + $0x448] ss:$12 sps:$4 sm:$0xff]  }
 0x69e   : > { %v15922_v48 = vcombine.high %v15850_v12, %v15850_v12  ;;  %v15921_v33 = vcombine.low %v15850_v12, %v15850_v12  ;;  %v19259_v60 = vld [vmem:[%s25929_s5 + $0x444] ss:$12 sps:$4 sm:$0xff]   ;;  %v19273_v8 = vld [vmem:[%s25929_s5 + $0x400] ss:$12 sps:$4 sm:$0xff]   ;;  %v19271_v46 = vld [vmem:[%s25929_s5 + $0x3fc] ss:$12 sps:$4 sm:$0xff]  }
 0x69f   : > { %4521 = vmatpush1.bf16.msra.mxu0 %v22356_v47  ;;  %4738 = vmatpush1.bf16.msra.mxu1 %v22356_v47  ;;  %v19262_v56 = vld [vmem:[%s25929_s5 + $0x464] ss:$0 sps:$4 sm:$0xff]   ;;  %v19265_v31 = vld [vmem:[%s25929_s5 + $0x430] ss:$12 sps:$4 sm:$0xff]   ;;  %v19277_v22 = vld [vmem:[%s25929_s5 + $0x3e8] ss:$12 sps:$4 sm:$0xff]  }
 0x6a0   : > { %18426 = vmatprep.subr.bf16.mxu0 %v22354_v38  ;;  %5315 = vmatprep.subr.bf16.mxu1 %v19211_v34  ;;  %v5307_v52 = vsel %vm5305_vm7, %v15921_v33, 0  ;;  %v19263_v34 = vld [vmem:[%s25929_s5 + $0x42c] ss:$12 sps:$4 sm:$0xff]   ;;  %v19275_v6 = vld [vmem:[%s25929_s5 + $0x3e4] ss:$12 sps:$4 sm:$0xff]  }
 0x6a1   : > { %v19281_v16 = vld [vmem:[%s25929_s5 + $0x3d0] ss:$12 sps:$4 sm:$0xff]   ;;  %v19283_v1 = vld [vmem:[%s25929_s5 + $0x3b4] ss:$12 sps:$4 sm:$0xff]  }
 0x6a2   : > { %15745 = vmatmul.mubr.msk.bf16.vlgmr.msra.gmra.mxu0 %vm4487_vm6, %v19205_v4  ;;  %15754 = vmatmul.mubr.msk.bf16.vlgmr.msra.gmra.mxu1 %vm4487_vm6, %v19206_v59  ;;  %v19278_v12 = vld [vmem:[%s25929_s5 + $0x404] ss:$12 sps:$4 sm:$0xff]  }
 0x6a3   : > { %18427 = vmatpush3.bf16.msra.mxu0 %v22354_v38  ;;  %4548 = vmatprep.mubr.bf16.mxu0 %v25985_v43 }
 0x6a4   : > { %18428 = vmatprep.subr.bf16.mxu0 %v22374_v0  ;;  %4765 = vmatprep.mubr.bf16.mxu1 %v25985_v43 }
 0x6a5   : > { %5316 = vmatpush1.bf16.msra.mxu1 %v19209_v58  ;;  %v19279_v58 = vld [vmem:[%s25929_s5 + $0x3cc] ss:$12 sps:$4 sm:$0xff]  }
 0x6a6   : > { %5317 = vmatprep.subr.bf16.mxu1 %v19214_v55  ;;  %v19285_v55 = vld [vmem:[%s25929_s5 + $0x3b8] ss:$12 sps:$4 sm:$0xff]  }
 0x6a7   : > { %18429 = vmatpush3.bf16.msra.mxu0 %v22374_v0 }
 0x6a8   : > { %18430 = vmatprep.subr.bf16.mxu0 %v22386_v54 }
 0x6a9   : > { %5318 = vmatpush1.bf16.msra.mxu1 %v19212_v32  ;;  %v19287_v32 = vld [vmem:[%s25929_s5 + $0x3a4] ss:$12 sps:$4 sm:$0xff]  }
 0x6aa   : > { %15746 = vmatmul.mubr.msk.bf16.gmra.mxu0 %vm4487_vm6, %v19207_v17  ;;  %15755 = vmatmul.mubr.msk.bf16.gmra.mxu1 %vm4487_vm6, %v19208_v11 }
 0x6ab   : > { %18431 = vmatpush3.bf16.msra.mxu0 %v22386_v54  ;;  %18432 = vmatprep.mubr.msk.bf16.mxu0 %vm4487_vm6, %v19205_v4  ;;  %v19269_v4 = vld [vmem:[%s25929_s5 + $0x418] ss:$12 sps:$4 sm:$0xff]  }
 0x6ac   : > { %18436 = vmatprep.subr.bf16.mxu0 %v22354_v38  ;;  %5319 = vmatprep.subr.bf16.mxu1 %v19217_v41 }
 0x6ad   : > { %5320 = vmatpush1.bf16.msra.mxu1 %v19215_v29 }
 0x6ae   : > { %5321 = vmatprep.subr.bf16.mxu1 %v19220_v63 }
 0x6b1   : > { %5322 = vmatpush1.bf16.msra.mxu1 %v19218_v7 }
 0x6b2   : > { %18433 = vmatmul.mubr.msk.bf16.vlgmr.msra.gmra.mxu0 %vm4487_vm6, %v19207_v17  ;;  %5323 = vmatprep.subr.bf16.mxu1 %v19223_v49 }
 0x6b3   : > { %18437 = vmatpush3.bf16.msra.mxu0 %v22354_v38  ;;  %18442 = vmatprep.mubr.msk.bf16.mxu0 %vm4487_vm6, %v19206_v59  ;;  %v19267_v59 = vld [vmem:[%s25929_s5 + $0x414] ss:$12 sps:$4 sm:$0xff]  }
 0x6b4   : > { %18438 = vmatprep.subr.bf16.mxu0 %v22374_v0 }
 0x6b5   : > { %5324 = vmatpush1.bf16.msra.mxu1 %v19221_v61 }
 0x6b6   : > { %5325 = vmatprep.subr.bf16.mxu1 %v19226_v40 }
 0x6b7   : > { %18439 = vmatpush3.bf16.msra.mxu0 %v22374_v0 }
 0x6b8   : > { %18440 = vmatprep.subr.bf16.mxu0 %v22386_v54 }
 0x6b9   : > { %5326 = vmatpush1.bf16.msra.mxu1 %v19224_v57 }
 0x6ba   : > { %5327 = vmatprep.subr.bf16.mxu1 %v19229_v14 }
 0x6bb   : > { %18441 = vmatpush3.bf16.msra.mxu0 %v22386_v54 }
 0x6bc   : > { %15924 = vmatprep.subr.msk.bf16.mxu0 %vm5305_vm7, %v15922_v48  ;;  %v19282_v48 = vld [vmem:[%s25929_s5 + $0x3ec] ss:$12 sps:$4 sm:$0xff]  }
 0x6bd   : > { %5328 = vmatpush1.bf16.msra.mxu1 %v19227_v23 }
 0x6be   : > { %18443 = vmatmul.mubr.msk.bf16.vlgmr.msra.gmra.mxu0 %vm4487_vm6, %v19208_v11  ;;  %5329 = vmatprep.subr.bf16.mxu1 %v19232_v10  ;;  %v5313_v10 = vsel %vm5305_vm7, %v19262_v56, 0 }
 0x6bf   : > { %5398 = vmatprep.mubr.bf16.mxu0 %v25985_v43  ;;  %5367 = vmatpush1.bf16.msra.mxu0 %v5307_v52 }
 0x6c0   : > { %5368 = vmatprep.subr.bf16.mxu0 %v19261_v45 }
 0x6c1   : > { %5330 = vmatpush1.bf16.msra.mxu1 %v19230_v51  ;;  %v19266_v51 = vld [vmem:[%s25929_s5 + $0x44c] ss:$12 sps:$4 sm:$0xff]  }
 0x6c2   : > { %5331 = vmatprep.subr.bf16.mxu1 %v19235_v44 }
 0x6c3   : > { %5369 = vmatpush1.bf16.msra.mxu0 %v19259_v60  ;;  %v19289_v60 = vld [vmem:[%s25929_s5 + $0x3bc] ss:$12 sps:$4 sm:$0xff]  }
 0x6c4   : > { %5370 = vmatprep.subr.bf16.mxu0 %v19265_v31 }
 0x6c5   : > { %5332 = vmatpush2.bf16.msra.mxu1 %v19233_v53 }
 0x6c6   : > { %5333 = vmatprep.subr.bf16.mxu1 %v19238_v13 }
 0x6c7   : > { %5371 = vmatpush1.bf16.msra.mxu0 %v19263_v34  ;;  %v19288_v34 = vld [vmem:[%s25929_s5 + $0x2e4] ss:$12 sps:$4 sm:$0xff]  }
 0x6c8   : > { %5372 = vmatprep.subr.bf16.mxu0 %v19269_v4 }
 0x6c9   : > { %5334 = vmatpush2.bf16.msra.mxu1 %v19236_v35 }
 0x6ca   : > { %5335 = vmatprep.subr.bf16.mxu1 %v19241_v62 }
 0x6cb   : > { %5373 = vmatpush1.bf16.msra.mxu0 %v19267_v59  ;;  %v19290_v59 = vld [vmem:[%s25929_s5 + $0x38c] ss:$12 sps:$4 sm:$0xff]  }
 0x6cc   : > { %5374 = vmatprep.subr.bf16.mxu0 %v19273_v8 }
 0x6cd   : > { %5336 = vmatpush2.bf16.msra.mxu1 %v19239_v3  ;;  %v19270_v3 = vld [vmem:[%s25929_s5 + $0x434] ss:$12 sps:$4 sm:$0xff]  }
 0x6ce   : > { %5337 = vmatprep.subr.bf16.mxu1 %v19244_v50 }
 0x6cf   : > { %5375 = vmatpush1.bf16.msra.mxu0 %v19271_v46 }
 0x6d0   : > { %5376 = vmatprep.subr.bf16.mxu0 %v19277_v22  ;;  %v19291_v22 = vld [vmem:[%s25929_s5 + $0x2cc] ss:$12 sps:$4 sm:$0xff]  }
 0x6d1   : > { %5338 = vmatpush2.bf16.msra.mxu1 %v19242_v20 }
 0x6d2   : > { %5339 = vmatprep.subr.bf16.mxu1 %v19247_v30 }
 0x6d3   : > { %5377 = vmatpush1.bf16.msra.mxu0 %v19275_v6  ;;  %v19294_v6 = vld [vmem:[%s25929_s5 + $0x374] ss:$12 sps:$4 sm:$0xff]  }
 0x6d4   : > { %5378 = vmatprep.subr.bf16.mxu0 %v19281_v16 }
 0x6d5   : > { %5340 = vmatpush2.bf16.msra.mxu1 %v19245_v36 }
 0x6d6   : > { %5341 = vmatprep.subr.bf16.mxu1 %v19250_v27 }
 0x6d7   : > { %5379 = vmatpush1.bf16.msra.mxu0 %v19279_v58 }
 0x6d8   : > { %5380 = vmatprep.subr.bf16.mxu0 %v19285_v55  ;;  %v19295_v55 = vld [vmem:[%s25929_s5 + $0x2b4] ss:$12 sps:$4 sm:$0xff]  }
 0x6d9   : > { %5342 = vmatpush2.bf16.msra.mxu1 %v19248_v9  ;;  %v19274_v9 = vld [vmem:[%s25929_s5 + $0x41c] ss:$12 sps:$4 sm:$0xff]  }
 0x6da   : > { %5343 = vmatprep.subr.bf16.mxu1 %v19253_v25 }
 0x6db   : > { %5381 = vmatpush1.bf16.msra.mxu0 %v19283_v1  ;;  %v19298_v1 = vld [vmem:[%s25929_s5 + $0x214] ss:$12 sps:$4 sm:$0xff]  }
 0x6dc   : > { %17814 = vmatprep.subr.bf16.mxu0 %v19287_v32  ;;  %v19296_v32 = vld [vmem:[%s25929_s5 + $0x210] ss:$12 sps:$4 sm:$0xff]  }
 0x6dd   : > { %5344 = vmatpush2.bf16.msra.mxu1 %v19251_v15 }
 0x6de   : > { %5345 = vmatprep.subr.bf16.mxu1 %v19258_v21  ;;  %v19286_v21 = vld [vmem:[%s25929_s5 + $0x3d4] ss:$12 sps:$4 sm:$0xff]  }
 0x6e1   : > { %5346 = vmatpush2.bf16.msra.mxu1 %v19256_v28 }
 0x6e2   : > { %18732 = vmatprep.subr.msk.bf16.mxu1 %vm5305_vm7, %v19262_v56  ;;  %v4703_v56 = vld [vmem:[%s25929_s5 + $0x228] sm:$0xff] }
 0x6e3   : > { %v15999_v8 = vcombine.high %v4703_v56, %v4703_v56  ;;  %v15998_v46 = vcombine.low %v4703_v56, %v4703_v56  ;;  %v19333_v56 = vld [vmem:[%s25929_s5 + $0x170] ss:$12 sps:$4 sm:$0xff]  }
 0x6e5   : > { %v5896_v16 = vsel %vm5305_vm7, %v15998_v46, 0  ;;  %v19343_v46 = vld [vmem:[%s25929_s5 + $0x140] ss:$12 sps:$4 sm:$0xff]  }
 0x762   : > { %v4757_v17 = vpop.f32.mrf.mxu1  ;;  %v4540_v11 = vpop.f32.mrf.mxu0 }
 0x764   : > { %v4759_v41 = vpop.f32.mrf.mxu1  ;;  %v22548_v29 = vpop.f32.mrf.mxu0 }
 0x766   : > { %v4761_v63 = vpop.f32.mrf.mxu1  ;;  %v4544_v7 = vpop.f32.mrf.mxu0 }
 0x767   : > { %v22550_v49 = vpack.c.bf16 %v4544_v7, %v4540_v11  ;;  %v22552_v61 = vpack.c.bf16 %v4761_v63, %v4757_v17  ;;  %v19299_v17 = vld [vmem:[%s25929_s5 + $0x35c] ss:$12 sps:$4 sm:$0xff]   ;;  %v19301_v63 = vld [vmem:[%s25929_s5 + $0x1f8] ss:$12 sps:$4 sm:$0xff]  }
 0x768   : > { %v4763_v40 = vpop.f32.mrf.mxu1  ;;  %v22554_v57 = vpop.f32.mrf.mxu0  ;;  %v19303_v11 = vld [vmem:[%s25929_s5 + $0x1fc] ss:$12 sps:$4 sm:$0xff]   ;;  %v19304_v7 = vld [vmem:[%s25929_s5 + $0x344] ss:$12 sps:$4 sm:$0xff]  }
 0x769   : > { %v22556_v14 = vpack.c.bf16 %v4763_v40, %v4759_v41  ;;  %v19300_v41 = vld [vmem:[%s25929_s5 + $0x29c] ss:$12 sps:$4 sm:$0xff]   ;;  %v19308_v40 = vld [vmem:[%s25929_s5 + $0x1e4] ss:$12 sps:$4 sm:$0xff]  }
 0x76a   : > { %v22558_v23 = vpop.f32.mrf.mxu0  ;;  %v4767_v44 = vpop.f32.mrf.mxu1 }
 0x76b   : > { %5347 = vmatprep.mubr.bf16.mxu1 %v22556_v14  ;;  %v22574_v30 = vpack.c.bf16 %v4767_v44, %v4767_v44  ;;  %v19313_v44 = vld [vmem:[%s25929_s5 + $0x1cc] ss:$12 sps:$4 sm:$0xff]  }
 0x76c   : > { %5348 = vmatmul.mubr.bf16.vlgmr.msra.gmra.mxu1 %v22552_v61  ;;  %v22566_v53 = vpop.f32.mrf.mxu0  ;;  %v4769_v13 = vpop.f32.mrf.mxu1 }
 0x76d   : > { %18447 = vmatpush3.bf16.msra.mxu1 %v5313_v10  ;;  %v22568_v35 = vpack.c.bf16 %v4769_v13, %v4769_v13  ;;  %v19306_v10 = vld [vmem:[%s25929_s5 + $0x1e0] ss:$12 sps:$4 sm:$0xff]  }
 0x76e   : > { %v4554_v62 = vpop.f32.mrf.mxu0  ;;  %18448 = vmatprep.subr.bf16.mxu1 %v19266_v51  ;;  %v4771_v50 = vpop.f32.mrf.mxu1  ;;  %v19310_v13 = vld [vmem:[%s25929_s5 + $0x26c] ss:$12 sps:$4 sm:$0xff]  }
 0x76f   : > { %5357 = vmatprep.mubr.bf16.mxu1 %v22568_v35  ;;  %v19311_v62 = vld [vmem:[%s25929_s5 + $0x1c8] ss:$12 sps:$4 sm:$0xff]  }
 0x770   : > { %v4555_v20 = vpop.f32.mrf.mxu0  ;;  %v4772_v36 = vpop.f32.mrf.mxu1  ;;  %v19318_v50 = vld [vmem:[%s25929_s5 + $0x1b4] ss:$12 sps:$4 sm:$0xff]  }
 0x771   : > { %18449 = vmatpush3.bf16.msra.mxu1 %v19266_v51  ;;  %v19309_v51 = vld [vmem:[%s25929_s5 + $0x32c] ss:$12 sps:$4 sm:$0xff]   ;;  %v19315_v20 = vld [vmem:[%s25929_s5 + $0x254] ss:$12 sps:$4 sm:$0xff]   ;;  %v19316_v36 = vld [vmem:[%s25929_s5 + $0x1b0] ss:$12 sps:$4 sm:$0xff]  }
 0x772   : > { %v22576_v27 = vpop.f32.mrf.mxu0  ;;  %18450 = vmatprep.subr.bf16.mxu1 %v19270_v3 }
 0x774   : > { %v22581_v15 = vpop.f32.mrf.mxu0  ;;  %5358 = vmatmul.mubr.bf16.gmra.mxu1 %v22574_v30 }
 0x775   : > { %18451 = vmatpush3.bf16.msra.mxu1 %v19270_v3  ;;  %v19314_v3 = vld [vmem:[%s25929_s5 + $0x314] ss:$12 sps:$4 sm:$0xff]  }
 0x776   : > { %v18435_v25 = vpop.f32.mrf.mxu0  ;;  %18452 = vmatprep.subr.bf16.mxu1 %v19274_v9 }
 0x777   : > { %v19323_v25 = vld [vmem:[%s25929_s5 + $0x19c] ss:$12 sps:$4 sm:$0xff]  }
 0x778   : > { %v22590_v33 = vpop.f32.mrf.mxu0 }
 0x779   : > { %18453 = vmatpush3.bf16.msra.mxu1 %v19274_v9  ;;  %v19319_v9 = vld [vmem:[%s25929_s5 + $0x2fc] ss:$12 sps:$4 sm:$0xff]  }
 0x77a   : > { %18454 = vmatprep.subr.bf16.mxu1 %v19278_v12 }
 0x77d   : > { %18455 = vmatpush3.bf16.msra.mxu1 %v19278_v12  ;;  %v19320_v12 = vld [vmem:[%s25929_s5 + $0x23c] ss:$12 sps:$4 sm:$0xff]  }
 0x77e   : > { %v18444_v28 = vpop.f32.mrf.mxu0  ;;  %18456 = vmatprep.subr.bf16.mxu1 %v19282_v48 }
 0x77f   : > { %v4827_v58 = vpack.c.bf16 %v18444_v28, %v18444_v28  ;;  %v19326_v28 = vld [vmem:[%s25929_s5 + $0xac] ss:$12 sps:$4 sm:$0xff]  }
 0x780   : > { %v4808_v52 = vpop.f32.mrf.mxu0 }
 0x781   : > { %18457 = vmatpush3.bf16.msra.mxu1 %v19282_v48  ;;  %v19321_v48 = vld [vmem:[%s25929_s5 + $0x198] ss:$12 sps:$4 sm:$0xff]  }
 0x782   : > { %v18445_v45 = vpop.f32.mrf.mxu0  ;;  %18458 = vmatprep.subr.bf16.mxu1 %v19286_v21 }
 0x783   : > { %v19327_v45 = vld [vmem:[%s25929_s5 + $0x180] ss:$12 sps:$4 sm:$0xff]  }
 0x784   : > { %v4811_v31 = vpop.f32.mrf.mxu0 }
 0x785   : > { %v4824_v4 = vpack.c.bf16 %v4811_v31, %v4808_v52  ;;  %18459 = vmatpush3.bf16.msra.mxu1 %v19286_v21  ;;  %v19329_v21 = vld [vmem:[%s25929_s5 + $0x184] ss:$12 sps:$4 sm:$0xff]   ;;  %v19324_v52 = vld [vmem:[%s25929_s5 + $0xa8] ss:$12 sps:$4 sm:$0xff]  }
 0x786   : > { %18460 = vmatprep.subr.bf16.mxu1 %v19289_v60  ;;  %v19330_v31 = vld [vmem:[%s25929_s5 + $0x90] ss:$12 sps:$4 sm:$0xff]  }
 0x787   : > { %15925 = vmatmul.mubr.msk.bf16.vlgmr.msra.gmra.mxu0 %vm4317_vm2, %v4824_v4  ;;  %18462 = vmatprep.mubr.msk.bf16.mxu1 %vm4317_vm2, %v4824_v4  ;;  %v19337_v4 = vld [vmem:[%s25929_s5 + $0x7c] ss:$12 sps:$4 sm:$0xff]  }
 0x788   : > { %17815 = vmatpush3.bf16.msra.mxu0 %v19288_v34  ;;  %5408 = vmatprep.mubr.bf16.mxu0 %v25985_v43  ;;  %v19334_v34 = vld [vmem:[%s25929_s5 + $0xb0] ss:$12 sps:$4 sm:$0xff]  }
 0x789   : > { %18461 = vmatpush3.bf16.msra.mxu1 %v19289_v60  ;;  %17816 = vmatprep.subr.bf16.mxu0 %v19290_v59  ;;  %v19332_v60 = vld [vmem:[%s25929_s5 + $0x94] ss:$12 sps:$4 sm:$0xff]   ;;  %v19338_v59 = vld [vmem:[%s25929_s5 + $0x158] ss:$12 sps:$4 sm:$0xff]  }
 0x78a   : > { %16001 = vmatprep.subr.msk.bf16.mxu1 %vm5305_vm7, %v15999_v8  ;;  %v4606_v8 = vpack.c.bf16 %v22554_v57, %v22548_v29  ;;  %v19344_v29 = vld [vmem:[%s25929_s5 + $0x80] ss:$12 sps:$4 sm:$0xff]   ;;  %v22753_v57 = vpack.c.bf16 %v22576_v27, %v22576_v27  ;;  %v19349_v27 = vld [vmem:[%s25929_s5 + $0x68] ss:$12 sps:$4 sm:$0xff]  }
 0x78c   : > { %17817 = vmatpush3.bf16.msra.mxu0 %v19291_v22  ;;  %18463 = vmatmul.mubr.msk.bf16.vlgmr.msra.gmra.mxu1 %vm4317_vm2, %v4827_v58  ;;  %v19340_v22 = vld [vmem:[%s25929_s5 + $0x60] ss:$12 sps:$4 sm:$0xff]  }
 0x78d   : > { %5956 = vmatpush1.bf16.msra.mxu1 %v5896_v16  ;;  %17818 = vmatprep.subr.bf16.mxu0 %v19294_v6  ;;  %v19348_v6 = vld [vmem:[%s25929_s5 + $0x128] ss:$12 sps:$4 sm:$0xff]  }
 0x78e   : > { %5957 = vmatprep.subr.bf16.mxu1 %v19298_v1  ;;  %5987 = vmatprep.mubr.bf16.mxu1 %v25985_v43  ;;  %v19352_v16 = vld [vmem:[%s25929_s5 + $0x34] ss:$12 sps:$4 sm:$0xff]   ;;  %v19353_v1 = vld [vmem:[%s25929_s5 + $0x110] ss:$12 sps:$4 sm:$0xff]  }
 0x78f   : > { %15926 = vmatmul.mubr.msk.bf16.gmra.mxu0 %vm4317_vm2, %v4827_v58  ;;  %v19345_v58 = vld [vmem:[%s25929_s5 + $0x48] ss:$12 sps:$4 sm:$0xff]  }
 0x790   : > { %17819 = vmatpush3.bf16.msra.mxu0 %v19295_v55  ;;  %5449 = vmatprep.mubr.bf16.mxu0 %v22556_v14  ;;  %v19305_v14 = vld [vmem:[%s25929_s5 + $0x284] ss:$12 sps:$4 sm:$0xff]  }
 0x791   : > { %5958 = vmatpush1.bf16.msra.mxu1 %v19296_v32  ;;  %17820 = vmatprep.subr.bf16.mxu0 %v19299_v17  ;;  %v19350_v55 = vld [vmem:[%s25929_s5 + $0x30] ss:$12 sps:$4 sm:$0xff]  }
 0x792   : > { %5959 = vmatprep.subr.bf16.mxu1 %v19303_v11  ;;  %v19354_v32 = vld [vmem:[%s25929_s5 + $0x50] ss:$12 sps:$4 sm:$0xff]   ;;  %v19358_v11 = vld [vmem:[%s25929_s5 + $0xf8] ss:$12 sps:$4 sm:$0xff]  }
 0x793   : > { %v19357_v17 = vld [vmem:[%s25929_s5 + $0x1c] ss:$12 sps:$4 sm:$0xff]  }
 0x794   : > { %17821 = vmatpush3.bf16.msra.mxu0 %v19300_v41  ;;  %v19355_v41 = vld [vmem:[%s25929_s5 + $0x18] ss:$12 sps:$4 sm:$0xff]  }
 0x795   : > { %5960 = vmatpush1.bf16.msra.mxu1 %v19301_v63  ;;  %17822 = vmatprep.subr.bf16.mxu0 %v19304_v7  ;;  %v19359_v63 = vld [vmem:[%s25929_s5 + $0x38] ss:$12 sps:$4 sm:$0xff]  }
 0x796   : > { %5961 = vmatprep.subr.bf16.mxu1 %v19308_v40  ;;  %v19362_v7 = vld [vmem:[%s25929_s5 + $0x4] ss:$12 sps:$4 sm:$0xff]   ;;  %v19363_v40 = vld [vmem:[%s25929_s5 + $0xe0] ss:$12 sps:$4 sm:$0xff]  }
 0x798   : > { %17823 = vmatpush3.bf16.msra.mxu0 %v19305_v14  ;;  %v19360_v14 = vld [vmem:[%s25929_s5] ss:$12 sps:$4 sm:$0xff]  }
 0x799   : > { %5962 = vmatpush1.bf16.msra.mxu1 %v19306_v10  ;;  %17824 = vmatprep.subr.bf16.mxu0 %v19309_v51  ;;  %v19364_v10 = vld [vmem:[%s25929_s5 + $0x20] ss:$12 sps:$4 sm:$0xff]  }
 0x79a   : > { %5963 = vmatprep.subr.bf16.mxu1 %v19313_v44  ;;  %v19367_v51 = vld [vmem:[%s25929_s5 + $0x16c] ss:$12 sps:$4 sm:$0xff]   ;;  %v19368_v44 = vld [vmem:[%s25929_s5 + $0xc8] ss:$12 sps:$4 sm:$0xff]  }
 0x79c   : > { %17825 = vmatpush3.bf16.msra.mxu0 %v19310_v13  ;;  %v19365_v13 = vld [vmem:[%s25929_s5 + $0x168] ss:$12 sps:$4 sm:$0xff]  }
 0x79d   : > { %5964 = vmatpush1.bf16.msra.mxu1 %v19311_v62  ;;  %17826 = vmatprep.subr.bf16.mxu0 %v19314_v3  ;;  %v19369_v62 = vld [vmem:[%s25929_s5 + $0x8] ss:$12 sps:$4 sm:$0xff]  }
 0x79e   : > { %5965 = vmatprep.subr.bf16.mxu1 %v19318_v50  ;;  %v19372_v3 = vld [vmem:[%s25929_s5 + $0x154] ss:$12 sps:$4 sm:$0xff]   ;;  %v19370_v50 = vld [vmem:[%s25929_s5 + $0x150] ss:$12 sps:$4 sm:$0xff]  }
 0x7a0   : > { %17827 = vmatpush3.bf16.msra.mxu0 %v19315_v20  ;;  %v19375_v20 = vld [vmem:[%s25929_s5 + $0x13c] ss:$12 sps:$4 sm:$0xff]  }
 0x7a1   : > { %5966 = vmatpush1.bf16.msra.mxu1 %v19316_v36  ;;  %17828 = vmatprep.subr.bf16.mxu0 %v19319_v9  ;;  %v4609_v36 = vpack.c.bf16 %v22566_v53, %v22566_v53  ;;  %v19373_v9 = vld [vmem:[%s25929_s5 + $0x138] ss:$12 sps:$4 sm:$0xff]   ;;  %v19376_v53 = vld [vmem:[%s25929_s5 + $0x120] ss:$12 sps:$4 sm:$0xff]  }
 0x7a2   : > { %5967 = vmatprep.subr.bf16.mxu1 %v19323_v25  ;;  %v19381_v25 = vld [vmem:[%s25929_s5 + $0x10c] ss:$12 sps:$4 sm:$0xff]  }
 0x7a4   : > { %17829 = vmatpush3.bf16.msra.mxu0 %v19320_v12  ;;  %v19385_v12 = vld [vmem:[%s25929_s5 + $0xd8] ss:$12 sps:$4 sm:$0xff]  }
 0x7a5   : > { %5968 = vmatpush1.bf16.msra.mxu1 %v19321_v48  ;;  %5904 = vmatprep.subr.bf16.mxu0 %v19326_v28  ;;  %v19390_v48 = vld [vmem:[%s25929_s5 + $0xc4] ss:$12 sps:$4 sm:$0xff]   ;;  %v19388_v28 = vld [vmem:[%s25929_s5 + $0xc0] ss:$12 sps:$4 sm:$0xff]  }
 0x7a6   : > { %5969 = vmatprep.subr.bf16.mxu1 %v19329_v21  ;;  %v22879_v21 = vld [vmem:[%s25928_s4 + $0x20] ss:$0 sps:$4 sm:$0xff]  }
 0x7a7   : > { %5450 = vmatmul.mubr.bf16.vlgmr.msra.gmra.mxu0 %v22552_v61  ;;  %v22722_v61 = vpack.c.bf16 %v22590_v33, %v22581_v15  ;;  %v19339_v15 = vld [vmem:[%s25929_s5 + $0x98] ss:$12 sps:$4 sm:$0xff]  }
 0x7a8   : > { %5905 = vmatpush1.bf16.msra.mxu0 %v19324_v52  ;;  %5457 = vmatprep.mubr.bf16.mxu0 %v22568_v35  ;;  %v19335_v35 = vld [vmem:[%s25929_s5 + $0x78] ss:$12 sps:$4 sm:$0xff]   ;;  %v19391_v52 = vld [vmem:[%s25929_s5 + $0x230] ss:$0 sps:$4 sm:$0xff]  }
 0x7a9   : > { %5970 = vmatpush1.bf16.msra.mxu1 %v19327_v45  ;;  %5906 = vmatprep.subr.bf16.mxu0 %v19332_v60  ;;  %v19342_v33 = vld [vmem:[%s25929_s5 + $0x64] ss:$12 sps:$4 sm:$0xff]   ;;  %v5902_v45 = vsel %vm5305_vm7, %v19391_v52, 0 }
 0x7aa   : > { %17852 = vmatprep.subr.bf16.mxu1 %v19333_v56  ;;  %v19392_v60 = vld [vmem:[%s25929_s5 + $0x218] ss:$12 sps:$4 sm:$0xff]   ;;  %v19393_v56 = vld [vmem:[%s25929_s5 + $0x200] ss:$12 sps:$4 sm:$0xff]  }
 0x7ac   : > { %5907 = vmatpush1.bf16.msra.mxu0 %v19330_v31  ;;  %16002 = vmatmul.mubr.msk.bf16.vlgmr.msra.gmra.mxu1 %vm4317_vm2, %v22722_v61  ;;  %v19394_v31 = vld [vmem:[%s25929_s5 + $0x1e8] ss:$12 sps:$4 sm:$0xff]  }
 0x7ad   : > { %17853 = vmatpush3.bf16.msra.mxu1 %v19334_v34  ;;  %5908 = vmatprep.subr.bf16.mxu0 %v19337_v4  ;;  %v19397_v34 = vld [vmem:[%s25929_s5 + $0x1b8] ss:$12 sps:$4 sm:$0xff]   ;;  %v19398_v4 = vld [vmem:[%s25929_s5 + $0x1a0] ss:$12 sps:$4 sm:$0xff]  }
 0x7ae   : > { %17854 = vmatprep.subr.bf16.mxu1 %v19338_v59  ;;  %5997 = vmatprep.mubr.bf16.mxu1 %v25985_v43  ;;  %v19403_v59 = vld [vmem:[%s25929_s5 + $0x514] ss:$12 sps:$4 sm:$0xff]  }
 0x7af   : > { %5458 = vmatmul.mubr.bf16.gmra.mxu0 %v22574_v30  ;;  %v19347_v30 = vld [vmem:[%s25929_s5 + $0x4c] ss:$12 sps:$4 sm:$0xff]  }
 0x7b0   : > { %5909 = vmatpush1.bf16.msra.mxu0 %v19335_v35  ;;  %5936 = vmatprep.mubr.bf16.mxu0 %v4606_v8  ;;  %v19406_v35 = vld [vmem:[%s25929_s5 + $0x4fc] ss:$12 sps:$4 sm:$0xff]  }
 0x7b1   : > { %17855 = vmatpush3.bf16.msra.mxu1 %v19339_v15  ;;  %5910 = vmatprep.subr.bf16.mxu0 %v19342_v33  ;;  %v19399_v15 = vld [vmem:[%s25929_s5 + $0x188] ss:$12 sps:$4 sm:$0xff]   ;;  %v19404_v33 = vld [vmem:[%s25929_s5 + $0x4f8] ss:$12 sps:$4 sm:$0xff]  }
 0x7b2   : > { %17856 = vmatprep.subr.bf16.mxu1 %v19343_v46  ;;  %v19407_v46 = vld [vmem:[%s25929_s5 + $0x4e0] ss:$12 sps:$4 sm:$0xff]  }
 0x7b4   : > { %5911 = vmatpush1.bf16.msra.mxu0 %v19340_v22  ;;  %16003 = vmatmul.mubr.msk.bf16.gmra.mxu1 %vm4317_vm2, %v22753_v57  ;;  %v19412_v22 = vld [vmem:[%s25929_s5 + $0x4cc] ss:$12 sps:$4 sm:$0xff]  }
 0x7b5   : > { %17857 = vmatpush3.bf16.msra.mxu1 %v19344_v29  ;;  %6038 = vmatprep.mubr.bf16.mxu1 %v4606_v8  ;;  %v19409_v8 = vld [vmem:[%s25929_s5 + $0x4e4] ss:$12 sps:$4 sm:$0xff]   ;;  %v19410_v29 = vld [vmem:[%s25929_s5 + $0x4c8] ss:$12 sps:$4 sm:$0xff]  }
 0x7b6   : > { %5912 = vmatprep.subr.bf16.mxu0 %v19347_v30  ;;  %17858 = vmatprep.subr.bf16.mxu1 %v19348_v6  ;;  %v19413_v30 = vld [vmem:[%s25929_s5 + $0x4b0] ss:$12 sps:$4 sm:$0xff]   ;;  %v19415_v6 = vld [vmem:[%s25929_s5 + $0x4b4] ss:$12 sps:$4 sm:$0xff]  }
 0x7b8   : > { %5913 = vmatpush1.bf16.msra.mxu0 %v19345_v58  ;;  %v19422_v58 = vld [vmem:[%s25929_s5 + $0x468] ss:$12 sps:$4 sm:$0xff]  }
 0x7b9   : > { %17859 = vmatpush3.bf16.msra.mxu1 %v19349_v27  ;;  %5914 = vmatprep.subr.bf16.mxu0 %v19352_v16  ;;  %v19424_v27 = vld [vmem:[%s25929_s5 + $0x46c] ss:$12 sps:$4 sm:$0xff]   ;;  %v19427_v16 = vld [vmem:[%s25929_s5 + $0x5d4] ss:$12 sps:$4 sm:$0xff]  }
 0x7ba   : > { %17860 = vmatprep.subr.bf16.mxu1 %v19353_v1  ;;  %v19425_v1 = vld [vmem:[%s25929_s5 + $0x5d0] ss:$12 sps:$4 sm:$0xff]  }
 0x7bc   : > { %5915 = vmatpush1.bf16.msra.mxu0 %v19350_v55  ;;  %v19430_v55 = vld [vmem:[%s25929_s5 + $0x5bc] ss:$12 sps:$4 sm:$0xff]  }
 0x7bd   : > { %17861 = vmatpush3.bf16.msra.mxu1 %v19354_v32  ;;  %5916 = vmatprep.subr.bf16.mxu0 %v19357_v17  ;;  %v19428_v32 = vld [vmem:[%s25929_s5 + $0x5b8] ss:$12 sps:$4 sm:$0xff]  }
 0x7be   : > { %17862 = vmatprep.subr.bf16.mxu1 %v19358_v11  ;;  %v19433_v17 = vld [vmem:[%s25929_s5 + $0x5a4] ss:$12 sps:$4 sm:$0xff]   ;;  %v19431_v11 = vld [vmem:[%s25929_s5 + $0x5a0] ss:$12 sps:$4 sm:$0xff]  }
 0x7c0   : > { %5917 = vmatpush1.bf16.msra.mxu0 %v19355_v41 }
 0x7c1   : > { %17863 = vmatpush3.bf16.msra.mxu1 %v19359_v63  ;;  %5918 = vmatprep.subr.bf16.mxu0 %v19362_v7  ;;  %v19434_v63 = vld [vmem:[%s25929_s5 + $0x588] ss:$12 sps:$4 sm:$0xff]   ;;  %v19436_v7 = vld [vmem:[%s25929_s5 + $0x58c] ss:$12 sps:$4 sm:$0xff]  }
 0x7c2   : > { %17864 = vmatprep.subr.bf16.mxu1 %v19363_v40 }
 0x7c4   : > { %5919 = vmatpush1.bf16.msra.mxu0 %v19360_v14 }
 0x7c5   : > { %17865 = vmatpush3.bf16.msra.mxu1 %v19364_v10  ;;  %5920 = vmatprep.subr.bf16.mxu0 %v19367_v51  ;;  %v19437_v10 = vld [vmem:[%s25929_s5 + $0x570] ss:$12 sps:$4 sm:$0xff]   ;;  %v19439_v51 = vld [vmem:[%s25929_s5 + $0x574] ss:$12 sps:$4 sm:$0xff]  }
 0x7c6   : > { %17866 = vmatprep.subr.bf16.mxu1 %v19368_v44 }
 0x7c8   : > { %5921 = vmatpush2.bf16.msra.mxu0 %v19365_v13 }
 0x7c9   : > { %17867 = vmatpush3.bf16.msra.mxu1 %v19369_v62  ;;  %5922 = vmatprep.subr.bf16.mxu0 %v19372_v3  ;;  %v19440_v62 = vld [vmem:[%s25929_s5 + $0x558] ss:$12 sps:$4 sm:$0xff]   ;;  %v19442_v3 = vld [vmem:[%s25929_s5 + $0x55c] ss:$12 sps:$4 sm:$0xff]  }
 0x7ca   : > { %6130 = vmatprep.subr.bf16.mxu1 %v22327_v24  ;;  %v19378_v24 = vld [vmem:[%s25929_s5 + $0x124] ss:$12 sps:$4 sm:$0xff]  }
 0x7cc   : > { %5923 = vmatpush2.bf16.msra.mxu0 %v19370_v50  ;;  %6039 = vmatmul.mubr.bf16.vlgmr.msra.gmra.mxu1 %v22550_v49  ;;  %v19445_v50 = vld [vmem:[%s25929_s5 + $0x544] ss:$12 sps:$4 sm:$0xff]  }
 0x7cd   : > { %6046 = vmatprep.mubr.bf16.mxu1 %v4609_v36  ;;  %6131 = vmatpush1.bf16.msra.mxu1 %v22329_v2  ;;  %v4608_v2 = vpack.c.bf16 %v22558_v23, %v22558_v23  ;;  %v19395_v23 = vld [vmem:[%s25928_s4 + $0x18] sm:$0xff]  }
 0x7ce   : > { %5924 = vmatprep.subr.bf16.mxu0 %v19375_v20  ;;  %6132 = vmatprep.subr.bf16.mxu1 %v22334_v19  ;;  %v19379_v19 = vld [vmem:[%s25929_s5 + $0x108] ss:$12 sps:$4 sm:$0xff]  }
 0x7d0   : > { %5925 = vmatpush2.bf16.msra.mxu0 %v19373_v9  ;;  %v19443_v9 = vld [vmem:[%s25929_s5 + $0x540] ss:$12 sps:$4 sm:$0xff]  }
 0x7d1   : > { %6133 = vmatpush1.bf16.msra.mxu1 %v22341_v39  ;;  %5926 = vmatprep.subr.bf16.mxu0 %v19378_v24  ;;  %v19384_v39 = vld [vmem:[%s25929_s5 + $0xf4] ss:$12 sps:$4 sm:$0xff]  }
 0x7d2   : > { %6134 = vmatprep.subr.bf16.mxu1 %v22343_v26  ;;  %v19382_v26 = vld [vmem:[%s25929_s5 + $0xf0] ss:$12 sps:$4 sm:$0xff]  }
 0x7d4   : > { %5927 = vmatpush2.bf16.msra.mxu0 %v19376_v53  ;;  %6047 = vmatmul.mubr.bf16.gmra.mxu1 %v4608_v2 }
 0x7d5   : > { %6135 = vmatpush1.bf16.msra.mxu1 %v22356_v47  ;;  %5928 = vmatprep.subr.bf16.mxu0 %v19381_v25  ;;  %v19387_v47 = vld [vmem:[%s25929_s5 + $0xdc] ss:$12 sps:$4 sm:$0xff]  }
 0x7d6   : > { %6152 = vmatprep.mubr.bf16.mxu1 %v25985_v43  ;;  %6711 = vmatprep.subr.bf16.mxu1 %v19403_v59  ;;  %v19454_v25 = vld [vmem:[%s25929_s5 + $0x67c] ss:$12 sps:$4 sm:$0xff]  }
 0x7d8   : > { %5929 = vmatpush2.bf16.msra.mxu0 %v19379_v19  ;;  %v19448_v19 = vld [vmem:[%s25929_s5 + $0x52c] ss:$12 sps:$4 sm:$0xff]  }
 0x7d9   : > { %5930 = vmatprep.subr.bf16.mxu0 %v19384_v39 }
 0x7dc   : > { %5931 = vmatpush2.bf16.msra.mxu0 %v19382_v26  ;;  %16011 = vmatmul.mubr.msk.bf16.vlgmr.msra.gmra.mxu1 %vm4487_vm6, %v19395_v23 }
 0x7dd   : > { %5932 = vmatprep.subr.bf16.mxu0 %v19387_v47  ;;  %6162 = vmatprep.mubr.bf16.mxu1 %v25985_v43  ;;  %v19446_v47 = vld [vmem:[%s25929_s5 + $0x528] ss:$12 sps:$4 sm:$0xff]  }
 0x7e0   : > { %5933 = vmatpush2.bf16.msra.mxu0 %v19385_v12  ;;  %v19458_v12 = vld [vmem:[%s25929_s5 + $0x664] ss:$12 sps:$4 sm:$0xff]  }
 0x7e1   : > { %5934 = vmatprep.subr.bf16.mxu0 %v19390_v48  ;;  %v23039_v48 = vld [vmem:[%s25929_s5 + $0x698] ss:$0 sps:$4 sm:$0xff]  }
 0x7e4   : > { %5935 = vmatpush2.bf16.msra.mxu0 %v19388_v28  ;;  %16012 = vmatmul.mubr.msk.bf16.gmra.mxu1 %vm4487_vm6, %v22879_v21  ;;  %v19456_v28 = vld [vmem:[%s25929_s5 + $0x660] ss:$12 sps:$4 sm:$0xff]  }
 0x7e5   : > { %18733 = vmatprep.subr.msk.bf16.mxu0 %vm5305_vm7, %v19391_v52 }
 0x7e7   : > { %5937 = vmatmul.mubr.bf16.vlgmr.msra.gmra.mxu0 %v22550_v49  ;;  %v19396_v49 = vld [vmem:[%s25929_s5 + $0x1d0] ss:$12 sps:$4 sm:$0xff]  }
 0x7e8   : > { %5946 = vmatprep.mubr.bf16.mxu0 %v4609_v36  ;;  %18467 = vmatpush3.bf16.msra.mxu0 %v5902_v45  ;;  %v16107_v36 = vld [vmem:[%s25929_s5 + $0x690] sm:$0xff] }
 0x7e9   : > { %18468 = vmatprep.subr.bf16.mxu0 %v19392_v60  ;;  %v16179_v24 = vcombine.high %v16107_v36, %v16107_v36  ;;  %v16178_v53 = vcombine.low %v16107_v36, %v16107_v36  ;;  %v19460_v45 = vld [vmem:[%s25929_s5 + $0x648] ss:$12 sps:$4 sm:$0xff]  }
 0x7eb   : > { %v6703_v39 = vsel %vm5305_vm7, %v16178_v53, 0 }
 0x7ec   : > { %18469 = vmatpush3.bf16.msra.mxu0 %v19392_v60  ;;  %v19462_v60 = vld [vmem:[%s25929_s5 + $0x64c] ss:$12 sps:$4 sm:$0xff]  }
 0x7ed   : > { %18470 = vmatprep.subr.bf16.mxu0 %v19393_v56 }
 0x7ef   : > { %5947 = vmatmul.mubr.bf16.gmra.mxu0 %v4608_v2 }
 0x7f0   : > { %18471 = vmatpush3.bf16.msra.mxu0 %v19393_v56  ;;  %18482 = vmatprep.mubr.msk.bf16.mxu0 %vm4317_vm2, %v22722_v61  ;;  %v19401_v61 = vld [vmem:[%s25929_s5 + $0x510] ss:$12 sps:$4 sm:$0xff]  }
 0x7f1   : > { %18472 = vmatprep.subr.bf16.mxu0 %v19394_v31  ;;  %6712 = vmatpush1.bf16.msra.mxu1 %v19401_v61 }
 0x7f2   : > { %6713 = vmatprep.subr.bf16.mxu1 %v19406_v35 }
 0x7f4   : > { %18473 = vmatpush3.bf16.msra.mxu0 %v19394_v31 }
 0x7f5   : > { %18474 = vmatprep.subr.bf16.mxu0 %v19396_v49  ;;  %6714 = vmatpush1.bf16.msra.mxu1 %v19404_v33  ;;  %v19470_v33 = vld [vmem:[%s25929_s5 + $0x61c] ss:$12 sps:$4 sm:$0xff]  }
 0x7f6   : > { %6715 = vmatprep.subr.bf16.mxu1 %v19409_v8 }
 0x7f8   : > { %18475 = vmatpush3.bf16.msra.mxu0 %v19396_v49 }
 0x7f9   : > { %18476 = vmatprep.subr.bf16.mxu0 %v19397_v34  ;;  %6716 = vmatpush1.bf16.msra.mxu1 %v19407_v46  ;;  %v19468_v46 = vld [vmem:[%s25929_s5 + $0x618] ss:$12 sps:$4 sm:$0xff]  }
 0x7fa   : > { %6717 = vmatprep.subr.bf16.mxu1 %v19412_v22 }
 0x7fc   : > { %18477 = vmatpush3.bf16.msra.mxu0 %v19397_v34  ;;  %v19464_v34 = vld [vmem:[%s25929_s5 + $0x630] ss:$12 sps:$4 sm:$0xff]  }
 0x7fd   : > { %18478 = vmatprep.subr.bf16.mxu0 %v19398_v4  ;;  %6718 = vmatpush1.bf16.msra.mxu1 %v19410_v29 }
 0x7fe   : > { %6719 = vmatprep.subr.bf16.mxu1 %v19415_v6 }
 0x800   : > { %18479 = vmatpush3.bf16.msra.mxu0 %v19398_v4  ;;  %v19466_v4 = vld [vmem:[%s25929_s5 + $0x634] ss:$12 sps:$4 sm:$0xff]  }
 0x801   : > { %18480 = vmatprep.subr.bf16.mxu0 %v19399_v15  ;;  %6720 = vmatpush1.bf16.msra.mxu1 %v19413_v30 }
 0x804   : > { %18481 = vmatpush3.bf16.msra.mxu0 %v19399_v15 }
 0x805   : > { %18486 = vmatprep.subr.bf16.mxu0 %v22354_v38 }
 0x807   : > { %18483 = vmatmul.mubr.msk.bf16.vlgmr.msra.gmra.mxu0 %vm4317_vm2, %v22753_v57  ;;  %v19419_v57 = vld [vmem:[%s25929_s5 + $0x480] ss:$12 sps:$4 sm:$0xff]  }
 0x808   : > { %18487 = vmatpush3.bf16.msra.mxu0 %v22354_v38  ;;  %18492 = vmatprep.mubr.msk.bf16.mxu0 %vm4487_vm6, %v19395_v23  ;;  %v19416_v38 = vld [vmem:[%s25929_s5 + $0x498] ss:$12 sps:$4 sm:$0xff]  }
 0x809   : > { %18488 = vmatprep.subr.bf16.mxu0 %v22374_v0  ;;  %v19452_v23 = vld [vmem:[%s25929_s5 + $0x678] ss:$12 sps:$4 sm:$0xff]  }
 0x80c   : > { %18489 = vmatpush3.bf16.msra.mxu0 %v22374_v0  ;;  %v19418_v0 = vld [vmem:[%s25929_s5 + $0x49c] ss:$12 sps:$4 sm:$0xff]  }
 0x80d   : > { %18490 = vmatprep.subr.bf16.mxu0 %v22386_v54  ;;  %6721 = vmatprep.subr.bf16.mxu1 %v19418_v0  ;;  %v19472_v0 = vld [vmem:[%s25929_s5 + $0x600] ss:$12 sps:$4 sm:$0xff]  }
 0x80e   : > { %6722 = vmatpush1.bf16.msra.mxu1 %v19416_v38 }
 0x810   : > { %18491 = vmatpush3.bf16.msra.mxu0 %v22386_v54  ;;  %v19421_v54 = vld [vmem:[%s25929_s5 + $0x484] ss:$12 sps:$4 sm:$0xff]  }
 0x811   : > { %6723 = vmatprep.subr.bf16.mxu1 %v19421_v54  ;;  %16181 = vmatprep.subr.msk.bf16.mxu0 %vm5305_vm7, %v16179_v24 }
 0x812   : > { %6724 = vmatpush1.bf16.msra.mxu1 %v19419_v57  ;;  %v19474_v57 = vld [vmem:[%s25929_s5 + $0x604] ss:$12 sps:$4 sm:$0xff]  }
 0x813   : > { %18493 = vmatmul.mubr.msk.bf16.vlgmr.msra.gmra.mxu0 %vm4487_vm6, %v22879_v21  ;;  %6725 = vmatprep.subr.bf16.mxu1 %v19424_v27  ;;  %v19478_v27 = vld [vmem:[%s25929_s5 + $0x5ec] ss:$12 sps:$4 sm:$0xff]   ;;  %vm13566_vm6 = vcmask 23552  }
 0x814   : > { %6794 = vmatprep.mubr.bf16.mxu0 %v25985_v43  ;;  %6763 = vmatpush1.bf16.msra.mxu0 %v6703_v39 }
 0x815   : > { %6764 = vmatprep.subr.bf16.mxu0 %v19454_v25 }
 0x816   : > { %6726 = vmatpush1.bf16.msra.mxu1 %v19422_v58  ;;  %v19476_v58 = vld [vmem:[%s25929_s5 + $0x5e8] ss:$12 sps:$4 sm:$0xff]  }
 0x817   : > { %6727 = vmatprep.subr.bf16.mxu1 %v19427_v16  ;;  %v19480_v16 = vld [vmem:[%s25929_s5 + $0x5d8] ss:$12 sps:$4 sm:$0xff]  }
 0x818   : > { %6765 = vmatpush1.bf16.msra.mxu0 %v19452_v23 }
 0x819   : > { %6766 = vmatprep.subr.bf16.mxu0 %v19458_v12 }
 0x81a   : > { %6728 = vmatpush2.bf16.msra.mxu1 %v19425_v1 }
 0x81b   : > { %6729 = vmatprep.subr.bf16.mxu1 %v19430_v55 }
 0x81c   : > { %6767 = vmatpush1.bf16.msra.mxu0 %v19456_v28 }
 0x81d   : > { %6768 = vmatprep.subr.bf16.mxu0 %v19462_v60 }
 0x81e   : > { %6730 = vmatpush2.bf16.msra.mxu1 %v19428_v32 }
 0x81f   : > { %6731 = vmatprep.subr.bf16.mxu1 %v19433_v17 }
 0x820   : > { %6769 = vmatpush1.bf16.msra.mxu0 %v19460_v45 }
 0x821   : > { %6770 = vmatprep.subr.bf16.mxu0 %v19466_v4 }
 0x822   : > { %6732 = vmatpush2.bf16.msra.mxu1 %v19431_v11 }
 0x823   : > { %6733 = vmatprep.subr.bf16.mxu1 %v19436_v7 }
 0x824   : > { %6771 = vmatpush1.bf16.msra.mxu0 %v19464_v34 }
 0x825   : > { %6772 = vmatprep.subr.bf16.mxu0 %v19470_v33 }
 0x826   : > { %6734 = vmatpush2.bf16.msra.mxu1 %v19434_v63 }
 0x827   : > { %6735 = vmatprep.subr.bf16.mxu1 %v19439_v51 }
 0x828   : > { %6773 = vmatpush1.bf16.msra.mxu0 %v19468_v46 }
 0x829   : > { %6774 = vmatprep.subr.bf16.mxu0 %v19474_v57 }
 0x82a   : > { %6736 = vmatpush2.bf16.msra.mxu1 %v19437_v10 }
 0x82b   : > { %6737 = vmatprep.subr.bf16.mxu1 %v19442_v3 }
 0x82c   : > { %v5349_v41 = vpop.f32.mrf.mxu1  ;;  %6775 = vmatpush1.bf16.msra.mxu0 %v19472_v0 }
 0x82d   : > { %6776 = vmatprep.subr.bf16.mxu0 %v19478_v27 }
 0x82e   : > { %v5351_v40 = vpop.f32.mrf.mxu1  ;;  %6738 = vmatpush2.bf16.msra.mxu1 %v19440_v62 }
 0x82f   : > { %6739 = vmatprep.subr.bf16.mxu1 %v19445_v50 }
 0x830   : > { %v5353_v14 = vpop.f32.mrf.mxu1  ;;  %6777 = vmatpush1.bf16.msra.mxu0 %v19476_v58 }
 0x831   : > { %17895 = vmatprep.subr.bf16.mxu0 %v19480_v16 }
 0x832   : > { %v23002_v44 = vpop.f32.mrf.mxu1  ;;  %6740 = vmatpush2.bf16.msra.mxu1 %v19443_v9 }
 0x833   : > { %6741 = vmatprep.subr.bf16.mxu1 %v19448_v19 }
 0x834   : > { %v5359_v13 = vpop.f32.mrf.mxu1 }
 0x836   : > { %v5361_v20 = vpop.f32.mrf.mxu1  ;;  %6742 = vmatpush2.bf16.msra.mxu1 %v19446_v47 }
 0x837   : > { %18734 = vmatprep.subr.msk.bf16.mxu1 %vm5305_vm7, %v23039_v48 }
 0x838   : > { %v5363_v2 = vpop.f32.mrf.mxu1 }
 0x83a   : > { %v5364_v26 = vpop.f32.mrf.mxu1 }
 0x847   : > { %v5400_v21 = vpop.f32.mrf.mxu0 }
 0x848   : > { %v23046_v52 = vadd.f32 %v5400_v21, %v5349_v41 }
 0x849   : > { %v5402_v56 = vpop.f32.mrf.mxu0 }
 0x84a   : > { %v23054_v31 = vadd.f32 %v5402_v56, %v5351_v40 }
 0x84b   : > { %v5404_v49 = vpop.f32.mrf.mxu0 }
 0x84c   : > { %v23062_v61 = vadd.f32 %v5404_v49, %v5353_v14  ;;  %v18464_v59 = vpop.f32.mrf.mxu1 }
 0x84d   : > { %v23064_v35 = vpop.f32.mrf.mxu0 }
 0x84e   : > { %v5499_v15 = vpop.f32.mrf.mxu1 }
 0x84f   : > { %v5410_v8 = vpop.f32.mrf.mxu0 }
 0x850   : > { %v23072_v22 = vadd.f32 %v5410_v8, %v5359_v13  ;;  %v18465_v29 = vpop.f32.mrf.mxu1 }
 0x851   : > { %v5412_v30 = vpop.f32.mrf.mxu0 }
 0x852   : > { %v23074_v6 = vadd.f32 %v5412_v30, %v5361_v20  ;;  %v5502_v32 = vpop.f32.mrf.mxu1  ;;  %v6709_v30 = vsel %vm5305_vm7, %v23039_v48, 0  ;;  %v19459_v48 = vld [vmem:[%s25929_s5 + $0x668] ss:$12 sps:$4 sm:$0xff]  }
 0x853   : > { %v5414_v38 = vpop.f32.mrf.mxu0 }
 0x854   : > { %v19455_v38 = vld [vmem:[%s25929_s5 + $0x680] ss:$12 sps:$4 sm:$0xff]  }
 0x855   : > { %v5415_v54 = vpop.f32.mrf.mxu0 }
 0x867   : > { %v17830_v1 = vpop.f32.mrf.mxu0 }
 0x869   : > { %v17831_v55 = vpop.f32.mrf.mxu0 }
 0x86a   : > { %v17832_v17 = vadd.f32 %v17831_v55, %v17830_v1 }
 0x86b   : > { %v17833_v11 = vpop.f32.mrf.mxu0 }
 0x86c   : > { %v5500_v41 = vadd.f32 %v17832_v17, %v5499_v15  ;;  %v5989_v63 = vpop.f32.mrf.mxu1 }
 0x86d   : > { %v17834_v7 = vpop.f32.mrf.mxu0 }
 0x86e   : > { %v5991_v40 = vpop.f32.mrf.mxu1  ;;  %v17835_v19 = vadd.f32 %v17834_v7, %v17833_v11 }
 0x86f   : > { %v17836_v14 = vpop.f32.mrf.mxu0 }
 0x870   : > { %v5993_v10 = vpop.f32.mrf.mxu1  ;;  %v5503_v12 = vadd.f32 %v17835_v19, %v5502_v32 }
 0x871   : > { %v17837_v51 = vpop.f32.mrf.mxu0 }
 0x872   : > { %v17838_v13 = vadd.f32 %v17837_v51, %v17836_v14  ;;  %v23091_v62 = vpop.f32.mrf.mxu1  ;;  %v19463_v14 = vld [vmem:[%s25929_s5 + $0x650] ss:$12 sps:$4 sm:$0xff]  }
 0x873   : > { %v17839_v3 = vpop.f32.mrf.mxu0 }
 0x874   : > { %v5508_v50 = vadd.f32 %v18464_v59, %v17838_v13  ;;  %v5999_v20 = vpop.f32.mrf.mxu1 }
 0x875   : > { %v17840_v36 = vpop.f32.mrf.mxu0 }
 0x876   : > { %v23093_v9 = vpop.f32.mrf.mxu1 }
 0x878   : > { %v6003_v24 = vpop.f32.mrf.mxu1 }
 0x87a   : > { %v6004_v53 = vpop.f32.mrf.mxu1 }
 0x88c   : > { %v17868_v25 = vpop.f32.mrf.mxu1 }
 0x88e   : > { %v17869_v2 = vpop.f32.mrf.mxu1 }
 0x88f   : > { %v17870_v39 = vadd.f32 %v17869_v2, %v17868_v25 }
 0x890   : > { %v17871_v26 = vpop.f32.mrf.mxu1 }
 0x891   : > { %v23095_v23 = vadd.f32 %v17870_v39, %v5500_v41 }
 0x892   : > { %v17872_v47 = vpop.f32.mrf.mxu1 }
 0x893   : > { %v17873_v28 = vadd.f32 %v17872_v47, %v17871_v26 }
 0x894   : > { %v17874_v21 = vpop.f32.mrf.mxu1 }
 0x895   : > { %v23097_v45 = vadd.f32 %v17873_v28, %v5503_v12 }
 0x896   : > { %v17875_v60 = vpop.f32.mrf.mxu1 }
 0x897   : > { %v17876_v56 = vadd.f32 %v17875_v60, %v17874_v21  ;;  %v19481_v60 = vld [vmem:[%s25929_s5 + $0x518] ss:$12 sps:$4 sm:$0xff]  }
 0x898   : > { %v17877_v49 = vpop.f32.mrf.mxu1 }
 0x899   : > { %v6049_v34 = vadd.f32 %v17876_v56, %v5508_v50  ;;  %v19482_v49 = vld [vmem:[%s25929_s5 + $0x5c0] ss:$12 sps:$4 sm:$0xff]  }
 0x89a   : > { %v17878_v4 = vpop.f32.mrf.mxu1 }
 0x89b   : > { %v19484_v4 = vld [vmem:[%s25929_s5 + $0x5a8] ss:$12 sps:$4 sm:$0xff]  }
 0x89c   : > { %v6154_v59 = vpop.f32.mrf.mxu1 }
 0x89e   : > { %v6156_v15 = vpop.f32.mrf.mxu1 }
 0x8a0   : > { %v6158_v33 = vpop.f32.mrf.mxu1 }
 0x8a1   : > { %v23099_v8 = vpack.c.bf16 %v6158_v33, %v6154_v59  ;;  %v19485_v59 = vld [vmem:[%s25929_s5 + $0x4e8] ss:$12 sps:$4 sm:$0xff]   ;;  %v19487_v33 = vld [vmem:[%s25929_s5 + $0x4d0] ss:$12 sps:$4 sm:$0xff]  }
 0x8a2   : > { %v6160_v46 = vpop.f32.mrf.mxu1 }
 0x8a3   : > { %v23101_v29 = vpack.c.bf16 %v6160_v46, %v6156_v15  ;;  %v19486_v15 = vld [vmem:[%s25929_s5 + $0x590] ss:$12 sps:$4 sm:$0xff]   ;;  %v19488_v46 = vld [vmem:[%s25929_s5 + $0x578] ss:$12 sps:$4 sm:$0xff]  }
 0x8a4   : > { %v6164_v0 = vpop.f32.mrf.mxu1 }
 0x8a5   : > { %6743 = vmatprep.mubr.bf16.mxu1 %v23101_v29  ;;  %v23120_v17 = vpack.c.bf16 %v6164_v0, %v6164_v0  ;;  %v19492_v0 = vld [vmem:[%s25929_s5 + $0x548] ss:$12 sps:$4 sm:$0xff]  }
 0x8a6   : > { %6744 = vmatmul.mubr.bf16.vlgmr.msra.gmra.mxu1 %v23099_v8  ;;  %v6166_v57 = vpop.f32.mrf.mxu1 }
 0x8a7   : > { %v5938_v54 = vpop.f32.mrf.mxu0  ;;  %18497 = vmatpush3.bf16.msra.mxu1 %v6709_v30  ;;  %v23110_v58 = vpack.c.bf16 %v6166_v57, %v6166_v57  ;;  %v19489_v30 = vld [vmem:[%s25929_s5 + $0x4b8] ss:$12 sps:$4 sm:$0xff]   ;;  %v19493_v57 = vld [vmem:[%s25929_s5 + $0x488] ss:$12 sps:$4 sm:$0xff]  }
 0x8a8   : > { %v5939_v27 = vadd.f32 %v5938_v54, %v23046_v52  ;;  %18498 = vmatprep.subr.bf16.mxu1 %v19455_v38  ;;  %v6168_v16 = vpop.f32.mrf.mxu1  ;;  %v19494_v54 = vld [vmem:[%s25929_s5 + $0x530] ss:$12 sps:$4 sm:$0xff]  }
 0x8a9   : > { %v5940_v1 = vpop.f32.mrf.mxu0  ;;  %6753 = vmatprep.mubr.bf16.mxu1 %v23110_v58 }
 0x8aa   : > { %v23117_v55 = vadd.f32 %v5989_v63, %v5939_v27  ;;  %v5941_v32 = vadd.f32 %v5940_v1, %v23054_v31  ;;  %v6169_v11 = vpop.f32.mrf.mxu1  ;;  %v19495_v27 = vld [vmem:[%s25929_s5 + $0x470] ss:$12 sps:$4 sm:$0xff]  }
 0x8ab   : > { %v5942_v41 = vpop.f32.mrf.mxu0  ;;  %18499 = vmatpush3.bf16.msra.mxu1 %v19455_v38  ;;  %v19490_v38 = vld [vmem:[%s25929_s5 + $0x560] ss:$12 sps:$4 sm:$0xff]  }
 0x8ac   : > { %v23122_v7 = vadd.f32 %v5991_v40, %v5941_v32  ;;  %v5943_v52 = vadd.f32 %v5942_v41, %v23062_v61  ;;  %18500 = vmatprep.subr.bf16.mxu1 %v19459_v48  ;;  %v19467_v61 = vld [vmem:[%s25929_s5 + $0x638] ss:$12 sps:$4 sm:$0xff]  }
 0x8ad   : > { %v23128_v51 = vpop.f32.mrf.mxu0 }
 0x8ae   : > { %v23130_v63 = vadd.f32 %v5993_v10, %v5943_v52  ;;  %6754 = vmatmul.mubr.bf16.gmra.mxu1 %v23120_v17 }
 0x8af   : > { %v5948_v31 = vpop.f32.mrf.mxu0  ;;  %18501 = vmatpush3.bf16.msra.mxu1 %v19459_v48 }
 0x8b0   : > { %v5949_v13 = vadd.f32 %v5948_v31, %v23072_v22  ;;  %18502 = vmatprep.subr.bf16.mxu1 %v19463_v14  ;;  %v19471_v22 = vld [vmem:[%s25929_s5 + $0x620] ss:$12 sps:$4 sm:$0xff]  }
 0x8b1   : > { %v5950_v40 = vpop.f32.mrf.mxu0 }
 0x8b2   : > { %v23137_v3 = vadd.f32 %v5999_v20, %v5949_v13  ;;  %v5951_v50 = vadd.f32 %v5950_v40, %v23074_v6  ;;  %v19475_v20 = vld [vmem:[%s25929_s5 + $0x608] ss:$12 sps:$4 sm:$0xff]   ;;  %v19479_v6 = vld [vmem:[%s25929_s5 + $0x5f0] ss:$12 sps:$4 sm:$0xff]  }
 0x8b3   : > { %v5952_v36 = vpop.f32.mrf.mxu0  ;;  %18503 = vmatpush3.bf16.msra.mxu1 %v19463_v14 }
 0x8b4   : > { %v23141_v10 = vadd.f32 %v23093_v9, %v5951_v50  ;;  %18504 = vmatprep.subr.bf16.mxu1 %v19467_v61  ;;  %v25986_v9 = vmov 0.0  }
 0x8b5   : > { %v5953_v24 = vpop.f32.mrf.mxu0 }
 0x8b7   : > { %18505 = vmatpush3.bf16.msra.mxu1 %v19467_v61 }
 0x8b8   : > { %18506 = vmatprep.subr.bf16.mxu1 %v19471_v22 }
 0x8bb   : > { %18507 = vmatpush3.bf16.msra.mxu1 %v19471_v22 }
 0x8bc   : > { %18508 = vmatprep.subr.bf16.mxu1 %v19475_v20 }
 0x8bf   : > { %18509 = vmatpush3.bf16.msra.mxu1 %v19475_v20 }
 0x8c0   : > { %18510 = vmatprep.subr.bf16.mxu1 %v19479_v6 }
 0x8c3   : > { %18511 = vmatpush3.bf16.msra.mxu1 %v19479_v6 }
 0x8c4   : > { %18524 = vmatprep.subr.bf16.mxu1 %v25986_v9 }
 0x8c7   : > { %v18484_v53 = vpop.f32.mrf.mxu0 }
 0x8c8   : > { %v23153_v25 = vadd.f32 %v18484_v53, %v6049_v34 }
 0x8c9   : > { %v6088_v2 = vpop.f32.mrf.mxu0 }
 0x8ca   : > { %v23156_v19 = vadd.f32 %v6088_v2, %v23095_v23  ;;  %v19483_v23 = vld [vmem:[%s25929_s5 + $0x500] ss:$12 sps:$4 sm:$0xff]  }
 0x8cb   : > { %v18485_v39 = vpop.f32.mrf.mxu0 }
 0x8cd   : > { %v23158_v26 = vpop.f32.mrf.mxu0 }
 0x8d3   : > { %v18494_v47 = vpop.f32.mrf.mxu0 }
 0x8d4   : > { %v6224_v34 = vpack.c.bf16 %v18494_v47, %v18494_v47 }
 0x8d5   : > { %v6205_v12 = vpop.f32.mrf.mxu0 }
 0x8d7   : > { %v18495_v28 = vpop.f32.mrf.mxu0 }
 0x8d9   : > { %v6208_v21 = vpop.f32.mrf.mxu0 }
 0x8da   : > { %v6221_v56 = vpack.c.bf16 %v6208_v21, %v6205_v12 }
 0x8dc   : > { %16182 = vmatmul.mubr.msk.bf16.vlgmr.msra.gmra.mxu0 %vm4317_vm2, %v6221_v56  ;;  %18512 = vmatprep.mubr.msk.bf16.mxu1 %vm4317_vm2, %v6221_v56  ;;  %v5407_v56 = vadd.f32 %v23064_v35, %v23002_v44 }
 0x8dd   : > { %17896 = vmatpush3.bf16.msra.mxu0 %v19481_v60  ;;  %18513 = vmatmul.mubr.msk.bf16.vlgmr.msra.gmra.mxu1 %vm4317_vm2, %v6224_v34 }
 0x8de   : > { %17897 = vmatprep.subr.bf16.mxu0 %v19482_v49  ;;  %6804 = vmatprep.mubr.bf16.mxu0 %v25985_v43 }
 0x8df   : > { %18528 = vmatprep.mubr.msk.bf16.mxu1 %vm20552_vm0, %v25986_v9 }
 0x8e1   : > { %17898 = vmatpush3.bf16.msra.mxu0 %v19483_v23  ;;  %v5945_v23 = vadd.f32 %v23128_v51, %v5407_v56  ;;  %v6092_v51 = vadd.f32 %v23158_v26, %v23097_v45 }
 0x8e2   : > { %17899 = vmatprep.subr.bf16.mxu0 %v19484_v4 }
 0x8e3   : > { %v5996_v44 = vadd.f32 %v23091_v62, %v5945_v23 }
 0x8e4   : > { %16183 = vmatmul.mubr.msk.bf16.gmra.mxu0 %vm4317_vm2, %v6224_v34  ;;  %vm11519_vm2 = vcmask 1041408  }
 0x8e5   : > { %17900 = vmatpush3.bf16.msra.mxu0 %v19485_v59  ;;  %6845 = vmatprep.mubr.bf16.mxu0 %v23101_v29  ;;  %v19491_v29 = vld [vmem:[%s25929_s5 + $0x4a0] ss:$12 sps:$4 sm:$0xff]  }
 0x8e6   : > { %17901 = vmatprep.subr.bf16.mxu0 %v19486_v15 }
 0x8e9   : > { %17902 = vmatpush3.bf16.msra.mxu0 %v19487_v33 }
 0x8ea   : > { %17903 = vmatprep.subr.bf16.mxu0 %v19488_v46 }
 0x8ed   : > { %17904 = vmatpush3.bf16.msra.mxu0 %v19489_v30 }
 0x8ee   : > { %17905 = vmatprep.subr.bf16.mxu0 %v19490_v38 }
 0x8f1   : > { %17906 = vmatpush3.bf16.msra.mxu0 %v19491_v29 }
 0x8f2   : > { %17907 = vmatprep.subr.bf16.mxu0 %v19492_v0 }
 0x8f5   : > { %17908 = vmatpush3.bf16.msra.mxu0 %v19493_v57 }
 0x8f6   : > { %17909 = vmatprep.subr.bf16.mxu0 %v19494_v54 }
 0x8f9   : > { %17910 = vmatpush3.bf16.msra.mxu0 %v19495_v27 }
 0x8fc   : > { %6846 = vmatmul.mubr.bf16.vlgmr.msra.gmra.mxu0 %v23099_v8 }
 0x8fd   : > { %6853 = vmatprep.mubr.bf16.mxu0 %v23110_v58 }
 0x904   : > { %6854 = vmatmul.mubr.bf16.gmra.mxu0 %v23120_v17 }
 0x905   : > { %7095 = vmatprep.mubr.bf16.mxu0 %v25985_v43 }
 0x966   : > { %v6745_v48 = vpop.f32.mrf.mxu1 }
 0x968   : > { %v6747_v16 = vpop.f32.mrf.mxu1 }
 0x96a   : > { %v6749_v1 = vpop.f32.mrf.mxu1 }
 0x96c   : > { %v6751_v32 = vpop.f32.mrf.mxu1 }
 0x96e   : > { %v6755_v11 = vpop.f32.mrf.mxu1 }
 0x970   : > { %v6757_v41 = vpop.f32.mrf.mxu1 }
 0x972   : > { %v6759_v52 = vpop.f32.mrf.mxu1 }
 0x974   : > { %v6760_v14 = vpop.f32.mrf.mxu1 }
 0x99c   : > { %v6796_v31 = vpop.f32.mrf.mxu0 }
 0x99d   : > { %v6797_v13 = vadd.f32 %v6796_v31, %v6745_v48  ;;  %v18514_v61 = vpop.f32.mrf.mxu1 }
 0x99e   : > { %v6798_v40 = vpop.f32.mrf.mxu0 }
 0x99f   : > { %v6909_v8 = vadd.f32 %v6797_v13, %v23117_v55  ;;  %v6799_v50 = vadd.f32 %v6798_v40, %v6747_v16  ;;  %v6895_v58 = vpop.f32.mrf.mxu1 }
 0x9a0   : > { %v6800_v36 = vpop.f32.mrf.mxu0 }
 0x9a1   : > { %v6910_v17 = vadd.f32 %v6799_v50, %v23122_v7  ;;  %v6801_v22 = vadd.f32 %v6800_v36, %v6749_v1  ;;  %v18515_v24 = vpop.f32.mrf.mxu1  ;;  %v6918_v7 = vld [vmem:[%s25930_s6] sm:$0x7] }
 0x9a2   : > { %v6802_v20 = vpop.f32.mrf.mxu0 }
 0x9a3   : > { %v6912_v6 = vadd.f32 %v6801_v22, %v23130_v63  ;;  %v6927_v63 = vrot.slane %v6918_v7, %v22095_v37  ;;  %v6803_v33 = vadd.f32 %v6802_v20, %v6751_v32  ;;  %v6898_v29 = vpop.f32.mrf.mxu1 }
 0x9a4   : > { %v6806_v53 = vpop.f32.mrf.mxu0 }
 0x9a5   : > { %v6807_v2 = vadd.f32 %v6806_v53, %v6755_v11  ;;  %v6936_v15 = vadd.f32 %v6927_v63, %v6910_v17  ;;  %v6913_v48 = vadd.f32 %v6803_v33, %v5996_v44 }
 0x9a6   : > { %v6808_v39 = vpop.f32.mrf.mxu0 }
 0x9a7   : > { %v6915_v47 = vadd.f32 %v6807_v2, %v23137_v3  ;;  %v6809_v12 = vadd.f32 %v6808_v39, %v6757_v41  ;;  %v6923_v3 = vrot.slane %v6918_v7, %v22104_v42  ;;  %v6939_v31 = vadd.f32 %v6927_v63, %v6913_v48 }
 0x9a8   : > { %v6810_v28 = vpop.f32.mrf.mxu0 }
 0x9a9   : > { %v6916_v21 = vadd.f32 %v6809_v12, %v23141_v10  ;;  %v6931_v10 = vrot.slane %v6918_v7, %v22110_v5  ;;  %v6935_v35 = vadd.f32 %v6923_v3, %v6909_v8  ;;  %v6941_v8 = vadd.f32 %v6923_v3, %v6915_v47 }
 0x9aa   : > { %v6811_v55 = vpop.f32.mrf.mxu0 }
 0x9ab   : > { %v6944_v27 = vadd.f32 %v6936_v15, %v6935_v35  ;;  %v6942_v50 = vadd.f32 %v6927_v63, %v6916_v21  ;;  %v6952_v22 = vsel %vm4336_vm3, %v6941_v8, 0.0 }
 0x9ad   : > { %v6954_v20 = vsel %vm4336_vm3, %v6942_v50, 0.0 }
 0x9bc   : > { %v17911_v60 = vpop.f32.mrf.mxu0 }
 0x9be   : > { %v17912_v49 = vpop.f32.mrf.mxu0 }
 0x9bf   : > { %v17913_v34 = vadd.f32 %v17912_v49, %v17911_v60 }
 0x9c0   : > { %v17914_v4 = vpop.f32.mrf.mxu0 }
 0x9c1   : > { %v6896_v59 = vadd.f32 %v17913_v34, %v6895_v58 }
 0x9c2   : > { %v17915_v46 = vpop.f32.mrf.mxu0 }
 0x9c3   : > { %v6911_v30 = vadd.f32 %v6896_v59, %v23156_v19  ;;  %v17916_v38 = vadd.f32 %v17915_v46, %v17914_v4  ;;  %v6938_v19 = vadd.f32 %v6923_v3, %v6912_v6 }
 0x9c4   : > { %v17917_v0 = vpop.f32.mrf.mxu0 }
 0x9c5   : > { %v6937_v57 = vadd.f32 %v6931_v10, %v6911_v30  ;;  %v6899_v54 = vadd.f32 %v17916_v38, %v6898_v29 }
 0x9c6   : > { %v17918_v16 = vpop.f32.mrf.mxu0 }
 0x9c7   : > { %v6946_v1 = vsel %vm6945_vm8, %v6937_v57, 0.0  ;;  %v6914_v32 = vadd.f32 %v6899_v54, %v6092_v51  ;;  %v17919_v11 = vadd.f32 %v17918_v16, %v17917_v0 }
 0x9c8   : > { %v6947_v41 = vadd.f32 %v6946_v1, %v6944_v27  ;;  %v17920_v52 = vpop.f32.mrf.mxu0 }
 0x9c9   : > { %v6940_v62 = vadd.f32 %v6931_v10, %v6914_v32  ;;  %v6904_v14 = vadd.f32 %v18514_v61, %v17919_v11 }
 0x9ca   : > { %v17921_v13 = vpop.f32.mrf.mxu0  ;;  %v6948_v40 = vadd.f32 %v6947_v41, %v6938_v19 }
 0x9cb   : > { %v6917_v45 = vadd.f32 %v6904_v14, %v23153_v25  ;;  %v6950_v58 = vsel %vm6945_vm8, %v6940_v62, 0.0 }
 0x9cc   : > { %v6949_v26 = vadd.f32 %v6948_v40, %v6939_v31 }
 0x9cd   : > { %v6943_v17 = vadd.f32 %v6931_v10, %v6917_v45 }
 0x9ce   : > { %v6951_v36 = vadd.f32 %v6950_v58, %v6949_v26  ;;  %v7052_v58 = vsel %vm7051_vm10, 4294967295, %v20554_v18 }
 0x9cf   : > { %v6957_v61 = vsel %vm6956_vm9, %v6943_v17, 0.0 }
 0x9d0   : > { %v6953_v24 = vadd.f32 %v6952_v22, %v6951_v36 }
 0x9d2   : > { %v6955_v6 = vadd.f32 %v6954_v20, %v6953_v24 }
 0x9d4   : > { %v6958_v53 = vadd.f32 %v6957_v61, %v6955_v6 }
 0x9d6   : > { %6959 = vadd.xlane.f32.xlu1 %v6958_v53 }
 0xa5f   : > { %v6960_v2 = vpop.xlane.xlu1 %6959 }
 0xa60   : > { %v6961_v39 = vrot.slane %v6960_v2, 4 }
 0xa62   : > { %v6962_v25 = vadd.f32 %v6961_v39, %v6960_v2 }
 0xa64   : > { %v6963_v47 = vrot.slane %v6962_v25, 2 }
 0xa66   : > { %v6964_v12 = vadd.f32 %v6963_v47, %v6962_v25  ;;  %v7053_v25 = vsel %vm5305_vm7, %v7052_v58, 0  ;;  %v19528_v58 = vld [vmem:[%s25932_s8 + $0x228] ss:$12 sps:$4 sm:$0xff]  }
 0xa68   : > { %v6965_v28 = vrot.slane %v6964_v12, 1 }
 0xa6a   : > { %v6966_v21 = vadd.f32 %v6965_v28, %v6964_v12 }
 0xa6c   : > { %18742 = vpush %v6966_v21 }
 0xa9d   : > { %s18743_s29 = spop %18742 }
 0xa9e   : > { %s6968_s20 = smul.f32 0.00011814745, %s18743_s29 }
 0xaa0   : > { %v6969_v55 = vstv %s6968_s20 }
 0xaa1   : > { %v23241_v60 = vsub.f32 %v6935_v35, %v6969_v55  ;;  %v6971_v7 = vsub.f32 %v6936_v15, %v6969_v55  ;;  %v6972_v56 = vsub.f32 %v6937_v57, %v6969_v55  ;;  %v6973_v63 = vsub.f32 %v6938_v19, %v6969_v55 }
 0xaa2   : > { %v6975_v3 = vsub.f32 %v6940_v62, %v6969_v55  ;;  %v6974_v4 = vsub.f32 %v6939_v31, %v6969_v55  ;;  %v6976_v33 = vsub.f32 %v6941_v8, %v6969_v55  ;;  %v6977_v38 = vsub.f32 %v6942_v50, %v6969_v55 }
 0xaa3   : > { %v6979_v49 = vmul.f32 %v23241_v60, %v23241_v60  ;;  %v6980_v34 = vmul.f32 %v6971_v7, %v6971_v7  ;;  %v6981_v23 = vmul.f32 %v6972_v56, %v6972_v56  ;;  %v6982_v46 = vmul.f32 %v6973_v63, %v6973_v63 }
 0xaa4   : > { %v6984_v44 = vmul.f32 %v6975_v3, %v6975_v3  ;;  %v6983_v35 = vmul.f32 %v6974_v4, %v6974_v4  ;;  %v6978_v15 = vsub.f32 %v6943_v17, %v6969_v55  ;;  %v6985_v0 = vmul.f32 %v6976_v33, %v6976_v33 }
 0xaa5   : > { %v6988_v59 = vadd.f32 %v6980_v34, %v6979_v49  ;;  %v6989_v10 = vsel %vm6945_vm8, %v6981_v23, 0.0  ;;  %v6986_v57 = vmul.f32 %v6977_v38, %v6977_v38 }
 0xaa6   : > { %v6993_v54 = vsel %vm6945_vm8, %v6984_v44, 0.0  ;;  %v6987_v48 = vmul.f32 %v6978_v15, %v6978_v15  ;;  %v6995_v16 = vsel %vm4336_vm3, %v6985_v0, 0.0  ;;  %v19513_v44 = vld [vmem:[%s25932_s8 + $0x438] ss:$12 sps:$4 sm:$0xff]   ;;  %v19525_v0 = vld [vmem:[%s25932_s8 + $0x408] ss:$12 sps:$4 sm:$0xff]  }
 0xaa7   : > { %v6990_v30 = vadd.f32 %v6989_v10, %v6988_v59  ;;  %v6997_v32 = vsel %vm4336_vm3, %v6986_v57, 0.0  ;;  %v19531_v57 = vld [vmem:[%s25932_s8 + $0x3f0] ss:$12 sps:$4 sm:$0xff]   ;;  %vm11515_vm3 = vcmask 39936  }
 0xaa8   : > { %v6999_v19 = vsel %vm6956_vm9, %v6987_v48, 0.0  ;;  %v19537_v48 = vld [vmem:[%s25932_s8 + $0x3d8] ss:$12 sps:$4 sm:$0xff]  }
 0xaa9   : > { %v6991_v29 = vadd.f32 %v6990_v30, %v6982_v46  ;;  %v19496_v30 = vld [vmem:[%s25931_s7 + $0x8] sm:$0x3f]  }
 0xaab   : > { %v6992_v51 = vadd.f32 %v6991_v29, %v6983_v35  ;;  %v19521_v35 = vld [vmem:[%s25932_s8 + $0x424] ss:$12 sps:$4 sm:$0xff]   ;;  %v19519_v29 = vld [vmem:[%s25932_s8 + $0x420] ss:$12 sps:$4 sm:$0xff]  }
 0xaad   : > { %v6994_v27 = vadd.f32 %v6993_v54, %v6992_v51  ;;  %v19533_v51 = vld [vmem:[%s25932_s8 + $0x3f4] ss:$12 sps:$4 sm:$0xff]   ;;  %v19539_v54 = vld [vmem:[%s25932_s8 + $0x3dc] ss:$12 sps:$4 sm:$0xff]  }
 0xaaf   : > { %v6996_v1 = vadd.f32 %v6995_v16, %v6994_v27  ;;  %v19500_v27 = vld [vmem:[%s25932_s8 + $0x2d4] ss:$12 sps:$4 sm:$0xff]   ;;  %v19498_v16 = vld [vmem:[%s25932_s8 + $0x2d0] ss:$12 sps:$4 sm:$0xff]  }
 0xab1   : > { %v6998_v11 = vadd.f32 %v6997_v32, %v6996_v1  ;;  %v19545_v1 = vld [vmem:[%s25932_s8 + $0x3c4] ss:$12 sps:$4 sm:$0xff]   ;;  %v19503_v32 = vld [vmem:[%s25932_s8 + $0x2bc] ss:$12 sps:$4 sm:$0xff]  }
 0xab3   : > { %v7000_v41 = vadd.f32 %v6999_v19, %v6998_v11  ;;  %v19543_v11 = vld [vmem:[%s25932_s8 + $0x3c0] ss:$12 sps:$4 sm:$0xff]   ;;  %v19501_v19 = vld [vmem:[%s25932_s8 + $0x2b8] ss:$12 sps:$4 sm:$0xff]  }
 0xab5   : > { %7001 = vadd.xlane.f32.xlu1 %v7000_v41  ;;  %v19506_v41 = vld [vmem:[%s25932_s8 + $0x2a4] ss:$12 sps:$4 sm:$0xff]  }
 0xb3e   : > { %v7002_v52 = vpop.xlane.xlu1 %7001 }
 0xb3f   : > { %v7003_v62 = vrot.slane %v7002_v52, 4 }
 0xb41   : > { %v7004_v14 = vadd.f32 %v7003_v62, %v7002_v52  ;;  %v19504_v52 = vld [vmem:[%s25932_s8 + $0x2a0] ss:$12 sps:$4 sm:$0xff]  }
 0xb42   : > { %v19509_v62 = vld [vmem:[%s25932_s8 + $0x28c] ss:$12 sps:$4 sm:$0xff]  }
 0xb43   : > { %v7005_v31 = vrot.slane %v7004_v14, 2 }
 0xb45   : > { %v7006_v13 = vadd.f32 %v7005_v31, %v7004_v14  ;;  %v19507_v14 = vld [vmem:[%s25932_s8 + $0x288] ss:$12 sps:$4 sm:$0xff]  }
 0xb46   : > { %v19512_v31 = vld [vmem:[%s25932_s8 + $0x274] ss:$12 sps:$4 sm:$0xff]  }
 0xb47   : > { %v7007_v40 = vrot.slane %v7006_v13, 1 }
 0xb49   : > { %v7008_v8 = vadd.f32 %v7007_v40, %v7006_v13  ;;  %v19510_v13 = vld [vmem:[%s25932_s8 + $0x270] ss:$12 sps:$4 sm:$0xff]  }
 0xb4a   : > { %v19518_v40 = vld [vmem:[%s25932_s8 + $0x25c] ss:$12 sps:$4 sm:$0xff]  }
 0xb4b   : > { %18744 = vpush %v7008_v8  ;;  %v19516_v8 = vld [vmem:[%s25932_s8 + $0x258] ss:$12 sps:$4 sm:$0xff]  }
 0xb7c   : > { %s18745_s1 = spop %18744 }
 0xb7d   : > { %s7010_s22 = smul.f32 0.00011814745, %s18745_s1 }
 0xb7f   : > { %s7011_s23 = sadd.f32 1e-05, %s7010_s22 }
 0xb81   : > { %v7012_v45 = vstv %s7011_s23 }
 0xb82   : > { %20497 = vrsqrt.f32 %v7012_v45  ;;  %v19524_v45 = vld [vmem:[%s25932_s8 + $0x244] ss:$12 sps:$4 sm:$0xff]  }
 0xb8f   : > { %v20498_v26 = vpop.eup %20497 }
 0xb90   : > { %18746 = vpush %v20498_v26  ;;  %v19522_v26 = vld [vmem:[%s25932_s8 + $0x240] ss:$12 sps:$4 sm:$0xff]  }
 0xbc1   : > { %s18747_s24 = spop %18746 }
 0xbc2   : > { %v7015_v50 = vstv %s18747_s24 }
 0xbc3   : > { %v7023_v36 = vmul.f32 %v7015_v50, %v6977_v38  ;;  %v7024_v17 = vmul.f32 %v7015_v50, %v6978_v15  ;;  %v7022_v22 = vmul.f32 %v7015_v50, %v6976_v33  ;;  %v7017_v24 = vmul.f32 %v7015_v50, %v6971_v7  ;;  %v19497_v38 = vld [vmem:[%s25931_s7] sm:$0x3f]   ;;  %v19527_v15 = vld [vmem:[%s25932_s8 + $0x40c] ss:$12 sps:$4 sm:$0xff]  }
 0xbc4   : > { %v7020_v20 = vmul.f32 %v7015_v50, %v6974_v4  ;;  %v7018_v6 = vmul.f32 %v7015_v50, %v6972_v56  ;;  %v7021_v39 = vmul.f32 %v7015_v50, %v6975_v3  ;;  %v7016_v12 = vmul.f32 %v7015_v50, %v23241_v60 }
 0xbc5   : > { %v7032_v61 = vmax.f32 %v7023_v36, 0.0  ;;  %v7033_v53 = vmax.f32 %v7024_v17, 0.0  ;;  %v7031_v2 = vmax.f32 %v7022_v22, 0.0  ;;  %v7026_v47 = vmax.f32 %v7017_v24, 0.0  ;;  %v19536_v36 = vld [vmem:[%s25932_s8 + $0x394] ss:$12 sps:$4 sm:$0xff]  }
 0xbc6   : > { %v7019_v28 = vmul.f32 %v7015_v50, %v6973_v63  ;;  %v7029_v34 = vmax.f32 %v7020_v20, 0.0  ;;  %v7027_v23 = vmax.f32 %v7018_v6, 0.0  ;;  %v7030_v4 = vmax.f32 %v7021_v39, 0.0  ;;  %v19515_v63 = vld [vmem:[%s25932_s8 + $0x43c] ss:$12 sps:$4 sm:$0xff]  }
 0xbc7   : > { %v7038_v21 = vpack.c.bf16 %v7032_v61, %v7032_v61  ;;  %v7039_v55 = vpack.c.bf16 %v7033_v53, %v7033_v53  ;;  %v7037_v49 = vpack.c.bf16 %v7031_v2, %v7031_v2  ;;  %v7025_v10 = vmax.f32 %v7016_v12, 0.0  ;;  %v19530_v50 = vld [vmem:[%s25932_s8 + $0x22c] ss:$12 sps:$4 sm:$0xff]   ;;  %v19534_v17 = vld [vmem:[%s25932_s8 + $0x390] ss:$12 sps:$4 sm:$0xff]  }
 0xbc8   : > { %v7028_v3 = vmax.f32 %v7019_v28, 0.0  ;;  %v23262_v60 = vpack.c.bf16 %v7029_v34, %v7026_v47  ;;  %v23270_v33 = vpack.c.bf16 %v7030_v4, %v7027_v23  ;;  %v19542_v22 = vld [vmem:[%s25932_s8 + $0x37c] ss:$12 sps:$4 sm:$0xff]   ;;  %v19540_v24 = vld [vmem:[%s25932_s8 + $0x378] ss:$12 sps:$4 sm:$0xff]  }
 0xbc9   : > { %v23254_v59 = vand.u32 %v7053_v25, %v7038_v21  ;;  %v23256_v7 = vand.u32 %v7053_v25, %v7039_v55  ;;  %v23258_v56 = vand.u32 %v7053_v25, %v7037_v49  ;;  %v19546_v20 = vld [vmem:[%s25932_s8 + $0x360] ss:$12 sps:$4 sm:$0xff]   ;;  %v19548_v6 = vld [vmem:[%s25932_s8 + $0x364] ss:$12 sps:$4 sm:$0xff]   ;;  %v19549_v61 = vld [vmem:[%s25932_s8 + $0x3a8] ss:$12 sps:$4 sm:$0xff]  }
 0xbca   : > { %v23272_v46 = vpack.c.bf16 %v7028_v3, %v7025_v10  ;;  %v19551_v53 = vld [vmem:[%s25932_s8 + $0x3ac] ss:$12 sps:$4 sm:$0xff]   ;;  %v19552_v2 = vld [vmem:[%s25932_s8 + $0x348] ss:$12 sps:$4 sm:$0xff]   ;;  %v19557_v47 = vld [vmem:[%s25932_s8 + $0x330] ss:$12 sps:$4 sm:$0xff]  }
 0xbcb   : > { %7075 = vmatprep.subr.bf16.mxu0 %v23254_v59  ;;  %18525 = vmatpush3.bf16.msra.mxu1 %v23256_v7  ;;  %v19554_v39 = vld [vmem:[%s25932_s8 + $0x34c] ss:$12 sps:$4 sm:$0xff]   ;;  %v19559_v12 = vld [vmem:[%s25932_s8 + $0x334] ss:$12 sps:$4 sm:$0xff]   ;;  %v19564_v21 = vld [vmem:[%s25932_s8 + $0x31c] ss:$12 sps:$4 sm:$0xff]  }
 0xbcc   : > { %7076 = vmatpush1.bf16.msra.mxu0 %v23258_v56  ;;  %18526 = vmatprep.subr.bf16.mxu1 %v25986_v9  ;;  %v19555_v25 = vld [vmem:[%s25932_s8 + $0x398] ss:$12 sps:$4 sm:$0xff]   ;;  %v19567_v55 = vld [vmem:[%s25932_s8 + $0x300] ss:$12 sps:$4 sm:$0xff]   ;;  %v19572_v34 = vld [vmem:[%s25932_s8 + $0x2e8] ss:$12 sps:$4 sm:$0xff]  }
 0xbcd   : > { %7077 = vmatprep.subr.bf16.mxu0 %v23262_v60  ;;  %v19562_v28 = vld [vmem:[%s25932_s8 + $0x318] ss:$12 sps:$4 sm:$0xff]  }
 0xbce   : > { %v19569_v49 = vld [vmem:[%s25932_s8 + $0x304] ss:$12 sps:$4 sm:$0xff]   ;;  %v19574_v23 = vld [vmem:[%s25932_s8 + $0x2ec] ss:$12 sps:$4 sm:$0xff]  }
 0xbcf   : > { %18527 = vmatpush3.bf16.msra.mxu1 %v23270_v33  ;;  %v19580_v4 = vld [vmem:[%s25932_s8 + $0xac] ss:$12 sps:$4 sm:$0xff]  }
 0xbd0   : > { %7078 = vmatpush1.bf16.msra.mxu0 %v23272_v46  ;;  %7849 = vmatprep.subr.bf16.mxu1 %v19515_v63 }
 0xbd1   : > { %18516 = vmatprep.subr.bf16.mxu0 %v25986_v9 }
 0xbd2   : > { %18529 = vmatmul.mubr.msk.bf16.vlgmr.msra.gmra.mxu1 %vm7047_vm11, %v19496_v30 }
 0xbd3   : > { %16187 = vmatmul.mubr.msk.bf16.vlgmr.msra.gmra.mxu0 %vm7047_vm11, %v19497_v38  ;;  %7850 = vmatpush1.bf16.msra.mxu1 %v19513_v44  ;;  %v19556_v44 = vld [vmem:[%s25932_s8 + $0x2d8] ss:$12 sps:$4 sm:$0xff]  }
 0xbd4   : > { %18517 = vmatpush3.bf16.msra.mxu0 %v23256_v7  ;;  %18520 = vmatprep.mubr.msk.bf16.mxu0 %vm20552_vm0, %v25986_v9 }
 0xbd5   : > { %18518 = vmatprep.subr.bf16.mxu0 %v25986_v9  ;;  %7851 = vmatprep.subr.bf16.mxu1 %v19521_v35 }
 0xbd6   : > { %7879 = vmatprep.mubr.bf16.mxu1 %v25985_v43 }
 0xbd7   : > { %7852 = vmatpush1.bf16.msra.mxu1 %v19519_v29 }
 0xbd8   : > { %18519 = vmatpush3.bf16.msra.mxu0 %v23270_v33  ;;  %7853 = vmatprep.subr.bf16.mxu1 %v19527_v15  ;;  %v19560_v15 = vld [vmem:[%s25932_s8 + $0x380] ss:$12 sps:$4 sm:$0xff]  }
 0xbd9   : > { %7265 = vmatprep.subr.bf16.mxu0 %v23254_v59 }
 0xbdb   : > { %18521 = vmatmul.mubr.msk.bf16.vlgmr.msra.gmra.mxu0 %vm7047_vm11, %v19497_v38  ;;  %7854 = vmatpush1.bf16.msra.mxu1 %v19525_v0 }
 0xbdc   : > { %7266 = vmatpush1.bf16.msra.mxu0 %v23258_v56  ;;  %7285 = vmatprep.mubr.bf16.mxu0 %v25985_v43 }
 0xbdd   : > { %7267 = vmatprep.subr.bf16.mxu0 %v23262_v60  ;;  %7855 = vmatprep.subr.bf16.mxu1 %v19533_v51 }
 0xbdf   : > { %7856 = vmatpush1.bf16.msra.mxu1 %v19531_v57 }
 0xbe0   : > { %7268 = vmatpush1.bf16.msra.mxu0 %v23272_v46  ;;  %7857 = vmatprep.subr.bf16.mxu1 %v19539_v54  ;;  %v19561_v54 = vld [vmem:[%s25932_s8 + $0x2c0] ss:$12 sps:$4 sm:$0xff]  }
 0xbe1   : > { %7804 = vmatprep.subr.bf16.mxu0 %v19500_v27 }
 0xbe3   : > { %16192 = vmatmul.mubr.msk.bf16.vlgmr.msra.gmra.mxu0 %vm7047_vm11, %v19496_v30  ;;  %7858 = vmatpush1.bf16.msra.mxu1 %v19537_v48  ;;  %v19565_v48 = vld [vmem:[%s25932_s8 + $0x368] ss:$12 sps:$4 sm:$0xff]  }
 0xbe4   : > { %7805 = vmatpush1.bf16.msra.mxu0 %v19498_v16  ;;  %7859 = vmatprep.subr.bf16.mxu1 %v19545_v1  ;;  %v19566_v1 = vld [vmem:[%s25932_s8 + $0x2a8] ss:$12 sps:$4 sm:$0xff]  }
 0xbe5   : > { %7806 = vmatprep.subr.bf16.mxu0 %v19503_v32 }
 0xbe7   : > { %7860 = vmatpush1.bf16.msra.mxu1 %v19543_v11  ;;  %v19570_v11 = vld [vmem:[%s25932_s8 + $0x350] ss:$12 sps:$4 sm:$0xff]  }
 0xbe8   : > { %7807 = vmatpush1.bf16.msra.mxu0 %v19501_v19  ;;  %7861 = vmatprep.subr.bf16.mxu1 %v19551_v53  ;;  %v19590_v53 = vld [vmem:[%s25932_s8 + $0x7c] ss:$12 sps:$4 sm:$0xff]  }
 0xbe9   : > { %7808 = vmatprep.subr.bf16.mxu0 %v19506_v41 }
 0xbeb   : > { %7862 = vmatpush1.bf16.msra.mxu1 %v19549_v61  ;;  %v19587_v61 = vld [vmem:[%s25932_s8 + $0x2f0] ss:$12 sps:$4 sm:$0xff]  }
 0xbec   : > { %7809 = vmatpush1.bf16.msra.mxu0 %v19504_v52  ;;  %17939 = vmatprep.subr.bf16.mxu1 %v19555_v25  ;;  %v19571_v52 = vld [vmem:[%s25932_s8 + $0x290] ss:$12 sps:$4 sm:$0xff]  }
 0xbed   : > { %7810 = vmatprep.subr.bf16.mxu0 %v19509_v62  ;;  %v19594_v25 = vld [vmem:[%s25932_s8 + $0x64] ss:$12 sps:$4 sm:$0xff]  }
 0xbf0   : > { %7811 = vmatpush1.bf16.msra.mxu0 %v19507_v14  ;;  %v19575_v14 = vld [vmem:[%s25932_s8 + $0x338] ss:$12 sps:$4 sm:$0xff]  }
 0xbf1   : > { %7812 = vmatprep.subr.bf16.mxu0 %v19512_v31 }
 0xbf4   : > { %7813 = vmatpush1.bf16.msra.mxu0 %v19510_v13  ;;  %v19576_v13 = vld [vmem:[%s25932_s8 + $0x278] ss:$12 sps:$4 sm:$0xff]  }
 0xbf5   : > { %7814 = vmatprep.subr.bf16.mxu0 %v19518_v40 }
 0xbf8   : > { %7815 = vmatpush1.bf16.msra.mxu0 %v19516_v8  ;;  %v19577_v8 = vld [vmem:[%s25932_s8 + $0x320] ss:$12 sps:$4 sm:$0xff]  }
 0xbf9   : > { %7816 = vmatprep.subr.bf16.mxu0 %v19524_v45 }
 0xbfc   : > { %7817 = vmatpush1.bf16.msra.mxu0 %v19522_v26 }
 0xbfd   : > { %7818 = vmatprep.subr.bf16.mxu0 %v19530_v50  ;;  %v19578_v50 = vld [vmem:[%s25932_s8 + $0xa8] ss:$12 sps:$4 sm:$0xff]  }
 0xc00   : > { %7819 = vmatpush1.bf16.msra.mxu0 %v19528_v58  ;;  %v19581_v58 = vld [vmem:[%s25932_s8 + $0x260] ss:$12 sps:$4 sm:$0xff]  }
 0xc01   : > { %7820 = vmatprep.subr.bf16.mxu0 %v19536_v36 }
 0xc04   : > { %7821 = vmatpush2.bf16.msra.mxu0 %v19534_v17  ;;  %v19582_v17 = vld [vmem:[%s25932_s8 + $0x308] ss:$12 sps:$4 sm:$0xff]  }
 0xc05   : > { %7822 = vmatprep.subr.bf16.mxu0 %v19542_v22  ;;  %v19585_v22 = vld [vmem:[%s25932_s8 + $0x94] ss:$12 sps:$4 sm:$0xff]  }
 0xc08   : > { %7823 = vmatpush2.bf16.msra.mxu0 %v19540_v24 }
 0xc09   : > { %7824 = vmatprep.subr.bf16.mxu0 %v19548_v6  ;;  %v19586_v6 = vld [vmem:[%s25932_s8 + $0x248] ss:$12 sps:$4 sm:$0xff]  }
 0xc0c   : > { %7825 = vmatpush2.bf16.msra.mxu0 %v19546_v20  ;;  %v19583_v20 = vld [vmem:[%s25932_s8 + $0x90] ss:$12 sps:$4 sm:$0xff]  }
 0xc0d   : > { %7826 = vmatprep.subr.bf16.mxu0 %v19554_v39  ;;  %v19591_v39 = vld [vmem:[%s25932_s8 + $0x230] ss:$12 sps:$4 sm:$0xff]  }
 0xc10   : > { %7827 = vmatpush2.bf16.msra.mxu0 %v19552_v2  ;;  %v19588_v2 = vld [vmem:[%s25932_s8 + $0x78] ss:$12 sps:$4 sm:$0xff]  }
 0xc11   : > { %7828 = vmatprep.subr.bf16.mxu0 %v19559_v12  ;;  %v19595_v12 = vld [vmem:[%s25932_s8 + $0x440] ss:$12 sps:$4 sm:$0xff]  }
 0xc14   : > { %7829 = vmatpush2.bf16.msra.mxu0 %v19557_v47  ;;  %v19592_v47 = vld [vmem:[%s25932_s8 + $0x60] ss:$12 sps:$4 sm:$0xff]  }
 0xc15   : > { %7830 = vmatprep.subr.bf16.mxu0 %v19564_v21  ;;  %v19596_v21 = vld [vmem:[%s25932_s8 + $0x48] ss:$12 sps:$4 sm:$0xff]  }
 0xc18   : > { %7831 = vmatpush2.bf16.msra.mxu0 %v19562_v28  ;;  %v19598_v28 = vld [vmem:[%s25932_s8 + $0x4c] ss:$12 sps:$4 sm:$0xff]  }
 0xc19   : > { %7832 = vmatprep.subr.bf16.mxu0 %v19569_v49  ;;  %v19602_v49 = vld [vmem:[%s25932_s8 + $0x34] ss:$12 sps:$4 sm:$0xff]  }
 0xc1c   : > { %7833 = vmatpush2.bf16.msra.mxu0 %v19567_v55  ;;  %v19599_v55 = vld [vmem:[%s25932_s8 + $0x428] ss:$12 sps:$4 sm:$0xff]  }
 0xc1d   : > { %7834 = vmatprep.subr.bf16.mxu0 %v19574_v23  ;;  %v19603_v23 = vld [vmem:[%s25932_s8 + $0x410] ss:$12 sps:$4 sm:$0xff]  }
 0xc20   : > { %7835 = vmatpush2.bf16.msra.mxu0 %v19572_v34  ;;  %v19600_v34 = vld [vmem:[%s25932_s8 + $0x30] ss:$12 sps:$4 sm:$0xff]  }
 0xc21   : > { %8343 = vmatprep.subr.bf16.mxu0 %v19580_v4  ;;  %v19606_v4 = vld [vmem:[%s25932_s8 + $0x1c] ss:$12 sps:$4 sm:$0xff]  }
 0xc92   : > { %v7330_v10 = vpop.f32.mrf.mxu1 }
 0xc93   : > { %v7097_v3 = vpop.f32.mrf.mxu0 }
 0xc94   : > { %v18530_v63 = vpop.f32.mrf.mxu1 }
 0xc95   : > { %v7099_v30 = vpop.f32.mrf.mxu0  ;;  %v19610_v63 = vld [vmem:[%s25932_s8 + $0x4] ss:$12 sps:$4 sm:$0xff]  }
 0xc96   : > { %v7333_v38 = vpop.f32.mrf.mxu1 }
 0xc97   : > { %v23442_v35 = vpack.c.bf16 %v7333_v38, %v7330_v10  ;;  %v7101_v29 = vpop.f32.mrf.mxu0  ;;  %v19604_v10 = vld [vmem:[%s25932_s8 + $0x18] ss:$12 sps:$4 sm:$0xff]   ;;  %v19611_v38 = vld [vmem:[%s25932_s8 + $0x3e0] ss:$12 sps:$4 sm:$0xff]  }
 0xc98   : > { %v23447_v0 = vpack.c.bf16 %v7101_v29, %v7097_v3  ;;  %v18531_v51 = vpop.f32.mrf.mxu1  ;;  %v19607_v3 = vld [vmem:[%s25932_s8 + $0x3f8] ss:$12 sps:$4 sm:$0xff]   ;;  %v19612_v29 = vld [vmem:[%s25932_s8 + $0x168] ss:$12 sps:$4 sm:$0xff]  }
 0xc99   : > { %v7103_v57 = vpop.f32.mrf.mxu0  ;;  %16355 = vmatmul.mubr.msk.bf16.vlgmr.msra.gmra.mxu1 %vm6945_vm8, %v23442_v35  ;;  %v19618_v51 = vld [vmem:[%s25932_s8 + $0x154] ss:$12 sps:$4 sm:$0xff]  }
 0xc9a   : > { %17940 = vmatpush3.bf16.msra.mxu1 %v19556_v44  ;;  %v23489_v24 = vpack.c.bf16 %v7103_v57, %v7099_v30  ;;  %v19608_v30 = vld [vmem:[%s25932_s8] ss:$12 sps:$4 sm:$0xff]   ;;  %v19616_v57 = vld [vmem:[%s25932_s8 + $0x150] ss:$12 sps:$4 sm:$0xff]  }
 0xc9b   : > { %v7140_v27 = vpop.f32.mrf.mxu0  ;;  %17941 = vmatprep.subr.bf16.mxu1 %v19560_v15  ;;  %v19614_v44 = vld [vmem:[%s25932_s8 + $0x16c] ss:$12 sps:$4 sm:$0xff]   ;;  %v19615_v15 = vld [vmem:[%s25932_s8 + $0x3c8] ss:$12 sps:$4 sm:$0xff]  }
 0xc9d   : > { %v18522_v16 = vpop.f32.mrf.mxu0 }
 0xc9e   : > { %17942 = vmatpush3.bf16.msra.mxu1 %v19561_v54  ;;  %v19619_v54 = vld [vmem:[%s25932_s8 + $0x3b0] ss:$12 sps:$4 sm:$0xff]   ;;  %v19620_v16 = vld [vmem:[%s25932_s8 + $0x138] ss:$12 sps:$4 sm:$0xff]  }
 0xc9f   : > { %v7143_v32 = vpop.f32.mrf.mxu0  ;;  %17943 = vmatprep.subr.bf16.mxu1 %v19565_v48  ;;  %v19625_v48 = vld [vmem:[%s25932_s8 + $0x214] ss:$12 sps:$4 sm:$0xff]  }
 0xca0   : > { %v23463_v19 = vpack.c.bf16 %v7143_v32, %v7140_v27  ;;  %v19622_v27 = vld [vmem:[%s25932_s8 + $0x13c] ss:$12 sps:$4 sm:$0xff]   ;;  %v19628_v32 = vld [vmem:[%s25932_s8 + $0x124] ss:$12 sps:$4 sm:$0xff]  }
 0xca1   : > { %v18523_v41 = vpop.f32.mrf.mxu0 }
 0xca2   : > { %17944 = vmatpush3.bf16.msra.mxu1 %v19566_v1  ;;  %v19623_v1 = vld [vmem:[%s25932_s8 + $0x210] ss:$12 sps:$4 sm:$0xff]   ;;  %v19626_v41 = vld [vmem:[%s25932_s8 + $0x120] ss:$12 sps:$4 sm:$0xff]  }
 0xca3   : > { %v7287_v62 = vpop.f32.mrf.mxu0  ;;  %17945 = vmatprep.subr.bf16.mxu1 %v19570_v11  ;;  %v19631_v11 = vld [vmem:[%s25932_s8 + $0x1fc] ss:$12 sps:$4 sm:$0xff]  }
 0xca5   : > { %v7289_v31 = vpop.f32.mrf.mxu0 }
 0xca6   : > { %17946 = vmatpush3.bf16.msra.mxu1 %v19571_v52  ;;  %v19629_v52 = vld [vmem:[%s25932_s8 + $0x1f8] ss:$12 sps:$4 sm:$0xff]  }
 0xca7   : > { %v7291_v40 = vpop.f32.mrf.mxu0  ;;  %17947 = vmatprep.subr.bf16.mxu1 %v19575_v14  ;;  %v19632_v14 = vld [vmem:[%s25932_s8 + $0x108] ss:$12 sps:$4 sm:$0xff]  }
 0xca8   : > { %v7337_v36 = vpack.c.bf16 %v7291_v40, %v7287_v62  ;;  %v19634_v62 = vld [vmem:[%s25932_s8 + $0x10c] ss:$12 sps:$4 sm:$0xff]  }
 0xca9   : > { %v7293_v45 = vpop.f32.mrf.mxu0  ;;  %v19643_v40 = vld [vmem:[%s25932_s8 + $0x1cc] ss:$12 sps:$4 sm:$0xff]  }
 0xcaa   : > { %v7338_v26 = vpack.c.bf16 %v7293_v45, %v7289_v31  ;;  %17948 = vmatpush3.bf16.msra.mxu1 %v19576_v13  ;;  %v19635_v31 = vld [vmem:[%s25932_s8 + $0x1e0] ss:$12 sps:$4 sm:$0xff]   ;;  %v19641_v45 = vld [vmem:[%s25932_s8 + $0x1c8] ss:$12 sps:$4 sm:$0xff]  }
 0xcab   : > { %17949 = vmatprep.subr.bf16.mxu1 %v19577_v8  ;;  %v19640_v13 = vld [vmem:[%s25932_s8 + $0xf4] ss:$12 sps:$4 sm:$0xff]   ;;  %v19638_v8 = vld [vmem:[%s25932_s8 + $0xf0] ss:$12 sps:$4 sm:$0xff]  }
 0xcac   : > { %7836 = vmatprep.mubr.bf16.mxu0 %v7338_v26  ;;  %7922 = vmatprep.mubr.bf16.mxu1 %v7338_v26  ;;  %v19646_v26 = vld [vmem:[%s25932_s8 + $0xdc] ss:$12 sps:$4 sm:$0xff]  }
 0xcad   : > { %7837 = vmatmul.mubr.bf16.vlgmr.msra.gmra.mxu0 %v7337_v36 }
 0xcae   : > { %17950 = vmatpush3.bf16.msra.mxu1 %v19581_v58  ;;  %8344 = vmatpush1.bf16.msra.mxu0 %v19578_v50  ;;  %v19649_v50 = vld [vmem:[%s25932_s8 + $0x1b4] ss:$12 sps:$4 sm:$0xff]   ;;  %v19644_v58 = vld [vmem:[%s25932_s8 + $0xd8] ss:$12 sps:$4 sm:$0xff]  }
 0xcaf   : > { %8375 = vmatprep.mubr.bf16.mxu0 %v23489_v24  ;;  %17951 = vmatprep.subr.bf16.mxu1 %v19582_v17  ;;  %v19652_v17 = vld [vmem:[%s25932_s8 + $0xc4] ss:$12 sps:$4 sm:$0xff]  }
 0xcb0   : > { %8345 = vmatprep.subr.bf16.mxu0 %v19585_v22  ;;  %v19655_v22 = vld [vmem:[%s25932_s8 + $0x19c] ss:$12 sps:$4 sm:$0xff]  }
 0xcb2   : > { %17952 = vmatpush3.bf16.msra.mxu1 %v19586_v6  ;;  %8346 = vmatpush1.bf16.msra.mxu0 %v19583_v20  ;;  %v19650_v20 = vld [vmem:[%s25932_s8 + $0xc0] ss:$12 sps:$4 sm:$0xff]   ;;  %v19653_v6 = vld [vmem:[%s25932_s8 + $0x198] ss:$12 sps:$4 sm:$0xff]  }
 0xcb3   : > { %17953 = vmatprep.subr.bf16.mxu1 %v19587_v61  ;;  %8347 = vmatprep.subr.bf16.mxu0 %v19590_v53  ;;  %v19658_v61 = vld [vmem:[%s25932_s8 + $0x184] ss:$12 sps:$4 sm:$0xff]   ;;  %v19656_v53 = vld [vmem:[%s25932_s8 + $0x180] ss:$12 sps:$4 sm:$0xff]  }
 0xcb6   : > { %17954 = vmatpush3.bf16.msra.mxu1 %v19591_v39  ;;  %8348 = vmatpush1.bf16.msra.mxu0 %v19588_v2  ;;  %v19659_v2 = vld [vmem:[%s25932_s8 + $0x218] ss:$12 sps:$4 sm:$0xff]   ;;  %v19660_v39 = vld [vmem:[%s25932_s8 + $0x170] ss:$12 sps:$4 sm:$0xff]  }
 0xcb7   : > { %18532 = vmatprep.subr.bf16.mxu1 %v25986_v9  ;;  %8349 = vmatprep.subr.bf16.mxu0 %v19594_v25  ;;  %v19661_v25 = vld [vmem:[%s25932_s8 + $0xb0] ss:$12 sps:$4 sm:$0xff]  }
 0xcb9   : > { %7923 = vmatmul.mubr.bf16.vlgmr.msra.gmra.mxu1 %v7337_v36  ;;  %v19647_v36 = vld [vmem:[%s25932_s8 + $0x1b0] ss:$12 sps:$4 sm:$0xff]  }
 0xcba   : > { %18533 = vmatpush3.bf16.msra.mxu1 %v19595_v12  ;;  %8350 = vmatpush1.bf16.msra.mxu0 %v19592_v47  ;;  %v19662_v47 = vld [vmem:[%s25932_s8 + $0x200] ss:$12 sps:$4 sm:$0xff]   ;;  %v19663_v12 = vld [vmem:[%s25932_s8 + $0x158] ss:$12 sps:$4 sm:$0xff]  }
 0xcbb   : > { %18534 = vmatprep.subr.bf16.mxu1 %v25986_v9  ;;  %8351 = vmatprep.subr.bf16.mxu0 %v19598_v28  ;;  %v19664_v28 = vld [vmem:[%s25932_s8 + $0x98] ss:$12 sps:$4 sm:$0xff]  }
 0xcbc   : > { %18546 = vmatprep.mubr.msk.bf16.mxu1 %vm20552_vm0, %v25986_v9 }
 0xcbe   : > { %18535 = vmatpush3.bf16.msra.mxu1 %v19599_v55  ;;  %8352 = vmatpush1.bf16.msra.mxu0 %v19596_v21  ;;  %v19665_v21 = vld [vmem:[%s25932_s8 + $0x1e8] ss:$12 sps:$4 sm:$0xff]   ;;  %v19666_v55 = vld [vmem:[%s25932_s8 + $0x140] ss:$12 sps:$4 sm:$0xff]  }
 0xcbf   : > { %18536 = vmatprep.subr.bf16.mxu1 %v25986_v9  ;;  %8353 = vmatprep.subr.bf16.mxu0 %v19602_v49  ;;  %v19668_v49 = vld [vmem:[%s25932_s8 + $0x1d0] ss:$12 sps:$4 sm:$0xff]  }
 0xcc2   : > { %18537 = vmatpush3.bf16.msra.mxu1 %v19603_v23  ;;  %8354 = vmatpush1.bf16.msra.mxu0 %v19600_v34  ;;  %v19669_v34 = vld [vmem:[%s25932_s8 + $0x128] ss:$12 sps:$4 sm:$0xff]  }
 0xcc3   : > { %18538 = vmatprep.subr.bf16.mxu1 %v25986_v9  ;;  %8355 = vmatprep.subr.bf16.mxu0 %v19606_v4  ;;  %v19670_v23 = vld [vmem:[%s25932_s8 + $0x68] ss:$12 sps:$4 sm:$0xff]   ;;  %v19671_v4 = vld [vmem:[%s25932_s8 + $0x1b8] ss:$12 sps:$4 sm:$0xff]  }
 0xcc6   : > { %18539 = vmatpush3.bf16.msra.mxu1 %v19607_v3  ;;  %8356 = vmatpush1.bf16.msra.mxu0 %v19604_v10  ;;  %v19672_v10 = vld [vmem:[%s25932_s8 + $0x110] ss:$12 sps:$4 sm:$0xff]  }
 0xcc7   : > { %18540 = vmatprep.subr.bf16.mxu1 %v25986_v9  ;;  %8357 = vmatprep.subr.bf16.mxu0 %v19610_v63  ;;  %v19673_v3 = vld [vmem:[%s25932_s8 + $0x50] ss:$12 sps:$4 sm:$0xff]   ;;  %v19674_v63 = vld [vmem:[%s25932_s8 + $0x1a0] ss:$12 sps:$4 sm:$0xff]  }
 0xcca   : > { %18541 = vmatpush3.bf16.msra.mxu1 %v19611_v38  ;;  %8358 = vmatpush1.bf16.msra.mxu0 %v19608_v30  ;;  %v19675_v30 = vld [vmem:[%s25932_s8 + $0xf8] ss:$12 sps:$4 sm:$0xff]  }
 0xccb   : > { %18542 = vmatprep.subr.bf16.mxu1 %v25986_v9  ;;  %8359 = vmatprep.subr.bf16.mxu0 %v19614_v44  ;;  %v19676_v38 = vld [vmem:[%s25932_s8 + $0x38] ss:$12 sps:$4 sm:$0xff]   ;;  %v19677_v44 = vld [vmem:[%s25932_s8 + $0x188] ss:$12 sps:$4 sm:$0xff]  }
 0xcce   : > { %18543 = vmatpush3.bf16.msra.mxu1 %v19615_v15  ;;  %8360 = vmatpush2.bf16.msra.mxu0 %v19612_v29  ;;  %v19678_v29 = vld [vmem:[%s25932_s8 + $0xe0] ss:$12 sps:$4 sm:$0xff]  }
 0xccf   : > { %18544 = vmatprep.subr.bf16.mxu1 %v25986_v9  ;;  %8361 = vmatprep.subr.bf16.mxu0 %v19618_v51  ;;  %v19679_v15 = vld [vmem:[%s25932_s8 + $0x20] ss:$12 sps:$4 sm:$0xff]   ;;  %v19680_v51 = vld [vmem:[%s25932_s8 + $0xc8] ss:$12 sps:$4 sm:$0xff]  }
 0xcd2   : > { %18545 = vmatpush3.bf16.msra.mxu1 %v19619_v54  ;;  %8362 = vmatpush2.bf16.msra.mxu0 %v19616_v57  ;;  %v19681_v57 = vld [vmem:[%s25932_s8 + $0x8] ss:$12 sps:$4 sm:$0xff]  }
 0xcd3   : > { %8363 = vmatprep.subr.bf16.mxu0 %v19622_v27  ;;  %8388 = vmatprep.subr.bf16.mxu1 %v19625_v48  ;;  %v19682_v54 = vld [vmem:[%s25931_s7 + $0x10] sm:$0x3f]   ;;  %v19695_v27 = vld [vmem:[%s25932_s8 + $0x498] ss:$12 sps:$4 sm:$0xff]   ;;  %v19697_v48 = vld [vmem:[%s25932_s8 + $0x49c] ss:$12 sps:$4 sm:$0xff]  }
 0xcd5   : > { %18547 = vmatmul.mubr.msk.bf16.vlgmr.msra.gmra.mxu1 %vm6945_vm8, %v23442_v35  ;;  %v19637_v35 = vld [vmem:[%s25932_s8 + $0x1e4] ss:$12 sps:$4 sm:$0xff]  }
 0xcd6   : > { %8364 = vmatpush2.bf16.msra.mxu0 %v19620_v16  ;;  %8389 = vmatpush1.bf16.msra.mxu1 %v19623_v1  ;;  %v19698_v16 = vld [vmem:[%s25932_s8 + $0x480] ss:$12 sps:$4 sm:$0xff]   ;;  %v19700_v1 = vld [vmem:[%s25932_s8 + $0x484] ss:$12 sps:$4 sm:$0xff]  }
 0xcd7   : > { %8365 = vmatprep.subr.bf16.mxu0 %v19628_v32  ;;  %8390 = vmatprep.subr.bf16.mxu1 %v19631_v11  ;;  %v19703_v32 = vld [vmem:[%s25932_s8 + $0x46c] ss:$12 sps:$4 sm:$0xff]  }
 0xcd8   : > { %8418 = vmatprep.mubr.bf16.mxu1 %v25985_v43  ;;  %v19704_v11 = vld [vmem:[%s25932_s8 + $0x660] ss:$12 sps:$4 sm:$0xff]  }
 0xcda   : > { %8366 = vmatpush2.bf16.msra.mxu0 %v19626_v41  ;;  %8391 = vmatpush1.bf16.msra.mxu1 %v19629_v52  ;;  %v19701_v41 = vld [vmem:[%s25932_s8 + $0x468] ss:$12 sps:$4 sm:$0xff]   ;;  %v19706_v52 = vld [vmem:[%s25932_s8 + $0x664] ss:$12 sps:$4 sm:$0xff]  }
 0xcdb   : > { %8367 = vmatprep.subr.bf16.mxu0 %v19634_v62  ;;  %8392 = vmatprep.subr.bf16.mxu1 %v19637_v35  ;;  %v19709_v62 = vld [vmem:[%s25932_s8 + $0x454] ss:$12 sps:$4 sm:$0xff]   ;;  %v19712_v35 = vld [vmem:[%s25932_s8 + $0x64c] ss:$12 sps:$4 sm:$0xff]  }
 0xcde   : > { %8368 = vmatpush2.bf16.msra.mxu0 %v19632_v14  ;;  %8393 = vmatpush1.bf16.msra.mxu1 %v19635_v31  ;;  %v19710_v14 = vld [vmem:[%s25932_s8 + $0x648] ss:$12 sps:$4 sm:$0xff]   ;;  %v19707_v31 = vld [vmem:[%s25932_s8 + $0x450] ss:$12 sps:$4 sm:$0xff]  }
 0xcdf   : > { %8369 = vmatprep.subr.bf16.mxu0 %v19640_v13  ;;  %8394 = vmatprep.subr.bf16.mxu1 %v19643_v40  ;;  %v19718_v13 = vld [vmem:[%s25932_s8 + $0x634] ss:$12 sps:$4 sm:$0xff]   ;;  %v19715_v40 = vld [vmem:[%s25932_s8 + $0x5bc] ss:$12 sps:$4 sm:$0xff]  }
 0xce2   : > { %8370 = vmatpush2.bf16.msra.mxu0 %v19638_v8  ;;  %8395 = vmatpush1.bf16.msra.mxu1 %v19641_v45  ;;  %v19716_v8 = vld [vmem:[%s25932_s8 + $0x630] ss:$12 sps:$4 sm:$0xff]   ;;  %v19713_v45 = vld [vmem:[%s25932_s8 + $0x5b8] ss:$12 sps:$4 sm:$0xff]  }
 0xce3   : > { %8371 = vmatprep.subr.bf16.mxu0 %v19646_v26  ;;  %8396 = vmatprep.subr.bf16.mxu1 %v19649_v50  ;;  %v19724_v26 = vld [vmem:[%s25932_s8 + $0x61c] ss:$12 sps:$4 sm:$0xff]   ;;  %v19721_v50 = vld [vmem:[%s25932_s8 + $0x5a4] ss:$12 sps:$4 sm:$0xff]  }
 0xce6   : > { %8372 = vmatpush2.bf16.msra.mxu0 %v19644_v58  ;;  %8397 = vmatpush1.bf16.msra.mxu1 %v19647_v36  ;;  %v19722_v58 = vld [vmem:[%s25932_s8 + $0x618] ss:$12 sps:$4 sm:$0xff]   ;;  %v19719_v36 = vld [vmem:[%s25932_s8 + $0x5a0] ss:$12 sps:$4 sm:$0xff]  }
 0xce7   : > { %8373 = vmatprep.subr.bf16.mxu0 %v19652_v17  ;;  %8398 = vmatprep.subr.bf16.mxu1 %v19655_v22  ;;  %v19725_v17 = vld [vmem:[%s25932_s8 + $0x588] ss:$12 sps:$4 sm:$0xff]   ;;  %v19727_v22 = vld [vmem:[%s25932_s8 + $0x58c] ss:$12 sps:$4 sm:$0xff]  }
 0xcea   : > { %8374 = vmatpush2.bf16.msra.mxu0 %v19650_v20  ;;  %8399 = vmatpush1.bf16.msra.mxu1 %v19653_v6  ;;  %v19728_v20 = vld [vmem:[%s25932_s8 + $0x600] ss:$12 sps:$4 sm:$0xff]   ;;  %v19730_v6 = vld [vmem:[%s25932_s8 + $0x604] ss:$12 sps:$4 sm:$0xff]  }
 0xceb   : > { %8400 = vmatprep.subr.bf16.mxu1 %v19658_v61  ;;  %18550 = vmatprep.subr.bf16.mxu0 %v25986_v9  ;;  %v19731_v61 = vld [vmem:[%s25932_s8 + $0x570] ss:$12 sps:$4 sm:$0xff]  }
 0xced   : > { %8376 = vmatmul.mubr.bf16.vlgmr.msra.gmra.mxu0 %v23447_v0 }
 0xcee   : > { %8401 = vmatpush1.bf16.msra.mxu1 %v19656_v53  ;;  %18551 = vmatpush3.bf16.msra.mxu0 %v19659_v2  ;;  %v19733_v53 = vld [vmem:[%s25932_s8 + $0x574] ss:$12 sps:$4 sm:$0xff]  }
 0xcef   : > { %17969 = vmatprep.subr.bf16.mxu1 %v19660_v39  ;;  %18552 = vmatprep.subr.bf16.mxu0 %v25986_v9  ;;  %v19734_v2 = vld [vmem:[%s25932_s8 + $0x5e8] ss:$12 sps:$4 sm:$0xff]   ;;  %v19736_v39 = vld [vmem:[%s25932_s8 + $0x5ec] ss:$12 sps:$4 sm:$0xff]  }
 0xcf0   : > { %18564 = vmatprep.mubr.msk.bf16.mxu0 %vm20552_vm0, %v25986_v9 }
 0xcf1   : > { %16426 = vmatmul.mubr.msk.bf16.vlgmr.msra.gmra.mxu1 %vm6945_vm8, %v23463_v19 }
 0xcf2   : > { %17970 = vmatpush3.bf16.msra.mxu1 %v19661_v25  ;;  %8461 = vmatprep.mubr.bf16.mxu1 %v23489_v24  ;;  %v19667_v24 = vld [vmem:[%s25932_s8 + $0x80] ss:$12 sps:$4 sm:$0xff]   ;;  %v19737_v25 = vld [vmem:[%s25932_s8 + $0x558] ss:$12 sps:$4 sm:$0xff]  }
 0xcf3   : > { %18553 = vmatpush3.bf16.msra.mxu0 %v19662_v47  ;;  %17971 = vmatprep.subr.bf16.mxu1 %v19663_v12  ;;  %v19739_v47 = vld [vmem:[%s25932_s8 + $0x55c] ss:$12 sps:$4 sm:$0xff]  }
 0xcf4   : > { %18554 = vmatprep.subr.bf16.mxu0 %v25986_v9  ;;  %v19740_v12 = vld [vmem:[%s25932_s8 + $0x5d0] ss:$12 sps:$4 sm:$0xff]  }
 0xcf6   : > { %17972 = vmatpush3.bf16.msra.mxu1 %v19664_v28  ;;  %v19742_v28 = vld [vmem:[%s25932_s8 + $0x5d4] ss:$12 sps:$4 sm:$0xff]  }
 0xcf7   : > { %18555 = vmatpush3.bf16.msra.mxu0 %v19665_v21  ;;  %17973 = vmatprep.subr.bf16.mxu1 %v19666_v55  ;;  %v19743_v21 = vld [vmem:[%s25932_s8 + $0x540] ss:$12 sps:$4 sm:$0xff]   ;;  %v19745_v55 = vld [vmem:[%s25932_s8 + $0x544] ss:$12 sps:$4 sm:$0xff]  }
 0xcf8   : > { %18556 = vmatprep.subr.bf16.mxu0 %v25986_v9 }
 0xcfa   : > { %17974 = vmatpush3.bf16.msra.mxu1 %v19667_v24  ;;  %v19746_v24 = vld [vmem:[%s25932_s8 + $0x5c0] ss:$12 sps:$4 sm:$0xff]  }
 0xcfb   : > { %18557 = vmatpush3.bf16.msra.mxu0 %v19668_v49  ;;  %17975 = vmatprep.subr.bf16.mxu1 %v19669_v34  ;;  %v19748_v49 = vld [vmem:[%s25932_s8 + $0x528] ss:$12 sps:$4 sm:$0xff]   ;;  %v19750_v34 = vld [vmem:[%s25932_s8 + $0x52c] ss:$12 sps:$4 sm:$0xff]  }
 0xcfc   : > { %18558 = vmatprep.subr.bf16.mxu0 %v25986_v9 }
 0xcfe   : > { %17976 = vmatpush3.bf16.msra.mxu1 %v19670_v23  ;;  %v19753_v23 = vld [vmem:[%s25932_s8 + $0x510] ss:$12 sps:$4 sm:$0xff]  }
 0xcff   : > { %18559 = vmatpush3.bf16.msra.mxu0 %v19671_v4  ;;  %17977 = vmatprep.subr.bf16.mxu1 %v19672_v10  ;;  %v19755_v4 = vld [vmem:[%s25932_s8 + $0x514] ss:$12 sps:$4 sm:$0xff]  }
 0xd00   : > { %18560 = vmatprep.subr.bf16.mxu0 %v25986_v9 }
 0xd02   : > { %17978 = vmatpush3.bf16.msra.mxu1 %v19673_v3 }
 0xd03   : > { %18561 = vmatpush3.bf16.msra.mxu0 %v19674_v63  ;;  %17979 = vmatprep.subr.bf16.mxu1 %v19675_v30 }
 0xd04   : > { %18562 = vmatprep.subr.bf16.mxu0 %v25986_v9 }
 0xd06   : > { %17980 = vmatpush3.bf16.msra.mxu1 %v19676_v38 }
 0xd07   : > { %18563 = vmatpush3.bf16.msra.mxu0 %v19677_v44  ;;  %17981 = vmatprep.subr.bf16.mxu1 %v19678_v29 }
 0xd08   : > { %18568 = vmatprep.subr.bf16.mxu0 %v25986_v9 }
 0xd0a   : > { %18565 = vmatmul.mubr.msk.bf16.vlgmr.msra.gmra.mxu0 %vm6945_vm8, %v23463_v19  ;;  %17982 = vmatpush3.bf16.msra.mxu1 %v19679_v15  ;;  %v19694_v19 = vld [vmem:[%s25932_s8 + $0x4b4] ss:$12 sps:$4 sm:$0xff]  }
 0xd0b   : > { %18569 = vmatpush3.bf16.msra.mxu0 %v23256_v7  ;;  %17983 = vmatprep.subr.bf16.mxu1 %v19680_v51  ;;  %v19685_v7 = vld [vmem:[%s25932_s8 + $0x4fc] ss:$12 sps:$4 sm:$0xff]  }
 0xd0c   : > { %18570 = vmatprep.subr.bf16.mxu0 %v25986_v9  ;;  %18572 = vmatprep.mubr.msk.bf16.mxu0 %vm20552_vm0, %v25986_v9 }
 0xd0e   : > { %17984 = vmatpush3.bf16.msra.mxu1 %v19681_v57 }
 0xd0f   : > { %18571 = vmatpush3.bf16.msra.mxu0 %v23270_v33  ;;  %8534 = vmatprep.subr.bf16.mxu1 %v23254_v59  ;;  %v19683_v59 = vld [vmem:[%s25932_s8 + $0x4f8] ss:$12 sps:$4 sm:$0xff]  }
 0xd10   : > { %v19691_v33 = vld [vmem:[%s25932_s8 + $0x4cc] ss:$12 sps:$4 sm:$0xff]   ;;  %9118 = vmatprep.subr.bf16.mxu0 %v19706_v52 }
 0xd11   : > { %8462 = vmatmul.mubr.bf16.vlgmr.msra.gmra.mxu1 %v23447_v0  ;;  %v19692_v0 = vld [vmem:[%s25932_s8 + $0x4b0] ss:$12 sps:$4 sm:$0xff]  }
 0xd12   : > { %18573 = vmatmul.mubr.msk.bf16.vlgmr.msra.gmra.mxu0 %vm7047_vm11, %v19682_v54  ;;  %8535 = vmatpush1.bf16.msra.mxu1 %v23258_v56  ;;  %v19688_v56 = vld [vmem:[%s25932_s8 + $0x4e4] ss:$12 sps:$4 sm:$0xff]  }
 0xd13   : > { %8536 = vmatprep.subr.bf16.mxu1 %v23262_v60  ;;  %8554 = vmatprep.mubr.bf16.mxu1 %v25985_v43  ;;  %v19686_v60 = vld [vmem:[%s25932_s8 + $0x4e0] ss:$12 sps:$4 sm:$0xff]  }
 0xd14   : > { %9148 = vmatprep.mubr.bf16.mxu0 %v25985_v43  ;;  %9119 = vmatpush1.bf16.msra.mxu0 %v19704_v11 }
 0xd15   : > { %9120 = vmatprep.subr.bf16.mxu0 %v19712_v35 }
 0xd16   : > { %8537 = vmatpush1.bf16.msra.mxu1 %v23272_v46  ;;  %v19689_v46 = vld [vmem:[%s25932_s8 + $0x4c8] ss:$12 sps:$4 sm:$0xff]  }
 0xd17   : > { %9073 = vmatprep.subr.bf16.mxu1 %v19685_v7 }
 0xd18   : > { %9121 = vmatpush1.bf16.msra.mxu0 %v19710_v14 }
 0xd19   : > { %16431 = vmatmul.mubr.msk.bf16.vlgmr.msra.gmra.mxu1 %vm7047_vm11, %v19682_v54  ;;  %9122 = vmatprep.subr.bf16.mxu0 %v19718_v13 }
 0xd1a   : > { %9074 = vmatpush1.bf16.msra.mxu1 %v19683_v59 }
 0xd1b   : > { %9075 = vmatprep.subr.bf16.mxu1 %v19688_v56 }
 0xd1c   : > { %9123 = vmatpush1.bf16.msra.mxu0 %v19716_v8 }
 0xd1d   : > { %9124 = vmatprep.subr.bf16.mxu0 %v19724_v26 }
 0xd1e   : > { %9076 = vmatpush1.bf16.msra.mxu1 %v19686_v60 }
 0xd1f   : > { %9077 = vmatprep.subr.bf16.mxu1 %v19691_v33 }
 0xd20   : > { %9125 = vmatpush1.bf16.msra.mxu0 %v19722_v58 }
 0xd21   : > { %9126 = vmatprep.subr.bf16.mxu0 %v19730_v6 }
 0xd22   : > { %9078 = vmatpush1.bf16.msra.mxu1 %v19689_v46 }
 0xd23   : > { %9079 = vmatprep.subr.bf16.mxu1 %v19694_v19 }
 0xd24   : > { %9127 = vmatpush1.bf16.msra.mxu0 %v19728_v20 }
 0xd25   : > { %9128 = vmatprep.subr.bf16.mxu0 %v19736_v39 }
 0xd26   : > { %9080 = vmatpush1.bf16.msra.mxu1 %v19692_v0 }
 0xd27   : > { %9081 = vmatprep.subr.bf16.mxu1 %v19697_v48 }
 0xd28   : > { %9129 = vmatpush1.bf16.msra.mxu0 %v19734_v2 }
 0xd29   : > { %9130 = vmatprep.subr.bf16.mxu0 %v19742_v28 }
 0xd2a   : > { %9082 = vmatpush1.bf16.msra.mxu1 %v19695_v27 }
 0xd2b   : > { %9083 = vmatprep.subr.bf16.mxu1 %v19700_v1 }
 0xd2c   : > { %9131 = vmatpush1.bf16.msra.mxu0 %v19740_v12 }
 0xd2d   : > { %18002 = vmatprep.subr.bf16.mxu0 %v19746_v24 }
 0xd2e   : > { %9084 = vmatpush1.bf16.msra.mxu1 %v19698_v16 }
 0xd2f   : > { %9085 = vmatprep.subr.bf16.mxu1 %v19703_v32 }
 0xd32   : > { %9086 = vmatpush1.bf16.msra.mxu1 %v19701_v41 }
 0xd33   : > { %9087 = vmatprep.subr.bf16.mxu1 %v19709_v62 }
 0xd36   : > { %9088 = vmatpush1.bf16.msra.mxu1 %v19707_v31 }
 0xd37   : > { %9089 = vmatprep.subr.bf16.mxu1 %v19715_v40 }
 0xd3a   : > { %9090 = vmatpush2.bf16.msra.mxu1 %v19713_v45 }
 0xd3b   : > { %9091 = vmatprep.subr.bf16.mxu1 %v19721_v50 }
 0xd3e   : > { %9092 = vmatpush2.bf16.msra.mxu1 %v19719_v36 }
 0xd3f   : > { %9093 = vmatprep.subr.bf16.mxu1 %v19727_v22 }
 0xd42   : > { %9094 = vmatpush2.bf16.msra.mxu1 %v19725_v17 }
 0xd43   : > { %9095 = vmatprep.subr.bf16.mxu1 %v19733_v53 }
 0xd46   : > { %9096 = vmatpush2.bf16.msra.mxu1 %v19731_v61 }
 0xd47   : > { %9097 = vmatprep.subr.bf16.mxu1 %v19739_v47 }
 0xd4a   : > { %9098 = vmatpush2.bf16.msra.mxu1 %v19737_v25 }
 0xd4b   : > { %9099 = vmatprep.subr.bf16.mxu1 %v19745_v55  ;;  %v19747_v55 = vld [vmem:[%s25932_s8 + $0x500] ss:$12 sps:$4 sm:$0xff]  }
 0xd4e   : > { %9100 = vmatpush2.bf16.msra.mxu1 %v19743_v21 }
 0xd4f   : > { %9101 = vmatprep.subr.bf16.mxu1 %v19750_v34  ;;  %v19751_v34 = vld [vmem:[%s25932_s8 + $0x5a8] ss:$12 sps:$4 sm:$0xff]  }
 0xd52   : > { %9102 = vmatpush2.bf16.msra.mxu1 %v19748_v49 }
 0xd53   : > { %9103 = vmatprep.subr.bf16.mxu1 %v19755_v4 }
 0xd56   : > { %9104 = vmatpush2.bf16.msra.mxu1 %v19753_v23 }
 0xd57   : > { %18576 = vmatprep.subr.bf16.mxu1 %v25986_v9 }
 0xd59   : > { %v7881_v10 = vpop.f32.mrf.mxu1 }
 0xd5b   : > { %v7883_v3 = vpop.f32.mrf.mxu1 }
 0xd5d   : > { %v7885_v29 = vpop.f32.mrf.mxu1 }
 0xd5f   : > { %v7887_v57 = vpop.f32.mrf.mxu1 }
 0xd6d   : > { %v7838_v63 = vpop.f32.mrf.mxu0 }
 0xd6e   : > { %v7882_v30 = vadd.f32 %v7881_v10, %v7838_v63 }
 0xd6f   : > { %v7840_v38 = vpop.f32.mrf.mxu0 }
 0xd70   : > { %v7884_v44 = vadd.f32 %v7883_v3, %v7840_v38 }
 0xd71   : > { %v7842_v15 = vpop.f32.mrf.mxu0 }
 0xd72   : > { %v7886_v51 = vadd.f32 %v7885_v29, %v7842_v15 }
 0xd73   : > { %v7844_v1 = vpop.f32.mrf.mxu0 }
 0xd74   : > { %v7888_v8 = vadd.f32 %v7887_v57, %v7844_v1  ;;  %v19768_v1 = vld [vmem:[%s25932_s8 + $0x620] ss:$12 sps:$4 sm:$0xff]  }
 0xd79   : > { %v17955_v54 = vpop.f32.mrf.mxu1 }
 0xd7b   : > { %v17956_v59 = vpop.f32.mrf.mxu1 }
 0xd7c   : > { %v17957_v7 = vadd.f32 %v17956_v59, %v17955_v54  ;;  %v19758_v54 = vld [vmem:[%s25932_s8 + $0x578] ss:$12 sps:$4 sm:$0xff]  }
 0xd7d   : > { %v17958_v56 = vpop.f32.mrf.mxu1 }
 0xd7f   : > { %v17959_v60 = vpop.f32.mrf.mxu1 }
 0xd80   : > { %v17960_v33 = vadd.f32 %v17959_v60, %v17958_v56  ;;  %v19760_v60 = vld [vmem:[%s25932_s8 + $0x4b8] ss:$12 sps:$4 sm:$0xff]  }
 0xd95   : > { %v7965_v46 = vpop.f32.mrf.mxu1 }
 0xd96   : > { %v7966_v0 = vadd.f32 %v17957_v7, %v7965_v46  ;;  %v19759_v7 = vld [vmem:[%s25932_s8 + $0x668] ss:$12 sps:$4 sm:$0xff]   ;;  %v19762_v46 = vld [vmem:[%s25932_s8 + $0x650] ss:$12 sps:$4 sm:$0xff]  }
 0xd97   : > { %v18548_v19 = vpop.f32.mrf.mxu1 }
 0xd98   : > { %v19764_v19 = vld [vmem:[%s25932_s8 + $0x548] ss:$12 sps:$4 sm:$0xff]  }
 0xd99   : > { %v7968_v27 = vpop.f32.mrf.mxu1 }
 0xd9a   : > { %v7969_v48 = vadd.f32 %v17960_v33, %v7968_v27  ;;  %v19761_v33 = vld [vmem:[%s25932_s8 + $0x560] ss:$12 sps:$4 sm:$0xff]   ;;  %v19765_v27 = vld [vmem:[%s25932_s8 + $0x638] ss:$12 sps:$4 sm:$0xff]  }
 0xd9b   : > { %v18549_v16 = vpop.f32.mrf.mxu1 }
 0xd9c   : > { %v19767_v16 = vld [vmem:[%s25932_s8 + $0x530] ss:$12 sps:$4 sm:$0xff]  }
 0xdad   : > { %v8377_v32 = vpop.f32.mrf.mxu0 }
 0xdae   : > { %v8378_v11 = vadd.f32 %v8377_v32, %v7882_v30  ;;  %v19752_v30 = vld [vmem:[%s25932_s8 + $0x4e8] ss:$12 sps:$4 sm:$0xff]   ;;  %v19769_v32 = vld [vmem:[%s25932_s8 + $0x470] ss:$12 sps:$4 sm:$0xff]  }
 0xdaf   : > { %v8379_v41 = vpop.f32.mrf.mxu0 }
 0xdb0   : > { %v8380_v52 = vadd.f32 %v8379_v41, %v7884_v44  ;;  %v19756_v44 = vld [vmem:[%s25932_s8 + $0x590] ss:$12 sps:$4 sm:$0xff]   ;;  %v19771_v41 = vld [vmem:[%s25932_s8 + $0x608] ss:$12 sps:$4 sm:$0xff]  }
 0xdb1   : > { %v8381_v62 = vpop.f32.mrf.mxu0  ;;  %v8420_v35 = vpop.f32.mrf.mxu1 }
 0xdb2   : > { %v8382_v14 = vadd.f32 %v8381_v62, %v7886_v51  ;;  %v23907_v31 = vadd.f32 %v8420_v35, %v8378_v11  ;;  %v19757_v51 = vld [vmem:[%s25932_s8 + $0x4d0] ss:$12 sps:$4 sm:$0xff]   ;;  %v19770_v11 = vld [vmem:[%s25932_s8 + $0x518] ss:$12 sps:$4 sm:$0xff]  }
 0xdb3   : > { %v8383_v13 = vpop.f32.mrf.mxu0  ;;  %v8422_v40 = vpop.f32.mrf.mxu1  ;;  %v19773_v62 = vld [vmem:[%s25932_s8 + $0x5f0] ss:$12 sps:$4 sm:$0xff]   ;;  %v19774_v35 = vld [vmem:[%s25932_s8 + $0x5d8] ss:$12 sps:$4 sm:$0xff]  }
 0xdb4   : > { %v23909_v45 = vadd.f32 %v8422_v40, %v8380_v52  ;;  %v8384_v50 = vadd.f32 %v8383_v13, %v7888_v8  ;;  %v19772_v52 = vld [vmem:[%s25932_s8 + $0x458] ss:$12 sps:$4 sm:$0xff]  }
 0xdb5   : > { %v8424_v26 = vpop.f32.mrf.mxu1 }
 0xdb6   : > { %v23911_v58 = vadd.f32 %v8424_v26, %v8382_v14 }
 0xdb7   : > { %v8426_v36 = vpop.f32.mrf.mxu1 }
 0xdb8   : > { %v23913_v17 = vadd.f32 %v8426_v36, %v8384_v50 }
 0xdca   : > { %v8504_v22 = vpop.f32.mrf.mxu0 }
 0xdcc   : > { %v18566_v20 = vpop.f32.mrf.mxu0 }
 0xdce   : > { %v8507_v6 = vpop.f32.mrf.mxu0 }
 0xdd0   : > { %v18567_v61 = vpop.f32.mrf.mxu0 }
 0xdd1   : > { %v17985_v53 = vpop.f32.mrf.mxu1 }
 0xdd2   : > { %v8599_v2 = vpop.f32.mrf.mxu0 }
 0xdd3   : > { %v17986_v39 = vpop.f32.mrf.mxu1 }
 0xdd4   : > { %v17987_v25 = vadd.f32 %v17986_v39, %v17985_v53  ;;  %v18574_v47 = vpop.f32.mrf.mxu0 }
 0xdd5   : > { %v17988_v12 = vpop.f32.mrf.mxu1 }
 0xdd6   : > { %v8464_v28 = vadd.f32 %v17987_v25, %v7966_v0  ;;  %v8602_v21 = vpop.f32.mrf.mxu0  ;;  %v19763_v0 = vld [vmem:[%s25932_s8 + $0x4a0] ss:$12 sps:$4 sm:$0xff]  }
 0xdd7   : > { %v23918_v24 = vpack.c.bf16 %v8602_v21, %v8599_v2  ;;  %v17989_v49 = vpop.f32.mrf.mxu1  ;;  %v9247_v2 = vld [vmem:[%s25933_s9] sm:$0x7] }
 0xdd8   : > { %v17990_v23 = vadd.f32 %v17989_v49, %v17988_v12  ;;  %v18575_v4 = vpop.f32.mrf.mxu0  ;;  %v23923_v10 = vadd.f32 %v8504_v22, %v8464_v28  ;;  %v9256_v47 = vrot.slane %v9247_v2, %v22095_v37 }
 0xdd9   : > { %16594 = vmatmul.mubr.msk.bf16.vlgmr.msra.gmra.mxu0 %vm6945_vm8, %v23918_v24  ;;  %v8556_v3 = vpop.f32.mrf.mxu1 }
 0xdda   : > { %v8467_v63 = vadd.f32 %v17990_v23, %v7969_v48  ;;  %18003 = vmatpush3.bf16.msra.mxu0 %v19747_v55  ;;  %v19766_v48 = vld [vmem:[%s25932_s8 + $0x488] ss:$12 sps:$4 sm:$0xff]  }
 0xddb   : > { %v8558_v38 = vpop.f32.mrf.mxu1  ;;  %18004 = vmatprep.subr.bf16.mxu0 %v19751_v34 }
 0xddc   : > { %v23933_v29 = vadd.f32 %v8507_v6, %v8467_v63 }
 0xddd   : > { %v8560_v15 = vpop.f32.mrf.mxu1 }
 0xdde   : > { %18005 = vmatpush3.bf16.msra.mxu0 %v19752_v30  ;;  %v8606_v56 = vpack.c.bf16 %v8560_v15, %v8556_v3  ;;  %v9260_v3 = vrot.slane %v9247_v2, %v22110_v5 }
 0xddf   : > { %v8562_v57 = vpop.f32.mrf.mxu1  ;;  %18006 = vmatprep.subr.bf16.mxu0 %v19756_v44 }
 0xde0   : > { %v8607_v59 = vpack.c.bf16 %v8562_v57, %v8558_v38 }
 0xde2   : > { %18007 = vmatpush3.bf16.msra.mxu0 %v19757_v51  ;;  %9105 = vmatprep.mubr.bf16.mxu1 %v8607_v59 }
 0xde3   : > { %9106 = vmatmul.mubr.bf16.vlgmr.msra.gmra.mxu1 %v8606_v56  ;;  %18008 = vmatprep.subr.bf16.mxu0 %v19758_v54 }
 0xde4   : > { %18577 = vmatpush3.bf16.msra.mxu1 %v19759_v7  ;;  %9191 = vmatprep.mubr.bf16.mxu0 %v8607_v59 }
 0xde5   : > { %18578 = vmatprep.subr.bf16.mxu1 %v25986_v9  ;;  %18590 = vmatprep.mubr.msk.bf16.mxu1 %vm20552_vm0, %v25986_v9 }
 0xde6   : > { %18009 = vmatpush3.bf16.msra.mxu0 %v19760_v60 }
 0xde7   : > { %18010 = vmatprep.subr.bf16.mxu0 %v19761_v33 }
 0xde8   : > { %18579 = vmatpush3.bf16.msra.mxu1 %v19762_v46 }
 0xde9   : > { %18580 = vmatprep.subr.bf16.mxu1 %v25986_v9 }
 0xdea   : > { %18011 = vmatpush3.bf16.msra.mxu0 %v19763_v0 }
 0xdeb   : > { %18012 = vmatprep.subr.bf16.mxu0 %v19764_v19 }
 0xdec   : > { %18581 = vmatpush3.bf16.msra.mxu1 %v19765_v27 }
 0xded   : > { %18582 = vmatprep.subr.bf16.mxu1 %v25986_v9 }
 0xdee   : > { %18013 = vmatpush3.bf16.msra.mxu0 %v19766_v48 }
 0xdef   : > { %18014 = vmatprep.subr.bf16.mxu0 %v19767_v16 }
 0xdf0   : > { %18583 = vmatpush3.bf16.msra.mxu1 %v19768_v1 }
 0xdf1   : > { %18584 = vmatprep.subr.bf16.mxu1 %v25986_v9 }
 0xdf2   : > { %18015 = vmatpush3.bf16.msra.mxu0 %v19769_v32 }
 0xdf3   : > { %18016 = vmatprep.subr.bf16.mxu0 %v19770_v11 }
 0xdf4   : > { %18585 = vmatpush3.bf16.msra.mxu1 %v19771_v41 }
 0xdf5   : > { %18586 = vmatprep.subr.bf16.mxu1 %v25986_v9 }
 0xdf6   : > { %18017 = vmatpush3.bf16.msra.mxu0 %v19772_v52 }
 0xdf8   : > { %18587 = vmatpush3.bf16.msra.mxu1 %v19773_v62 }
 0xdf9   : > { %9192 = vmatmul.mubr.bf16.vlgmr.msra.gmra.mxu0 %v8606_v56  ;;  %18588 = vmatprep.subr.bf16.mxu1 %v25986_v9 }
 0xdfa   : > { %9392 = vmatprep.mubr.bf16.mxu0 %v25985_v43 }
 0xdfc   : > { %18589 = vmatpush3.bf16.msra.mxu1 %v19774_v35 }
 0xdff   : > { %18591 = vmatmul.mubr.msk.bf16.vlgmr.msra.gmra.mxu1 %vm6945_vm8, %v23918_v24  ;;  %v9252_v24 = vrot.slane %v9247_v2, %v22104_v42 }
 0xe99   : > { %v9150_v14 = vpop.f32.mrf.mxu0 }
 0xe9b   : > { %v9152_v13 = vpop.f32.mrf.mxu0 }
 0xe9d   : > { %v9154_v8 = vpop.f32.mrf.mxu0 }
 0xe9f   : > { %v9156_v50 = vpop.f32.mrf.mxu0 }
 0xea3   : > { %v9107_v40 = vpop.f32.mrf.mxu1 }
 0xea4   : > { %v9151_v6 = vadd.f32 %v9150_v14, %v9107_v40 }
 0xea5   : > { %v9109_v26 = vpop.f32.mrf.mxu1 }
 0xea6   : > { %v9153_v22 = vadd.f32 %v9152_v13, %v9109_v26  ;;  %v9241_v55 = vadd.f32 %v9151_v6, %v23907_v31 }
 0xea7   : > { %v9111_v36 = vpop.f32.mrf.mxu1 }
 0xea8   : > { %v9155_v39 = vadd.f32 %v9154_v8, %v9111_v36  ;;  %v9242_v25 = vadd.f32 %v9153_v22, %v23909_v45  ;;  %v9264_v15 = vadd.f32 %v9252_v24, %v9241_v55 }
 0xea9   : > { %v9113_v61 = vpop.f32.mrf.mxu1 }
 0xeaa   : > { %v9157_v28 = vadd.f32 %v9156_v50, %v9113_v61  ;;  %v9244_v23 = vadd.f32 %v9155_v39, %v23911_v58  ;;  %v9265_v63 = vadd.f32 %v9256_v47, %v9242_v25 }
 0xeac   : > { %v9245_v45 = vadd.f32 %v9157_v28, %v23913_v17  ;;  %v9267_v57 = vadd.f32 %v9252_v24, %v9244_v23  ;;  %v9270_v59 = vadd.f32 %v9265_v63, %v9264_v15 }
 0xeae   : > { %v9268_v56 = vadd.f32 %v9256_v47, %v9245_v45  ;;  %v9273_v0 = vsel %vm7051_vm10, %v9267_v57, 0.0  ;;  %v19777_v45 = vld [vmem:[%s25935_s11 + $0x2bc] ss:$12 sps:$4 sm:$0xff]  }
 0xeaf   : > { %10065 = vmatprep.subr.bf16.mxu1 %v19777_v45  ;;  %v19826_v45 = vld [vmem:[%s25935_s11 + $0x2e8] ss:$12 sps:$4 sm:$0xff]  }
 0xeb9   : > { %v18018_v20 = vpop.f32.mrf.mxu0 }
 0xebb   : > { %v18019_v53 = vpop.f32.mrf.mxu0 }
 0xebc   : > { %v18020_v21 = vadd.f32 %v18019_v53, %v18018_v20 }
 0xebd   : > { %v18021_v12 = vpop.f32.mrf.mxu0 }
 0xebf   : > { %v18022_v49 = vpop.f32.mrf.mxu0  ;;  %v9234_v34 = vpop.f32.mrf.mxu1 }
 0xec0   : > { %v9235_v4 = vadd.f32 %v18020_v21, %v9234_v34  ;;  %v18023_v38 = vadd.f32 %v18022_v49, %v18021_v12 }
 0xec1   : > { %v18592_v30 = vpop.f32.mrf.mxu1 }
 0xec2   : > { %v9243_v44 = vadd.f32 %v9235_v4, %v23923_v10  ;;  %v9275_v10 = vsel %vm7051_vm10, %v9268_v56, 0.0  ;;  %v19775_v30 = vld [vmem:[%s25935_s11 + $0x2b8] ss:$12 sps:$4 sm:$0xff]  }
 0xec3   : > { %v9237_v51 = vpop.f32.mrf.mxu1  ;;  %10066 = vmatpush1.bf16.msra.mxu1 %v19775_v30  ;;  %v19825_v30 = vld [vmem:[%s25935_s11 + $0x3dc] ss:$12 sps:$4 sm:$0xff]  }
 0xec4   : > { %v9266_v31 = vadd.f32 %v9260_v3, %v9243_v44  ;;  %v9238_v54 = vadd.f32 %v18023_v38, %v9237_v51  ;;  %v19780_v38 = vld [vmem:[%s25935_s11 + $0x2a4] ss:$12 sps:$4 sm:$0xff]   ;;  %v19778_v44 = vld [vmem:[%s25935_s11 + $0x2a0] ss:$12 sps:$4 sm:$0xff]   ;;  %v19781_v51 = vld [vmem:[%s25935_s11 + $0x288] ss:$12 sps:$4 sm:$0xff]  }
 0xec5   : > { %v18593_v7 = vpop.f32.mrf.mxu1  ;;  %10067 = vmatprep.subr.bf16.mxu1 %v19780_v38  ;;  %v19828_v38 = vld [vmem:[%s25935_s11 + $0x2ec] ss:$12 sps:$4 sm:$0xff]  }
 0xec6   : > { %v9271_v58 = vsel %vm743_vm1, %v9266_v31, 0.0  ;;  %v9246_v60 = vadd.f32 %v9238_v54, %v23933_v29  ;;  %v19789_v54 = vld [vmem:[%s25935_s11 + $0x25c] ss:$12 sps:$4 sm:$0xff]   ;;  %v19792_v7 = vld [vmem:[%s25935_s11 + $0x244] ss:$12 sps:$4 sm:$0xff]  }
 0xec7   : > { %v9272_v33 = vadd.f32 %v9271_v58, %v9270_v59  ;;  %10068 = vmatpush1.bf16.msra.mxu1 %v19778_v44  ;;  %v19787_v59 = vld [vmem:[%s25935_s11 + $0x258] ss:$12 sps:$4 sm:$0xff]   ;;  %v19829_v44 = vld [vmem:[%s25935_s11 + $0x3c0] ss:$12 sps:$4 sm:$0xff]  }
 0xec8   : > { %v9269_v46 = vadd.f32 %v9260_v3, %v9246_v60  ;;  %v19795_v58 = vld [vmem:[%s25935_s11 + $0x22c] ss:$12 sps:$4 sm:$0xff]   ;;  %v19793_v60 = vld [vmem:[%s25935_s11 + $0x228] ss:$12 sps:$4 sm:$0xff]  }
 0xec9   : > { %v9274_v17 = vadd.f32 %v9273_v0, %v9272_v33  ;;  %v19798_v33 = vld [vmem:[%s25935_s11 + $0x214] ss:$12 sps:$4 sm:$0xff]   ;;  %v19796_v0 = vld [vmem:[%s25935_s11 + $0x210] ss:$12 sps:$4 sm:$0xff]  }
 0xeca   : > { %v9278_v27 = vsel %vm9277_vm12, %v9269_v46, 0.0 }
 0xecb   : > { %v9276_v19 = vadd.f32 %v9275_v10, %v9274_v17  ;;  %v19801_v17 = vld [vmem:[%s25935_s11 + $0x37c] ss:$12 sps:$4 sm:$0xff]   ;;  %v19799_v10 = vld [vmem:[%s25935_s11 + $0x378] ss:$12 sps:$4 sm:$0xff]  }
 0xecd   : > { %v9279_v48 = vadd.f32 %v9278_v27, %v9276_v19  ;;  %v19804_v19 = vld [vmem:[%s25935_s11 + $0x364] ss:$12 sps:$4 sm:$0xff]   ;;  %v19802_v27 = vld [vmem:[%s25935_s11 + $0x360] ss:$12 sps:$4 sm:$0xff]  }
 0xecf   : > { %9280 = vadd.xlane.f32.xlu0 %v9279_v48  ;;  %v19807_v48 = vld [vmem:[%s25935_s11 + $0x34c] ss:$12 sps:$4 sm:$0xff]  }
 0xf58   : > { %v9281_v16 = vpop.xlane.xlu0 %9280 }
 0xf59   : > { %v9282_v1 = vrot.slane %v9281_v16, 4 }
 0xf5b   : > { %v9283_v32 = vadd.f32 %v9282_v1, %v9281_v16  ;;  %v19805_v1 = vld [vmem:[%s25935_s11 + $0x348] ss:$12 sps:$4 sm:$0xff]  }
 0xf5d   : > { %v9284_v11 = vrot.slane %v9283_v32, 2 }
 0xf5f   : > { %v9285_v41 = vadd.f32 %v9284_v11, %v9283_v32  ;;  %v9349_v11 = vsel %vm9347_vm13, 4294967295, %v20554_v18 }
 0xf61   : > { %v9286_v52 = vrot.slane %v9285_v41, 1 }
 0xf63   : > { %v9287_v29 = vadd.f32 %v9286_v52, %v9285_v41 }
 0xf65   : > { %18748 = vpush %v9287_v29 }
 0xf96   : > { %s18749_s2 = spop %18748 }
 0xf97   : > { %s9289_s29 = smul.f32 0.00025826445, %s18749_s2 }
 0xf99   : > { %v9290_v62 = vstv %s9289_s29 }
 0xf9a   : > { %v24016_v35 = vsub.f32 %v9264_v15, %v9290_v62  ;;  %v24018_v14 = vsub.f32 %v9265_v63, %v9290_v62  ;;  %v24020_v13 = vsub.f32 %v9266_v31, %v9290_v62  ;;  %v24022_v40 = vsub.f32 %v9267_v57, %v9290_v62  ;;  %v19783_v15 = vld [vmem:[%s25935_s11 + $0x28c] ss:$12 sps:$4 sm:$0xff]   ;;  %v19786_v57 = vld [vmem:[%s25935_s11 + $0x274] ss:$12 sps:$4 sm:$0xff]   ;;  %v19784_v31 = vld [vmem:[%s25935_s11 + $0x270] ss:$12 sps:$4 sm:$0xff]  }
 0xf9b   : > { %v24024_v8 = vsub.f32 %v9268_v56, %v9290_v62  ;;  %v24032_v22 = vsub.f32 %v9269_v46, %v9290_v62  ;;  %10069 = vmatprep.subr.bf16.mxu1 %v19783_v15  ;;  %v19790_v56 = vld [vmem:[%s25935_s11 + $0x240] ss:$12 sps:$4 sm:$0xff]   ;;  %v19831_v15 = vld [vmem:[%s25935_s11 + $0x3c4] ss:$12 sps:$4 sm:$0xff]  }
 0xf9c   : > { %v9297_v26 = vmul.f32 %v24016_v35, %v24016_v35  ;;  %v9298_v50 = vmul.f32 %v24018_v14, %v24018_v14  ;;  %v9299_v36 = vmul.f32 %v24020_v13, %v24020_v13  ;;  %v9300_v20 = vmul.f32 %v24022_v40, %v24022_v40  ;;  %10070 = vmatpush1.bf16.msra.mxu1 %v19781_v51  ;;  %v19832_v51 = vld [vmem:[%s25935_s11 + $0x2d0] ss:$12 sps:$4 sm:$0xff]  }
 0xf9d   : > { %v9301_v53 = vmul.f32 %v24024_v8, %v24024_v8  ;;  %v9302_v39 = vmul.f32 %v24032_v22, %v24032_v22  ;;  %10071 = vmatprep.subr.bf16.mxu1 %v19786_v57  ;;  %v19834_v57 = vld [vmem:[%s25935_s11 + $0x2d4] ss:$12 sps:$4 sm:$0xff]  }
 0xf9e   : > { %v9303_v6 = vadd.f32 %v9298_v50, %v9297_v26  ;;  %v9304_v61 = vsel %vm743_vm1, %v9299_v36, 0.0  ;;  %v9306_v25 = vsel %vm7051_vm10, %v9300_v20, 0.0 }
 0xf9f   : > { %v9308_v12 = vsel %vm7051_vm10, %v9301_v53, 0.0  ;;  %v9310_v21 = vsel %vm9277_vm12, %v9302_v39, 0.0  ;;  %v9350_v53 = vsel %vm9348_vm14, %v9349_v11, 0 }
 0xfa0   : > { %v9305_v2 = vadd.f32 %v9304_v61, %v9303_v6  ;;  %10072 = vmatpush1.bf16.msra.mxu1 %v19784_v31  ;;  %v19835_v31 = vld [vmem:[%s25935_s11 + $0x3a8] ss:$12 sps:$4 sm:$0xff]  }
 0xfa1   : > { %10073 = vmatprep.subr.bf16.mxu1 %v19789_v54  ;;  %v19837_v54 = vld [vmem:[%s25935_s11 + $0x3ac] ss:$12 sps:$4 sm:$0xff]  }
 0xfa2   : > { %v9307_v47 = vadd.f32 %v9306_v25, %v9305_v2 }
 0xfa4   : > { %v9309_v28 = vadd.f32 %v9308_v12, %v9307_v47  ;;  %10074 = vmatpush1.bf16.msra.mxu1 %v19787_v59  ;;  %v19808_v12 = vld [vmem:[%s25935_s11 + $0x330] ss:$12 sps:$4 sm:$0xff]   ;;  %v19840_v59 = vld [vmem:[%s25935_s11 + $0xac] ss:$12 sps:$4 sm:$0xff]  }
 0xfa5   : > { %10075 = vmatprep.subr.bf16.mxu1 %v19792_v7  ;;  %v19841_v7 = vld [vmem:[%s25935_s11 + $0x390] ss:$12 sps:$4 sm:$0xff]  }
 0xfa6   : > { %v9311_v55 = vadd.f32 %v9310_v21, %v9309_v28  ;;  %v19810_v28 = vld [vmem:[%s25935_s11 + $0x334] ss:$12 sps:$4 sm:$0xff]  }
 0xfa7   : > { %v19811_v21 = vld [vmem:[%s25935_s11 + $0x408] ss:$12 sps:$4 sm:$0xff]  }
 0xfa8   : > { %9312 = vadd.xlane.f32.xlu1 %v9311_v55  ;;  %10076 = vmatpush1.bf16.msra.mxu1 %v19790_v56  ;;  %v19813_v55 = vld [vmem:[%s25935_s11 + $0x40c] ss:$12 sps:$4 sm:$0xff]   ;;  %v19843_v56 = vld [vmem:[%s25935_s11 + $0x394] ss:$12 sps:$4 sm:$0xff]  }
 0xfa9   : > { %10077 = vmatprep.subr.bf16.mxu1 %v19795_v58  ;;  %v19847_v58 = vld [vmem:[%s25935_s11 + $0x380] ss:$12 sps:$4 sm:$0xff]  }
 0xfac   : > { %10078 = vmatpush1.bf16.msra.mxu1 %v19793_v60 }
 0xfad   : > { %10079 = vmatprep.subr.bf16.mxu1 %v19798_v33 }
 0xfb0   : > { %10080 = vmatpush1.bf16.msra.mxu1 %v19796_v0 }
 0xfb1   : > { %10081 = vmatprep.subr.bf16.mxu1 %v19801_v17 }
 0xfb4   : > { %10082 = vmatpush2.bf16.msra.mxu1 %v19799_v10 }
 0xfb5   : > { %10083 = vmatprep.subr.bf16.mxu1 %v19804_v19 }
 0xfb8   : > { %10084 = vmatpush2.bf16.msra.mxu1 %v19802_v27 }
 0xfb9   : > { %10085 = vmatprep.subr.bf16.mxu1 %v19807_v48 }
 0xfbc   : > { %10086 = vmatpush2.bf16.msra.mxu1 %v19805_v1 }
 0xfbd   : > { %10087 = vmatprep.subr.bf16.mxu1 %v19810_v28  ;;  %v19861_v28 = vld [vmem:[%s25935_s11 + $0x4c] ss:$12 sps:$4 sm:$0xff]  }
 0xfc0   : > { %10088 = vmatpush2.bf16.msra.mxu1 %v19808_v12  ;;  %v19858_v12 = vld [vmem:[%s25935_s11 + $0x290] ss:$12 sps:$4 sm:$0xff]  }
0x1031   : > { %v9313_v24 = vpop.xlane.xlu1 %9312 }
0x1032   : > { %v9314_v49 = vrot.slane %v9313_v24, 4 }
0x1034   : > { %v9315_v34 = vadd.f32 %v9314_v49, %v9313_v24  ;;  %v19814_v24 = vld [vmem:[%s25935_s11 + $0x318] ss:$12 sps:$4 sm:$0xff]   ;;  %v19816_v49 = vld [vmem:[%s25935_s11 + $0x31c] ss:$12 sps:$4 sm:$0xff]  }
0x1035   : > { %10089 = vmatprep.subr.bf16.mxu1 %v19816_v49  ;;  %v19866_v49 = vld [vmem:[%s25935_s11 + $0x34] ss:$12 sps:$4 sm:$0xff]  }
0x1036   : > { %v9316_v23 = vrot.slane %v9315_v34, 2  ;;  %10090 = vmatpush2.bf16.msra.mxu1 %v19814_v24  ;;  %v19863_v24 = vld [vmem:[%s25935_s11 + $0x278] ss:$12 sps:$4 sm:$0xff]  }
0x1038   : > { %v9317_v4 = vadd.f32 %v9316_v23, %v9315_v34  ;;  %v19817_v34 = vld [vmem:[%s25935_s11 + $0x3f0] ss:$12 sps:$4 sm:$0xff]   ;;  %v19819_v23 = vld [vmem:[%s25935_s11 + $0x3f4] ss:$12 sps:$4 sm:$0xff]  }
0x103a   : > { %v9318_v3 = vrot.slane %v9317_v4, 1 }
0x103c   : > { %v9319_v63 = vadd.f32 %v9318_v3, %v9317_v4  ;;  %v19820_v4 = vld [vmem:[%s25935_s11 + $0x300] ss:$12 sps:$4 sm:$0xff]   ;;  %v19822_v3 = vld [vmem:[%s25935_s11 + $0x304] ss:$12 sps:$4 sm:$0xff]  }
0x103d   : > { %10091 = vmatprep.subr.bf16.mxu1 %v19822_v3  ;;  %v19871_v3 = vld [vmem:[%s25935_s11 + $0x1c] ss:$12 sps:$4 sm:$0xff]  }
0x103e   : > { %18750 = vpush %v9319_v63  ;;  %v19823_v63 = vld [vmem:[%s25935_s11 + $0x3d8] ss:$12 sps:$4 sm:$0xff]   ;;  %10092 = vmatpush2.bf16.msra.mxu1 %v19820_v4  ;;  %v19868_v4 = vld [vmem:[%s25935_s11 + $0x260] ss:$12 sps:$4 sm:$0xff]  }
0x103f   : > { %10093 = vmatprep.subr.bf16.mxu1 %v19828_v38  ;;  %v19876_v38 = vld [vmem:[%s25935_s11 + $0x4] ss:$12 sps:$4 sm:$0xff]  }
0x1042   : > { %10094 = vmatpush2.bf16.msra.mxu1 %v19826_v45  ;;  %v19873_v45 = vld [vmem:[%s25935_s11 + $0x248] ss:$12 sps:$4 sm:$0xff]  }
0x1043   : > { %10095 = vmatprep.subr.bf16.mxu1 %v19834_v57  ;;  %v19881_v57 = vld [vmem:[%s25935_s11 + $0x16c] ss:$12 sps:$4 sm:$0xff]  }
0x1046   : > { %10096 = vmatpush2.bf16.msra.mxu1 %v19832_v51  ;;  %v19878_v51 = vld [vmem:[%s25935_s11 + $0x230] ss:$12 sps:$4 sm:$0xff]  }
0x1047   : > { %10582 = vmatprep.subr.bf16.mxu1 %v19840_v59  ;;  %v19883_v59 = vld [vmem:[%s25935_s11 + $0x218] ss:$12 sps:$4 sm:$0xff]  }
0x106f   : > { %s18751_s22 = spop %18750 }
0x1070   : > { %s9321_s3 = smul.f32 0.00025826445, %s18751_s22 }
0x1072   : > { %s9322_s26 = sadd.f32 1e-05, %s9321_s3 }
0x1074   : > { %v9323_v46 = vstv %s9322_s26 }
0x1075   : > { %20499 = vrsqrt.f32 %v9323_v46 }
0x1082   : > { %v20500_v16 = vpop.eup %20499 }
0x1083   : > { %18752 = vpush %v20500_v16 }
0x10b4   : > { %s18753_s23 = spop %18752 }
0x10b5   : > { %v9326_v32 = vstv %s18753_s23 }
0x10b6   : > { %v9327_v41 = vmul.f32 %v9326_v32, %v24016_v35  ;;  %v9329_v52 = vmul.f32 %v9326_v32, %v24020_v13  ;;  %v9330_v29 = vmul.f32 %v9326_v32, %v24022_v40  ;;  %v9332_v62 = vmul.f32 %v9326_v32, %v24032_v22  ;;  %v16598_v22 = vld [vmem:[%s25934_s10 + $0x4] sm:$0x7] }
0x10b7   : > { %v9328_v26 = vmul.f32 %v9326_v32, %v24018_v14  ;;  %v9331_v50 = vmul.f32 %v9326_v32, %v24024_v8  ;;  %v9342_v14 = vld [vmem:[%s25934_s10] sm:$0x7]  ;;  %v19838_v32 = vld [vmem:[%s25935_s11 + $0xa8] ss:$12 sps:$4 sm:$0xff]  }
0x10b8   : > { %v9333_v36 = vmax.f32 %v9327_v41, 0.0  ;;  %v9336_v20 = vmax.f32 %v9330_v29, 0.0  ;;  %v9335_v2 = vmax.f32 %v9329_v52, 0.0  ;;  %v9338_v39 = vmax.f32 %v9332_v62, 0.0  ;;  %v19846_v52 = vld [vmem:[%s25935_s11 + $0x94] ss:$12 sps:$4 sm:$0xff]  }
0x10b9   : > { %v9334_v6 = vmax.f32 %v9328_v26, 0.0  ;;  %v9337_v61 = vmax.f32 %v9331_v50, 0.0  ;;  %v19844_v26 = vld [vmem:[%s25935_s11 + $0x90] ss:$12 sps:$4 sm:$0xff]  }
0x10ba   : > { %v9339_v25 = vpack.c.bf16 %v9336_v20, %v9333_v36  ;;  %v9341_v40 = vpack.c.bf16 %v9338_v39, %v9335_v2  ;;  %v19848_v36 = vld [vmem:[%s25935_s11 + $0x2c0] ss:$12 sps:$4 sm:$0xff]   ;;  %v19849_v2 = vld [vmem:[%s25935_s11 + $0x78] ss:$12 sps:$4 sm:$0xff]  }
0x10bb   : > { %v9340_v47 = vpack.c.bf16 %v9337_v61, %v9334_v6  ;;  %v19851_v6 = vld [vmem:[%s25935_s11 + $0x7c] ss:$12 sps:$4 sm:$0xff]  }
0x10bc   : > { %v24118_v35 = vand.u32 %v9350_v53, %v9339_v25  ;;  %v24128_v8 = vand.u32 %v9350_v53, %v9341_v40  ;;  %v19852_v61 = vld [vmem:[%s25935_s11 + $0x368] ss:$12 sps:$4 sm:$0xff]   ;;  %v19857_v40 = vld [vmem:[%s25935_s11 + $0x350] ss:$12 sps:$4 sm:$0xff]  }
0x10bd   : > { %v24120_v13 = vand.u32 %v9350_v53, %v9340_v47  ;;  %v19853_v25 = vld [vmem:[%s25935_s11 + $0x2a8] ss:$12 sps:$4 sm:$0xff]   ;;  %v19856_v47 = vld [vmem:[%s25935_s11 + $0x64] ss:$12 sps:$4 sm:$0xff]  }
0x10bf   : > { %9374 = vmatprep.subr.bf16.mxu0 %v24120_v13 }
0x10c0   : > { %9375 = vmatpush1.bf16.msra.mxu0 %v24118_v35 }
0x10c1   : > { %18594 = vmatprep.subr.bf16.mxu0 %v25986_v9 }
0x10c3   : > { %16596 = vmatmul.mubr.msk.bf16.vlgmr.msra.gmra.mxu0 %vm9343_vm15, %v9342_v14 }
0x10c4   : > { %18595 = vmatpush3.bf16.msra.mxu0 %v24128_v8  ;;  %18596 = vmatprep.mubr.msk.bf16.mxu0 %vm20552_vm0, %v25986_v9 }
0x10c5   : > { %9551 = vmatprep.subr.bf16.mxu0 %v24120_v13 }
0x10cb   : > { %18597 = vmatmul.mubr.msk.bf16.vlgmr.msra.gmra.mxu0 %vm9343_vm15, %v9342_v14 }
0x10cc   : > { %9552 = vmatpush1.bf16.msra.mxu0 %v24118_v35  ;;  %9569 = vmatprep.mubr.bf16.mxu0 %v25985_v43 }
0x10cd   : > { %18600 = vmatprep.subr.bf16.mxu0 %v25986_v9 }
0x10d3   : > { %16599 = vmatmul.mubr.msk.bf16.vlgmr.msra.gmra.mxu0 %vm9343_vm15, %v16598_v22 }
0x10d4   : > { %18601 = vmatpush3.bf16.msra.mxu0 %v24128_v8  ;;  %18602 = vmatprep.mubr.msk.bf16.mxu0 %vm20552_vm0, %v25986_v9 }
0x10d5   : > { %10110 = vmatprep.subr.bf16.mxu0 %v19813_v55  ;;  %v19859_v55 = vld [vmem:[%s25935_s11 + $0x48] ss:$12 sps:$4 sm:$0xff]  }
0x10db   : > { %18603 = vmatmul.mubr.msk.bf16.vlgmr.msra.gmra.mxu0 %vm9343_vm15, %v16598_v22  ;;  %v19854_v22 = vld [vmem:[%s25935_s11 + $0x60] ss:$12 sps:$4 sm:$0xff]  }
0x10dc   : > { %10138 = vmatprep.mubr.bf16.mxu0 %v25985_v43  ;;  %10111 = vmatpush1.bf16.msra.mxu0 %v19811_v21  ;;  %v19862_v21 = vld [vmem:[%s25935_s11 + $0x338] ss:$12 sps:$4 sm:$0xff]  }
0x10dd   : > { %10112 = vmatprep.subr.bf16.mxu0 %v19819_v23  ;;  %v19864_v23 = vld [vmem:[%s25935_s11 + $0x30] ss:$12 sps:$4 sm:$0xff]  }
0x10e0   : > { %10113 = vmatpush1.bf16.msra.mxu0 %v19817_v34  ;;  %v19867_v34 = vld [vmem:[%s25935_s11 + $0x320] ss:$12 sps:$4 sm:$0xff]  }
0x10e1   : > { %10114 = vmatprep.subr.bf16.mxu0 %v19825_v30  ;;  %v19869_v30 = vld [vmem:[%s25935_s11 + $0x18] ss:$12 sps:$4 sm:$0xff]  }
0x10e4   : > { %10115 = vmatpush1.bf16.msra.mxu0 %v19823_v63  ;;  %v19872_v63 = vld [vmem:[%s25935_s11 + $0x308] ss:$12 sps:$4 sm:$0xff]  }
0x10e5   : > { %10116 = vmatprep.subr.bf16.mxu0 %v19831_v15  ;;  %v19874_v15 = vld [vmem:[%s25935_s11] ss:$12 sps:$4 sm:$0xff]  }
0x10e8   : > { %10117 = vmatpush1.bf16.msra.mxu0 %v19829_v44  ;;  %v19877_v44 = vld [vmem:[%s25935_s11 + $0x2f0] ss:$12 sps:$4 sm:$0xff]  }
0x10e9   : > { %10118 = vmatprep.subr.bf16.mxu0 %v19837_v54  ;;  %v19879_v54 = vld [vmem:[%s25935_s11 + $0x168] ss:$12 sps:$4 sm:$0xff]  }
0x10ec   : > { %10119 = vmatpush1.bf16.msra.mxu0 %v19835_v31  ;;  %v19882_v31 = vld [vmem:[%s25935_s11 + $0x2d8] ss:$12 sps:$4 sm:$0xff]  }
0x10ed   : > { %10120 = vmatprep.subr.bf16.mxu0 %v19843_v56  ;;  %v19884_v56 = vld [vmem:[%s25935_s11 + $0x150] ss:$12 sps:$4 sm:$0xff]  }
0x10f0   : > { %10121 = vmatpush1.bf16.msra.mxu0 %v19841_v7  ;;  %v19886_v7 = vld [vmem:[%s25935_s11 + $0x154] ss:$12 sps:$4 sm:$0xff]  }
0x10f1   : > { %18036 = vmatprep.subr.bf16.mxu0 %v19847_v58  ;;  %v19887_v58 = vld [vmem:[%s25935_s11 + $0x410] ss:$12 sps:$4 sm:$0xff]  }
0x1183   : > { %v24220_v60 = vpop.f32.mrf.mxu0 }
0x1185   : > { %v9396_v33 = vpop.f32.mrf.mxu0 }
0x1186   : > { %v24232_v29 = vpack.c.bf16 %v9396_v33, %v9396_v33  ;;  %v19890_v33 = vld [vmem:[%s25935_s11 + $0x13c] ss:$12 sps:$4 sm:$0xff]  }
0x1187   : > { %v9398_v46 = vpop.f32.mrf.mxu0 }
0x1188   : > { %v19888_v46 = vld [vmem:[%s25935_s11 + $0x138] ss:$12 sps:$4 sm:$0xff]  }
0x1189   : > { %v9399_v0 = vpop.f32.mrf.mxu0 }
0x118a   : > { %v19891_v0 = vld [vmem:[%s25935_s11 + $0x3f8] ss:$12 sps:$4 sm:$0xff]  }
0x118b   : > { %v24222_v17 = vpop.f32.mrf.mxu0 }
0x118d   : > { %v18598_v10 = vpop.f32.mrf.mxu0 }
0x118e   : > { %v19894_v10 = vld [vmem:[%s25935_s11 + $0x124] ss:$12 sps:$4 sm:$0xff]  }
0x118f   : > { %v9438_v19 = vpop.f32.mrf.mxu0 }
0x1190   : > { %v19892_v19 = vld [vmem:[%s25935_s11 + $0x120] ss:$12 sps:$4 sm:$0xff]  }
0x1191   : > { %v18599_v27 = vpop.f32.mrf.mxu0 }
0x1192   : > { %v19895_v27 = vld [vmem:[%s25935_s11 + $0x3e0] ss:$12 sps:$4 sm:$0xff]  }
0x1193   : > { %v9571_v48 = vpop.f32.mrf.mxu0 }
0x1194   : > { %v24227_v11 = vpack.c.bf16 %v9571_v48, %v9571_v48  ;;  %v19898_v48 = vld [vmem:[%s25935_s11 + $0x10c] ss:$12 sps:$4 sm:$0xff]  }
0x1195   : > { %v9573_v16 = vpop.f32.mrf.mxu0 }
0x1196   : > { %v9619_v1 = vpack.c.bf16 %v9573_v16, %v9573_v16  ;;  %v19896_v16 = vld [vmem:[%s25935_s11 + $0x108] ss:$12 sps:$4 sm:$0xff]  }
0x1197   : > { %v9575_v41 = vpop.f32.mrf.mxu0 }
0x1198   : > { %10097 = vmatprep.mubr.bf16.mxu1 %v9619_v1  ;;  %v19903_v41 = vld [vmem:[%s25935_s11 + $0x3b0] ss:$12 sps:$4 sm:$0xff]  }
0x1199   : > { %v9576_v62 = vpop.f32.mrf.mxu0  ;;  %10098 = vmatmul.mubr.bf16.vlgmr.msra.gmra.mxu1 %v24227_v11 }
0x119a   : > { %10583 = vmatpush1.bf16.msra.mxu1 %v19838_v32  ;;  %10614 = vmatprep.mubr.bf16.mxu1 %v24232_v29  ;;  %v19902_v32 = vld [vmem:[%s25935_s11 + $0xf4] ss:$12 sps:$4 sm:$0xff]   ;;  %v19904_v62 = vld [vmem:[%s25935_s11 + $0xd8] ss:$12 sps:$4 sm:$0xff]  }
0x119b   : > { %v9612_v50 = vpop.f32.mrf.mxu0  ;;  %10584 = vmatprep.subr.bf16.mxu1 %v19846_v52  ;;  %v19906_v52 = vld [vmem:[%s25935_s11 + $0xdc] ss:$12 sps:$4 sm:$0xff]  }
0x119c   : > { %v24242_v20 = vpack.c.bf16 %v9612_v50, %v9612_v50  ;;  %v19910_v50 = vld [vmem:[%s25935_s11 + $0xc4] ss:$12 sps:$4 sm:$0xff]  }
0x119d   : > { %v18604_v53 = vpop.f32.mrf.mxu0 }
0x119e   : > { %10585 = vmatpush1.bf16.msra.mxu1 %v19844_v26  ;;  %16755 = vmatmul.mubr.msk.bf16.vlgmr.msra.gmra.mxu0 %vm743_vm1, %v24242_v20  ;;  %v19907_v26 = vld [vmem:[%s25935_s11 + $0x398] ss:$12 sps:$4 sm:$0xff]  }
0x119f   : > { %18037 = vmatpush3.bf16.msra.mxu0 %v19848_v36  ;;  %10179 = vmatprep.mubr.bf16.mxu0 %v9619_v1  ;;  %v9615_v39 = vpop.f32.mrf.mxu0  ;;  %v19899_v1 = vld [vmem:[%s25935_s11 + $0x3c8] ss:$12 sps:$4 sm:$0xff]   ;;  %v19916_v53 = vld [vmem:[%s25935_s11 + $0x1e4] ss:$12 sps:$4 sm:$0xff]  }
0x11a0   : > { %10586 = vmatprep.subr.bf16.mxu1 %v19851_v6  ;;  %18038 = vmatprep.subr.bf16.mxu0 %v19852_v61  ;;  %v19913_v36 = vld [vmem:[%s25935_s11 + $0x1fc] ss:$12 sps:$4 sm:$0xff]   ;;  %v19908_v6 = vld [vmem:[%s25935_s11 + $0xc0] ss:$12 sps:$4 sm:$0xff]   ;;  %v19911_v61 = vld [vmem:[%s25935_s11 + $0x1f8] ss:$12 sps:$4 sm:$0xff]   ;;  %v24415_v39 = vpack.c.bf16 %v24220_v60, %v24220_v60 }
0x11a1   : > { %v18605_v14 = vpop.f32.mrf.mxu0  ;;  %v19921_v60 = vld [vmem:[%s25935_s11 + $0x1e8] ss:$12 sps:$4 sm:$0xff]  }
0x11a2   : > { %10587 = vmatpush1.bf16.msra.mxu1 %v19849_v2  ;;  %v19917_v2 = vld [vmem:[%s25935_s11 + $0x200] ss:$12 sps:$4 sm:$0xff]   ;;  %v19925_v14 = vld [vmem:[%s25935_s11 + $0x1d0] ss:$12 sps:$4 sm:$0xff]  }
0x11a3   : > { %18039 = vmatpush3.bf16.msra.mxu0 %v19853_v25  ;;  %10588 = vmatprep.subr.bf16.mxu1 %v19856_v47  ;;  %v19914_v25 = vld [vmem:[%s25935_s11 + $0x1e0] ss:$12 sps:$4 sm:$0xff]   ;;  %v19918_v47 = vld [vmem:[%s25935_s11 + $0x1c8] ss:$12 sps:$4 sm:$0xff]  }
0x11a4   : > { %18040 = vmatprep.subr.bf16.mxu0 %v19857_v40  ;;  %v19924_v40 = vld [vmem:[%s25935_s11 + $0x1b4] ss:$12 sps:$4 sm:$0xff]  }
0x11a6   : > { %10589 = vmatpush1.bf16.msra.mxu1 %v19854_v22  ;;  %v19922_v22 = vld [vmem:[%s25935_s11 + $0x1b0] ss:$12 sps:$4 sm:$0xff]  }
0x11a7   : > { %18041 = vmatpush3.bf16.msra.mxu0 %v19858_v12  ;;  %10590 = vmatprep.subr.bf16.mxu1 %v19861_v28  ;;  %v19928_v12 = vld [vmem:[%s25935_s11 + $0x19c] ss:$12 sps:$4 sm:$0xff]   ;;  %v19929_v28 = vld [vmem:[%s25935_s11 + $0x1b8] ss:$12 sps:$4 sm:$0xff]  }
0x11a8   : > { %18042 = vmatprep.subr.bf16.mxu0 %v19862_v21  ;;  %v19926_v21 = vld [vmem:[%s25935_s11 + $0x198] ss:$12 sps:$4 sm:$0xff]  }
0x11aa   : > { %10591 = vmatpush1.bf16.msra.mxu1 %v19859_v55  ;;  %v19932_v55 = vld [vmem:[%s25935_s11 + $0x184] ss:$12 sps:$4 sm:$0xff]  }
0x11ab   : > { %18043 = vmatpush3.bf16.msra.mxu0 %v19863_v24  ;;  %10592 = vmatprep.subr.bf16.mxu1 %v19866_v49  ;;  %v19933_v24 = vld [vmem:[%s25935_s11 + $0x1a0] ss:$12 sps:$4 sm:$0xff]  }
0x11ac   : > { %18044 = vmatprep.subr.bf16.mxu0 %v19867_v34  ;;  %v19930_v49 = vld [vmem:[%s25935_s11 + $0x180] ss:$12 sps:$4 sm:$0xff]   ;;  %v19934_v34 = vld [vmem:[%s25935_s11 + $0x170] ss:$12 sps:$4 sm:$0xff]  }
0x11ae   : > { %10593 = vmatpush1.bf16.msra.mxu1 %v19864_v23  ;;  %v19935_v23 = vld [vmem:[%s25935_s11 + $0x188] ss:$12 sps:$4 sm:$0xff]  }
0x11af   : > { %18045 = vmatpush3.bf16.msra.mxu0 %v19868_v4  ;;  %10594 = vmatprep.subr.bf16.mxu1 %v19871_v3  ;;  %v19936_v4 = vld [vmem:[%s25935_s11 + $0xb0] ss:$12 sps:$4 sm:$0xff]   ;;  %v9443_v3 = vpack.c.bf16 %v24222_v17, %v24222_v17  ;;  %v19939_v17 = vld [vmem:[%s25935_s11 + $0x140] ss:$12 sps:$4 sm:$0xff]  }
0x11b0   : > { %18046 = vmatprep.subr.bf16.mxu0 %v19872_v63  ;;  %v19937_v63 = vld [vmem:[%s25935_s11 + $0x158] ss:$12 sps:$4 sm:$0xff]  }
0x11b2   : > { %10595 = vmatpush1.bf16.msra.mxu1 %v19869_v30  ;;  %v19938_v30 = vld [vmem:[%s25935_s11 + $0x98] ss:$12 sps:$4 sm:$0xff]  }
0x11b3   : > { %18047 = vmatpush3.bf16.msra.mxu0 %v19873_v45  ;;  %10596 = vmatprep.subr.bf16.mxu1 %v19876_v38  ;;  %v19940_v45 = vld [vmem:[%s25935_s11 + $0x80] ss:$12 sps:$4 sm:$0xff]   ;;  %v19942_v38 = vld [vmem:[%s25935_s11 + $0x68] ss:$12 sps:$4 sm:$0xff]  }
0x11b4   : > { %18048 = vmatprep.subr.bf16.mxu0 %v19877_v44  ;;  %v19943_v44 = vld [vmem:[%s25935_s11 + $0x110] ss:$12 sps:$4 sm:$0xff]  }
0x11b6   : > { %10597 = vmatpush1.bf16.msra.mxu1 %v19874_v15  ;;  %v19944_v15 = vld [vmem:[%s25935_s11 + $0x50] ss:$12 sps:$4 sm:$0xff]  }
0x11b7   : > { %18049 = vmatpush3.bf16.msra.mxu0 %v19878_v51  ;;  %10598 = vmatprep.subr.bf16.mxu1 %v19881_v57  ;;  %v19945_v51 = vld [vmem:[%s25935_s11 + $0xf8] ss:$12 sps:$4 sm:$0xff]  }
0x11b8   : > { %18050 = vmatprep.subr.bf16.mxu0 %v19882_v31  ;;  %v19946_v57 = vld [vmem:[%s25935_s11 + $0x38] ss:$12 sps:$4 sm:$0xff]   ;;  %v19947_v31 = vld [vmem:[%s25935_s11 + $0xe0] ss:$12 sps:$4 sm:$0xff]  }
0x11ba   : > { %10599 = vmatpush2.bf16.msra.mxu1 %v19879_v54  ;;  %v19948_v54 = vld [vmem:[%s25935_s11 + $0x20] ss:$12 sps:$4 sm:$0xff]  }
0x11bb   : > { %18051 = vmatpush3.bf16.msra.mxu0 %v19883_v59  ;;  %10600 = vmatprep.subr.bf16.mxu1 %v19886_v7  ;;  %v19949_v59 = vld [vmem:[%s25935_s11 + $0xc8] ss:$12 sps:$4 sm:$0xff]  }
0x11bc   : > { %18606 = vmatprep.subr.bf16.mxu0 %v25986_v9  ;;  %v19950_v7 = vld [vmem:[%s25935_s11 + $0x8] ss:$12 sps:$4 sm:$0xff]  }
0x11be   : > { %10180 = vmatmul.mubr.bf16.vlgmr.msra.gmra.mxu0 %v24227_v11  ;;  %10601 = vmatpush2.bf16.msra.mxu1 %v19884_v56  ;;  %v19900_v11 = vld [vmem:[%s25935_s11 + $0xf0] ss:$12 sps:$4 sm:$0xff]   ;;  %v16825_v56 = vld [vmem:[%s25934_s10 + $0x8] sm:$0x7] }
0x11bf   : > { %18607 = vmatpush3.bf16.msra.mxu0 %v19887_v58  ;;  %10602 = vmatprep.subr.bf16.mxu1 %v19890_v33  ;;  %v19954_v58 = vld [vmem:[%s25935_s11 + $0x4b0] ss:$12 sps:$4 sm:$0xff]  }
0x11c0   : > { %18608 = vmatprep.subr.bf16.mxu0 %v25986_v9  ;;  %18618 = vmatprep.mubr.msk.bf16.mxu0 %vm20552_vm0, %v25986_v9  ;;  %v19959_v33 = vld [vmem:[%s25935_s11 + $0x49c] ss:$12 sps:$4 sm:$0xff]  }
0x11c2   : > { %10603 = vmatpush2.bf16.msra.mxu1 %v19888_v46  ;;  %v19957_v46 = vld [vmem:[%s25935_s11 + $0x498] ss:$12 sps:$4 sm:$0xff]  }
0x11c3   : > { %18609 = vmatpush3.bf16.msra.mxu0 %v19891_v0  ;;  %10604 = vmatprep.subr.bf16.mxu1 %v19894_v10  ;;  %v19962_v0 = vld [vmem:[%s25935_s11 + $0x484] ss:$12 sps:$4 sm:$0xff]   ;;  %v19960_v10 = vld [vmem:[%s25935_s11 + $0x480] ss:$12 sps:$4 sm:$0xff]  }
0x11c4   : > { %18610 = vmatprep.subr.bf16.mxu0 %v25986_v9 }
0x11c6   : > { %10605 = vmatpush2.bf16.msra.mxu1 %v19892_v19  ;;  %v19965_v19 = vld [vmem:[%s25935_s11 + $0x46c] ss:$12 sps:$4 sm:$0xff]  }
0x11c7   : > { %18611 = vmatpush3.bf16.msra.mxu0 %v19895_v27  ;;  %10606 = vmatprep.subr.bf16.mxu1 %v19898_v48  ;;  %v19963_v27 = vld [vmem:[%s25935_s11 + $0x468] ss:$12 sps:$4 sm:$0xff]   ;;  %v19966_v48 = vld [vmem:[%s25935_s11 + $0x450] ss:$12 sps:$4 sm:$0xff]  }
0x11c8   : > { %18612 = vmatprep.subr.bf16.mxu0 %v25986_v9 }
0x11ca   : > { %10607 = vmatpush2.bf16.msra.mxu1 %v19896_v16  ;;  %v19968_v16 = vld [vmem:[%s25935_s11 + $0x454] ss:$12 sps:$4 sm:$0xff]  }
0x11cb   : > { %18613 = vmatpush3.bf16.msra.mxu0 %v19899_v1  ;;  %10608 = vmatprep.subr.bf16.mxu1 %v19902_v32  ;;  %v19969_v1 = vld [vmem:[%s25935_s11 + $0x438] ss:$12 sps:$4 sm:$0xff]   ;;  %v19971_v32 = vld [vmem:[%s25935_s11 + $0x43c] ss:$12 sps:$4 sm:$0xff]  }
0x11cc   : > { %18614 = vmatprep.subr.bf16.mxu0 %v25986_v9 }
0x11ce   : > { %10609 = vmatpush2.bf16.msra.mxu1 %v19900_v11  ;;  %v19974_v11 = vld [vmem:[%s25935_s11 + $0x424] ss:$12 sps:$4 sm:$0xff]  }
0x11cf   : > { %18615 = vmatpush3.bf16.msra.mxu0 %v19903_v41  ;;  %10610 = vmatprep.subr.bf16.mxu1 %v19906_v52  ;;  %v19972_v41 = vld [vmem:[%s25935_s11 + $0x420] ss:$12 sps:$4 sm:$0xff]  }
0x11d0   : > { %18616 = vmatprep.subr.bf16.mxu0 %v25986_v9  ;;  %v19977_v52 = vld [vmem:[%s25935_s11 + $0x58c] ss:$12 sps:$4 sm:$0xff]  }
0x11d2   : > { %10611 = vmatpush2.bf16.msra.mxu1 %v19904_v62  ;;  %v19987_v62 = vld [vmem:[%s25935_s11 + $0x618] ss:$12 sps:$4 sm:$0xff]  }
0x11d3   : > { %18617 = vmatpush3.bf16.msra.mxu0 %v19907_v26  ;;  %10612 = vmatprep.subr.bf16.mxu1 %v19910_v50  ;;  %v19989_v26 = vld [vmem:[%s25935_s11 + $0x61c] ss:$12 sps:$4 sm:$0xff]  }
0x11d4   : > { %10627 = vmatprep.subr.bf16.mxu0 %v19913_v36  ;;  %v19975_v50 = vld [vmem:[%s25935_s11 + $0x588] ss:$12 sps:$4 sm:$0xff]   ;;  %v19995_v36 = vld [vmem:[%s25935_s11 + $0x604] ss:$12 sps:$4 sm:$0xff]  }
0x11d6   : > { %18619 = vmatmul.mubr.msk.bf16.vlgmr.msra.gmra.mxu0 %vm743_vm1, %v24242_v20  ;;  %10613 = vmatpush2.bf16.msra.mxu1 %v19908_v6  ;;  %v19920_v20 = vld [vmem:[%s25935_s11 + $0x1cc] ss:$12 sps:$4 sm:$0xff]   ;;  %v19980_v6 = vld [vmem:[%s25935_s11 + $0x574] ss:$12 sps:$4 sm:$0xff]  }
0x11d7   : > { %10628 = vmatpush1.bf16.msra.mxu0 %v19911_v61  ;;  %18622 = vmatprep.subr.bf16.mxu1 %v25986_v9  ;;  %v19993_v61 = vld [vmem:[%s25935_s11 + $0x600] ss:$12 sps:$4 sm:$0xff]  }
0x11d8   : > { %10629 = vmatprep.subr.bf16.mxu0 %v19916_v53  ;;  %10655 = vmatprep.mubr.bf16.mxu0 %v25985_v43  ;;  %v19978_v53 = vld [vmem:[%s25935_s11 + $0x570] ss:$12 sps:$4 sm:$0xff]  }
0x11d9   : > { %10615 = vmatmul.mubr.bf16.vlgmr.msra.gmra.mxu1 %v24415_v39 }
0x11da   : > { %18623 = vmatpush3.bf16.msra.mxu1 %v19917_v2  ;;  %18634 = vmatprep.mubr.msk.bf16.mxu1 %vm20552_vm0, %v25986_v9  ;;  %v19983_v2 = vld [vmem:[%s25935_s11 + $0x55c] ss:$12 sps:$4 sm:$0xff]  }
0x11db   : > { %10630 = vmatpush1.bf16.msra.mxu0 %v19914_v25  ;;  %18624 = vmatprep.subr.bf16.mxu1 %v25986_v9  ;;  %v19986_v25 = vld [vmem:[%s25935_s11 + $0x544] ss:$12 sps:$4 sm:$0xff]  }
0x11dc   : > { %10631 = vmatprep.subr.bf16.mxu0 %v19920_v20  ;;  %v19984_v20 = vld [vmem:[%s25935_s11 + $0x540] ss:$12 sps:$4 sm:$0xff]  }
0x11de   : > { %18625 = vmatpush3.bf16.msra.mxu1 %v19921_v60  ;;  %v19992_v60 = vld [vmem:[%s25935_s11 + $0x52c] ss:$12 sps:$4 sm:$0xff]  }
0x11df   : > { %10632 = vmatpush1.bf16.msra.mxu0 %v19918_v47  ;;  %18626 = vmatprep.subr.bf16.mxu1 %v25986_v9  ;;  %v19990_v47 = vld [vmem:[%s25935_s11 + $0x528] ss:$12 sps:$4 sm:$0xff]  }
0x11e0   : > { %10633 = vmatprep.subr.bf16.mxu0 %v19924_v40  ;;  %v19998_v40 = vld [vmem:[%s25935_s11 + $0x514] ss:$12 sps:$4 sm:$0xff]  }
0x11e2   : > { %18627 = vmatpush3.bf16.msra.mxu1 %v19925_v14  ;;  %v20001_v14 = vld [vmem:[%s25935_s11 + $0x5ec] ss:$12 sps:$4 sm:$0xff]  }
0x11e3   : > { %10634 = vmatpush1.bf16.msra.mxu0 %v19922_v22  ;;  %18628 = vmatprep.subr.bf16.mxu1 %v25986_v9  ;;  %v19996_v22 = vld [vmem:[%s25935_s11 + $0x510] ss:$12 sps:$4 sm:$0xff]  }
0x11e4   : > { %10635 = vmatprep.subr.bf16.mxu0 %v19928_v12  ;;  %v19999_v12 = vld [vmem:[%s25935_s11 + $0x5e8] ss:$12 sps:$4 sm:$0xff]  }
0x11e6   : > { %18629 = vmatpush3.bf16.msra.mxu1 %v19929_v28  ;;  %v20002_v28 = vld [vmem:[%s25935_s11 + $0x4f8] ss:$12 sps:$4 sm:$0xff]  }
0x11e7   : > { %10636 = vmatpush1.bf16.msra.mxu0 %v19926_v21  ;;  %18630 = vmatprep.subr.bf16.mxu1 %v25986_v9  ;;  %v20004_v21 = vld [vmem:[%s25935_s11 + $0x4fc] ss:$12 sps:$4 sm:$0xff]  }
0x11e8   : > { %10637 = vmatprep.subr.bf16.mxu0 %v19932_v55  ;;  %v20005_v55 = vld [vmem:[%s25935_s11 + $0x5d0] ss:$12 sps:$4 sm:$0xff]  }
0x11ea   : > { %18631 = vmatpush3.bf16.msra.mxu1 %v19933_v24  ;;  %v20007_v24 = vld [vmem:[%s25935_s11 + $0x5d4] ss:$12 sps:$4 sm:$0xff]  }
0x11eb   : > { %10638 = vmatpush1.bf16.msra.mxu0 %v19930_v49  ;;  %18632 = vmatprep.subr.bf16.mxu1 %v25986_v9 }
0x11ec   : > { %18065 = vmatprep.subr.bf16.mxu0 %v19934_v34  ;;  %v20008_v34 = vld [vmem:[%s25935_s11 + $0x4e0] ss:$12 sps:$4 sm:$0xff]  }
0x11ee   : > { %16823 = vmatmul.mubr.msk.bf16.vlgmr.msra.gmra.mxu0 %vm743_vm1, %v9443_v3  ;;  %18633 = vmatpush3.bf16.msra.mxu1 %v19935_v23  ;;  %v20010_v23 = vld [vmem:[%s25935_s11 + $0x4e4] ss:$12 sps:$4 sm:$0xff]  }
0x11ef   : > { %18066 = vmatpush3.bf16.msra.mxu0 %v19936_v4  ;;  %10696 = vmatprep.mubr.bf16.mxu0 %v24232_v29  ;;  %v19941_v29 = vld [vmem:[%s25935_s11 + $0x128] ss:$12 sps:$4 sm:$0xff]   ;;  %v20011_v4 = vld [vmem:[%s25935_s11 + $0x5b8] ss:$12 sps:$4 sm:$0xff]  }
0x11f0   : > { %18067 = vmatprep.subr.bf16.mxu0 %v19937_v63 }
0x11f1   : > { %18635 = vmatmul.mubr.msk.bf16.vlgmr.msra.gmra.mxu1 %vm743_vm1, %v9443_v3  ;;  %v20013_v3 = vld [vmem:[%s25935_s11 + $0x5bc] ss:$12 sps:$4 sm:$0xff]  }
0x11f3   : > { %18068 = vmatpush3.bf16.msra.mxu0 %v19938_v30  ;;  %v20016_v30 = vld [vmem:[%s25935_s11 + $0x5a4] ss:$12 sps:$4 sm:$0xff]  }
0x11f4   : > { %18069 = vmatprep.subr.bf16.mxu0 %v19939_v17 }
0x11f7   : > { %18070 = vmatpush3.bf16.msra.mxu0 %v19940_v45  ;;  %v20014_v45 = vld [vmem:[%s25935_s11 + $0x5a0] ss:$12 sps:$4 sm:$0xff]  }
0x11f8   : > { %18071 = vmatprep.subr.bf16.mxu0 %v19941_v29 }
0x11fb   : > { %18072 = vmatpush3.bf16.msra.mxu0 %v19942_v38 }
0x11fc   : > { %18073 = vmatprep.subr.bf16.mxu0 %v19943_v44 }
0x11ff   : > { %18074 = vmatpush3.bf16.msra.mxu0 %v19944_v15  ;;  %v20017_v15 = vld [vmem:[%s25935_s11 + $0x590] ss:$12 sps:$4 sm:$0xff]  }
0x1200   : > { %18075 = vmatprep.subr.bf16.mxu0 %v19945_v51 }
0x1203   : > { %18076 = vmatpush3.bf16.msra.mxu0 %v19946_v57 }
0x1204   : > { %18077 = vmatprep.subr.bf16.mxu0 %v19947_v31 }
0x1207   : > { %18078 = vmatpush3.bf16.msra.mxu0 %v19948_v54 }
0x1208   : > { %18079 = vmatprep.subr.bf16.mxu0 %v19949_v59 }
0x120b   : > { %18080 = vmatpush3.bf16.msra.mxu0 %v19950_v7 }
0x120c   : > { %10763 = vmatprep.subr.bf16.mxu0 %v24120_v13  ;;  %v19951_v13 = vld [vmem:[%s25935_s11 + $0x4c8] ss:$12 sps:$4 sm:$0xff]  }
0x120e   : > { %10697 = vmatmul.mubr.bf16.vlgmr.msra.gmra.mxu0 %v24415_v39  ;;  %v19981_v39 = vld [vmem:[%s25935_s11 + $0x558] ss:$12 sps:$4 sm:$0xff]  }
0x120f   : > { %10764 = vmatpush1.bf16.msra.mxu0 %v24118_v35  ;;  %10781 = vmatprep.mubr.bf16.mxu0 %v25985_v43  ;;  %v19953_v35 = vld [vmem:[%s25935_s11 + $0x4cc] ss:$12 sps:$4 sm:$0xff]  }
0x1210   : > { %18638 = vmatprep.subr.bf16.mxu0 %v25986_v9  ;;  %11277 = vmatprep.subr.bf16.mxu1 %v19953_v35 }
0x1211   : > { %11278 = vmatpush1.bf16.msra.mxu1 %v19951_v13 }
0x1216   : > { %16826 = vmatmul.mubr.msk.bf16.vlgmr.msra.gmra.mxu0 %vm9343_vm15, %v16825_v56 }
0x1217   : > { %18639 = vmatpush3.bf16.msra.mxu0 %v24128_v8  ;;  %18640 = vmatprep.mubr.msk.bf16.mxu0 %vm20552_vm0, %v25986_v9  ;;  %v19956_v8 = vld [vmem:[%s25935_s11 + $0x4b4] ss:$12 sps:$4 sm:$0xff]  }
0x1218   : > { %11279 = vmatprep.subr.bf16.mxu1 %v19956_v8  ;;  %11322 = vmatprep.subr.bf16.mxu0 %v19989_v26 }
0x1219   : > { %11280 = vmatpush1.bf16.msra.mxu1 %v19954_v58 }
0x121a   : > { %11281 = vmatprep.subr.bf16.mxu1 %v19959_v33 }
0x121d   : > { %11282 = vmatpush1.bf16.msra.mxu1 %v19957_v46 }
0x121e   : > { %18641 = vmatmul.mubr.msk.bf16.vlgmr.msra.gmra.mxu0 %vm9343_vm15, %v16825_v56  ;;  %11283 = vmatprep.subr.bf16.mxu1 %v19962_v0 }
0x121f   : > { %11350 = vmatprep.mubr.bf16.mxu0 %v25985_v43  ;;  %11323 = vmatpush1.bf16.msra.mxu0 %v19987_v62 }
0x1220   : > { %11324 = vmatprep.subr.bf16.mxu0 %v19995_v36 }
0x1221   : > { %11284 = vmatpush1.bf16.msra.mxu1 %v19960_v10 }
0x1222   : > { %11285 = vmatprep.subr.bf16.mxu1 %v19965_v19 }
0x1223   : > { %11325 = vmatpush1.bf16.msra.mxu0 %v19993_v61 }
0x1224   : > { %11326 = vmatprep.subr.bf16.mxu0 %v20001_v14 }
0x1225   : > { %11286 = vmatpush1.bf16.msra.mxu1 %v19963_v27 }
0x1226   : > { %11287 = vmatprep.subr.bf16.mxu1 %v19968_v16 }
0x1227   : > { %11327 = vmatpush1.bf16.msra.mxu0 %v19999_v12 }
0x1228   : > { %11328 = vmatprep.subr.bf16.mxu0 %v20007_v24  ;;  %v20018_v24 = vld [vmem:[%s25935_s11 + $0x4d0] ss:$12 sps:$4 sm:$0xff]  }
0x1229   : > { %11288 = vmatpush1.bf16.msra.mxu1 %v19966_v48 }
0x122a   : > { %11289 = vmatprep.subr.bf16.mxu1 %v19971_v32 }
0x122b   : > { %11329 = vmatpush1.bf16.msra.mxu0 %v20005_v55 }
0x122c   : > { %11330 = vmatprep.subr.bf16.mxu0 %v20013_v3  ;;  %v20020_v3 = vld [vmem:[%s25935_s11 + $0x4b8] ss:$12 sps:$4 sm:$0xff]  }
0x122d   : > { %11290 = vmatpush1.bf16.msra.mxu1 %v19969_v1 }
0x122e   : > { %11291 = vmatprep.subr.bf16.mxu1 %v19974_v11 }
0x122f   : > { %11331 = vmatpush1.bf16.msra.mxu0 %v20011_v4 }
0x1230   : > { %11332 = vmatprep.subr.bf16.mxu0 %v20016_v30 }
0x1231   : > { %11292 = vmatpush1.bf16.msra.mxu1 %v19972_v41 }
0x1232   : > { %11293 = vmatprep.subr.bf16.mxu1 %v19977_v52 }
0x1233   : > { %11333 = vmatpush1.bf16.msra.mxu0 %v20014_v45  ;;  %v20023_v45 = vld [vmem:[%s25935_s11 + $0x548] ss:$12 sps:$4 sm:$0xff]  }
0x1234   : > { %18096 = vmatprep.subr.bf16.mxu0 %v20017_v15  ;;  %v20027_v15 = vld [vmem:[%s25935_s11 + $0x518] ss:$12 sps:$4 sm:$0xff]  }
0x1235   : > { %11294 = vmatpush2.bf16.msra.mxu1 %v19975_v50 }
0x1236   : > { %11295 = vmatprep.subr.bf16.mxu1 %v19980_v6 }
0x1239   : > { %11296 = vmatpush2.bf16.msra.mxu1 %v19978_v53 }
0x123a   : > { %11297 = vmatprep.subr.bf16.mxu1 %v19983_v2 }
0x123d   : > { %11298 = vmatpush2.bf16.msra.mxu1 %v19981_v39 }
0x123e   : > { %11299 = vmatprep.subr.bf16.mxu1 %v19986_v25 }
0x1241   : > { %11300 = vmatpush2.bf16.msra.mxu1 %v19984_v20 }
0x1242   : > { %11301 = vmatprep.subr.bf16.mxu1 %v19992_v60 }
0x1245   : > { %11302 = vmatpush2.bf16.msra.mxu1 %v19990_v47 }
0x1246   : > { %11303 = vmatprep.subr.bf16.mxu1 %v19998_v40 }
0x1249   : > { %11304 = vmatpush2.bf16.msra.mxu1 %v19996_v22 }
0x124a   : > { %11305 = vmatprep.subr.bf16.mxu1 %v20004_v21 }
0x124d   : > { %11306 = vmatpush2.bf16.msra.mxu1 %v20002_v28 }
0x124e   : > { %11307 = vmatprep.subr.bf16.mxu1 %v20010_v23 }
0x1251   : > { %11308 = vmatpush2.bf16.msra.mxu1 %v20008_v34  ;;  %v20019_v34 = vld [vmem:[%s25935_s11 + $0x578] ss:$12 sps:$4 sm:$0xff]  }
0x1259   : > { %v10099_v49 = vpop.f32.mrf.mxu1 }
0x125b   : > { %v10101_v63 = vpop.f32.mrf.mxu1 }
0x125d   : > { %v10103_v17 = vpop.f32.mrf.mxu1 }
0x125e   : > { %v10140_v29 = vpop.f32.mrf.mxu0  ;;  %v20022_v17 = vld [vmem:[%s25935_s11 + $0x4a0] ss:$12 sps:$4 sm:$0xff]  }
0x125f   : > { %v10141_v38 = vadd.f32 %v10140_v29, %v10099_v49  ;;  %v10104_v44 = vpop.f32.mrf.mxu1  ;;  %v20024_v29 = vld [vmem:[%s25935_s11 + $0x488] ss:$12 sps:$4 sm:$0xff]  }
0x1260   : > { %v10142_v51 = vpop.f32.mrf.mxu0  ;;  %v20026_v44 = vld [vmem:[%s25935_s11 + $0x470] ss:$12 sps:$4 sm:$0xff]  }
0x1261   : > { %v10143_v57 = vadd.f32 %v10142_v51, %v10101_v63  ;;  %v20021_v63 = vld [vmem:[%s25935_s11 + $0x560] ss:$12 sps:$4 sm:$0xff]   ;;  %v20028_v51 = vld [vmem:[%s25935_s11 + $0x458] ss:$12 sps:$4 sm:$0xff]  }
0x1262   : > { %v10144_v31 = vpop.f32.mrf.mxu0 }
0x1263   : > { %v20030_v31 = vld [vmem:[%s25935_s11 + $0x440] ss:$12 sps:$4 sm:$0xff]  }
0x1264   : > { %v10145_v54 = vpop.f32.mrf.mxu0 }
0x1265   : > { %v20031_v54 = vld [vmem:[%s25935_s11 + $0x4e8] ss:$12 sps:$4 sm:$0xff]  }
0x127e   : > { %v18052_v59 = vpop.f32.mrf.mxu0 }
0x1280   : > { %v18053_v7 = vpop.f32.mrf.mxu0 }
0x1281   : > { %v18054_v56 = vadd.f32 %v18053_v7, %v18052_v59  ;;  %v20032_v59 = vld [vmem:[%s25935_s11 + $0x428] ss:$12 sps:$4 sm:$0xff]   ;;  %v20033_v7 = vld [vmem:[%s25935_s11 + $0x620] ss:$12 sps:$4 sm:$0xff]  }
0x1282   : > { %v18055_v13 = vpop.f32.mrf.mxu0 }
0x1283   : > { %v20035_v13 = vld [vmem:[%s25935_s11 + $0x5f0] ss:$12 sps:$4 sm:$0xff]  }
0x1284   : > { %v18056_v35 = vpop.f32.mrf.mxu0 }
0x1285   : > { %v20036_v35 = vld [vmem:[%s25935_s11 + $0x5d8] ss:$12 sps:$4 sm:$0xff]  }
0x1296   : > { %v10221_v58 = vpop.f32.mrf.mxu0 }
0x1297   : > { %v10222_v8 = vadd.f32 %v18054_v56, %v10221_v58  ;;  %v20034_v56 = vld [vmem:[%s25935_s11 + $0x608] ss:$12 sps:$4 sm:$0xff]   ;;  %v20037_v58 = vld [vmem:[%s25935_s11 + $0x5c0] ss:$12 sps:$4 sm:$0xff]  }
0x1298   : > { %v18620_v33 = vpop.f32.mrf.mxu0 }
0x1299   : > { %v10616_v46 = vpop.f32.mrf.mxu1 }
0x129a   : > { %v10617_v0 = vadd.f32 %v10616_v46, %v10141_v38  ;;  %v10224_v10 = vpop.f32.mrf.mxu0  ;;  %v20025_v38 = vld [vmem:[%s25935_s11 + $0x530] ss:$12 sps:$4 sm:$0xff]  }
0x129b   : > { %v10618_v19 = vpop.f32.mrf.mxu1 }
0x129c   : > { %v10619_v27 = vadd.f32 %v10618_v19, %v10143_v57  ;;  %v18621_v48 = vpop.f32.mrf.mxu0  ;;  %v20029_v57 = vld [vmem:[%s25935_s11 + $0x500] ss:$12 sps:$4 sm:$0xff]  }
0x129d   : > { %v10620_v16 = vpop.f32.mrf.mxu1 }
0x129f   : > { %v10621_v1 = vpop.f32.mrf.mxu1 }
0x12ae   : > { %v10657_v32 = vpop.f32.mrf.mxu0 }
0x12af   : > { %v24671_v11 = vadd.f32 %v10657_v32, %v10617_v0 }
0x12b0   : > { %v10659_v41 = vpop.f32.mrf.mxu0 }
0x12b1   : > { %v24673_v52 = vadd.f32 %v10659_v41, %v10619_v27  ;;  %v10738_v62 = vpop.f32.mrf.mxu1 }
0x12b2   : > { %v10661_v26 = vpop.f32.mrf.mxu0 }
0x12b3   : > { %v18636_v50 = vpop.f32.mrf.mxu1 }
0x12b4   : > { %v10662_v36 = vpop.f32.mrf.mxu0 }
0x12b5   : > { %v10741_v6 = vpop.f32.mrf.mxu1  ;;  %v11442_v36 = vld [vmem:[%s25936_s12] sm:$0x7] }
0x12b7   : > { %v18637_v61 = vpop.f32.mrf.mxu1 }
0x12b8   : > { %v11451_v61 = vrot.slane %v11442_v36, %v22095_v37 }
0x12ce   : > { %v18081_v53 = vpop.f32.mrf.mxu0 }
0x12d0   : > { %v18082_v2 = vpop.f32.mrf.mxu0 }
0x12d1   : > { %v18083_v39 = vadd.f32 %v18082_v2, %v18081_v53  ;;  %v11447_v2 = vrot.slane %v11442_v36, %v22104_v42 }
0x12d2   : > { %v18084_v25 = vpop.f32.mrf.mxu0 }
0x12d3   : > { %v10699_v20 = vadd.f32 %v18083_v39, %v10222_v8  ;;  %v20038_v8 = vld [vmem:[%s25935_s11 + $0x5a8] ss:$12 sps:$4 sm:$0xff]  }
0x12d4   : > { %v18085_v60 = vpop.f32.mrf.mxu0 }
0x12d5   : > { %v24675_v47 = vadd.f32 %v10738_v62, %v10699_v20 }
0x12d6   : > { %v10783_v40 = vpop.f32.mrf.mxu0 }
0x12d7   : > { %v10830_v12 = vpack.c.bf16 %v10783_v40, %v10783_v40 }
0x12d8   : > { %v10785_v14 = vpop.f32.mrf.mxu0 }
0x12d9   : > { %v10831_v22 = vpack.c.bf16 %v10785_v14, %v10785_v14  ;;  %v11455_v14 = vrot.slane %v11442_v36, %v22110_v5 }
0x12da   : > { %v10787_v28 = vpop.f32.mrf.mxu0 }
0x12db   : > { %11309 = vmatprep.mubr.bf16.mxu1 %v10831_v22 }
0x12dc   : > { %v10788_v21 = vpop.f32.mrf.mxu0  ;;  %11310 = vmatmul.mubr.bf16.vlgmr.msra.gmra.mxu1 %v10830_v12 }
0x12dd   : > { %11563 = vmatprep.mubr.bf16.mxu1 %v25985_v43 }
0x12de   : > { %v10824_v55 = vpop.f32.mrf.mxu0 }
0x12df   : > { %v10832_v49 = vpack.c.bf16 %v10824_v55, %v10824_v55 }
0x12e0   : > { %v18642_v23 = vpop.f32.mrf.mxu0 }
0x12e1   : > { %16982 = vmatmul.mubr.msk.bf16.vlgmr.msra.gmra.mxu0 %vm743_vm1, %v10832_v49 }
0x12e2   : > { %18097 = vmatpush3.bf16.msra.mxu0 %v20018_v24  ;;  %11391 = vmatprep.mubr.bf16.mxu0 %v10831_v22  ;;  %v10827_v4 = vpop.f32.mrf.mxu0 }
0x12e3   : > { %18098 = vmatprep.subr.bf16.mxu0 %v20019_v34 }
0x12e4   : > { %v18643_v30 = vpop.f32.mrf.mxu0 }
0x12e6   : > { %18099 = vmatpush3.bf16.msra.mxu0 %v20020_v3 }
0x12e7   : > { %18100 = vmatprep.subr.bf16.mxu0 %v20021_v63 }
0x12ea   : > { %18101 = vmatpush3.bf16.msra.mxu0 %v20022_v17 }
0x12eb   : > { %18102 = vmatprep.subr.bf16.mxu0 %v20023_v45 }
0x12ee   : > { %18103 = vmatpush3.bf16.msra.mxu0 %v20024_v29 }
0x12ef   : > { %18104 = vmatprep.subr.bf16.mxu0 %v20025_v38 }
0x12f2   : > { %18105 = vmatpush3.bf16.msra.mxu0 %v20026_v44 }
0x12f3   : > { %18106 = vmatprep.subr.bf16.mxu0 %v20027_v15 }
0x12f6   : > { %18107 = vmatpush3.bf16.msra.mxu0 %v20028_v51 }
0x12f7   : > { %18108 = vmatprep.subr.bf16.mxu0 %v20029_v57 }
0x12fa   : > { %18109 = vmatpush3.bf16.msra.mxu0 %v20030_v31 }
0x12fb   : > { %18110 = vmatprep.subr.bf16.mxu0 %v20031_v54 }
0x12fe   : > { %18111 = vmatpush3.bf16.msra.mxu0 %v20032_v59 }
0x12ff   : > { %18644 = vmatprep.subr.bf16.mxu0 %v25986_v9 }
0x1301   : > { %11392 = vmatmul.mubr.bf16.vlgmr.msra.gmra.mxu0 %v10830_v12 }
0x1302   : > { %18645 = vmatpush3.bf16.msra.mxu0 %v20033_v7  ;;  %18656 = vmatprep.mubr.msk.bf16.mxu0 %vm20552_vm0, %v25986_v9 }
0x1303   : > { %18646 = vmatprep.subr.bf16.mxu0 %v25986_v9 }
0x1306   : > { %18647 = vmatpush3.bf16.msra.mxu0 %v20034_v56 }
0x1307   : > { %18648 = vmatprep.subr.bf16.mxu0 %v25986_v9 }
0x130a   : > { %18649 = vmatpush3.bf16.msra.mxu0 %v20035_v13 }
0x130b   : > { %18650 = vmatprep.subr.bf16.mxu0 %v25986_v9 }
0x130e   : > { %18651 = vmatpush3.bf16.msra.mxu0 %v20036_v35 }
0x130f   : > { %18652 = vmatprep.subr.bf16.mxu0 %v25986_v9 }
0x1312   : > { %18653 = vmatpush3.bf16.msra.mxu0 %v20037_v58 }
0x1313   : > { %18654 = vmatprep.subr.bf16.mxu0 %v25986_v9 }
0x1316   : > { %18655 = vmatpush3.bf16.msra.mxu0 %v20038_v8 }
0x1317   : > { %18666 = vmatprep.subr.bf16.mxu0 %v25986_v9 }
0x1319   : > { %18657 = vmatmul.mubr.msk.bf16.vlgmr.msra.gmra.mxu0 %vm743_vm1, %v10832_v49  ;;  %vm11465_vm1 = vcmask 520192  }
0x131a   : > { %18668 = vmatprep.mubr.msk.bf16.mxu0 %vm20552_vm0, %v25986_v9 }
0x139c   : > { %v11311_v33 = vpop.f32.mrf.mxu1 }
0x139e   : > { %v11313_v46 = vpop.f32.mrf.mxu1 }
0x13a0   : > { %v11315_v0 = vpop.f32.mrf.mxu1 }
0x13a1   : > { %v11352_v10 = vpop.f32.mrf.mxu0 }
0x13a2   : > { %v11316_v19 = vpop.f32.mrf.mxu1  ;;  %v11353_v50 = vadd.f32 %v11352_v10, %v11311_v33 }
0x13a3   : > { %v11354_v27 = vpop.f32.mrf.mxu0 }
0x13a4   : > { %v11355_v26 = vadd.f32 %v11354_v27, %v11313_v46  ;;  %v11439_v53 = vadd.f32 %v11353_v50, %v24671_v11 }
0x13a5   : > { %v11356_v48 = vpop.f32.mrf.mxu0 }
0x13a6   : > { %v11440_v6 = vadd.f32 %v11355_v26, %v24673_v52  ;;  %v11459_v60 = vadd.f32 %v11447_v2, %v11439_v53  ;;  %v20065_v53 = vld [vmem:[%s25938_s14 + $0x3ac] ss:$12 sps:$4 sm:$0xff]  }
0x13a7   : > { %v11357_v16 = vpop.f32.mrf.mxu0 }
0x13a8   : > { %v11460_v39 = vadd.f32 %v11451_v61, %v11440_v6  ;;  %v11462_v55 = vsel %vm9347_vm13, %v11459_v60, 0.0 }
0x13aa   : > { %v11463_v28 = vsel %vm9347_vm13, %v11460_v39, 0.0 }
0x13ab   : > { %v11464_v24 = vadd.f32 %v11463_v28, %v11462_v55  ;;  %v20075_v28 = vld [vmem:[%s25938_s14 + $0x378] ss:$12 sps:$4 sm:$0xff]   ;;  %v20081_v55 = vld [vmem:[%s25938_s14 + $0x360] ss:$12 sps:$4 sm:$0xff]  }
0x13c1   : > { %v18112_v1 = vpop.f32.mrf.mxu0 }
0x13c3   : > { %v18113_v32 = vpop.f32.mrf.mxu0 }
0x13c4   : > { %v18114_v25 = vadd.f32 %v18113_v32, %v18112_v1  ;;  %v11520_v32 = vsel %vm11519_vm2, 4294967295, %v20554_v18 }
0x13c5   : > { %v18115_v41 = vpop.f32.mrf.mxu0  ;;  %v11521_v50 = vsel %vm7051_vm10, %v11520_v32, 0 }
0x13c7   : > { %v18116_v62 = vpop.f32.mrf.mxu0 }
0x13d9   : > { %v11433_v20 = vpop.f32.mrf.mxu0 }
0x13da   : > { %v11434_v40 = vadd.f32 %v18114_v25, %v11433_v20  ;;  %v16986_v20 = vld [vmem:[%s25937_s13 + $0x2] sm:$0x3] }
0x13db   : > { %v18658_v22 = vpop.f32.mrf.mxu0 }
0x13dc   : > { %v11441_v12 = vadd.f32 %v11434_v40, %v24675_v47  ;;  %v11514_v40 = vld [vmem:[%s25937_s13] sm:$0x3]  ;;  %v20069_v22 = vld [vmem:[%s25938_s14 + $0x390] ss:$12 sps:$4 sm:$0xff]  }
0x13dd   : > { %v11436_v21 = vpop.f32.mrf.mxu0 }
0x13de   : > { %v11461_v52 = vadd.f32 %v11455_v14, %v11441_v12  ;;  %v20071_v14 = vld [vmem:[%s25938_s14 + $0x394] ss:$12 sps:$4 sm:$0xff]   ;;  %v20077_v12 = vld [vmem:[%s25938_s14 + $0x37c] ss:$12 sps:$4 sm:$0xff]   ;;  %v20041_v21 = vld [vmem:[%s25938_s14 + $0x28c] ss:$12 sps:$4 sm:$0xff]  }
0x13df   : > { %v18659_v11 = vpop.f32.mrf.mxu0 }
0x13e0   : > { %v11466_v49 = vsel %vm11465_vm1, %v11461_v52, 0.0  ;;  %v20039_v11 = vld [vmem:[%s25938_s14 + $0x288] ss:$12 sps:$4 sm:$0xff]  }
0x13e1   : > { %v11467_v34 = vadd.f32 %v11466_v49, %v11464_v24  ;;  %v20044_v24 = vld [vmem:[%s25938_s14 + $0x274] ss:$12 sps:$4 sm:$0xff]   ;;  %v20042_v49 = vld [vmem:[%s25938_s14 + $0x270] ss:$12 sps:$4 sm:$0xff]  }
0x13e3   : > { %11468 = vadd.xlane.f32.xlu0 %v11467_v34  ;;  %v20047_v34 = vld [vmem:[%s25938_s14 + $0x25c] ss:$12 sps:$4 sm:$0xff]  }
0x146c   : > { %v11469_v23 = vpop.xlane.xlu0 %11468 }
0x146d   : > { %v11470_v4 = vrot.slane %v11469_v23, 4 }
0x146f   : > { %v11471_v3 = vadd.f32 %v11470_v4, %v11469_v23  ;;  %v20045_v23 = vld [vmem:[%s25938_s14 + $0x258] ss:$12 sps:$4 sm:$0xff]  }
0x1470   : > { %v20050_v4 = vld [vmem:[%s25938_s14 + $0x244] ss:$12 sps:$4 sm:$0xff]  }
0x1471   : > { %v11472_v63 = vrot.slane %v11471_v3, 2 }
0x1473   : > { %v11473_v30 = vadd.f32 %v11472_v63, %v11471_v3  ;;  %v20048_v3 = vld [vmem:[%s25938_s14 + $0x240] ss:$12 sps:$4 sm:$0xff]  }
0x1474   : > { %v20053_v63 = vld [vmem:[%s25938_s14 + $0x22c] ss:$12 sps:$4 sm:$0xff]  }
0x1475   : > { %v11474_v17 = vrot.slane %v11473_v30, 1 }
0x1477   : > { %v11475_v47 = vadd.f32 %v11474_v17, %v11473_v30  ;;  %v20051_v30 = vld [vmem:[%s25938_s14 + $0x228] ss:$12 sps:$4 sm:$0xff]  }
0x1478   : > { %v20056_v17 = vld [vmem:[%s25938_s14 + $0x214] ss:$12 sps:$4 sm:$0xff]  }
0x1479   : > { %18754 = vpush %v11475_v47  ;;  %v20054_v47 = vld [vmem:[%s25938_s14 + $0x210] ss:$12 sps:$4 sm:$0xff]  }
0x14aa   : > { %s18755_s1 = spop %18754 }
0x14ab   : > { %s11477_s22 = smul.f32 0.000625, %s18755_s1 }
0x14ad   : > { %v11478_v45 = vstv %s11477_s22 }
0x14ae   : > { %v11479_v29 = vsub.f32 %v11459_v60, %v11478_v45  ;;  %v11480_v38 = vsub.f32 %v11460_v39, %v11478_v45  ;;  %v11481_v44 = vsub.f32 %v11461_v52, %v11478_v45  ;;  %v20063_v60 = vld [vmem:[%s25938_s14 + $0x3a8] ss:$12 sps:$4 sm:$0xff]   ;;  %v20083_v52 = vld [vmem:[%s25938_s14 + $0x364] ss:$12 sps:$4 sm:$0xff]  }
0x14af   : > { %v20059_v45 = vld [vmem:[%s25938_s14 + $0x1fc] ss:$12 sps:$4 sm:$0xff]  }
0x14b0   : > { %v11482_v15 = vmul.f32 %v11479_v29, %v11479_v29  ;;  %v11483_v51 = vmul.f32 %v11480_v38, %v11480_v38  ;;  %v11484_v57 = vmul.f32 %v11481_v44, %v11481_v44 }
0x14b2   : > { %v11485_v31 = vsel %vm9347_vm13, %v11482_v15, 0.0  ;;  %v11486_v54 = vsel %vm9347_vm13, %v11483_v51, 0.0  ;;  %v11488_v7 = vsel %vm11465_vm1, %v11484_v57, 0.0  ;;  %v20068_v15 = vld [vmem:[%s25938_s14 + $0x34c] ss:$12 sps:$4 sm:$0xff]  }
0x14b3   : > { %v11487_v59 = vadd.f32 %v11486_v54, %v11485_v31  ;;  %v20066_v51 = vld [vmem:[%s25938_s14 + $0x348] ss:$12 sps:$4 sm:$0xff]   ;;  %v20072_v31 = vld [vmem:[%s25938_s14 + $0x330] ss:$12 sps:$4 sm:$0xff]  }
0x14b4   : > { %v20074_v57 = vld [vmem:[%s25938_s14 + $0x334] ss:$12 sps:$4 sm:$0xff]   ;;  %v20080_v54 = vld [vmem:[%s25938_s14 + $0x31c] ss:$12 sps:$4 sm:$0xff]  }
0x14b5   : > { %v11489_v56 = vadd.f32 %v11488_v7, %v11487_v59  ;;  %v20078_v59 = vld [vmem:[%s25938_s14 + $0x318] ss:$12 sps:$4 sm:$0xff]   ;;  %v20084_v7 = vld [vmem:[%s25938_s14 + $0x300] ss:$12 sps:$4 sm:$0xff]  }
0x14b7   : > { %11490 = vadd.xlane.f32.xlu1 %v11489_v56  ;;  %v20086_v56 = vld [vmem:[%s25938_s14 + $0x304] ss:$12 sps:$4 sm:$0xff]  }
0x1540   : > { %v11491_v13 = vpop.xlane.xlu1 %11490 }
0x1541   : > { %v11492_v35 = vrot.slane %v11491_v13, 4 }
0x1543   : > { %v11493_v58 = vadd.f32 %v11492_v35, %v11491_v13  ;;  %v20087_v13 = vld [vmem:[%s25938_s14 + $0x350] ss:$12 sps:$4 sm:$0xff]   ;;  %v20089_v35 = vld [vmem:[%s25938_s14 + $0x2e8] ss:$12 sps:$4 sm:$0xff]  }
0x1545   : > { %v11494_v8 = vrot.slane %v11493_v58, 2 }
0x1547   : > { %v11495_v33 = vadd.f32 %v11494_v8, %v11493_v58  ;;  %v20091_v58 = vld [vmem:[%s25938_s14 + $0x2ec] ss:$12 sps:$4 sm:$0xff]   ;;  %v20094_v8 = vld [vmem:[%s25938_s14 + $0x2d0] ss:$12 sps:$4 sm:$0xff]  }
0x1549   : > { %v11496_v46 = vrot.slane %v11495_v33, 1 }
0x154b   : > { %v11497_v0 = vadd.f32 %v11496_v46, %v11495_v33  ;;  %v20096_v33 = vld [vmem:[%s25938_s14 + $0x2d4] ss:$12 sps:$4 sm:$0xff]   ;;  %v20099_v46 = vld [vmem:[%s25938_s14 + $0x2b8] ss:$12 sps:$4 sm:$0xff]  }
0x154d   : > { %18756 = vpush %v11497_v0  ;;  %v20101_v0 = vld [vmem:[%s25938_s14 + $0x2bc] ss:$12 sps:$4 sm:$0xff]  }
0x157e   : > { %s18757_s23 = spop %18756 }
0x157f   : > { %s11499_s24 = smul.f32 0.000625, %s18757_s23 }
0x1581   : > { %s11500_s3 = sadd.f32 1e-05, %s11499_s24 }
0x1583   : > { %v11501_v10 = vstv %s11500_s3 }
0x1584   : > { %20501 = vrsqrt.f32 %v11501_v10  ;;  %v20104_v10 = vld [vmem:[%s25938_s14 + $0x2a0] ss:$12 sps:$4 sm:$0xff]  }
0x1591   : > { %v20502_v19 = vpop.eup %20501 }
0x1592   : > { %18758 = vpush %v20502_v19  ;;  %v20106_v19 = vld [vmem:[%s25938_s14 + $0x2a4] ss:$12 sps:$4 sm:$0xff]  }
0x15c3   : > { %s18759_s27 = spop %18758 }
0x15c4   : > { %v11504_v27 = vstv %s18759_s27 }
0x15c5   : > { %v11505_v48 = vmul.f32 %v11504_v27, %v11479_v29  ;;  %v11506_v16 = vmul.f32 %v11504_v27, %v11480_v38  ;;  %v11507_v1 = vmul.f32 %v11504_v27, %v11481_v44  ;;  %v20057_v29 = vld [vmem:[%s25938_s14 + $0x1f8] ss:$12 sps:$4 sm:$0xff]   ;;  %v20060_v44 = vld [vmem:[%s25938_s14 + $0x1e0] ss:$12 sps:$4 sm:$0xff]  }
0x15c6   : > { %v20062_v38 = vld [vmem:[%s25938_s14 + $0x1e4] ss:$12 sps:$4 sm:$0xff]   ;;  %v20112_v27 = vld [vmem:[%s25938_s14 + $0xac] ss:$12 sps:$4 sm:$0xff]  }
0x15c7   : > { %v11508_v41 = vmax.f32 %v11505_v48, 0.0  ;;  %v11509_v62 = vmax.f32 %v11506_v16, 0.0  ;;  %v11510_v26 = vmax.f32 %v11507_v1, 0.0  ;;  %v20088_v16 = vld [vmem:[%s25938_s14 + $0x290] ss:$12 sps:$4 sm:$0xff]  }
0x15c9   : > { %v11511_v36 = vpack.c.bf16 %v11508_v41, %v11508_v41  ;;  %v11512_v6 = vpack.c.bf16 %v11509_v62, %v11509_v62  ;;  %v11513_v61 = vpack.c.bf16 %v11510_v26, %v11510_v26  ;;  %v20092_v41 = vld [vmem:[%s25938_s14 + $0x338] ss:$12 sps:$4 sm:$0xff]  }
0x15cb   : > { %v24775_v2 = vand.u32 %v11521_v50, %v11511_v36  ;;  %v24777_v39 = vand.u32 %v11521_v50, %v11513_v61  ;;  %v24779_v25 = vand.u32 %v11521_v50, %v11512_v6  ;;  %v20093_v36 = vld [vmem:[%s25938_s14 + $0x278] ss:$12 sps:$4 sm:$0xff]   ;;  %v20097_v61 = vld [vmem:[%s25938_s14 + $0x320] ss:$12 sps:$4 sm:$0xff]  }
0x15cd   : > { %11545 = vmatprep.subr.bf16.mxu1 %v24779_v25  ;;  %18667 = vmatpush3.bf16.msra.mxu0 %v24777_v39 }
0x15ce   : > { %11546 = vmatpush1.bf16.msra.mxu1 %v24775_v2  ;;  %12238 = vmatprep.subr.bf16.mxu0 %v20065_v53 }
0x15cf   : > { %18660 = vmatprep.subr.bf16.mxu1 %v25986_v9 }
0x15d0   : > { %18669 = vmatmul.mubr.msk.bf16.vlgmr.msra.gmra.mxu0 %vm11515_vm3, %v16986_v20 }
0x15d1   : > { %16984 = vmatmul.mubr.msk.bf16.vlgmr.msra.gmra.mxu1 %vm11515_vm3, %v11514_v40  ;;  %12239 = vmatpush1.bf16.msra.mxu0 %v20063_v60  ;;  %v20098_v60 = vld [vmem:[%s25938_s14 + $0x260] ss:$12 sps:$4 sm:$0xff]  }
0x15d2   : > { %18661 = vmatpush3.bf16.msra.mxu1 %v24777_v39  ;;  %18662 = vmatprep.mubr.msk.bf16.mxu1 %vm20552_vm0, %v25986_v9 }
0x15d3   : > { %11714 = vmatprep.subr.bf16.mxu1 %v24779_v25  ;;  %12240 = vmatprep.subr.bf16.mxu0 %v20071_v14  ;;  %v20102_v14 = vld [vmem:[%s25938_s14 + $0x308] ss:$12 sps:$4 sm:$0xff]  }
0x15d4   : > { %12262 = vmatprep.mubr.bf16.mxu0 %v25985_v43 }
0x15d5   : > { %12241 = vmatpush1.bf16.msra.mxu0 %v20069_v22 }
0x15d6   : > { %12242 = vmatprep.subr.bf16.mxu0 %v20077_v12  ;;  %v20103_v12 = vld [vmem:[%s25938_s14 + $0x248] ss:$12 sps:$4 sm:$0xff]  }
0x15d9   : > { %18663 = vmatmul.mubr.msk.bf16.vlgmr.msra.gmra.mxu1 %vm11515_vm3, %v11514_v40  ;;  %12243 = vmatpush1.bf16.msra.mxu0 %v20075_v28 }
0x15da   : > { %11715 = vmatpush1.bf16.msra.mxu1 %v24775_v2  ;;  %11732 = vmatprep.mubr.bf16.mxu1 %v25985_v43 }
0x15db   : > { %12189 = vmatprep.subr.bf16.mxu1 %v20041_v21  ;;  %12244 = vmatprep.subr.bf16.mxu0 %v20083_v52  ;;  %v20107_v21 = vld [vmem:[%s25938_s14 + $0x2f0] ss:$12 sps:$4 sm:$0xff]  }
0x15dd   : > { %12245 = vmatpush1.bf16.msra.mxu0 %v20081_v55  ;;  %v20108_v55 = vld [vmem:[%s25938_s14 + $0x230] ss:$12 sps:$4 sm:$0xff]  }
0x15de   : > { %18129 = vmatprep.subr.bf16.mxu0 %v20087_v13  ;;  %v20131_v13 = vld [vmem:[%s25938_s14 + $0x398] ss:$12 sps:$4 sm:$0xff]  }
0x15e1   : > { %16987 = vmatmul.mubr.msk.bf16.vlgmr.msra.gmra.mxu1 %vm11515_vm3, %v16986_v20 }
0x15e2   : > { %12190 = vmatpush1.bf16.msra.mxu1 %v20039_v11 }
0x15e3   : > { %12191 = vmatprep.subr.bf16.mxu1 %v20044_v24  ;;  %v20109_v24 = vld [vmem:[%s25938_s14 + $0x2d8] ss:$12 sps:$4 sm:$0xff]  }
0x15e6   : > { %12192 = vmatpush1.bf16.msra.mxu1 %v20042_v49 }
0x15e7   : > { %12193 = vmatprep.subr.bf16.mxu1 %v20047_v34 }
0x15ea   : > { %12194 = vmatpush1.bf16.msra.mxu1 %v20045_v23 }
0x15eb   : > { %12195 = vmatprep.subr.bf16.mxu1 %v20050_v4  ;;  %v20110_v4 = vld [vmem:[%s25938_s14 + $0xa8] ss:$12 sps:$4 sm:$0xff]  }
0x15ee   : > { %12196 = vmatpush1.bf16.msra.mxu1 %v20048_v3  ;;  %v20113_v3 = vld [vmem:[%s25938_s14 + $0x218] ss:$12 sps:$4 sm:$0xff]  }
0x15ef   : > { %12197 = vmatprep.subr.bf16.mxu1 %v20053_v63  ;;  %v20114_v63 = vld [vmem:[%s25938_s14 + $0x2c0] ss:$12 sps:$4 sm:$0xff]  }
0x15f2   : > { %12198 = vmatpush1.bf16.msra.mxu1 %v20051_v30 }
0x15f3   : > { %12199 = vmatprep.subr.bf16.mxu1 %v20056_v17  ;;  %v20117_v17 = vld [vmem:[%s25938_s14 + $0x94] ss:$12 sps:$4 sm:$0xff]  }
0x15f6   : > { %12200 = vmatpush1.bf16.msra.mxu1 %v20054_v47 }
0x15f7   : > { %12201 = vmatprep.subr.bf16.mxu1 %v20059_v45 }
0x15fa   : > { %12202 = vmatpush1.bf16.msra.mxu1 %v20057_v29  ;;  %v20115_v29 = vld [vmem:[%s25938_s14 + $0x90] ss:$12 sps:$4 sm:$0xff]  }
0x15fb   : > { %12203 = vmatprep.subr.bf16.mxu1 %v20062_v38  ;;  %v20118_v38 = vld [vmem:[%s25938_s14 + $0x200] ss:$12 sps:$4 sm:$0xff]  }
0x15fe   : > { %12204 = vmatpush1.bf16.msra.mxu1 %v20060_v44  ;;  %v20119_v44 = vld [vmem:[%s25938_s14 + $0x2a8] ss:$12 sps:$4 sm:$0xff]  }
0x15ff   : > { %12205 = vmatprep.subr.bf16.mxu1 %v20068_v15  ;;  %v20122_v15 = vld [vmem:[%s25938_s14 + $0x7c] ss:$12 sps:$4 sm:$0xff]  }
0x1602   : > { %12206 = vmatpush2.bf16.msra.mxu1 %v20066_v51  ;;  %v20120_v51 = vld [vmem:[%s25938_s14 + $0x78] ss:$12 sps:$4 sm:$0xff]  }
0x1603   : > { %12207 = vmatprep.subr.bf16.mxu1 %v20074_v57  ;;  %v20123_v57 = vld [vmem:[%s25938_s14 + $0x1e8] ss:$12 sps:$4 sm:$0xff]  }
0x1606   : > { %12208 = vmatpush2.bf16.msra.mxu1 %v20072_v31  ;;  %v20126_v31 = vld [vmem:[%s25938_s14 + $0x64] ss:$12 sps:$4 sm:$0xff]  }
0x1607   : > { %12209 = vmatprep.subr.bf16.mxu1 %v20080_v54  ;;  %v20124_v54 = vld [vmem:[%s25938_s14 + $0x60] ss:$12 sps:$4 sm:$0xff]  }
0x160a   : > { %12210 = vmatpush2.bf16.msra.mxu1 %v20078_v59  ;;  %v20127_v59 = vld [vmem:[%s25938_s14 + $0x3b0] ss:$12 sps:$4 sm:$0xff]  }
0x160b   : > { %12211 = vmatprep.subr.bf16.mxu1 %v20086_v56  ;;  %v20128_v56 = vld [vmem:[%s25938_s14 + $0x48] ss:$12 sps:$4 sm:$0xff]  }
0x160e   : > { %12212 = vmatpush2.bf16.msra.mxu1 %v20084_v7  ;;  %v20130_v7 = vld [vmem:[%s25938_s14 + $0x4c] ss:$12 sps:$4 sm:$0xff]  }
0x160f   : > { %12213 = vmatprep.subr.bf16.mxu1 %v20091_v58  ;;  %v20132_v58 = vld [vmem:[%s25938_s14 + $0x30] ss:$12 sps:$4 sm:$0xff]  }
0x1612   : > { %12214 = vmatpush2.bf16.msra.mxu1 %v20089_v35  ;;  %v20134_v35 = vld [vmem:[%s25938_s14 + $0x34] ss:$12 sps:$4 sm:$0xff]  }
0x1613   : > { %12215 = vmatprep.subr.bf16.mxu1 %v20096_v33  ;;  %v20138_v33 = vld [vmem:[%s25938_s14 + $0x1c] ss:$12 sps:$4 sm:$0xff]  }
0x1616   : > { %12216 = vmatpush2.bf16.msra.mxu1 %v20094_v8  ;;  %v20135_v8 = vld [vmem:[%s25938_s14 + $0x380] ss:$12 sps:$4 sm:$0xff]  }
0x1617   : > { %12217 = vmatprep.subr.bf16.mxu1 %v20101_v0  ;;  %v20139_v0 = vld [vmem:[%s25938_s14 + $0x368] ss:$12 sps:$4 sm:$0xff]  }
0x161a   : > { %12218 = vmatpush2.bf16.msra.mxu1 %v20099_v46  ;;  %v20136_v46 = vld [vmem:[%s25938_s14 + $0x18] ss:$12 sps:$4 sm:$0xff]  }
0x161b   : > { %12219 = vmatprep.subr.bf16.mxu1 %v20106_v19  ;;  %v20145_v19 = vld [vmem:[%s25938_s14 + $0x1cc] ss:$12 sps:$4 sm:$0xff]  }
0x161e   : > { %12220 = vmatpush2.bf16.msra.mxu1 %v20104_v10  ;;  %v20142_v10 = vld [vmem:[%s25938_s14 + $0x4] ss:$12 sps:$4 sm:$0xff]  }
0x161f   : > { %12674 = vmatprep.subr.bf16.mxu1 %v20112_v27  ;;  %v20140_v27 = vld [vmem:[%s25938_s14] ss:$12 sps:$4 sm:$0xff]  }
0x1690   : > { %v11775_v48 = vpop.f32.mrf.mxu0 }
0x1691   : > { %v24928_v1 = vpack.c.bf16 %v11775_v48, %v11775_v48  ;;  %v24930_v32 = vpop.f32.mrf.mxu1  ;;  %v20143_v48 = vld [vmem:[%s25938_s14 + $0x1c8] ss:$12 sps:$4 sm:$0xff]  }
0x1692   : > { %v18670_v62 = vpop.f32.mrf.mxu0 }
0x1693   : > { %v11567_v26 = vpop.f32.mrf.mxu1  ;;  %17129 = vmatmul.mubr.msk.bf16.vlgmr.msra.gmra.mxu0 %vm12185_vm4, %v24928_v1  ;;  %v20146_v62 = vld [vmem:[%s25938_s14 + $0x168] ss:$12 sps:$4 sm:$0xff]  }
0x1694   : > { %18130 = vmatpush3.bf16.msra.mxu0 %v20088_v16  ;;  %v11778_v50 = vpop.f32.mrf.mxu0  ;;  %v24975_v47 = vpack.c.bf16 %v11567_v26, %v11567_v26  ;;  %v20148_v16 = vld [vmem:[%s25938_s14 + $0x16c] ss:$12 sps:$4 sm:$0xff]   ;;  %v20149_v26 = vld [vmem:[%s25938_s14 + $0x1b0] ss:$12 sps:$4 sm:$0xff]  }
0x1695   : > { %v11569_v6 = vpop.f32.mrf.mxu1  ;;  %18131 = vmatprep.subr.bf16.mxu0 %v20092_v41  ;;  %v20151_v41 = vld [vmem:[%s25938_s14 + $0x1b4] ss:$12 sps:$4 sm:$0xff]  }
0x1696   : > { %v18671_v53 = vpop.f32.mrf.mxu0  ;;  %v20154_v50 = vld [vmem:[%s25938_s14 + $0x154] ss:$12 sps:$4 sm:$0xff]   ;;  %v20155_v6 = vld [vmem:[%s25938_s14 + $0x198] ss:$12 sps:$4 sm:$0xff]  }
0x1697   : > { %v11570_v20 = vpop.f32.mrf.mxu1  ;;  %v20163_v53 = vld [vmem:[%s25938_s14 + $0x184] ss:$12 sps:$4 sm:$0xff]  }
0x1698   : > { %18132 = vmatpush3.bf16.msra.mxu0 %v20093_v36  ;;  %v20152_v36 = vld [vmem:[%s25938_s14 + $0x150] ss:$12 sps:$4 sm:$0xff]   ;;  %v20158_v20 = vld [vmem:[%s25938_s14 + $0x138] ss:$12 sps:$4 sm:$0xff]  }
0x1699   : > { %v24946_v40 = vpop.f32.mrf.mxu1  ;;  %18133 = vmatprep.subr.bf16.mxu0 %v20097_v61  ;;  %v20160_v61 = vld [vmem:[%s25938_s14 + $0x13c] ss:$12 sps:$4 sm:$0xff]  }
0x169b   : > { %v18664_v22 = vpop.f32.mrf.mxu1 }
0x169c   : > { %18134 = vmatpush3.bf16.msra.mxu0 %v20098_v60  ;;  %v20161_v60 = vld [vmem:[%s25938_s14 + $0x180] ss:$12 sps:$4 sm:$0xff]   ;;  %v20167_v22 = vld [vmem:[%s25938_s14 + $0x170] ss:$12 sps:$4 sm:$0xff]  }
0x169d   : > { %v11609_v28 = vpop.f32.mrf.mxu1  ;;  %18135 = vmatprep.subr.bf16.mxu0 %v20102_v14  ;;  %v20166_v14 = vld [vmem:[%s25938_s14 + $0x124] ss:$12 sps:$4 sm:$0xff]  }
0x169e   : > { %v20168_v28 = vld [vmem:[%s25938_s14 + $0xb0] ss:$12 sps:$4 sm:$0xff]  }
0x169f   : > { %v18665_v52 = vpop.f32.mrf.mxu1 }
0x16a0   : > { %18136 = vmatpush3.bf16.msra.mxu0 %v20103_v12  ;;  %v20164_v12 = vld [vmem:[%s25938_s14 + $0x120] ss:$12 sps:$4 sm:$0xff]  }
0x16a1   : > { %v11734_v11 = vpop.f32.mrf.mxu1  ;;  %18137 = vmatprep.subr.bf16.mxu0 %v20107_v21  ;;  %v25103_v21 = vpack.c.bf16 %v24946_v40, %v24946_v40  ;;  %v20171_v52 = vld [vmem:[%s25938_s14 + $0x10c] ss:$12 sps:$4 sm:$0xff]   ;;  %v20169_v40 = vld [vmem:[%s25938_s14 + $0x108] ss:$12 sps:$4 sm:$0xff]  }
0x16a2   : > { %v11781_v49 = vpack.c.bf16 %v11734_v11, %v11734_v11  ;;  %v20173_v11 = vld [vmem:[%s25938_s14 + $0x98] ss:$12 sps:$4 sm:$0xff]  }
0x16a3   : > { %v11736_v34 = vpop.f32.mrf.mxu1 }
0x16a4   : > { %v11782_v23 = vpack.c.bf16 %v11736_v34, %v11736_v34  ;;  %18138 = vmatpush3.bf16.msra.mxu0 %v20108_v55  ;;  %v20172_v55 = vld [vmem:[%s25938_s14 + $0x158] ss:$12 sps:$4 sm:$0xff]   ;;  %v20174_v34 = vld [vmem:[%s25938_s14 + $0xf0] ss:$12 sps:$4 sm:$0xff]  }
0x16a5   : > { %18139 = vmatprep.subr.bf16.mxu0 %v20109_v24  ;;  %v11738_v30 = vpop.f32.mrf.mxu1  ;;  %v20176_v24 = vld [vmem:[%s25938_s14 + $0xf4] ss:$12 sps:$4 sm:$0xff]  }
0x16a6   : > { %12221 = vmatprep.mubr.bf16.mxu1 %v11782_v23  ;;  %12303 = vmatprep.mubr.bf16.mxu0 %v11782_v23  ;;  %v20178_v23 = vld [vmem:[%s25938_s14 + $0x80] ss:$12 sps:$4 sm:$0xff]   ;;  %v20183_v30 = vld [vmem:[%s25938_s14 + $0x68] ss:$12 sps:$4 sm:$0xff]  }
0x16a7   : > { %12222 = vmatmul.mubr.bf16.vlgmr.msra.gmra.mxu1 %v11781_v49  ;;  %v11739_v45 = vpop.f32.mrf.mxu1 }
0x16a8   : > { %18140 = vmatpush3.bf16.msra.mxu0 %v20113_v3  ;;  %12675 = vmatpush1.bf16.msra.mxu1 %v20110_v4  ;;  %v20181_v4 = vld [vmem:[%s25938_s14 + $0xdc] ss:$12 sps:$4 sm:$0xff]   ;;  %v20184_v45 = vld [vmem:[%s25938_s14 + $0xc0] ss:$12 sps:$4 sm:$0xff]  }
0x16a9   : > { %12706 = vmatprep.mubr.bf16.mxu1 %v24975_v47  ;;  %18141 = vmatprep.subr.bf16.mxu0 %v20114_v63  ;;  %v20182_v3 = vld [vmem:[%s25938_s14 + $0x128] ss:$12 sps:$4 sm:$0xff]   ;;  %v20179_v63 = vld [vmem:[%s25938_s14 + $0xd8] ss:$12 sps:$4 sm:$0xff]  }
0x16aa   : > { %12676 = vmatprep.subr.bf16.mxu1 %v20117_v17  ;;  %v20186_v17 = vld [vmem:[%s25938_s14 + $0xc4] ss:$12 sps:$4 sm:$0xff]  }
0x16ac   : > { %18142 = vmatpush3.bf16.msra.mxu0 %v20118_v38  ;;  %12677 = vmatpush1.bf16.msra.mxu1 %v20115_v29  ;;  %v20188_v29 = vld [vmem:[%s25938_s14 + $0x50] ss:$12 sps:$4 sm:$0xff]   ;;  %v20189_v38 = vld [vmem:[%s25938_s14 + $0xf8] ss:$12 sps:$4 sm:$0xff]  }
0x16ad   : > { %18143 = vmatprep.subr.bf16.mxu0 %v20119_v44  ;;  %12678 = vmatprep.subr.bf16.mxu1 %v20122_v15  ;;  %v20190_v44 = vld [vmem:[%s25938_s14 + $0x38] ss:$12 sps:$4 sm:$0xff]   ;;  %v11612_v15 = vpack.c.bf16 %v24930_v32, %v24930_v32  ;;  %v20193_v32 = vld [vmem:[%s25938_s14 + $0xc8] ss:$12 sps:$4 sm:$0xff]  }
0x16b0   : > { %18144 = vmatpush3.bf16.msra.mxu0 %v20123_v57  ;;  %12679 = vmatpush1.bf16.msra.mxu1 %v20120_v51  ;;  %v20191_v51 = vld [vmem:[%s25938_s14 + $0xe0] ss:$12 sps:$4 sm:$0xff]  }
0x16b1   : > { %18672 = vmatprep.subr.bf16.mxu0 %v25986_v9  ;;  %12680 = vmatprep.subr.bf16.mxu1 %v20126_v31  ;;  %v20192_v57 = vld [vmem:[%s25938_s14 + $0x20] ss:$12 sps:$4 sm:$0xff]   ;;  %v20195_v31 = vld [vmem:[%s25938_s14 + $0x1d0] ss:$12 sps:$4 sm:$0xff]  }
0x16b3   : > { %12304 = vmatmul.mubr.bf16.vlgmr.msra.gmra.mxu0 %v11781_v49  ;;  %v20177_v49 = vld [vmem:[%s25938_s14 + $0x140] ss:$12 sps:$4 sm:$0xff]  }
0x16b4   : > { %18673 = vmatpush3.bf16.msra.mxu0 %v20127_v59  ;;  %12681 = vmatpush1.bf16.msra.mxu1 %v20124_v54  ;;  %v20196_v54 = vld [vmem:[%s25938_s14 + $0x1b8] ss:$12 sps:$4 sm:$0xff]   ;;  %v20197_v59 = vld [vmem:[%s25938_s14 + $0x1a0] ss:$12 sps:$4 sm:$0xff]  }
0x16b5   : > { %18674 = vmatprep.subr.bf16.mxu0 %v25986_v9  ;;  %12682 = vmatprep.subr.bf16.mxu1 %v20130_v7  ;;  %v20198_v7 = vld [vmem:[%s25938_s14 + $0x188] ss:$12 sps:$4 sm:$0xff]  }
0x16b6   : > { %18680 = vmatprep.mubr.msk.bf16.mxu0 %vm20552_vm0, %v25986_v9 }
0x16b8   : > { %18675 = vmatpush3.bf16.msra.mxu0 %v20131_v13  ;;  %12683 = vmatpush1.bf16.msra.mxu1 %v20128_v56  ;;  %v20199_v56 = vld [vmem:[%s25938_s14 + $0x468] ss:$12 sps:$4 sm:$0xff]   ;;  %v20201_v13 = vld [vmem:[%s25938_s14 + $0x46c] ss:$12 sps:$4 sm:$0xff]  }
0x16b9   : > { %18676 = vmatprep.subr.bf16.mxu0 %v25986_v9  ;;  %12684 = vmatprep.subr.bf16.mxu1 %v20134_v35  ;;  %v20204_v35 = vld [vmem:[%s25938_s14 + $0x454] ss:$12 sps:$4 sm:$0xff]  }
0x16bc   : > { %18677 = vmatpush3.bf16.msra.mxu0 %v20135_v8  ;;  %12685 = vmatpush1.bf16.msra.mxu1 %v20132_v58  ;;  %v20205_v58 = vld [vmem:[%s25938_s14 + $0x438] ss:$12 sps:$4 sm:$0xff]   ;;  %v20207_v8 = vld [vmem:[%s25938_s14 + $0x43c] ss:$12 sps:$4 sm:$0xff]  }
0x16bd   : > { %18678 = vmatprep.subr.bf16.mxu0 %v25986_v9  ;;  %12686 = vmatprep.subr.bf16.mxu1 %v20138_v33  ;;  %v20208_v33 = vld [vmem:[%s25938_s14 + $0x420] ss:$12 sps:$4 sm:$0xff]  }
0x16c0   : > { %18679 = vmatpush3.bf16.msra.mxu0 %v20139_v0  ;;  %12687 = vmatpush1.bf16.msra.mxu1 %v20136_v46  ;;  %v20210_v46 = vld [vmem:[%s25938_s14 + $0x424] ss:$12 sps:$4 sm:$0xff]   ;;  %v20213_v0 = vld [vmem:[%s25938_s14 + $0x40c] ss:$12 sps:$4 sm:$0xff]  }
0x16c1   : > { %12688 = vmatprep.subr.bf16.mxu1 %v20142_v10  ;;  %12723 = vmatprep.subr.bf16.mxu0 %v20145_v19  ;;  %v20211_v10 = vld [vmem:[%s25938_s14 + $0x408] ss:$12 sps:$4 sm:$0xff]  }
0x16c2   : > { %v20216_v19 = vld [vmem:[%s25938_s14 + $0x3f4] ss:$12 sps:$4 sm:$0xff]  }
0x16c3   : > { %18681 = vmatmul.mubr.msk.bf16.vlgmr.msra.gmra.mxu0 %vm12185_vm4, %v24928_v1  ;;  %v20157_v1 = vld [vmem:[%s25938_s14 + $0x19c] ss:$12 sps:$4 sm:$0xff]  }
0x16c4   : > { %12689 = vmatpush1.bf16.msra.mxu1 %v20140_v27  ;;  %12724 = vmatpush1.bf16.msra.mxu0 %v20143_v48  ;;  %v20214_v27 = vld [vmem:[%s25938_s14 + $0x3f0] ss:$12 sps:$4 sm:$0xff]  }
0x16c5   : > { %12690 = vmatprep.subr.bf16.mxu1 %v20148_v16  ;;  %12725 = vmatprep.subr.bf16.mxu0 %v20151_v41  ;;  %v20219_v48 = vld [vmem:[%s25938_s14 + $0x3dc] ss:$12 sps:$4 sm:$0xff]   ;;  %v20217_v16 = vld [vmem:[%s25938_s14 + $0x3d8] ss:$12 sps:$4 sm:$0xff]  }
0x16c6   : > { %12747 = vmatprep.mubr.bf16.mxu0 %v25985_v43  ;;  %v20222_v41 = vld [vmem:[%s25938_s14 + $0x3c4] ss:$12 sps:$4 sm:$0xff]  }
0x16c8   : > { %12691 = vmatpush2.bf16.msra.mxu1 %v20146_v62  ;;  %12726 = vmatpush1.bf16.msra.mxu0 %v20149_v26  ;;  %v20220_v62 = vld [vmem:[%s25938_s14 + $0x3c0] ss:$12 sps:$4 sm:$0xff]   ;;  %v20223_v26 = vld [vmem:[%s25938_s14 + $0x528] ss:$12 sps:$4 sm:$0xff]  }
0x16c9   : > { %12692 = vmatprep.subr.bf16.mxu1 %v20154_v50  ;;  %12727 = vmatprep.subr.bf16.mxu0 %v20157_v1  ;;  %v20225_v50 = vld [vmem:[%s25938_s14 + $0x52c] ss:$12 sps:$4 sm:$0xff]   ;;  %v20228_v1 = vld [vmem:[%s25938_s14 + $0x514] ss:$12 sps:$4 sm:$0xff]  }
0x16cc   : > { %12693 = vmatpush2.bf16.msra.mxu1 %v20152_v36  ;;  %12728 = vmatpush1.bf16.msra.mxu0 %v20155_v6  ;;  %v20226_v36 = vld [vmem:[%s25938_s14 + $0x510] ss:$12 sps:$4 sm:$0xff]  }
0x16cd   : > { %12694 = vmatprep.subr.bf16.mxu1 %v20160_v61  ;;  %12729 = vmatprep.subr.bf16.mxu0 %v20163_v53  ;;  %v20231_v6 = vld [vmem:[%s25938_s14 + $0x4fc] ss:$12 sps:$4 sm:$0xff]   ;;  %v20229_v61 = vld [vmem:[%s25938_s14 + $0x4f8] ss:$12 sps:$4 sm:$0xff]   ;;  %v20232_v53 = vld [vmem:[%s25938_s14 + $0x4e0] ss:$12 sps:$4 sm:$0xff]  }
0x16d0   : > { %12695 = vmatpush2.bf16.msra.mxu1 %v20158_v20  ;;  %12730 = vmatpush1.bf16.msra.mxu0 %v20161_v60  ;;  %v20234_v20 = vld [vmem:[%s25938_s14 + $0x4e4] ss:$12 sps:$4 sm:$0xff]   ;;  %v20235_v60 = vld [vmem:[%s25938_s14 + $0x588] ss:$12 sps:$4 sm:$0xff]  }
0x16d1   : > { %12696 = vmatprep.subr.bf16.mxu1 %v20166_v14  ;;  %18156 = vmatprep.subr.bf16.mxu0 %v20167_v22  ;;  %v20237_v14 = vld [vmem:[%s25938_s14 + $0x58c] ss:$12 sps:$4 sm:$0xff]  }
0x16d2   : > { %v20240_v22 = vld [vmem:[%s25938_s14 + $0x4cc] ss:$12 sps:$4 sm:$0xff]  }
0x16d3   : > { %17191 = vmatmul.mubr.msk.bf16.vlgmr.msra.gmra.mxu0 %vm12185_vm4, %v25103_v21 }
0x16d4   : > { %12697 = vmatpush2.bf16.msra.mxu1 %v20164_v12  ;;  %18157 = vmatpush3.bf16.msra.mxu0 %v20168_v28  ;;  %v20243_v12 = vld [vmem:[%s25938_s14 + $0x574] ss:$12 sps:$4 sm:$0xff]  }
0x16d5   : > { %12788 = vmatprep.mubr.bf16.mxu0 %v24975_v47  ;;  %12698 = vmatprep.subr.bf16.mxu1 %v20171_v52  ;;  %v20187_v47 = vld [vmem:[%s25938_s14 + $0x110] ss:$12 sps:$4 sm:$0xff]   ;;  %v20238_v28 = vld [vmem:[%s25938_s14 + $0x4c8] ss:$12 sps:$4 sm:$0xff]  }
0x16d6   : > { %18158 = vmatprep.subr.bf16.mxu0 %v20172_v55  ;;  %v20246_v52 = vld [vmem:[%s25938_s14 + $0x4b4] ss:$12 sps:$4 sm:$0xff]   ;;  %v20244_v55 = vld [vmem:[%s25938_s14 + $0x4b0] ss:$12 sps:$4 sm:$0xff]  }
0x16d8   : > { %12699 = vmatpush2.bf16.msra.mxu1 %v20169_v40  ;;  %18159 = vmatpush3.bf16.msra.mxu0 %v20173_v11  ;;  %v20249_v40 = vld [vmem:[%s25938_s14 + $0x55c] ss:$12 sps:$4 sm:$0xff]   ;;  %v20247_v11 = vld [vmem:[%s25938_s14 + $0x558] ss:$12 sps:$4 sm:$0xff]  }
0x16d9   : > { %12700 = vmatprep.subr.bf16.mxu1 %v20176_v24  ;;  %18160 = vmatprep.subr.bf16.mxu0 %v20177_v49  ;;  %v20250_v24 = vld [vmem:[%s25938_s14 + $0x498] ss:$12 sps:$4 sm:$0xff]   ;;  %v20252_v49 = vld [vmem:[%s25938_s14 + $0x49c] ss:$12 sps:$4 sm:$0xff]  }
0x16dc   : > { %12701 = vmatpush2.bf16.msra.mxu1 %v20174_v34  ;;  %18161 = vmatpush3.bf16.msra.mxu0 %v20178_v23  ;;  %v20255_v34 = vld [vmem:[%s25938_s14 + $0x544] ss:$12 sps:$4 sm:$0xff]   ;;  %v20253_v23 = vld [vmem:[%s25938_s14 + $0x540] ss:$12 sps:$4 sm:$0xff]  }
0x16dd   : > { %12702 = vmatprep.subr.bf16.mxu1 %v20181_v4  ;;  %18162 = vmatprep.subr.bf16.mxu0 %v20182_v3  ;;  %v20256_v4 = vld [vmem:[%s25938_s14 + $0x480] ss:$12 sps:$4 sm:$0xff]   ;;  %v20258_v3 = vld [vmem:[%s25938_s14 + $0x484] ss:$12 sps:$4 sm:$0xff]  }
0x16e0   : > { %12703 = vmatpush2.bf16.msra.mxu1 %v20179_v63  ;;  %18163 = vmatpush3.bf16.msra.mxu0 %v20183_v30  ;;  %v20259_v63 = vld [vmem:[%s25938_s14 + $0x530] ss:$12 sps:$4 sm:$0xff]  }
0x16e1   : > { %12704 = vmatprep.subr.bf16.mxu1 %v20186_v17  ;;  %18164 = vmatprep.subr.bf16.mxu0 %v20187_v47 }
0x16e4   : > { %12705 = vmatpush2.bf16.msra.mxu1 %v20184_v45  ;;  %18165 = vmatpush3.bf16.msra.mxu0 %v20188_v29 }
0x16e5   : > { %12855 = vmatprep.subr.bf16.mxu1 %v24779_v25  ;;  %18166 = vmatprep.subr.bf16.mxu0 %v20189_v38  ;;  %v20194_v25 = vld [vmem:[%s25938_s14 + $0x8] ss:$12 sps:$4 sm:$0xff]  }
0x16e7   : > { %12707 = vmatmul.mubr.bf16.vlgmr.msra.gmra.mxu1 %v11612_v15 }
0x16e8   : > { %18167 = vmatpush3.bf16.msra.mxu0 %v20190_v44  ;;  %12856 = vmatpush1.bf16.msra.mxu1 %v24775_v2  ;;  %v17193_v2 = vld [vmem:[%s25937_s13 + $0x4] sm:$0x3] }
0x16e9   : > { %18168 = vmatprep.subr.bf16.mxu0 %v20191_v51  ;;  %12873 = vmatprep.mubr.bf16.mxu1 %v25985_v43 }
0x16ea   : > { %13329 = vmatprep.subr.bf16.mxu1 %v20201_v13 }
0x16ec   : > { %18169 = vmatpush3.bf16.msra.mxu0 %v20192_v57 }
0x16ed   : > { %18170 = vmatprep.subr.bf16.mxu0 %v20193_v32 }
0x16ef   : > { %17194 = vmatmul.mubr.msk.bf16.vlgmr.msra.gmra.mxu1 %vm11515_vm3, %v17193_v2 }
0x16f0   : > { %18171 = vmatpush3.bf16.msra.mxu0 %v20194_v25  ;;  %13330 = vmatpush1.bf16.msra.mxu1 %v20199_v56 }
0x16f1   : > { %18684 = vmatprep.subr.bf16.mxu0 %v25986_v9  ;;  %13331 = vmatprep.subr.bf16.mxu1 %v20204_v35 }
0x16f3   : > { %12789 = vmatmul.mubr.bf16.vlgmr.msra.gmra.mxu0 %v11612_v15 }
0x16f4   : > { %18685 = vmatpush3.bf16.msra.mxu0 %v20195_v31  ;;  %18692 = vmatprep.mubr.msk.bf16.mxu0 %vm20552_vm0, %v25986_v9 }
0x16f5   : > { %18686 = vmatprep.subr.bf16.mxu0 %v25986_v9 }
0x16f8   : > { %18687 = vmatpush3.bf16.msra.mxu0 %v20196_v54 }
0x16f9   : > { %18688 = vmatprep.subr.bf16.mxu0 %v25986_v9 }
0x16fc   : > { %18689 = vmatpush3.bf16.msra.mxu0 %v20197_v59 }
0x16fd   : > { %18690 = vmatprep.subr.bf16.mxu0 %v25986_v9 }
0x1700   : > { %18691 = vmatpush3.bf16.msra.mxu0 %v20198_v7 }
0x1701   : > { %18696 = vmatprep.subr.bf16.mxu0 %v25986_v9 }
0x1703   : > { %18693 = vmatmul.mubr.msk.bf16.vlgmr.msra.gmra.mxu0 %vm12185_vm4, %v25103_v21  ;;  %v20241_v21 = vld [vmem:[%s25938_s14 + $0x570] ss:$12 sps:$4 sm:$0xff]  }
0x1704   : > { %18697 = vmatpush3.bf16.msra.mxu0 %v24777_v39  ;;  %18698 = vmatprep.mubr.msk.bf16.mxu0 %vm20552_vm0, %v25986_v9  ;;  %v20202_v39 = vld [vmem:[%s25938_s14 + $0x450] ss:$12 sps:$4 sm:$0xff]  }
0x1705   : > { %13332 = vmatpush1.bf16.msra.mxu1 %v20202_v39  ;;  %13378 = vmatprep.subr.bf16.mxu0 %v20237_v14 }
0x1706   : > { %13333 = vmatprep.subr.bf16.mxu1 %v20207_v8 }
0x1709   : > { %13334 = vmatpush1.bf16.msra.mxu1 %v20205_v58 }
0x170a   : > { %13335 = vmatprep.subr.bf16.mxu1 %v20210_v46 }
0x170b   : > { %18699 = vmatmul.mubr.msk.bf16.vlgmr.msra.gmra.mxu0 %vm11515_vm3, %v17193_v2 }
0x170c   : > { %13402 = vmatprep.mubr.bf16.mxu0 %v25985_v43  ;;  %13379 = vmatpush1.bf16.msra.mxu0 %v20235_v60 }
0x170d   : > { %13336 = vmatpush1.bf16.msra.mxu1 %v20208_v33  ;;  %13380 = vmatprep.subr.bf16.mxu0 %v20243_v12 }
0x170e   : > { %13337 = vmatprep.subr.bf16.mxu1 %v20213_v0 }
0x1710   : > { %13381 = vmatpush1.bf16.msra.mxu0 %v20241_v21 }
0x1711   : > { %13338 = vmatpush1.bf16.msra.mxu1 %v20211_v10  ;;  %13382 = vmatprep.subr.bf16.mxu0 %v20249_v40 }
0x1712   : > { %13339 = vmatprep.subr.bf16.mxu1 %v20216_v19 }
0x1714   : > { %13383 = vmatpush1.bf16.msra.mxu0 %v20247_v11  ;;  %v20260_v11 = vld [vmem:[%s25938_s14 + $0x470] ss:$12 sps:$4 sm:$0xff]  }
0x1715   : > { %13340 = vmatpush1.bf16.msra.mxu1 %v20214_v27  ;;  %13384 = vmatprep.subr.bf16.mxu0 %v20255_v34 }
0x1716   : > { %13341 = vmatprep.subr.bf16.mxu1 %v20219_v48 }
0x1718   : > { %13385 = vmatpush1.bf16.msra.mxu0 %v20253_v23 }
0x1719   : > { %13342 = vmatpush1.bf16.msra.mxu1 %v20217_v16  ;;  %18185 = vmatprep.subr.bf16.mxu0 %v20259_v63 }
0x171a   : > { %13343 = vmatprep.subr.bf16.mxu1 %v20222_v41 }
0x171d   : > { %13344 = vmatpush1.bf16.msra.mxu1 %v20220_v62 }
0x171e   : > { %13345 = vmatprep.subr.bf16.mxu1 %v20225_v50 }
0x1721   : > { %13346 = vmatpush2.bf16.msra.mxu1 %v20223_v26 }
0x1722   : > { %13347 = vmatprep.subr.bf16.mxu1 %v20228_v1 }
0x1725   : > { %13348 = vmatpush2.bf16.msra.mxu1 %v20226_v36 }
0x1726   : > { %13349 = vmatprep.subr.bf16.mxu1 %v20231_v6 }
0x1729   : > { %13350 = vmatpush2.bf16.msra.mxu1 %v20229_v61 }
0x172a   : > { %13351 = vmatprep.subr.bf16.mxu1 %v20234_v20 }
0x172d   : > { %13352 = vmatpush2.bf16.msra.mxu1 %v20232_v53 }
0x172e   : > { %13353 = vmatprep.subr.bf16.mxu1 %v20240_v22 }
0x1731   : > { %13354 = vmatpush2.bf16.msra.mxu1 %v20238_v28 }
0x1732   : > { %13355 = vmatprep.subr.bf16.mxu1 %v20246_v52 }
0x1735   : > { %13356 = vmatpush2.bf16.msra.mxu1 %v20244_v55 }
0x1736   : > { %13357 = vmatprep.subr.bf16.mxu1 %v20252_v49  ;;  %v20261_v49 = vld [vmem:[%s25938_s14 + $0x518] ss:$12 sps:$4 sm:$0xff]  }
0x1739   : > { %13358 = vmatpush2.bf16.msra.mxu1 %v20250_v24 }
0x173a   : > { %13359 = vmatprep.subr.bf16.mxu1 %v20258_v3  ;;  %v20263_v3 = vld [vmem:[%s25938_s14 + $0x500] ss:$12 sps:$4 sm:$0xff]  }
0x173d   : > { %13360 = vmatpush2.bf16.msra.mxu1 %v20256_v4  ;;  %v20262_v4 = vld [vmem:[%s25938_s14 + $0x458] ss:$12 sps:$4 sm:$0xff]  }
0x1753   : > { %v12264_v30 = vpop.f32.mrf.mxu0 }
0x1755   : > { %v12266_v17 = vpop.f32.mrf.mxu0 }
0x1757   : > { %v12268_v47 = vpop.f32.mrf.mxu0 }
0x1758   : > { %v20266_v47 = vld [vmem:[%s25938_s14 + $0x428] ss:$12 sps:$4 sm:$0xff]  }
0x1759   : > { %v12269_v45 = vpop.f32.mrf.mxu0 }
0x175a   : > { %v20267_v45 = vld [vmem:[%s25938_s14 + $0x4d0] ss:$12 sps:$4 sm:$0xff]  }
0x1767   : > { %v12223_v29 = vpop.f32.mrf.mxu1 }
0x1768   : > { %v12265_v38 = vadd.f32 %v12264_v30, %v12223_v29  ;;  %v20264_v30 = vld [vmem:[%s25938_s14 + $0x440] ss:$12 sps:$4 sm:$0xff]   ;;  %v20268_v29 = vld [vmem:[%s25938_s14 + $0x410] ss:$12 sps:$4 sm:$0xff]  }
0x1769   : > { %v12225_v44 = vpop.f32.mrf.mxu1 }
0x176a   : > { %v12267_v15 = vadd.f32 %v12266_v17, %v12225_v44  ;;  %v20265_v17 = vld [vmem:[%s25938_s14 + $0x4e8] ss:$12 sps:$4 sm:$0xff]   ;;  %v20270_v44 = vld [vmem:[%s25938_s14 + $0x3f8] ss:$12 sps:$4 sm:$0xff]  }
0x176b   : > { %v12227_v51 = vpop.f32.mrf.mxu1 }
0x176c   : > { %v20272_v51 = vld [vmem:[%s25938_s14 + $0x3e0] ss:$12 sps:$4 sm:$0xff]  }
0x176d   : > { %v12228_v57 = vpop.f32.mrf.mxu1 }
0x176e   : > { %v20273_v57 = vld [vmem:[%s25938_s14 + $0x488] ss:$12 sps:$4 sm:$0xff]  }
0x1773   : > { %v18145_v32 = vpop.f32.mrf.mxu0 }
0x1775   : > { %v18146_v25 = vpop.f32.mrf.mxu0 }
0x1776   : > { %v18147_v2 = vadd.f32 %v18146_v25, %v18145_v32  ;;  %v20274_v32 = vld [vmem:[%s25938_s14 + $0x3c8] ss:$12 sps:$4 sm:$0xff]   ;;  %v20275_v25 = vld [vmem:[%s25938_s14 + $0x590] ss:$12 sps:$4 sm:$0xff]  }
0x1777   : > { %v18148_v31 = vpop.f32.mrf.mxu0 }
0x1778   : > { %v20277_v31 = vld [vmem:[%s25938_s14 + $0x560] ss:$12 sps:$4 sm:$0xff]  }
0x1779   : > { %v18149_v54 = vpop.f32.mrf.mxu0 }
0x177a   : > { %v20278_v54 = vld [vmem:[%s25938_s14 + $0x548] ss:$12 sps:$4 sm:$0xff]  }
0x1783   : > { %v12345_v59 = vpop.f32.mrf.mxu0 }
0x1784   : > { %v12346_v7 = vadd.f32 %v18147_v2, %v12345_v59  ;;  %v20276_v2 = vld [vmem:[%s25938_s14 + $0x578] ss:$12 sps:$4 sm:$0xff]  }
0x1785   : > { %v18682_v56 = vpop.f32.mrf.mxu0 }
0x1787   : > { %v12348_v13 = vpop.f32.mrf.mxu0 }
0x1789   : > { %v18683_v35 = vpop.f32.mrf.mxu0 }
0x1793   : > { %v12749_v39 = vpop.f32.mrf.mxu0 }
0x1795   : > { %v12751_v58 = vpop.f32.mrf.mxu0 }
0x1797   : > { %v12753_v8 = vpop.f32.mrf.mxu0 }
0x1799   : > { %v12754_v33 = vpop.f32.mrf.mxu0 }
0x17a7   : > { %v12708_v46 = vpop.f32.mrf.mxu1 }
0x17a8   : > { %v12709_v0 = vadd.f32 %v12708_v46, %v12265_v38  ;;  %v20269_v38 = vld [vmem:[%s25938_s14 + $0x4b8] ss:$12 sps:$4 sm:$0xff]  }
0x17a9   : > { %v12710_v10 = vpop.f32.mrf.mxu1 }
0x17aa   : > { %v25332_v19 = vadd.f32 %v12749_v39, %v12709_v0  ;;  %v12711_v27 = vadd.f32 %v12710_v10, %v12267_v15  ;;  %v20271_v15 = vld [vmem:[%s25938_s14 + $0x4a0] ss:$12 sps:$4 sm:$0xff]  }
0x17ab   : > { %v12712_v48 = vpop.f32.mrf.mxu1 }
0x17ac   : > { %v25334_v16 = vadd.f32 %v12751_v58, %v12711_v27 }
0x17ad   : > { %v12713_v41 = vpop.f32.mrf.mxu1 }
0x17af   : > { %v12875_v62 = vpop.f32.mrf.mxu1 }
0x17b0   : > { %v12922_v26 = vpack.c.bf16 %v12875_v62, %v12875_v62 }
0x17b1   : > { %v12877_v50 = vpop.f32.mrf.mxu1 }
0x17b2   : > { %v12923_v1 = vpack.c.bf16 %v12877_v50, %v12877_v50 }
0x17b3   : > { %v18172_v36 = vpop.f32.mrf.mxu0  ;;  %v12879_v6 = vpop.f32.mrf.mxu1 }
0x17b4   : > { %13361 = vmatprep.mubr.bf16.mxu1 %v12923_v1 }
0x17b5   : > { %v18173_v61 = vpop.f32.mrf.mxu0  ;;  %13362 = vmatmul.mubr.bf16.vlgmr.msra.gmra.mxu1 %v12922_v26  ;;  %v12880_v53 = vpop.f32.mrf.mxu1 }
0x17b6   : > { %v18174_v20 = vadd.f32 %v18173_v61, %v18172_v36  ;;  %13614 = vmatprep.mubr.bf16.mxu1 %v25985_v43 }
0x17b7   : > { %v18175_v60 = vpop.f32.mrf.mxu0 }
0x17b8   : > { %v12791_v14 = vadd.f32 %v18174_v20, %v12346_v7 }
0x17b9   : > { %v18176_v22 = vpop.f32.mrf.mxu0 }
0x17c3   : > { %v12830_v12 = vpop.f32.mrf.mxu0 }
0x17c4   : > { %v25337_v28 = vadd.f32 %v12830_v12, %v12791_v14 }
0x17c5   : > { %v18694_v21 = vpop.f32.mrf.mxu0 }
0x17c7   : > { %v12833_v52 = vpop.f32.mrf.mxu0 }
0x17c9   : > { %v18695_v55 = vpop.f32.mrf.mxu0 }
0x17cb   : > { %v12916_v40 = vpop.f32.mrf.mxu0 }
0x17cc   : > { %v12924_v24 = vpack.c.bf16 %v12916_v40, %v12916_v40 }
0x17cd   : > { %v18700_v34 = vpop.f32.mrf.mxu0 }
0x17ce   : > { %17336 = vmatmul.mubr.msk.bf16.vlgmr.msra.gmra.mxu0 %vm12185_vm4, %v12924_v24 }
0x17cf   : > { %18186 = vmatpush3.bf16.msra.mxu0 %v20260_v11  ;;  %v12919_v23 = vpop.f32.mrf.mxu0  ;;  %13443 = vmatprep.mubr.bf16.mxu0 %v12923_v1 }
0x17d0   : > { %18187 = vmatprep.subr.bf16.mxu0 %v20261_v49 }
0x17d1   : > { %v18701_v63 = vpop.f32.mrf.mxu0 }
0x17d3   : > { %18188 = vmatpush3.bf16.msra.mxu0 %v20262_v4 }
0x17d4   : > { %18189 = vmatprep.subr.bf16.mxu0 %v20263_v3 }
0x17d7   : > { %18190 = vmatpush3.bf16.msra.mxu0 %v20264_v30 }
0x17d8   : > { %18191 = vmatprep.subr.bf16.mxu0 %v20265_v17 }
0x17db   : > { %18192 = vmatpush3.bf16.msra.mxu0 %v20266_v47 }
0x17dc   : > { %18193 = vmatprep.subr.bf16.mxu0 %v20267_v45 }
0x17df   : > { %18194 = vmatpush3.bf16.msra.mxu0 %v20268_v29 }
0x17e0   : > { %18195 = vmatprep.subr.bf16.mxu0 %v20269_v38 }
0x17e3   : > { %18196 = vmatpush3.bf16.msra.mxu0 %v20270_v44 }
0x17e4   : > { %18197 = vmatprep.subr.bf16.mxu0 %v20271_v15 }
0x17e7   : > { %18198 = vmatpush3.bf16.msra.mxu0 %v20272_v51 }
0x17e8   : > { %18199 = vmatprep.subr.bf16.mxu0 %v20273_v57 }
0x17eb   : > { %18200 = vmatpush3.bf16.msra.mxu0 %v20274_v32 }
0x17ec   : > { %18702 = vmatprep.subr.bf16.mxu0 %v25986_v9 }
0x17ee   : > { %13444 = vmatmul.mubr.bf16.vlgmr.msra.gmra.mxu0 %v12922_v26  ;;  %v13494_v26 = vld [vmem:[%s25939_s15] sm:$0x7] }
0x17ef   : > { %18703 = vmatpush3.bf16.msra.mxu0 %v20275_v25  ;;  %18710 = vmatprep.mubr.msk.bf16.mxu0 %vm20552_vm0, %v25986_v9  ;;  %v13503_v50 = vrot.slane %v13494_v26, %v22095_v37  ;;  %v13499_v1 = vrot.slane %v13494_v26, %v22104_v42 }
0x17f0   : > { %18704 = vmatprep.subr.bf16.mxu0 %v25986_v9 }
0x17f3   : > { %18705 = vmatpush3.bf16.msra.mxu0 %v20276_v2 }
0x17f4   : > { %18706 = vmatprep.subr.bf16.mxu0 %v25986_v9 }
0x17f7   : > { %18707 = vmatpush3.bf16.msra.mxu0 %v20277_v31 }
0x17f8   : > { %18708 = vmatprep.subr.bf16.mxu0 %v25986_v9 }
0x17fb   : > { %18709 = vmatpush3.bf16.msra.mxu0 %v20278_v54 }
0x17fc   : > { %18714 = vmatprep.subr.bf16.mxu0 %v25986_v9 }
0x17fe   : > { %18711 = vmatmul.mubr.msk.bf16.vlgmr.msra.gmra.mxu0 %vm12185_vm4, %v12924_v24 }
0x17ff   : > { %18716 = vmatprep.mubr.msk.bf16.mxu0 %vm20552_vm0, %v25986_v9 }
0x1875   : > { %v13363_v59 = vpop.f32.mrf.mxu1 }
0x1877   : > { %v13365_v7 = vpop.f32.mrf.mxu1 }
0x1879   : > { %v13367_v56 = vpop.f32.mrf.mxu1 }
0x187b   : > { %v13368_v13 = vpop.f32.mrf.mxu1 }
0x188e   : > { %v13404_v35 = vpop.f32.mrf.mxu0 }
0x188f   : > { %v13405_v39 = vadd.f32 %v13404_v35, %v13363_v59 }
0x1890   : > { %v13406_v58 = vpop.f32.mrf.mxu0 }
0x1891   : > { %v13491_v8 = vadd.f32 %v13405_v39, %v25332_v19  ;;  %v13407_v33 = vadd.f32 %v13406_v58, %v13365_v7 }
0x1892   : > { %v13408_v46 = vpop.f32.mrf.mxu0 }
0x1893   : > { %v13492_v0 = vadd.f32 %v13407_v33, %v25334_v16  ;;  %v13511_v61 = vadd.f32 %v13499_v1, %v13491_v8  ;;  %v13507_v16 = vrot.slane %v13494_v26, %v22110_v5  ;;  %v13571_v33 = vsel %vm13570_vm5, 4294967295, %v20554_v18  ;;  %v13565_v18 = vld [vmem:[%s25940_s16] sm:$0x1] }
0x1894   : > { %v13409_v10 = vpop.f32.mrf.mxu0 }
0x1895   : > { %v13512_v36 = vadd.f32 %v13503_v50, %v13492_v0  ;;  %v13514_v21 = vsel %vm7051_vm10, %v13511_v61, 0.0 }
0x1897   : > { %v13515_v14 = vsel %vm7051_vm10, %v13512_v36, 0.0 }
0x1898   : > { %v13516_v55 = vadd.f32 %v13515_v14, %v13514_v21  ;;  %v20282_v14 = vld [vmem:[%s25941_s17 + $0x1e0] ss:$8 sps:$4 sm:$0xff]   ;;  %v20315_v21 = vld [vmem:[%s25941_s17 + $0x2d0] ss:$8 sps:$4 sm:$0xff]  }
0x18ae   : > { %v18201_v27 = vpop.f32.mrf.mxu0 }
0x18b0   : > { %v18202_v48 = vpop.f32.mrf.mxu0 }
0x18b1   : > { %v18203_v6 = vadd.f32 %v18202_v48, %v18201_v27  ;;  %v13572_v27 = vsel %vm11519_vm2, %v13571_v33, 0  ;;  %v20353_v33 = vld [vmem:[%s25941_s17 + $0x74] ss:$8 sps:$4 sm:$0xff]  }
0x18b2   : > { %v18204_v41 = vpop.f32.mrf.mxu0 }
0x18b4   : > { %v18205_v62 = vpop.f32.mrf.mxu0 }
0x18be   : > { %v13485_v19 = vpop.f32.mrf.mxu0 }
0x18bf   : > { %v13486_v53 = vadd.f32 %v18203_v6, %v13485_v19  ;;  %v20305_v6 = vld [vmem:[%s25941_s17 + $0x2f4] ss:$8 sps:$4 sm:$0xff]   ;;  %v17340_v19 = vld [vmem:[%s25940_s16 + $0x1] sm:$0x1] }
0x18c0   : > { %v18712_v20 = vpop.f32.mrf.mxu0 }
0x18c1   : > { %v13493_v60 = vadd.f32 %v13486_v53, %v25337_v28  ;;  %v20279_v53 = vld [vmem:[%s25941_s17 + $0x1f0] ss:$8 sps:$4 sm:$0xff]   ;;  %v20284_v20 = vld [vmem:[%s25941_s17 + $0x1e4] ss:$8 sps:$4 sm:$0xff]  }
0x18c2   : > { %v13488_v22 = vpop.f32.mrf.mxu0 }
0x18c3   : > { %v13513_v12 = vadd.f32 %v13507_v16, %v13493_v60  ;;  %v20311_v16 = vld [vmem:[%s25941_s17 + $0x2e4] ss:$8 sps:$4 sm:$0xff]   ;;  %v20309_v60 = vld [vmem:[%s25941_s17 + $0x2e0] ss:$8 sps:$4 sm:$0xff]   ;;  %v20317_v22 = vld [vmem:[%s25941_s17 + $0x2d4] ss:$8 sps:$4 sm:$0xff]  }
0x18c4   : > { %v18713_v52 = vpop.f32.mrf.mxu0 }
0x18c5   : > { %v13517_v40 = vsel %vm7051_vm10, %v13513_v12, 0.0  ;;  %v20285_v52 = vld [vmem:[%s25941_s17 + $0x1d0] ss:$8 sps:$4 sm:$0xff]  }
0x18c6   : > { %v13518_v11 = vadd.f32 %v13517_v40, %v13516_v55  ;;  %v20323_v55 = vld [vmem:[%s25941_s17 + $0x2c4] ss:$8 sps:$4 sm:$0xff]  }
0x18c7   : > { %v20290_v40 = vld [vmem:[%s25941_s17 + $0x1c4] ss:$8 sps:$4 sm:$0xff]  }
0x18c8   : > { %13519 = vadd.xlane.f32.xlu0 %v13518_v11  ;;  %v20321_v11 = vld [vmem:[%s25941_s17 + $0x2c0] ss:$8 sps:$4 sm:$0xff]  }
0x1951   : > { %v13520_v24 = vpop.xlane.xlu0 %13519 }
0x1952   : > { %v13521_v49 = vrot.slane %v13520_v24, 4 }
0x1954   : > { %v13522_v34 = vadd.f32 %v13521_v49, %v13520_v24  ;;  %v20288_v24 = vld [vmem:[%s25941_s17 + $0x1c0] ss:$8 sps:$4 sm:$0xff]   ;;  %v20329_v49 = vld [vmem:[%s25941_s17 + $0x2b4] ss:$8 sps:$4 sm:$0xff]  }
0x1956   : > { %v13523_v23 = vrot.slane %v13522_v34, 2 }
0x1958   : > { %v13524_v5 = vadd.f32 %v13523_v23, %v13522_v34  ;;  %v20293_v34 = vld [vmem:[%s25941_s17 + $0x1b4] ss:$8 sps:$4 sm:$0xff]   ;;  %v20327_v23 = vld [vmem:[%s25941_s17 + $0x2b0] ss:$8 sps:$4 sm:$0xff]  }
0x195a   : > { %v13525_v4 = vrot.slane %v13524_v5, 1 }
0x195c   : > { %v13526_v3 = vadd.f32 %v13525_v4, %v13524_v5  ;;  %v20291_v5 = vld [vmem:[%s25941_s17 + $0x1b0] ss:$8 sps:$4 sm:$0xff]   ;;  %v20335_v4 = vld [vmem:[%s25941_s17 + $0x2a4] ss:$8 sps:$4 sm:$0xff]  }
0x195e   : > { %18760 = vpush %v13526_v3  ;;  %v20296_v3 = vld [vmem:[%s25941_s17 + $0x1a4] ss:$8 sps:$4 sm:$0xff]  }
0x198f   : > { %s18761_s1 = spop %18760 }
0x1990   : > { %s13528_s22 = smul.f32 0.00086805556, %s18761_s1  ;;  %s15094_s1 = sshll.u32 %s25990_s30, 1 }
0x1992   : > { %v13529_v28 = vstv %s13528_s22 }
0x1993   : > { %v13530_v63 = vsub.f32 %v13511_v61, %v13529_v28  ;;  %v13531_v30 = vsub.f32 %v13512_v36, %v13529_v28  ;;  %v13532_v17 = vsub.f32 %v13513_v12, %v13529_v28  ;;  %v20281_v36 = vld [vmem:[%s25941_s17 + $0x1f4] ss:$8 sps:$4 sm:$0xff]   ;;  %v20303_v61 = vld [vmem:[%s25941_s17 + $0x2f0] ss:$8 sps:$4 sm:$0xff]   ;;  %v20333_v28 = vld [vmem:[%s25941_s17 + $0x2a0] ss:$8 sps:$4 sm:$0xff]  }
0x1994   : > { %v20287_v12 = vld [vmem:[%s25941_s17 + $0x1d4] ss:$8 sps:$4 sm:$0xff]  }
0x1995   : > { %v13533_v47 = vmul.f32 %v13530_v63, %v13530_v63  ;;  %v13534_v45 = vmul.f32 %v13531_v30, %v13531_v30  ;;  %v13535_v29 = vmul.f32 %v13532_v17, %v13532_v17 }
0x1997   : > { %v13536_v38 = vsel %vm7051_vm10, %v13533_v47, 0.0  ;;  %v13537_v44 = vsel %vm7051_vm10, %v13534_v45, 0.0  ;;  %v13539_v51 = vsel %vm7051_vm10, %v13535_v29, 0.0  ;;  %v20302_v47 = vld [vmem:[%s25941_s17 + $0x184] ss:$8 sps:$4 sm:$0xff]  }
0x1998   : > { %v13538_v15 = vadd.f32 %v13537_v44, %v13536_v38  ;;  %v20300_v45 = vld [vmem:[%s25941_s17 + $0x180] ss:$8 sps:$4 sm:$0xff]   ;;  %v20308_v29 = vld [vmem:[%s25941_s17 + $0x274] ss:$8 sps:$4 sm:$0xff]   ;;  %v20306_v38 = vld [vmem:[%s25941_s17 + $0x270] ss:$8 sps:$4 sm:$0xff]  }
0x1999   : > { %v20314_v44 = vld [vmem:[%s25941_s17 + $0x264] ss:$8 sps:$4 sm:$0xff]  }
0x199a   : > { %v13540_v57 = vadd.f32 %v13539_v51, %v13538_v15  ;;  %v20312_v15 = vld [vmem:[%s25941_s17 + $0x260] ss:$8 sps:$4 sm:$0xff]   ;;  %v20320_v51 = vld [vmem:[%s25941_s17 + $0x254] ss:$8 sps:$4 sm:$0xff]  }
0x199c   : > { %13541 = vadd.xlane.f32.xlu1 %v13540_v57  ;;  %v20318_v57 = vld [vmem:[%s25941_s17 + $0x250] ss:$8 sps:$4 sm:$0xff]  }
0x1a25   : > { %v13542_v32 = vpop.xlane.xlu1 %13541 }
0x1a26   : > { %v13543_v25 = vrot.slane %v13542_v32, 4 }
0x1a28   : > { %v13544_v2 = vadd.f32 %v13543_v25, %v13542_v32  ;;  %v20326_v32 = vld [vmem:[%s25941_s17 + $0x244] ss:$8 sps:$4 sm:$0xff]   ;;  %v20324_v25 = vld [vmem:[%s25941_s17 + $0x240] ss:$8 sps:$4 sm:$0xff]  }
0x1a2a   : > { %v13545_v31 = vrot.slane %v13544_v2, 2 }
0x1a2c   : > { %v13546_v54 = vadd.f32 %v13545_v31, %v13544_v2  ;;  %v20332_v2 = vld [vmem:[%s25941_s17 + $0x234] ss:$8 sps:$4 sm:$0xff]   ;;  %v20330_v31 = vld [vmem:[%s25941_s17 + $0x230] ss:$8 sps:$4 sm:$0xff]  }
0x1a2e   : > { %v13547_v59 = vrot.slane %v13546_v54, 1 }
0x1a30   : > { %v13548_v7 = vadd.f32 %v13547_v59, %v13546_v54  ;;  %v20338_v54 = vld [vmem:[%s25941_s17 + $0x224] ss:$8 sps:$4 sm:$0xff]   ;;  %v20341_v59 = vld [vmem:[%s25941_s17 + $0x294] ss:$8 sps:$4 sm:$0xff]  }
0x1a32   : > { %18762 = vpush %v13548_v7  ;;  %v20336_v7 = vld [vmem:[%s25941_s17 + $0x220] ss:$8 sps:$4 sm:$0xff]  }
0x1a63   : > { %s18763_s23 = spop %18762 }
0x1a64   : > { %s13550_s24 = smul.f32 0.00086805556, %s18763_s23 }
0x1a66   : > { %s13551_s3 = sadd.f32 1e-05, %s13550_s24  ;;  %s600_s24 = scalar_lea.vmem %s25943_s19, %s15094_s1 }
0x1a68   : > { %v13552_v56 = vstv %s13551_s3 }
0x1a69   : > { %20503 = vrsqrt.f32 %v13552_v56  ;;  %v20339_v56 = vld [vmem:[%s25941_s17 + $0x290] ss:$8 sps:$4 sm:$0xff]  }
0x1a76   : > { %v20504_v13 = vpop.eup %20503 }
0x1a77   : > { %18764 = vpush %v20504_v13  ;;  %v20344_v13 = vld [vmem:[%s25941_s17 + $0x214] ss:$8 sps:$4 sm:$0xff]  }
0x1aa8   : > { %s18765_s27 = spop %18764 }
0x1aa9   : > { %v13555_v35 = vstv %s18765_s27 }
0x1aaa   : > { %v13556_v39 = vmul.f32 %v13555_v35, %v13530_v63  ;;  %v13557_v58 = vmul.f32 %v13555_v35, %v13531_v30  ;;  %v13558_v8 = vmul.f32 %v13555_v35, %v13532_v17  ;;  %v20294_v63 = vld [vmem:[%s25941_s17 + $0x1a0] ss:$8 sps:$4 sm:$0xff]   ;;  %v20299_v30 = vld [vmem:[%s25941_s17 + $0x194] ss:$8 sps:$4 sm:$0xff]   ;;  %v20297_v17 = vld [vmem:[%s25941_s17 + $0x190] ss:$8 sps:$4 sm:$0xff]  }
0x1aab   : > { %v20347_v35 = vld [vmem:[%s25941_s17 + $0x284] ss:$8 sps:$4 sm:$0xff]  }
0x1aac   : > { %v13559_v46 = vmax.f32 %v13556_v39, 0.0  ;;  %v13560_v0 = vmax.f32 %v13557_v58, 0.0  ;;  %v13561_v10 = vmax.f32 %v13558_v8, 0.0  ;;  %v20342_v39 = vld [vmem:[%s25941_s17 + $0x210] ss:$8 sps:$4 sm:$0xff]  }
0x1aad   : > { %v20345_v58 = vld [vmem:[%s25941_s17 + $0x280] ss:$8 sps:$4 sm:$0xff]   ;;  %v20350_v8 = vld [vmem:[%s25941_s17 + $0x204] ss:$8 sps:$4 sm:$0xff]  }
0x1aae   : > { %v13562_v48 = vpack.c.bf16 %v13559_v46, %v13559_v46  ;;  %v13563_v41 = vpack.c.bf16 %v13560_v0, %v13560_v0  ;;  %v13564_v62 = vpack.c.bf16 %v13561_v10, %v13561_v10  ;;  %v20348_v46 = vld [vmem:[%s25941_s17 + $0x200] ss:$8 sps:$4 sm:$0xff]   ;;  %v20359_v0 = vld [vmem:[%s25941_s17 + $0x174] ss:$8 sps:$4 sm:$0xff]  }
0x1ab0   : > { %v25425_v26 = vand.u32 %v13572_v27, %v13562_v48  ;;  %v25427_v50 = vand.u32 %v13572_v27, %v13564_v62  ;;  %v25429_v1 = vand.u32 %v13572_v27, %v13563_v41 }
0x1ab2   : > { %13596 = vmatprep.subr.bf16.mxu1 %v25429_v1  ;;  %18715 = vmatpush3.bf16.msra.mxu0 %v25427_v50 }
0x1ab3   : > { %13597 = vmatpush1.bf16.msra.mxu1 %v25425_v26  ;;  %18720 = vmatprep.subr.bf16.mxu0 %v25986_v9 }
0x1ab4   : > { %13733 = vmatprep.subr.bf16.mxu1 %v25429_v1 }
0x1ab5   : > { %18717 = vmatmul.mubr.msk.bf16.vlgmr.msra.gmra.mxu0 %vm13566_vm6, %v13565_v18 }
0x1ab6   : > { %17338 = vmatmul.mubr.msk.bf16.vlgmr.msra.gmra.mxu1 %vm13566_vm6, %v13565_v18  ;;  %18721 = vmatpush3.bf16.msra.mxu0 %v25427_v50 }
0x1ab7   : > { %13734 = vmatpush1.bf16.msra.mxu1 %v25425_v26  ;;  %18722 = vmatprep.mubr.msk.bf16.mxu0 %vm20552_vm0, %v25986_v9 }
0x1ab8   : > { %13751 = vmatprep.mubr.bf16.mxu1 %v25985_v43  ;;  %14092 = vmatprep.subr.bf16.mxu1 %v20281_v36 }
0x1ab9   : > { %14133 = vmatprep.subr.bf16.mxu0 %v20305_v6 }
0x1abd   : > { %18723 = vmatmul.mubr.msk.bf16.vlgmr.msra.gmra.mxu0 %vm13566_vm6, %v17340_v19 }
0x1abe   : > { %17341 = vmatmul.mubr.msk.bf16.vlgmr.msra.gmra.mxu1 %vm13566_vm6, %v17340_v19  ;;  %14134 = vmatpush1.bf16.msra.mxu0 %v20303_v61 }
0x1abf   : > { %14093 = vmatpush1.bf16.msra.mxu1 %v20279_v53  ;;  %14135 = vmatprep.subr.bf16.mxu0 %v20311_v16  ;;  %v20351_v53 = vld [vmem:[%s25941_s17 + $0x70] ss:$8 sps:$4 sm:$0xff]  }
0x1ac0   : > { %14094 = vmatprep.subr.bf16.mxu1 %v20284_v20  ;;  %14165 = vmatprep.mubr.bf16.mxu0 %v25985_v43 }
0x1ac2   : > { %14136 = vmatpush1.bf16.msra.mxu0 %v20309_v60  ;;  %v20356_v60 = vld [vmem:[%s25941_s17 + $0x64] ss:$8 sps:$4 sm:$0xff]  }
0x1ac3   : > { %14095 = vmatpush1.bf16.msra.mxu1 %v20282_v14  ;;  %14137 = vmatprep.subr.bf16.mxu0 %v20317_v22 }
0x1ac4   : > { %14096 = vmatprep.subr.bf16.mxu1 %v20287_v12 }
0x1ac6   : > { %14138 = vmatpush1.bf16.msra.mxu0 %v20315_v21 }
0x1ac7   : > { %14097 = vmatpush1.bf16.msra.mxu1 %v20285_v52  ;;  %14139 = vmatprep.subr.bf16.mxu0 %v20323_v55  ;;  %v20354_v52 = vld [vmem:[%s25941_s17 + $0x60] ss:$8 sps:$4 sm:$0xff]   ;;  %v20357_v55 = vld [vmem:[%s25941_s17 + $0x170] ss:$8 sps:$4 sm:$0xff]  }
0x1ac8   : > { %14098 = vmatprep.subr.bf16.mxu1 %v20290_v40 }
0x1aca   : > { %14140 = vmatpush1.bf16.msra.mxu0 %v20321_v11  ;;  %v20362_v11 = vld [vmem:[%s25941_s17 + $0x54] ss:$8 sps:$4 sm:$0xff]  }
0x1acb   : > { %14099 = vmatpush1.bf16.msra.mxu1 %v20288_v24  ;;  %14141 = vmatprep.subr.bf16.mxu0 %v20329_v49  ;;  %v20365_v24 = vld [vmem:[%s25941_s17 + $0x164] ss:$8 sps:$4 sm:$0xff]  }
0x1acc   : > { %14100 = vmatprep.subr.bf16.mxu1 %v20293_v34 }
0x1ace   : > { %14142 = vmatpush1.bf16.msra.mxu0 %v20327_v23 }
0x1acf   : > { %14101 = vmatpush1.bf16.msra.mxu1 %v20291_v5  ;;  %14143 = vmatprep.subr.bf16.mxu0 %v20335_v4  ;;  %v20360_v5 = vld [vmem:[%s25941_s17 + $0x50] ss:$8 sps:$4 sm:$0xff]   ;;  %v20363_v4 = vld [vmem:[%s25941_s17 + $0x160] ss:$8 sps:$4 sm:$0xff]  }
0x1ad0   : > { %14102 = vmatprep.subr.bf16.mxu1 %v20296_v3  ;;  %v20368_v3 = vld [vmem:[%s25941_s17 + $0x44] ss:$8 sps:$4 sm:$0xff]  }
0x1ad2   : > { %14144 = vmatpush1.bf16.msra.mxu0 %v20333_v28  ;;  %v20371_v28 = vld [vmem:[%s25941_s17 + $0x154] ss:$8 sps:$4 sm:$0xff]  }
0x1ad3   : > { %14103 = vmatpush1.bf16.msra.mxu1 %v20294_v63  ;;  %14145 = vmatprep.subr.bf16.mxu0 %v20341_v59  ;;  %v20366_v63 = vld [vmem:[%s25941_s17 + $0x40] ss:$8 sps:$4 sm:$0xff]  }
0x1ad4   : > { %14104 = vmatprep.subr.bf16.mxu1 %v20299_v30  ;;  %v20369_v30 = vld [vmem:[%s25941_s17 + $0x150] ss:$8 sps:$4 sm:$0xff]   ;;  %v20390_v59 = vld [vmem:[%s25941_s17] ss:$8 sps:$4 sm:$0xff]  }
0x1ad6   : > { %14146 = vmatpush1.bf16.msra.mxu0 %v20339_v56  ;;  %v20398_v56 = vld [vmem:[%s25941_s17 + $0xf4] ss:$8 sps:$4 sm:$0xff]  }
0x1ad7   : > { %14105 = vmatpush1.bf16.msra.mxu1 %v20297_v17  ;;  %14147 = vmatprep.subr.bf16.mxu0 %v20347_v35  ;;  %v20374_v17 = vld [vmem:[%s25941_s17 + $0x34] ss:$8 sps:$4 sm:$0xff]   ;;  %v20396_v35 = vld [vmem:[%s25941_s17 + $0xf0] ss:$8 sps:$4 sm:$0xff]  }
0x1ad8   : > { %14106 = vmatprep.subr.bf16.mxu1 %v20302_v47  ;;  %v20377_v47 = vld [vmem:[%s25941_s17 + $0x144] ss:$8 sps:$4 sm:$0xff]  }
0x1ada   : > { %14148 = vmatpush1.bf16.msra.mxu0 %v20345_v58  ;;  %v20404_v58 = vld [vmem:[%s25941_s17 + $0xe4] ss:$8 sps:$4 sm:$0xff]  }
0x1adb   : > { %14107 = vmatpush1.bf16.msra.mxu1 %v20300_v45  ;;  %14414 = vmatprep.subr.bf16.mxu0 %v20353_v33  ;;  %v20372_v45 = vld [vmem:[%s25941_s17 + $0x30] ss:$8 sps:$4 sm:$0xff]  }
0x1adc   : > { %14108 = vmatprep.subr.bf16.mxu1 %v20308_v29  ;;  %v20375_v29 = vld [vmem:[%s25941_s17 + $0x140] ss:$8 sps:$4 sm:$0xff]  }
0x1adf   : > { %14109 = vmatpush2.bf16.msra.mxu1 %v20306_v38  ;;  %v20380_v38 = vld [vmem:[%s25941_s17 + $0x24] ss:$8 sps:$4 sm:$0xff]  }
0x1ae0   : > { %14110 = vmatprep.subr.bf16.mxu1 %v20314_v44  ;;  %v20383_v44 = vld [vmem:[%s25941_s17 + $0x134] ss:$8 sps:$4 sm:$0xff]  }
0x1ae3   : > { %14111 = vmatpush2.bf16.msra.mxu1 %v20312_v15  ;;  %v20378_v15 = vld [vmem:[%s25941_s17 + $0x20] ss:$8 sps:$4 sm:$0xff]  }
0x1ae4   : > { %14112 = vmatprep.subr.bf16.mxu1 %v20320_v51  ;;  %v20381_v51 = vld [vmem:[%s25941_s17 + $0x130] ss:$8 sps:$4 sm:$0xff]  }
0x1ae7   : > { %14113 = vmatpush2.bf16.msra.mxu1 %v20318_v57  ;;  %v20386_v57 = vld [vmem:[%s25941_s17 + $0x14] ss:$8 sps:$4 sm:$0xff]  }
0x1ae8   : > { %14114 = vmatprep.subr.bf16.mxu1 %v20326_v32  ;;  %v20389_v32 = vld [vmem:[%s25941_s17 + $0x124] ss:$8 sps:$4 sm:$0xff]  }
0x1aeb   : > { %14115 = vmatpush2.bf16.msra.mxu1 %v20324_v25  ;;  %v20384_v25 = vld [vmem:[%s25941_s17 + $0x10] ss:$8 sps:$4 sm:$0xff]  }
0x1aec   : > { %14116 = vmatprep.subr.bf16.mxu1 %v20332_v2  ;;  %v20387_v2 = vld [vmem:[%s25941_s17 + $0x120] ss:$8 sps:$4 sm:$0xff]  }
0x1aef   : > { %14117 = vmatpush2.bf16.msra.mxu1 %v20330_v31  ;;  %v20392_v31 = vld [vmem:[%s25941_s17 + $0x4] ss:$8 sps:$4 sm:$0xff]  }
0x1af0   : > { %14118 = vmatprep.subr.bf16.mxu1 %v20338_v54  ;;  %v20395_v54 = vld [vmem:[%s25941_s17 + $0x114] ss:$8 sps:$4 sm:$0xff]  }
0x1af3   : > { %14119 = vmatpush2.bf16.msra.mxu1 %v20336_v7  ;;  %v20393_v7 = vld [vmem:[%s25941_s17 + $0x110] ss:$8 sps:$4 sm:$0xff]  }
0x1af4   : > { %14120 = vmatprep.subr.bf16.mxu1 %v20344_v13  ;;  %v20401_v13 = vld [vmem:[%s25941_s17 + $0x104] ss:$8 sps:$4 sm:$0xff]  }
0x1af7   : > { %14121 = vmatpush2.bf16.msra.mxu1 %v20342_v39  ;;  %v20399_v39 = vld [vmem:[%s25941_s17 + $0x100] ss:$8 sps:$4 sm:$0xff]  }
0x1af8   : > { %14122 = vmatprep.subr.bf16.mxu1 %v20350_v8  ;;  %v20402_v8 = vld [vmem:[%s25941_s17 + $0xe0] ss:$8 sps:$4 sm:$0xff]  }
0x1afb   : > { %14123 = vmatpush2.bf16.msra.mxu1 %v20348_v46  ;;  %v20407_v46 = vld [vmem:[%s25941_s17 + $0xd4] ss:$8 sps:$4 sm:$0xff]  }
0x1afc   : > { %14455 = vmatprep.subr.bf16.mxu1 %v20359_v0  ;;  %v20405_v0 = vld [vmem:[%s25941_s17 + $0xd0] ss:$8 sps:$4 sm:$0xff]  }
0x1b75   : > { %v25602_v10 = vpop.f32.mrf.mxu0 }
0x1b76   : > { %v25604_v27 = vpop.f32.mrf.mxu1  ;;  %v13665_v33 = vpack.c.bf16 %v25602_v10, %v25602_v10  ;;  %v20410_v10 = vld [vmem:[%s25941_s17 + $0xc4] ss:$8 sps:$4 sm:$0xff]  }
0x1b77   : > { %v18718_v48 = vpop.f32.mrf.mxu0 }
0x1b78   : > { %v13618_v41 = vpop.f32.mrf.mxu1  ;;  %v20413_v48 = vld [vmem:[%s25941_s17 + $0xb4] ss:$8 sps:$4 sm:$0xff]  }
0x1b79   : > { %v13660_v62 = vpop.f32.mrf.mxu0  ;;  %v13664_v19 = vpack.c.bf16 %v13618_v41, %v13618_v41  ;;  %v20411_v41 = vld [vmem:[%s25941_s17 + $0xb0] ss:$8 sps:$4 sm:$0xff]  }
0x1b7a   : > { %v13620_v18 = vpop.f32.mrf.mxu1  ;;  %v20416_v62 = vld [vmem:[%s25941_s17 + $0xa4] ss:$8 sps:$4 sm:$0xff]  }
0x1b7b   : > { %v18719_v36 = vpop.f32.mrf.mxu0  ;;  %v20414_v18 = vld [vmem:[%s25941_s17 + $0xa0] ss:$8 sps:$4 sm:$0xff]  }
0x1b7c   : > { %v13621_v6 = vpop.f32.mrf.mxu1  ;;  %v20419_v36 = vld [vmem:[%s25941_s17 + $0x94] ss:$8 sps:$4 sm:$0xff]  }
0x1b7d   : > { %v13794_v61 = vpop.f32.mrf.mxu0  ;;  %v20417_v6 = vld [vmem:[%s25941_s17 + $0x90] ss:$8 sps:$4 sm:$0xff]  }
0x1b7e   : > { %v13802_v16 = vpack.c.bf16 %v13794_v61, %v13794_v61  ;;  %v13753_v20 = vpop.f32.mrf.mxu1  ;;  %v20420_v61 = vld [vmem:[%s25941_s17 + $0x80] ss:$8 sps:$4 sm:$0xff]  }
0x1b7f   : > { %v18724_v14 = vpop.f32.mrf.mxu0  ;;  %v13800_v22 = vpack.c.bf16 %v13753_v20, %v13753_v20  ;;  %v20423_v20 = vld [vmem:[%s25941_s17 + $0x370] ss:$8 sps:$4 sm:$0xff]  }
0x1b80   : > { %v13755_v12 = vpop.f32.mrf.mxu1  ;;  %14166 = vmatmul.mubr.bf16.vlgmr.msra.gmra.mxu0 %v13802_v16  ;;  %v20425_v16 = vld [vmem:[%s25941_s17 + $0x374] ss:$8 sps:$4 sm:$0xff]   ;;  %v20434_v14 = vld [vmem:[%s25941_s17 + $0x344] ss:$8 sps:$4 sm:$0xff]  }
0x1b81   : > { %v13801_v21 = vpack.c.bf16 %v13755_v12, %v13755_v12  ;;  %14415 = vmatpush1.bf16.msra.mxu0 %v20351_v53  ;;  %v13797_v40 = vpop.f32.mrf.mxu0  ;;  %14446 = vmatprep.mubr.bf16.mxu0 %v13664_v19  ;;  %v20422_v19 = vld [vmem:[%s25941_s17 + $0x84] ss:$8 sps:$4 sm:$0xff]   ;;  %v13663_v53 = vpack.c.bf16 %v25604_v27, %v25604_v27  ;;  %v20437_v12 = vld [vmem:[%s25941_s17 + $0x334] ss:$8 sps:$4 sm:$0xff]  }
0x1b82   : > { %14416 = vmatprep.subr.bf16.mxu0 %v20356_v60  ;;  %v13757_v49 = vpop.f32.mrf.mxu1  ;;  %v20428_v27 = vld [vmem:[%s25941_s17 + $0x364] ss:$8 sps:$4 sm:$0xff]   ;;  %v20426_v60 = vld [vmem:[%s25941_s17 + $0x360] ss:$8 sps:$4 sm:$0xff]   ;;  %v20441_v40 = vld [vmem:[%s25941_s17 + $0x310] ss:$8 sps:$4 sm:$0xff]  }
0x1b83   : > { %14124 = vmatprep.mubr.bf16.mxu1 %v13801_v21  ;;  %v18725_v34 = vpop.f32.mrf.mxu0  ;;  %v20435_v21 = vld [vmem:[%s25941_s17 + $0x330] ss:$8 sps:$4 sm:$0xff]   ;;  %v20449_v49 = vld [vmem:[%s25941_s17 + $0x3f4] ss:$8 sps:$4 sm:$0xff]  }
0x1b84   : > { %14125 = vmatmul.mubr.bf16.vlgmr.msra.gmra.mxu1 %v13800_v22  ;;  %v13758_v23 = vpop.f32.mrf.mxu1  ;;  %v20432_v22 = vld [vmem:[%s25941_s17 + $0x340] ss:$8 sps:$4 sm:$0xff]   ;;  %v20447_v34 = vld [vmem:[%s25941_s17 + $0x3f0] ss:$8 sps:$4 sm:$0xff]  }
0x1b85   : > { %14417 = vmatpush1.bf16.msra.mxu0 %v20354_v52  ;;  %14456 = vmatpush1.bf16.msra.mxu1 %v20357_v55  ;;  %v20438_v52 = vld [vmem:[%s25941_s17 + $0x320] ss:$8 sps:$4 sm:$0xff]   ;;  %v20443_v55 = vld [vmem:[%s25941_s17 + $0x314] ss:$8 sps:$4 sm:$0xff]   ;;  %v20455_v23 = vld [vmem:[%s25941_s17 + $0x3e4] ss:$8 sps:$4 sm:$0xff]  }
0x1b86   : > { %14418 = vmatprep.subr.bf16.mxu0 %v20362_v11  ;;  %14457 = vmatprep.subr.bf16.mxu1 %v20365_v24  ;;  %v20446_v11 = vld [vmem:[%s25941_s17 + $0x304] ss:$8 sps:$4 sm:$0xff]   ;;  %v20444_v24 = vld [vmem:[%s25941_s17 + $0x300] ss:$8 sps:$4 sm:$0xff]  }
0x1b87   : > { %14487 = vmatprep.mubr.bf16.mxu1 %v25985_v43 }
0x1b89   : > { %14419 = vmatpush1.bf16.msra.mxu0 %v20360_v5  ;;  %14458 = vmatpush1.bf16.msra.mxu1 %v20363_v4  ;;  %v20453_v5 = vld [vmem:[%s25941_s17 + $0x3e0] ss:$8 sps:$4 sm:$0xff]   ;;  %v20461_v4 = vld [vmem:[%s25941_s17 + $0x3d4] ss:$8 sps:$4 sm:$0xff]  }
0x1b8a   : > { %14420 = vmatprep.subr.bf16.mxu0 %v20368_v3  ;;  %14459 = vmatprep.subr.bf16.mxu1 %v20371_v28  ;;  %v20452_v3 = vld [vmem:[%s25941_s17 + $0x474] ss:$8 sps:$4 sm:$0xff]   ;;  %v20459_v28 = vld [vmem:[%s25941_s17 + $0x3d0] ss:$8 sps:$4 sm:$0xff]  }
0x1b8d   : > { %14421 = vmatpush1.bf16.msra.mxu0 %v20366_v63  ;;  %14460 = vmatpush1.bf16.msra.mxu1 %v20369_v30  ;;  %v20450_v63 = vld [vmem:[%s25941_s17 + $0x470] ss:$8 sps:$4 sm:$0xff]   ;;  %v20458_v30 = vld [vmem:[%s25941_s17 + $0x464] ss:$8 sps:$4 sm:$0xff]  }
0x1b8e   : > { %14422 = vmatprep.subr.bf16.mxu0 %v20374_v17  ;;  %14461 = vmatprep.subr.bf16.mxu1 %v20377_v47  ;;  %v20465_v17 = vld [vmem:[%s25941_s17 + $0x3c0] ss:$8 sps:$4 sm:$0xff]  }
0x1b8f   : > { %v20456_v47 = vld [vmem:[%s25941_s17 + $0x460] ss:$8 sps:$4 sm:$0xff]  }
0x1b91   : > { %14423 = vmatpush1.bf16.msra.mxu0 %v20372_v45  ;;  %14462 = vmatpush1.bf16.msra.mxu1 %v20375_v29  ;;  %v20467_v45 = vld [vmem:[%s25941_s17 + $0x3c4] ss:$8 sps:$4 sm:$0xff]   ;;  %v20464_v29 = vld [vmem:[%s25941_s17 + $0x454] ss:$8 sps:$4 sm:$0xff]  }
0x1b92   : > { %14424 = vmatprep.subr.bf16.mxu0 %v20380_v38  ;;  %14463 = vmatprep.subr.bf16.mxu1 %v20383_v44  ;;  %v20473_v38 = vld [vmem:[%s25941_s17 + $0x3b4] ss:$8 sps:$4 sm:$0xff]   ;;  %v20471_v44 = vld [vmem:[%s25941_s17 + $0x3b0] ss:$8 sps:$4 sm:$0xff]  }
0x1b95   : > { %14425 = vmatpush1.bf16.msra.mxu0 %v20378_v15  ;;  %14464 = vmatpush1.bf16.msra.mxu1 %v20381_v51  ;;  %v20462_v15 = vld [vmem:[%s25941_s17 + $0x450] ss:$8 sps:$4 sm:$0xff]   ;;  %v20479_v51 = vld [vmem:[%s25941_s17 + $0x3a4] ss:$8 sps:$4 sm:$0xff]  }
0x1b96   : > { %14426 = vmatprep.subr.bf16.mxu0 %v20386_v57  ;;  %14465 = vmatprep.subr.bf16.mxu1 %v20389_v32  ;;  %v20470_v57 = vld [vmem:[%s25941_s17 + $0x444] ss:$8 sps:$4 sm:$0xff]   ;;  %v20477_v32 = vld [vmem:[%s25941_s17 + $0x3a0] ss:$8 sps:$4 sm:$0xff]  }
0x1b99   : > { %14427 = vmatpush1.bf16.msra.mxu0 %v20384_v25  ;;  %14466 = vmatpush1.bf16.msra.mxu1 %v20387_v2  ;;  %v20468_v25 = vld [vmem:[%s25941_s17 + $0x440] ss:$8 sps:$4 sm:$0xff]   ;;  %v20476_v2 = vld [vmem:[%s25941_s17 + $0x434] ss:$8 sps:$4 sm:$0xff]  }
0x1b9a   : > { %14428 = vmatprep.subr.bf16.mxu0 %v20392_v31  ;;  %14467 = vmatprep.subr.bf16.mxu1 %v20395_v54  ;;  %v20474_v31 = vld [vmem:[%s25941_s17 + $0x430] ss:$8 sps:$4 sm:$0xff]   ;;  %v20485_v54 = vld [vmem:[%s25941_s17 + $0x394] ss:$8 sps:$4 sm:$0xff]  }
0x1b9d   : > { %14429 = vmatpush1.bf16.msra.mxu0 %v20390_v59  ;;  %14468 = vmatpush1.bf16.msra.mxu1 %v20393_v7  ;;  %v20482_v59 = vld [vmem:[%s25941_s17 + $0x424] ss:$8 sps:$4 sm:$0xff]   ;;  %v20483_v7 = vld [vmem:[%s25941_s17 + $0x390] ss:$8 sps:$4 sm:$0xff]  }
0x1b9e   : > { %14430 = vmatprep.subr.bf16.mxu0 %v20398_v56  ;;  %14469 = vmatprep.subr.bf16.mxu1 %v20401_v13  ;;  %v20480_v56 = vld [vmem:[%s25941_s17 + $0x420] ss:$8 sps:$4 sm:$0xff]   ;;  %v20491_v13 = vld [vmem:[%s25941_s17 + $0x384] ss:$8 sps:$4 sm:$0xff]  }
0x1ba1   : > { %14431 = vmatpush2.bf16.msra.mxu0 %v20396_v35  ;;  %14470 = vmatpush1.bf16.msra.mxu1 %v20399_v39  ;;  %v20489_v35 = vld [vmem:[%s25941_s17 + $0x380] ss:$8 sps:$4 sm:$0xff]   ;;  %v20488_v39 = vld [vmem:[%s25941_s17 + $0x414] ss:$8 sps:$4 sm:$0xff]  }
0x1ba2   : > { %14515 = vmatprep.subr.bf16.mxu1 %v25429_v1  ;;  %14432 = vmatprep.subr.bf16.mxu0 %v20404_v58  ;;  %v20408_v1 = vld [vmem:[%s25941_s17 + $0xc0] ss:$8 sps:$4 sm:$0xff]   ;;  %v20486_v58 = vld [vmem:[%s25941_s17 + $0x410] ss:$8 sps:$4 sm:$0xff]  }
0x1ba4   : > { %14488 = vmatmul.mubr.bf16.vlgmr.msra.gmra.mxu1 %v13665_v33  ;;  %v20492_v33 = vld [vmem:[%s25941_s17 + $0x400] ss:$8 sps:$4 sm:$0xff]  }
0x1ba5   : > { %14433 = vmatpush2.bf16.msra.mxu0 %v20402_v8  ;;  %14516 = vmatpush1.bf16.msra.mxu1 %v25425_v26  ;;  %v17487_v26 = vld [vmem:[%s25940_s16 + $0x2] sm:$0x1]  ;;  %v20494_v8 = vld [vmem:[%s25941_s17 + $0x404] ss:$8 sps:$4 sm:$0xff]  }
0x1ba6   : > { %14434 = vmatprep.subr.bf16.mxu0 %v20407_v46  ;;  %14533 = vmatprep.mubr.bf16.mxu1 %v25985_v43 }
0x1ba7   : > { %14874 = vmatprep.subr.bf16.mxu1 %v20425_v16 }
0x1ba9   : > { %14435 = vmatpush2.bf16.msra.mxu0 %v20405_v0 }
0x1baa   : > { %14436 = vmatprep.subr.bf16.mxu0 %v20410_v10 }
0x1bac   : > { %17488 = vmatmul.mubr.msk.bf16.vlgmr.msra.gmra.mxu1 %vm13566_vm6, %v17487_v26 }
0x1bad   : > { %14437 = vmatpush2.bf16.msra.mxu0 %v20408_v1  ;;  %14875 = vmatpush1.bf16.msra.mxu1 %v20423_v20 }
0x1bae   : > { %14438 = vmatprep.subr.bf16.mxu0 %v20413_v48  ;;  %14876 = vmatprep.subr.bf16.mxu1 %v20428_v27 }
0x1bb1   : > { %14439 = vmatpush2.bf16.msra.mxu0 %v20411_v41  ;;  %14877 = vmatpush1.bf16.msra.mxu1 %v20426_v60 }
0x1bb2   : > { %14440 = vmatprep.subr.bf16.mxu0 %v20416_v62 }
0x1bb5   : > { %14441 = vmatpush2.bf16.msra.mxu0 %v20414_v18 }
0x1bb6   : > { %14442 = vmatprep.subr.bf16.mxu0 %v20419_v36 }
0x1bb9   : > { %14443 = vmatpush2.bf16.msra.mxu0 %v20417_v6 }
0x1bba   : > { %14444 = vmatprep.subr.bf16.mxu0 %v20422_v19 }
0x1bbd   : > { %14445 = vmatpush2.bf16.msra.mxu0 %v20420_v61 }
0x1bbe   : > { %18726 = vmatprep.subr.bf16.mxu0 %v25986_v9 }
0x1bc0   : > { %14447 = vmatmul.mubr.bf16.vlgmr.msra.gmra.mxu0 %v13663_v53 }
0x1bc1   : > { %18727 = vmatpush3.bf16.msra.mxu0 %v25427_v50  ;;  %18728 = vmatprep.mubr.msk.bf16.mxu0 %vm20552_vm0, %v25986_v9  ;;  %v20429_v9 = vld [vmem:[%s25941_s17 + $0x350] ss:$8 sps:$4 sm:$0xff]   ;;  %v20431_v50 = vld [vmem:[%s25941_s17 + $0x354] ss:$8 sps:$4 sm:$0xff]  }
0x1bc2   : > { %14878 = vmatprep.subr.bf16.mxu1 %v20431_v50  ;;  %14915 = vmatprep.subr.bf16.mxu0 %v20452_v3 }
0x1bc3   : > { %14879 = vmatpush1.bf16.msra.mxu1 %v20429_v9 }
0x1bc4   : > { %14880 = vmatprep.subr.bf16.mxu1 %v20434_v14 }
0x1bc7   : > { %14881 = vmatpush1.bf16.msra.mxu1 %v20432_v22 }
0x1bc8   : > { %18729 = vmatmul.mubr.msk.bf16.vlgmr.msra.gmra.mxu0 %vm13566_vm6, %v17487_v26  ;;  %14882 = vmatprep.subr.bf16.mxu1 %v20437_v12 }
0x1bc9   : > { %14947 = vmatprep.mubr.bf16.mxu0 %v25985_v43  ;;  %v20440_v43 = vld [vmem:[%s25941_s17 + $0x324] ss:$8 sps:$4 sm:$0xff]   ;;  %14916 = vmatpush1.bf16.msra.mxu0 %v20450_v63  ;;  %v14958_v63 = vld [vmem:[%s25942_s18] sm:$0x3] }
0x1bca   : > { %14917 = vmatprep.subr.bf16.mxu0 %v20458_v30 }
0x1bcb   : > { %14883 = vmatpush1.bf16.msra.mxu1 %v20435_v21 }
0x1bcc   : > { %14884 = vmatprep.subr.bf16.mxu1 %v20440_v43 }
0x1bcd   : > { %14918 = vmatpush1.bf16.msra.mxu0 %v20456_v47  ;;  %v14963_v47 = vrot.slane %v14958_v63, %v22104_v42 }
0x1bce   : > { %14919 = vmatprep.subr.bf16.mxu0 %v20464_v29 }
0x1bcf   : > { %14885 = vmatpush1.bf16.msra.mxu1 %v20438_v52 }
0x1bd0   : > { %14886 = vmatprep.subr.bf16.mxu1 %v20443_v55 }
0x1bd1   : > { %14920 = vmatpush1.bf16.msra.mxu0 %v20462_v15 }
0x1bd2   : > { %14921 = vmatprep.subr.bf16.mxu0 %v20470_v57 }
0x1bd3   : > { %14887 = vmatpush1.bf16.msra.mxu1 %v20441_v40 }
0x1bd4   : > { %14888 = vmatprep.subr.bf16.mxu1 %v20446_v11 }
0x1bd5   : > { %14922 = vmatpush1.bf16.msra.mxu0 %v20468_v25 }
0x1bd6   : > { %14923 = vmatprep.subr.bf16.mxu0 %v20476_v2 }
0x1bd7   : > { %14889 = vmatpush1.bf16.msra.mxu1 %v20444_v24 }
0x1bd8   : > { %14890 = vmatprep.subr.bf16.mxu1 %v20449_v49 }
0x1bd9   : > { %14924 = vmatpush1.bf16.msra.mxu0 %v20474_v31 }
0x1bda   : > { %14925 = vmatprep.subr.bf16.mxu0 %v20482_v59 }
0x1bdb   : > { %14891 = vmatpush2.bf16.msra.mxu1 %v20447_v34 }
0x1bdc   : > { %14892 = vmatprep.subr.bf16.mxu1 %v20455_v23 }
0x1bdd   : > { %14926 = vmatpush1.bf16.msra.mxu0 %v20480_v56 }
0x1bde   : > { %14927 = vmatprep.subr.bf16.mxu0 %v20488_v39 }
0x1bdf   : > { %14893 = vmatpush2.bf16.msra.mxu1 %v20453_v5 }
0x1be0   : > { %14894 = vmatprep.subr.bf16.mxu1 %v20461_v4 }
0x1be1   : > { %14928 = vmatpush1.bf16.msra.mxu0 %v20486_v58 }
0x1be2   : > { %14929 = vmatprep.subr.bf16.mxu0 %v20494_v8 }
0x1be3   : > { %14895 = vmatpush2.bf16.msra.mxu1 %v20459_v28 }
0x1be4   : > { %14896 = vmatprep.subr.bf16.mxu1 %v20467_v45 }
0x1be5   : > { %14930 = vmatpush1.bf16.msra.mxu0 %v20492_v33 }
0x1be7   : > { %14897 = vmatpush2.bf16.msra.mxu1 %v20465_v17 }
0x1be8   : > { %14898 = vmatprep.subr.bf16.mxu1 %v20473_v38 }
0x1beb   : > { %14899 = vmatpush2.bf16.msra.mxu1 %v20471_v44  ;;  %v14967_v44 = vrot.slane %v14958_v63, %v22095_v37 }
0x1bec   : > { %14900 = vmatprep.subr.bf16.mxu1 %v20479_v51 }
0x1bef   : > { %14901 = vmatpush2.bf16.msra.mxu1 %v20477_v32 }
0x1bf0   : > { %14902 = vmatprep.subr.bf16.mxu1 %v20485_v54 }
0x1bf3   : > { %14903 = vmatpush2.bf16.msra.mxu1 %v20483_v7 }
0x1bf4   : > { %14904 = vmatprep.subr.bf16.mxu1 %v20491_v13 }
0x1bf7   : > { %14905 = vmatpush2.bf16.msra.mxu1 %v20489_v35 }
0x1c40   : > { %v14167_v46 = vpop.f32.mrf.mxu0 }
0x1c42   : > { %v14169_v0 = vpop.f32.mrf.mxu0 }
0x1c44   : > { %v14126_v10 = vpop.f32.mrf.mxu1  ;;  %v14171_v1 = vpop.f32.mrf.mxu0 }
0x1c45   : > { %v14168_v26 = vadd.f32 %v14167_v46, %v14126_v10 }
0x1c46   : > { %v14128_v48 = vpop.f32.mrf.mxu1  ;;  %v14172_v41 = vpop.f32.mrf.mxu0 }
0x1c47   : > { %v14170_v62 = vadd.f32 %v14169_v0, %v14128_v48 }
0x1c48   : > { %v14130_v18 = vpop.f32.mrf.mxu1 }
0x1c4a   : > { %v14131_v36 = vpop.f32.mrf.mxu1 }
0x1c64   : > { %v14489_v6 = vpop.f32.mrf.mxu1 }
0x1c66   : > { %v14491_v19 = vpop.f32.mrf.mxu1 }
0x1c68   : > { %v14493_v61 = vpop.f32.mrf.mxu1 }
0x1c6a   : > { %v14494_v53 = vpop.f32.mrf.mxu1 }
0x1c6b   : > { %v20555_v53 = vmov 1966171168  }
0x1c6c   : > { %v14535_v16 = vpop.f32.mrf.mxu1 }
0x1c6d   : > { %v14582_v20 = vpack.c.bf16 %v14535_v16, %v14535_v16  ;;  %v15016_v16 = vunpack.c.l.s4 %v20555_v53 }
0x1c6e   : > { %v14537_v27 = vpop.f32.mrf.mxu1 }
0x1c6f   : > { %v14583_v60 = vpack.c.bf16 %v14537_v27, %v14537_v27 }
0x1c70   : > { %v14539_v9 = vpop.f32.mrf.mxu1 }
0x1c71   : > { %14906 = vmatprep.mubr.bf16.mxu1 %v14583_v60 }
0x1c72   : > { %14907 = vmatmul.mubr.bf16.vlgmr.msra.gmra.mxu1 %v14582_v20  ;;  %v14540_v50 = vpop.f32.mrf.mxu1  ;;  %v15017_v20 = vunpack.c.0.s8 %v15016_v16 }
0x1c80   : > { %v14448_v14 = vpop.f32.mrf.mxu0 }
0x1c81   : > { %v14449_v22 = vadd.f32 %v14448_v14, %v14168_v26 }
0x1c82   : > { %v14450_v12 = vpop.f32.mrf.mxu0 }
0x1c83   : > { %v14490_v21 = vadd.f32 %v14489_v6, %v14449_v22  ;;  %v14451_v43 = vadd.f32 %v14450_v12, %v14170_v62  ;;  %v25987_v22 = vld [vmem:[#allocation12_spill] sm:$0xff] }
0x1c84   : > { %v14452_v52 = vpop.f32.mrf.mxu0  ;;  %v15020_v12 = vsub.s32 %v15017_v20, %v25987_v22 }
0x1c85   : > { %v14492_v55 = vadd.f32 %v14491_v19, %v14451_v43  ;;  %v25988_v52 = vlaneseq }
0x1c86   : > { %v14453_v40 = vpop.f32.mrf.mxu0 }
0x1c87   : > { %vm15032_vm0 = vcmp.lt.s32.totalorder %v25988_v52, 256 }
0x1c88   : > { %v14576_v11 = vpop.f32.mrf.mxu0 }
0x1c89   : > { %v14584_v24 = vpack.c.bf16 %v14576_v11, %v14576_v11 }
0x1c8a   : > { %v18730_v49 = vpop.f32.mrf.mxu0 }
0x1c8b   : > { %14948 = vmatmul.mubr.bf16.vlgmr.msra.gmra.mxu0 %v14584_v24 }
0x1c8c   : > { %v14579_v34 = vpop.f32.mrf.mxu0 }
0x1c8e   : > { %v18731_v23 = vpop.f32.mrf.mxu0 }
0x1d32   : > { %v14908_v5 = vpop.f32.mrf.mxu1 }
0x1d34   : > { %v14910_v4 = vpop.f32.mrf.mxu1 }
0x1d36   : > { %v14912_v3 = vpop.f32.mrf.mxu1 }
0x1d38   : > { %v14913_v28 = vpop.f32.mrf.mxu1 }
0x1d4b   : > { %v14949_v30 = vpop.f32.mrf.mxu0 }
0x1d4c   : > { %v14950_v17 = vadd.f32 %v14949_v30, %v14908_v5 }
0x1d4d   : > { %v14951_v45 = vpop.f32.mrf.mxu0 }
0x1d4e   : > { %v14956_v29 = vadd.f32 %v14950_v17, %v14490_v21  ;;  %v14952_v38 = vadd.f32 %v14951_v45, %v14910_v4 }
0x1d4f   : > { %v14953_v15 = vpop.f32.mrf.mxu0 }
0x1d50   : > { %v14957_v51 = vadd.f32 %v14952_v38, %v14492_v55  ;;  %v14970_v57 = vadd.f32 %v14963_v47, %v14956_v29 }
0x1d51   : > { %v14954_v32 = vpop.f32.mrf.mxu0 }
0x1d52   : > { %v14971_v25 = vadd.f32 %v14967_v44, %v14957_v51  ;;  %v14972_v2 = vsel %vm13570_vm5, %v14970_v57, 0.0 }
0x1d54   : > { %v14973_v31 = vsel %vm13570_vm5, %v14971_v25, 0.0 }
0x1d55   : > { %v14974_v54 = vadd.f32 %v14973_v31, %v14972_v2 }
0x1d57   : > { %14975 = vadd.xlane.f32.xlu0 %v14974_v54 }
0x1de0   : > { %v14976_v59 = vpop.xlane.xlu0 %14975 }
0x1de1   : > { %v14977_v7 = vrot.slane %v14976_v59, 4 }
0x1de3   : > { %v14978_v56 = vadd.f32 %v14977_v7, %v14976_v59 }
0x1de5   : > { %v14979_v42 = vrot.slane %v14978_v56, 2 }
0x1de7   : > { %v14980_v13 = vadd.f32 %v14979_v42, %v14978_v56 }
0x1de9   : > { %v14981_v35 = vrot.slane %v14980_v13, 1 }
0x1deb   : > { %v14982_v39 = vadd.f32 %v14981_v35, %v14980_v13 }
0x1ded   : > { %18766 = vpush %v14982_v39 }
0x1e1e   : > { %s18767_s27 = spop %18766 }
0x1e1f   : > { %s14984_s28 = smul.f32 0.00390625, %s18767_s27 }
0x1e21   : > { %v14985_v37 = vstv %s14984_s28 }
0x1e22   : > { %v14986_v58 = vsub.f32 %v14970_v57, %v14985_v37  ;;  %v14987_v8 = vsub.f32 %v14971_v25, %v14985_v37 }
0x1e24   : > { %v14988_v33 = vmul.f32 %v14986_v58, %v14986_v58  ;;  %v14989_v46 = vmul.f32 %v14987_v8, %v14987_v8 }
0x1e26   : > { %v14990_v0 = vsel %vm13570_vm5, %v14988_v33, 0.0  ;;  %v14991_v10 = vsel %vm13570_vm5, %v14989_v46, 0.0 }
0x1e27   : > { %v14992_v1 = vadd.f32 %v14991_v10, %v14990_v0 }
0x1e29   : > { %14993 = vadd.xlane.f32.xlu1 %v14992_v1 }
0x1eb2   : > { %v14994_v26 = vpop.xlane.xlu1 %14993 }
0x1eb3   : > { %v14995_v48 = vrot.slane %v14994_v26, 4 }
0x1eb5   : > { %v14996_v41 = vadd.f32 %v14995_v48, %v14994_v26 }
0x1eb7   : > { %v14997_v62 = vrot.slane %v14996_v41, 2 }
0x1eb9   : > { %v14998_v18 = vadd.f32 %v14997_v62, %v14996_v41 }
0x1ebb   : > { %v14999_v36 = vrot.slane %v14998_v18, 1 }
0x1ebd   : > { %v15000_v6 = vadd.f32 %v14999_v36, %v14998_v18 }
0x1ebf   : > { %18768 = vpush %v15000_v6 }
0x1ef0   : > { %s18769_s26 = spop %18768 }
0x1ef1   : > { %s15002_s2 = smul.f32 0.00390625, %s18769_s26 }
0x1ef3   : > { %s15003_s29 = sadd.f32 1e-05, %s15002_s2 }
0x1ef5   : > { %v15004_v19 = vstv %s15003_s29 }
0x1ef6   : > { %20505 = vrsqrt.f32 %v15004_v19 }
0x1f03   : > { %v20506_v61 = vpop.eup %20505 }
0x1f04   : > { %18770 = vpush %v20506_v61 }
0x1f35   : > { %s18771_s20 = spop %18770 }
0x1f36   : > { %v15007_v27 = vstv %s18771_s20 }
0x1f37   : > { %v15008_v60 = vmul.f32 %v15007_v27, %v14986_v58  ;;  %v15009_v9 = vmul.f32 %v15007_v27, %v14987_v8 }
0x1f39   : > { %v15010_v50 = vmax.f32 %v15008_v60, 0.0  ;;  %v15011_v14 = vmax.f32 %v15009_v9, 0.0 }
0x1f3b   : > { %v15014_v21 = vcombine.low %v15010_v50, %v15011_v14 }
0x1f3d   : > { %v15021_v43 = vrot.slane %v15014_v21, %v15020_v12 }
0x1f3f   : > { %v15028_v55 = vrot.slane %v15021_v43, %v15020_v12 }
0x1f41   : > { %15034 = vst.msk [vmem:[%s600_s24] sm:$0x3] %vm15032_vm0, %v15028_v55 }
0x1f42 PF: > { %s29_s0 = sadd.s32 1, %s20549_s0  }
0x1f43   : > { %p26_p4 = scmp.ge.s32.totalorder %s29_s0, 4  }
0x1f45   :  { %28 = sbr.rel (!%p26_p4) target bundleno = 5 (0x5), region = 152 }

</bundles_post_ra>
